<compile_context>
chip_gen: v7x
topology: tpu7x:2x2x1
jax: 0.10.0
libtpu: 0.0.40
codegen_flags: <defaults>
</compile_context>

<pallas_src>
import functools
import math

import numpy as np
import jax
import jax.numpy as jnp
from jax import lax
from jax.experimental import pallas as pl
from jax.experimental.pallas import tpu as pltpu

# ----------------------------- configuration --------------------------------
DIM = 32
NUM_HEADS = 4
HEAD_DIM = DIM // NUM_HEADS
INPUT_RES = (8, 8, 8)       # (H, W, D)
WS = (4, 4, 4)              # window_size  (input_res > window -> kept)
SS = (2, 2, 2)              # shift_size   (SW-MSA, attention mask is used)
MLP_RATIO = 2.0
HIDDEN = int(DIM * MLP_RATIO)
BATCH = 2
N = WS[0] * WS[1] * WS[2]                                    # tokens / window = 64
NW = (INPUT_RES[0] // WS[0]) * (INPUT_RES[1] // WS[1]) * (INPUT_RES[2] // WS[2])  # 8
NTOK = NW * N                                                # tokens / batch element = 512
LN_EPS = 1e-5


# ------------------------------- glue helpers --------------------------------
def window_partition(x, ws):
    B, H, W, D, C = x.shape
    x = x.reshape(B, H // ws[0], ws[0], W // ws[1], ws[1], D // ws[2], ws[2], C)
    x = jnp.transpose(x, (0, 1, 3, 5, 2, 4, 6, 7))
    return x.reshape(-1, ws[0], ws[1], ws[2], C)


def window_reverse(windows, ws, img_size):
    H, W, D = img_size
    C = windows.shape[-1]
    x = windows.reshape(-1, H // ws[0], W // ws[1], D // ws[2], ws[0], ws[1], ws[2], C)
    x = jnp.transpose(x, (0, 1, 4, 2, 5, 3, 6, 7))
    return x.reshape(-1, H, W, D, C)


def _layernorm(x, g, b):                     # LN over the last (channel) axis
    mu = jnp.mean(x, axis=-1, keepdims=True)
    var = jnp.mean((x - mu) ** 2, axis=-1, keepdims=True)
    return (x - mu) * lax.rsqrt(var + LN_EPS) * g + b


def _ln_feat_major(x, g, b):                 # LN over the channel axis of a (C, T) slab
    mu = jnp.mean(x, axis=0, keepdims=True)
    var = jnp.mean((x - mu) ** 2, axis=0, keepdims=True)
    return (x - mu) * lax.rsqrt(var + LN_EPS) * g + b


def _gelu(x):
    # TODO(synk): PyTorch nn.GELU default is exact erf GELU; tanh approximation used here.
    return jax.nn.gelu(x, approximate=True)


def build_relative_position_encoding(window_size, pretrained_window_size=(0, 0, 0)):
    wh, ww, wd = window_size
    rch = np.arange(-(wh - 1), wh, dtype=np.float32)
    rcw = np.arange(-(ww - 1), ww, dtype=np.float32)
    rcd = np.arange(-(wd - 1), wd, dtype=np.float32)
    table = np.stack(np.meshgrid(rch, rcw, rcd, indexing="ij"), axis=-1)[None]
    if pretrained_window_size[0] > 0:
        div = [(p - 1) or 1 for p in pretrained_window_size]
    else:
        div = [(w - 1) or 1 for w in window_size]
    table = table / np.asarray(div, dtype=np.float32)
    table = table * 8.0
    table = np.sign(table) * np.log2(np.abs(table) + 1.0) / math.log2(8)

    coords = np.stack(np.meshgrid(np.arange(wh), np.arange(ww), np.arange(wd), indexing="ij"))
    cf = coords.reshape(3, -1)
    rel = cf[:, :, None] - cf[:, None, :]
    rel = np.transpose(rel, (1, 2, 0)).copy()
    rel[:, :, 0] += wh - 1
    rel[:, :, 1] += ww - 1
    rel[:, :, 2] += wd - 1
    rel[:, :, 0] *= (2 * ww - 1) * (2 * wd - 1)
    rel[:, :, 1] *= 2 * wd - 1
    idx = rel.sum(-1)
    return table.astype(np.float32), idx.astype(np.int32)


def compute_rel_pos_bias(table, idx, cpb_w1, cpb_b1, cpb_w2):
    t = jnp.asarray(table).reshape(-1, 3)
    h = jax.nn.relu(t @ cpb_w1.T + cpb_b1)
    bt = h @ cpb_w2.T                                         # (T, num_heads)
    rpb = bt[jnp.asarray(idx.reshape(-1))].reshape(N, N, NUM_HEADS)
    rpb = jnp.transpose(rpb, (2, 0, 1))
    return 16.0 * jax.nn.sigmoid(rpb)                         # (num_heads, N, N)


def build_attn_mask():
    H, W, D = INPUT_RES
    img_mask = np.zeros((1, H, W, D, 1), dtype=np.float32)
    cnt = 0
    for h in (slice(0, -WS[0]), slice(-WS[0], -SS[0]), slice(-SS[0], None)):
        for w in (slice(0, -WS[1]), slice(-WS[1], -SS[1]), slice(-SS[1], None)):
            for d in (slice(0, -WS[2]), slice(-WS[2], -SS[2]), slice(-SS[2], None)):
                img_mask[:, h, w, d, :] = cnt
                cnt += 1
    mw = np.asarray(window_partition(jnp.asarray(img_mask), WS)).reshape(-1, N)
    am = mw[:, None, :] - mw[:, :, None]
    am = np.where(am != 0, -100.0, 0.0).astype(np.float32)
    return jnp.asarray(am)                                    # (NW, N, N)


def init_params(key):
    ks = jax.random.split(key, 12)

    def nrm(k, shape, s=0.05):
        return jax.random.normal(k, shape, dtype=jnp.float32) * s

    p = {}
    p["wqkv"] = nrm(ks[0], (DIM, 3 * DIM))                    # qkv.weight.T
    q_bias = nrm(ks[1], (DIM,))
    k_bias = jnp.zeros((DIM,), jnp.float32)                   # k_bias buffer (always zero)
    v_bias = nrm(ks[2], (DIM,))
    p["bqkv"] = jnp.concatenate([q_bias, k_bias, v_bias])
    p["logit_scale"] = jnp.log(10.0 * jnp.ones((NUM_HEADS,), jnp.float32))
    p["cpb_w1"] = nrm(ks[3], (512, 3), 0.2)
    p["cpb_b1"] = nrm(ks[4], (512,), 0.2)
    p["cpb_w2"] = nrm(ks[5], (NUM_HEADS, 512), 0.2)
    p["wproj"] = nrm(ks[6], (DIM, DIM))                       # proj.weight.T
    p["bproj"] = nrm(ks[7], (DIM,))
    p["g1"] = jnp.ones((DIM,), jnp.float32)
    p["be1"] = jnp.zeros((DIM,), jnp.float32)
    p["w1"] = nrm(ks[8], (DIM, HIDDEN))                       # fc1.weight.T
    p["b1"] = nrm(ks[9], (HIDDEN,))
    p["w2"] = nrm(ks[10], (HIDDEN, DIM))                      # fc2.weight.T
    p["b2"] = nrm(ks[11], (DIM,))
    p["g2"] = jnp.ones((DIM,), jnp.float32)
    p["be2"] = jnp.zeros((DIM,), jnp.float32)
    return p


# ------------------------------ Pallas kernel --------------------------------
def swin_block_kernel(x_tm_ref, x_fm_ref, bias_ref,
                      wq_ref, bq_ref, wkt_ref, wv_ref, bv_ref,
                      hmask_ref, scale_ref, kmask_ref, vmask_ref,
                      wpt_ref, bpt_ref, g1_ref, be1_ref,
                      w1t_ref, b1t_ref, w2t_ref, b2t_ref, g2_ref, be2_ref,
                      out_ref, o_scr,
                      *, num_heads, num_windows, win_tokens):
    f32 = jnp.float32
    bf16 = jnp.bfloat16

    x_tm = x_tm_ref[0]                     # (NTOK, C) token-major slab, f32
    x_fm = x_fm_ref[0]                     # (C, NTOK) feature-major slab, f32

    # ---- QKV projections: three full-width matmuls (no per-head splits) -----
    # q/k stay f32 (logit-scale + post-LN amplify their rounding); V uses bf16
    # MXU operands (it only feeds the bf16 attn@V matmul anyway).
    q = jnp.dot(x_tm, wq_ref[...], preferred_element_type=f32) + bq_ref[...]       # (NTOK, C)
    kt = jnp.dot(wkt_ref[...], x_fm, preferred_element_type=f32)                   # (C, NTOK); k_bias == 0
    v = (jnp.dot(x_tm.astype(bf16), wv_ref[...], preferred_element_type=f32)
         + bv_ref[...]).astype(bf16)                                               # (NTOK, C) bf16

    # ---- cosine-attention per-head L2 norm via a block-diag ones matmul ------
    # (per-head logit scale folded into q's row scale; rsqrt runs on the EUP).
    hmask = hmask_ref[...]                                     # (C, C) 0/1 head blocks
    qss = jnp.dot(q * q, hmask, preferred_element_type=f32)    # per-head sum-sq, expanded over C
    qn = q * (lax.rsqrt(jnp.maximum(qss, 1e-24)) * scale_ref[...])
    kss = jnp.dot(hmask, kt * kt, preferred_element_type=f32)
    knt = kt * lax.rsqrt(jnp.maximum(kss, 1e-24))

    kmask = kmask_ref[...]                                     # (C, H*N) f32, hoisted
    vmask = vmask_ref[...]                                     # (H*N, C) bf16, hoisted

    # ---- attention: block-diagonal head packing, one window at a time --------
    # Each window writes straight into the VMEM scratch accumulator (no concat,
    # bounded live ranges); all matmuls are 2-D with >=32 contraction rows and
    # 32/256 lane-wide outputs -- no head_dim(=8)-lane tensors anywhere.
    for w in range(num_windows):
        lo = w * win_tokens
        q_w = qn[lo:lo + win_tokens, :]                        # (N, C)
        knt_w = knt[:, lo:lo + win_tokens]                     # (C, N)
        v_w = v[lo:lo + win_tokens, :]                         # (N, C) bf16

        # all heads' logits from ONE (N,C)@(C,H*N) matmul
        k_bd = jnp.concatenate([knt_w] * num_heads, axis=1) * kmask          # (C, H*N)
        s = jnp.dot(q_w, k_bd, preferred_element_type=f32) + bias_ref[w]     # (N, H*N)

        # A single shared per-row max is a valid shift for every head's softmax
        # (shift invariance); cosine logits are bounded (|s| <= scale + 16 + mask)
        # so no denominator underflow is possible.
        s = s - jnp.max(s, axis=-1, keepdims=True)
        p = jnp.exp(s).astype(bf16)                                           # (N, H*N)

        den = jnp.dot(p, vmask, preferred_element_type=f32)                   # (N, C) per-head sums
        v_bd = jnp.concatenate([v_w] * num_heads, axis=0) * vmask             # (H*N, C) bf16
        o_w = jnp.dot(p, v_bd, preferred_element_type=f32)                    # (N, C) head-concat
        o_scr[lo:lo + win_tokens, :] = (o_w * pl.reciprocal(den, approx=True)).astype(bf16)

    # ---- output projection: contract the full (head, head_dim)=C axis in ONE
    # dot_general, emitting the feature-major (C, NTOK) slab directly.
    o = o_scr[...]                                                            # (NTOK, C) bf16
    yt = lax.dot_general(wpt_ref[...], o, (((1,), (1,)), ((), ())),
                         preferred_element_type=f32) + bpt_ref[...]           # (C, NTOK)

    # ---- post-norm residual #1 (LayerNorm over the channel/sublane axis) -----
    h1t = x_fm + _ln_feat_major(yt, g1_ref[...], be1_ref[...])                # (C, NTOK)

    # ---- MLP + post-norm residual #2, all lane-dense (feature, token) slabs --
    z = jnp.dot(w1t_ref[...], h1t.astype(bf16), preferred_element_type=f32) + b1t_ref[...]
    z = _gelu(z)                                                              # (HIDDEN, NTOK)
    z = jnp.dot(w2t_ref[...], z.astype(bf16), preferred_element_type=f32) + b2t_ref[...]
    out_ref[0] = h1t + _ln_feat_major(z, g2_ref[...], be2_ref[...])           # (C, NTOK) store


def _rep_spec(a):
    nd = a.ndim
    return pl.BlockSpec(a.shape, lambda b, _nd=nd: (0,) * _nd)


def swin_block_forward(x, p, rpb, attn_mask, scale):
    B, H, W, D, C = x.shape
    bf16 = jnp.bfloat16

    shifted = jnp.roll(x, (-SS[0], -SS[1], -SS[2]), axis=(1, 2, 3))
    xw = window_partition(shifted, WS).reshape(B, NTOK, C)     # (B, tokens, C) window-major
    xw_fm = jnp.transpose(xw, (0, 2, 1))                       # (B, C, tokens) lane-dense

    # packed per-window bias: rpb (H, N, N) + shift mask (NW, N, N) -> (NW, N, H*N)
    bias = rpb[None, :, :, :] + attn_mask[:, None, :, :]       # (NW, heads, N, N)
    bias_packed = jnp.transpose(bias, (0, 2, 1, 3)).reshape(NW, N, NUM_HEADS * N)

    # constant 0/1 head-block masks (wrapper-side numpy, fetched once into VMEM)
    heads = np.arange(DIM) // HEAD_DIM
    col_heads = np.arange(NUM_HEADS * N) // N
    hmask = (heads[:, None] == heads[None, :]).astype(np.float32)        # (C, C)
    kmask = (heads[:, None] == col_heads[None, :]).astype(np.float32)    # (C, H*N)
    vmask = kmask.T                                                      # (H*N, C)

    wqkv = p["wqkv"]                                           # (C, 3C)
    wq = wqkv[:, 0 * C:1 * C]
    wk = wqkv[:, 1 * C:2 * C]
    wv = wqkv[:, 2 * C:3 * C]
    bq = p["bqkv"][0 * C:1 * C].reshape(1, C)
    bv = p["bqkv"][2 * C:3 * C].reshape(1, C)
    scale_exp = jnp.repeat(scale, HEAD_DIM).reshape(1, C)      # per-head scale over channels

    weight_args = [
        wq, bq, wk.T, wv.astype(bf16), bv,
        jnp.asarray(hmask), scale_exp, jnp.asarray(kmask), jnp.asarray(vmask, dtype=bf16),
        p["wproj"].T.astype(bf16), p["bproj"].reshape(C, 1),
        p["g1"].reshape(C, 1), p["be1"].reshape(C, 1),
        p["w1"].T.astype(bf16), p["b1"].reshape(HIDDEN, 1),
        p["w2"].T.astype(bf16), p["b2"].reshape(C, 1),
        p["g2"].reshape(C, 1), p["be2"].reshape(C, 1),
    ]

    out = pl.pallas_call(
        functools.partial(swin_block_kernel, num_heads=NUM_HEADS,
                          num_windows=NW, win_tokens=N),
        out_shape=jax.ShapeDtypeStruct((B, C, NTOK), jnp.float32),    # lane-dense (C, tokens)
        grid=(B,),                                             # one step per batch element
        in_specs=[
            pl.BlockSpec((1, NTOK, C), lambda b: (b, 0, 0)),   # token-major view of x
            pl.BlockSpec((1, C, NTOK), lambda b: (b, 0, 0)),   # feature-major view of x
            _rep_spec(bias_packed),                            # (NW, N, H*N) packed bias
        ] + [_rep_spec(a) for a in weight_args],
        out_specs=pl.BlockSpec((1, C, NTOK), lambda b: (b, 0, 0)),
        scratch_shapes=[pltpu.VMEM((NTOK, C), jnp.bfloat16)],  # attention-output accumulator
        compiler_params=pltpu.CompilerParams(
            dimension_semantics=("parallel",),                 # megacore sharding (B=2)
            vmem_limit_bytes=16 * 1024 * 1024),                # live set ~5 MiB; 25% of v7x VMEM
    )(xw, xw_fm, bias_packed, *weight_args)

    out = jnp.transpose(out, (0, 2, 1))                        # back to (B, tokens, C)
    out = out.reshape(B * NW, WS[0], WS[1], WS[2], C)
    out = window_reverse(out, WS, (H, W, D))
    out = jnp.roll(out, SS, axis=(1, 2, 3))
    return out


# ---------------------------- pure-JAX reference -----------------------------
def reference_forward(x, p, rpb, attn_mask, scale):
    B, H, W, D, C = x.shape
    shifted = jnp.roll(x, (-SS[0], -SS[1], -SS[2]), axis=(1, 2, 3))
    xw = window_partition(shifted, WS).reshape(-1, N, C)

    qkv = xw @ p["wqkv"] + p["bqkv"]
    qkv = qkv.reshape(-1, N, 3, NUM_HEADS, HEAD_DIM).transpose(2, 0, 3, 1, 4)
    q, k, v = qkv[0], qkv[1], qkv[2]
    qn = q / jnp.maximum(jnp.linalg.norm(q, axis=-1, keepdims=True), 1e-12)
    kn = k / jnp.maximum(jnp.linalg.norm(k, axis=-1, keepdims=True), 1e-12)
    attn = jnp.einsum("bhnd,bhmd->bhnm", qn, kn) * scale[None, :, None, None]
    attn = attn + rpb[None]
    attn = attn.reshape(B, NW, NUM_HEADS, N, N) + attn_mask[None, :, None]
    attn = attn.reshape(-1, NUM_HEADS, N, N)
    attn = jax.nn.softmax(attn, axis=-1)
    aw = jnp.einsum("bhnm,bhmd->bhnd", attn, v).transpose(0, 2, 1, 3).reshape(-1, N, C)
    aw = aw @ p["wproj"] + p["bproj"]

    aw = aw.reshape(-1, WS[0], WS[1], WS[2], C)
    shifted_out = window_reverse(aw, WS, (H, W, D))
    attn_x = jnp.roll(shifted_out, SS, axis=(1, 2, 3))

    x = x + _layernorm(attn_x, p["g1"], p["be1"])
    xt = x.reshape(B, -1, C)
    m = _gelu(xt @ p["w1"] + p["b1"]) @ p["w2"] + p["b2"]
    xt = xt + _layernorm(m, p["g2"], p["be2"])
    return xt.reshape(B, H, W, D, C)


# ------------------------------------ main ------------------------------------
if __name__ == "__main__":
    key = jax.random.PRNGKey(0)
    pkey, xkey = jax.random.split(key)
    params = init_params(pkey)
    x = jax.random.normal(xkey, (BATCH, *INPUT_RES, DIM), dtype=jnp.float32)

    table, idx = build_relative_position_encoding(WS)
    rpb = compute_rel_pos_bias(table, idx, params["cpb_w1"], params["cpb_b1"], params["cpb_w2"])
    attn_mask = build_attn_mask()
    scale = jnp.exp(jnp.minimum(params["logit_scale"], math.log(1.0 / 0.01)))

    out = jax.jit(swin_block_forward)(x, params, rpb, attn_mask, scale)
    out = jax.block_until_ready(out)

    ref = reference_forward(x, params, rpb, attn_mask, scale)
    np.testing.assert_allclose(np.asarray(out), np.asarray(ref), rtol=3e-2, atol=3e-2)

    print("KERNEL_OK")
</pallas_src>

<mosaic_0001>
module attributes {stable_mosaic.version = 11 : i64} {
  func.func @swin_block_kernel(%arg0: i32, %arg1: memref<1x512x32xf32, #tpu.memory_space<vmem>>, %arg2: memref<1x32x512xf32, #tpu.memory_space<vmem>>, %arg3: memref<8x64x256xf32, #tpu.memory_space<vmem>>, %arg4: memref<32x32xf32, #tpu.memory_space<vmem>>, %arg5: memref<1x32xf32, #tpu.memory_space<vmem>>, %arg6: memref<32x32xf32, #tpu.memory_space<vmem>>, %arg7: memref<32x32xbf16, #tpu.memory_space<vmem>>, %arg8: memref<1x32xf32, #tpu.memory_space<vmem>>, %arg9: memref<32x32xf32, #tpu.memory_space<vmem>>, %arg10: memref<1x32xf32, #tpu.memory_space<vmem>>, %arg11: memref<32x256xf32, #tpu.memory_space<vmem>>, %arg12: memref<256x32xbf16, #tpu.memory_space<vmem>>, %arg13: memref<32x32xbf16, #tpu.memory_space<vmem>>, %arg14: memref<32x1xf32, #tpu.memory_space<vmem>>, %arg15: memref<32x1xf32, #tpu.memory_space<vmem>>, %arg16: memref<32x1xf32, #tpu.memory_space<vmem>>, %arg17: memref<64x32xbf16, #tpu.memory_space<vmem>>, %arg18: memref<64x1xf32, #tpu.memory_space<vmem>>, %arg19: memref<32x64xbf16, #tpu.memory_space<vmem>>, %arg20: memref<32x1xf32, #tpu.memory_space<vmem>>, %arg21: memref<32x1xf32, #tpu.memory_space<vmem>>, %arg22: memref<32x1xf32, #tpu.memory_space<vmem>>, %arg23: memref<1x32x512xf32, #tpu.memory_space<vmem>>, %arg24: memref<512x32xbf16, #tpu.memory_space<vmem>>) attributes {dimension_semantics = [#tpu.dimension_semantics<parallel>], iteration_bounds = array<i64: 2>, scalar_prefetch = 0 : i64, scratch_operands = 1 : i64, tpu.core_type = #tpu.core_type<tc>, window_params = [{transform_indices = @transform_0, window_bounds = array<i64: 1, 512, 32>}, {transform_indices = @transform_1, window_bounds = array<i64: 1, 32, 512>}, {pipeline_mode = #tpu.pipeline_mode<synchronous>, transform_indices = @transform_2, window_bounds = array<i64: 8, 64, 256>}, {pipeline_mode = #tpu.pipeline_mode<synchronous>, transform_indices = @transform_3, window_bounds = array<i64: 32, 32>}, {pipeline_mode = #tpu.pipeline_mode<synchronous>, transform_indices = @transform_4, window_bounds = array<i64: 1, 32>}, {pipeline_mode = #tpu.pipeline_mode<synchronous>, transform_indices = @transform_5, window_bounds = array<i64: 32, 32>}, {pipeline_mode = #tpu.pipeline_mode<synchronous>, transform_indices = @transform_6, window_bounds = array<i64: 32, 32>}, {pipeline_mode = #tpu.pipeline_mode<synchronous>, transform_indices = @transform_7, window_bounds = array<i64: 1, 32>}, {pipeline_mode = #tpu.pipeline_mode<synchronous>, transform_indices = @transform_8, window_bounds = array<i64: 32, 32>}, {pipeline_mode = #tpu.pipeline_mode<synchronous>, transform_indices = @transform_9, window_bounds = array<i64: 1, 32>}, {pipeline_mode = #tpu.pipeline_mode<synchronous>, transform_indices = @transform_10, window_bounds = array<i64: 32, 256>}, {pipeline_mode = #tpu.pipeline_mode<synchronous>, transform_indices = @transform_11, window_bounds = array<i64: 256, 32>}, {pipeline_mode = #tpu.pipeline_mode<synchronous>, transform_indices = @transform_12, window_bounds = array<i64: 32, 32>}, {pipeline_mode = #tpu.pipeline_mode<synchronous>, transform_indices = @transform_13, window_bounds = array<i64: 32, 1>}, {pipeline_mode = #tpu.pipeline_mode<synchronous>, transform_indices = @transform_14, window_bounds = array<i64: 32, 1>}, {pipeline_mode = #tpu.pipeline_mode<synchronous>, transform_indices = @transform_15, window_bounds = array<i64: 32, 1>}, {pipeline_mode = #tpu.pipeline_mode<synchronous>, transform_indices = @transform_16, window_bounds = array<i64: 64, 32>}, {pipeline_mode = #tpu.pipeline_mode<synchronous>, transform_indices = @transform_17, window_bounds = array<i64: 64, 1>}, {pipeline_mode = #tpu.pipeline_mode<synchronous>, transform_indices = @transform_18, window_bounds = array<i64: 32, 64>}, {pipeline_mode = #tpu.pipeline_mode<synchronous>, transform_indices = @transform_19, window_bounds = array<i64: 32, 1>}, {pipeline_mode = #tpu.pipeline_mode<synchronous>, transform_indices = @transform_20, window_bounds = array<i64: 32, 1>}, {pipeline_mode = #tpu.pipeline_mode<synchronous>, transform_indices = @transform_21, window_bounds = array<i64: 32, 1>}, {transform_indices = @transform_22, window_bounds = array<i64: 1, 32, 512>}]} {
    %c0 = arith.constant 0 : index
    %c0_0 = arith.constant 0 : index
    %c0_1 = arith.constant 0 : index
    %0 = vector.load %arg1[%c0, %c0_0, %c0_1] : memref<1x512x32xf32, #tpu.memory_space<vmem>>, vector<1x512x32xf32>
    %1 = vector.shape_cast %0 : vector<1x512x32xf32> to vector<512x32xf32>
    %c0_2 = arith.constant 0 : index
    %c0_3 = arith.constant 0 : index
    %c0_4 = arith.constant 0 : index
    %2 = vector.load %arg2[%c0_2, %c0_3, %c0_4] : memref<1x32x512xf32, #tpu.memory_space<vmem>>, vector<1x32x512xf32>
    %3 = vector.shape_cast %2 : vector<1x32x512xf32> to vector<32x512xf32>
    %c0_5 = arith.constant 0 : index
    %c0_6 = arith.constant 0 : index
    %4 = vector.load %arg4[%c0_5, %c0_6] : memref<32x32xf32, #tpu.memory_space<vmem>>, vector<32x32xf32>
    %cst = arith.constant dense<0.000000e+00> : vector<512x32xf32>
    %5 = tpu.matmul %1, %4, %cst {dimension_numbers = #tpu.dot_dimension_numbers<[1], [0], [0], [1], [0, 0, 1, 1], [], []>} : vector<512x32xf32>, vector<32x32xf32>, vector<512x32xf32> -> vector<512x32xf32>
    %c0_7 = arith.constant 0 : index
    %c0_8 = arith.constant 0 : index
    %6 = vector.load %arg5[%c0_7, %c0_8] : memref<1x32xf32, #tpu.memory_space<vmem>>, vector<1x32xf32>
    %7 = vector.broadcast %6 : vector<1x32xf32> to vector<512x32xf32>
    %8 = arith.addf %5, %7 : vector<512x32xf32>
    %c0_9 = arith.constant 0 : index
    %c0_10 = arith.constant 0 : index
    %9 = vector.load %arg6[%c0_9, %c0_10] : memref<32x32xf32, #tpu.memory_space<vmem>>, vector<32x32xf32>
    %cst_11 = arith.constant dense<0.000000e+00> : vector<32x512xf32>
    %10 = tpu.matmul %9, %3, %cst_11 {dimension_numbers = #tpu.dot_dimension_numbers<[1], [0], [0], [1], [0, 0, 1, 1], [], []>} : vector<32x32xf32>, vector<32x512xf32>, vector<32x512xf32> -> vector<32x512xf32>
    %11 = arith.truncf %1 : vector<512x32xf32> to vector<512x32xbf16>
    %c0_12 = arith.constant 0 : index
    %c0_13 = arith.constant 0 : index
    %12 = vector.load %arg7[%c0_12, %c0_13] : memref<32x32xbf16, #tpu.memory_space<vmem>>, vector<32x32xbf16>
    %cst_14 = arith.constant dense<0.000000e+00> : vector<512x32xf32>
    %13 = tpu.matmul %11, %12, %cst_14 {dimension_numbers = #tpu.dot_dimension_numbers<[1], [0], [0], [1], [0, 0, 1, 1], [], []>} : vector<512x32xbf16>, vector<32x32xbf16>, vector<512x32xf32> -> vector<512x32xf32>
    %c0_15 = arith.constant 0 : index
    %c0_16 = arith.constant 0 : index
    %14 = vector.load %arg8[%c0_15, %c0_16] : memref<1x32xf32, #tpu.memory_space<vmem>>, vector<1x32xf32>
    %15 = vector.broadcast %14 : vector<1x32xf32> to vector<512x32xf32>
    %16 = arith.addf %13, %15 : vector<512x32xf32>
    %17 = arith.truncf %16 : vector<512x32xf32> to vector<512x32xbf16>
    %c0_17 = arith.constant 0 : index
    %c0_18 = arith.constant 0 : index
    %18 = vector.load %arg9[%c0_17, %c0_18] : memref<32x32xf32, #tpu.memory_space<vmem>>, vector<32x32xf32>
    %19 = arith.mulf %8, %8 : vector<512x32xf32>
    %cst_19 = arith.constant dense<0.000000e+00> : vector<512x32xf32>
    %20 = tpu.matmul %19, %18, %cst_19 {dimension_numbers = #tpu.dot_dimension_numbers<[1], [0], [0], [1], [0, 0, 1, 1], [], []>} : vector<512x32xf32>, vector<32x32xf32>, vector<512x32xf32> -> vector<512x32xf32>
    %cst_20 = arith.constant 1.000000e-24 : f32
    %21 = vector.broadcast %cst_20 : f32 to vector<512x32xf32>
    %22 = arith.maximumf %20, %21 : vector<512x32xf32>
    %23 = math.rsqrt %22 : vector<512x32xf32>
    %c0_21 = arith.constant 0 : index
    %c0_22 = arith.constant 0 : index
    %24 = vector.load %arg10[%c0_21, %c0_22] : memref<1x32xf32, #tpu.memory_space<vmem>>, vector<1x32xf32>
    %25 = vector.broadcast %24 : vector<1x32xf32> to vector<512x32xf32>
    %26 = arith.mulf %23, %25 : vector<512x32xf32>
    %27 = arith.mulf %8, %26 : vector<512x32xf32>
    %28 = arith.mulf %10, %10 : vector<32x512xf32>
    %cst_23 = arith.constant dense<0.000000e+00> : vector<32x512xf32>
    %29 = tpu.matmul %18, %28, %cst_23 {dimension_numbers = #tpu.dot_dimension_numbers<[1], [0], [0], [1], [0, 0, 1, 1], [], []>} : vector<32x32xf32>, vector<32x512xf32>, vector<32x512xf32> -> vector<32x512xf32>
    %cst_24 = arith.constant 1.000000e-24 : f32
    %30 = vector.broadcast %cst_24 : f32 to vector<32x512xf32>
    %31 = arith.maximumf %29, %30 : vector<32x512xf32>
    %32 = math.rsqrt %31 : vector<32x512xf32>
    %33 = arith.mulf %10, %32 : vector<32x512xf32>
    %c0_25 = arith.constant 0 : index
    %c0_26 = arith.constant 0 : index
    %34 = vector.load %arg11[%c0_25, %c0_26] : memref<32x256xf32, #tpu.memory_space<vmem>>, vector<32x256xf32>
    %c0_27 = arith.constant 0 : index
    %c0_28 = arith.constant 0 : index
    %35 = vector.load %arg12[%c0_27, %c0_28] : memref<256x32xbf16, #tpu.memory_space<vmem>>, vector<256x32xbf16>
    %36 = vector.extract_strided_slice %27 {offsets = [0, 0], sizes = [64, 32], strides = [1, 1]} : vector<512x32xf32> to vector<64x32xf32>
    %37 = vector.extract_strided_slice %33 {offsets = [0, 0], sizes = [32, 64], strides = [1, 1]} : vector<32x512xf32> to vector<32x64xf32>
    %38 = vector.extract_strided_slice %17 {offsets = [0, 0], sizes = [64, 32], strides = [1, 1]} : vector<512x32xbf16> to vector<64x32xbf16>
    %39 = tpu.concatenate %37, %37, %37, %37 in 1 : vector<32x64xf32>, vector<32x64xf32>, vector<32x64xf32>, vector<32x64xf32> -> vector<32x256xf32>
    %40 = arith.mulf %39, %34 : vector<32x256xf32>
    %cst_29 = arith.constant dense<0.000000e+00> : vector<64x256xf32>
    %41 = tpu.matmul %36, %40, %cst_29 {dimension_numbers = #tpu.dot_dimension_numbers<[1], [0], [0], [1], [0, 0, 1, 1], [], []>} : vector<64x32xf32>, vector<32x256xf32>, vector<64x256xf32> -> vector<64x256xf32>
    %c0_30 = arith.constant 0 : index
    %c0_31 = arith.constant 0 : index
    %c0_32 = arith.constant 0 : index
    %42 = vector.load %arg3[%c0_30, %c0_31, %c0_32] : memref<8x64x256xf32, #tpu.memory_space<vmem>>, vector<1x64x256xf32>
    %43 = vector.shape_cast %42 : vector<1x64x256xf32> to vector<64x256xf32>
    %44 = arith.addf %41, %43 : vector<64x256xf32>
    %cst_33 = arith.constant dense<0xFF800000> : vector<64xf32>
    %45 = vector.multi_reduction <maximumf>, %44, %cst_33 [1] : vector<64x256xf32> to vector<64xf32>
    %46 = vector.shape_cast %45 : vector<64xf32> to vector<64x1xf32>
    %47 = vector.broadcast %46 : vector<64x1xf32> to vector<64x256xf32>
    %48 = arith.subf %44, %47 : vector<64x256xf32>
    %49 = math.exp %48 : vector<64x256xf32>
    %50 = arith.truncf %49 : vector<64x256xf32> to vector<64x256xbf16>
    %cst_34 = arith.constant dense<0.000000e+00> : vector<64x32xf32>
    %51 = tpu.matmul %50, %35, %cst_34 {dimension_numbers = #tpu.dot_dimension_numbers<[1], [0], [0], [1], [0, 0, 1, 1], [], []>} : vector<64x256xbf16>, vector<256x32xbf16>, vector<64x32xf32> -> vector<64x32xf32>
    %52 = tpu.concatenate %38, %38, %38, %38 in 0 : vector<64x32xbf16>, vector<64x32xbf16>, vector<64x32xbf16>, vector<64x32xbf16> -> vector<256x32xbf16>
    %53 = arith.mulf %52, %35 : vector<256x32xbf16>
    %cst_35 = arith.constant dense<0.000000e+00> : vector<64x32xf32>
    %54 = tpu.matmul %50, %53, %cst_35 {dimension_numbers = #tpu.dot_dimension_numbers<[1], [0], [0], [1], [0, 0, 1, 1], [], []>} : vector<64x256xbf16>, vector<256x32xbf16>, vector<64x32xf32> -> vector<64x32xf32>
    %55 = tpu.reciprocal %51 {approx = true} : vector<64x32xf32> -> vector<64x32xf32>
    %56 = arith.mulf %54, %55 : vector<64x32xf32>
    %57 = arith.truncf %56 : vector<64x32xf32> to vector<64x32xbf16>
    %c0_36 = arith.constant 0 : index
    %c0_37 = arith.constant 0 : index
    %58 = vector.load %arg24[%c0_36, %c0_37] : memref<512x32xbf16, #tpu.memory_space<vmem>>, vector<64x32xbf16>
    tpu.vector_store %arg24[%c0_36, %c0_37], %57 {strides = array<i32>} : memref<512x32xbf16, #tpu.memory_space<vmem>>, vector<64x32xbf16>,
    %59 = vector.extract_strided_slice %27 {offsets = [64, 0], sizes = [64, 32], strides = [1, 1]} : vector<512x32xf32> to vector<64x32xf32>
    %60 = vector.extract_strided_slice %33 {offsets = [0, 64], sizes = [32, 64], strides = [1, 1]} : vector<32x512xf32> to vector<32x64xf32>
    %61 = vector.extract_strided_slice %17 {offsets = [64, 0], sizes = [64, 32], strides = [1, 1]} : vector<512x32xbf16> to vector<64x32xbf16>
    %62 = tpu.concatenate %60, %60, %60, %60 in 1 : vector<32x64xf32>, vector<32x64xf32>, vector<32x64xf32>, vector<32x64xf32> -> vector<32x256xf32>
    %63 = arith.mulf %62, %34 : vector<32x256xf32>
    %cst_38 = arith.constant dense<0.000000e+00> : vector<64x256xf32>
    %64 = tpu.matmul %59, %63, %cst_38 {dimension_numbers = #tpu.dot_dimension_numbers<[1], [0], [0], [1], [0, 0, 1, 1], [], []>} : vector<64x32xf32>, vector<32x256xf32>, vector<64x256xf32> -> vector<64x256xf32>
    %c1 = arith.constant 1 : index
    %c0_39 = arith.constant 0 : index
    %c0_40 = arith.constant 0 : index
    %65 = vector.load %arg3[%c1, %c0_39, %c0_40] : memref<8x64x256xf32, #tpu.memory_space<vmem>>, vector<1x64x256xf32>
    %66 = vector.shape_cast %65 : vector<1x64x256xf32> to vector<64x256xf32>
    %67 = arith.addf %64, %66 : vector<64x256xf32>
    %cst_41 = arith.constant dense<0xFF800000> : vector<64xf32>
    %68 = vector.multi_reduction <maximumf>, %67, %cst_41 [1] : vector<64x256xf32> to vector<64xf32>
    %69 = vector.shape_cast %68 : vector<64xf32> to vector<64x1xf32>
    %70 = vector.broadcast %69 : vector<64x1xf32> to vector<64x256xf32>
    %71 = arith.subf %67, %70 : vector<64x256xf32>
    %72 = math.exp %71 : vector<64x256xf32>
    %73 = arith.truncf %72 : vector<64x256xf32> to vector<64x256xbf16>
    %cst_42 = arith.constant dense<0.000000e+00> : vector<64x32xf32>
    %74 = tpu.matmul %73, %35, %cst_42 {dimension_numbers = #tpu.dot_dimension_numbers<[1], [0], [0], [1], [0, 0, 1, 1], [], []>} : vector<64x256xbf16>, vector<256x32xbf16>, vector<64x32xf32> -> vector<64x32xf32>
    %75 = tpu.concatenate %61, %61, %61, %61 in 0 : vector<64x32xbf16>, vector<64x32xbf16>, vector<64x32xbf16>, vector<64x32xbf16> -> vector<256x32xbf16>
    %76 = arith.mulf %75, %35 : vector<256x32xbf16>
    %cst_43 = arith.constant dense<0.000000e+00> : vector<64x32xf32>
    %77 = tpu.matmul %73, %76, %cst_43 {dimension_numbers = #tpu.dot_dimension_numbers<[1], [0], [0], [1], [0, 0, 1, 1], [], []>} : vector<64x256xbf16>, vector<256x32xbf16>, vector<64x32xf32> -> vector<64x32xf32>
    %78 = tpu.reciprocal %74 {approx = true} : vector<64x32xf32> -> vector<64x32xf32>
    %79 = arith.mulf %77, %78 : vector<64x32xf32>
    %80 = arith.truncf %79 : vector<64x32xf32> to vector<64x32xbf16>
    %c64 = arith.constant 64 : index
    %c0_44 = arith.constant 0 : index
    %81 = vector.load %arg24[%c64, %c0_44] : memref<512x32xbf16, #tpu.memory_space<vmem>>, vector<64x32xbf16>
    tpu.vector_store %arg24[%c64, %c0_44], %80 {strides = array<i32>} : memref<512x32xbf16, #tpu.memory_space<vmem>>, vector<64x32xbf16>,
    %82 = vector.extract_strided_slice %27 {offsets = [128, 0], sizes = [64, 32], strides = [1, 1]} : vector<512x32xf32> to vector<64x32xf32>
    %83 = vector.extract_strided_slice %33 {offsets = [0, 128], sizes = [32, 64], strides = [1, 1]} : vector<32x512xf32> to vector<32x64xf32>
    %84 = vector.extract_strided_slice %17 {offsets = [128, 0], sizes = [64, 32], strides = [1, 1]} : vector<512x32xbf16> to vector<64x32xbf16>
    %85 = tpu.concatenate %83, %83, %83, %83 in 1 : vector<32x64xf32>, vector<32x64xf32>, vector<32x64xf32>, vector<32x64xf32> -> vector<32x256xf32>
    %86 = arith.mulf %85, %34 : vector<32x256xf32>
    %cst_45 = arith.constant dense<0.000000e+00> : vector<64x256xf32>
    %87 = tpu.matmul %82, %86, %cst_45 {dimension_numbers = #tpu.dot_dimension_numbers<[1], [0], [0], [1], [0, 0, 1, 1], [], []>} : vector<64x32xf32>, vector<32x256xf32>, vector<64x256xf32> -> vector<64x256xf32>
    %c2 = arith.constant 2 : index
    %c0_46 = arith.constant 0 : index
    %c0_47 = arith.constant 0 : index
    %88 = vector.load %arg3[%c2, %c0_46, %c0_47] : memref<8x64x256xf32, #tpu.memory_space<vmem>>, vector<1x64x256xf32>
    %89 = vector.shape_cast %88 : vector<1x64x256xf32> to vector<64x256xf32>
    %90 = arith.addf %87, %89 : vector<64x256xf32>
    %cst_48 = arith.constant dense<0xFF800000> : vector<64xf32>
    %91 = vector.multi_reduction <maximumf>, %90, %cst_48 [1] : vector<64x256xf32> to vector<64xf32>
    %92 = vector.shape_cast %91 : vector<64xf32> to vector<64x1xf32>
    %93 = vector.broadcast %92 : vector<64x1xf32> to vector<64x256xf32>
    %94 = arith.subf %90, %93 : vector<64x256xf32>
    %95 = math.exp %94 : vector<64x256xf32>
    %96 = arith.truncf %95 : vector<64x256xf32> to vector<64x256xbf16>
    %cst_49 = arith.constant dense<0.000000e+00> : vector<64x32xf32>
    %97 = tpu.matmul %96, %35, %cst_49 {dimension_numbers = #tpu.dot_dimension_numbers<[1], [0], [0], [1], [0, 0, 1, 1], [], []>} : vector<64x256xbf16>, vector<256x32xbf16>, vector<64x32xf32> -> vector<64x32xf32>
    %98 = tpu.concatenate %84, %84, %84, %84 in 0 : vector<64x32xbf16>, vector<64x32xbf16>, vector<64x32xbf16>, vector<64x32xbf16> -> vector<256x32xbf16>
    %99 = arith.mulf %98, %35 : vector<256x32xbf16>
    %cst_50 = arith.constant dense<0.000000e+00> : vector<64x32xf32>
    %100 = tpu.matmul %96, %99, %cst_50 {dimension_numbers = #tpu.dot_dimension_numbers<[1], [0], [0], [1], [0, 0, 1, 1], [], []>} : vector<64x256xbf16>, vector<256x32xbf16>, vector<64x32xf32> -> vector<64x32xf32>
    %101 = tpu.reciprocal %97 {approx = true} : vector<64x32xf32> -> vector<64x32xf32>
    %102 = arith.mulf %100, %101 : vector<64x32xf32>
    %103 = arith.truncf %102 : vector<64x32xf32> to vector<64x32xbf16>
    %c128 = arith.constant 128 : index
    %c0_51 = arith.constant 0 : index
    %104 = vector.load %arg24[%c128, %c0_51] : memref<512x32xbf16, #tpu.memory_space<vmem>>, vector<64x32xbf16>
    tpu.vector_store %arg24[%c128, %c0_51], %103 {strides = array<i32>} : memref<512x32xbf16, #tpu.memory_space<vmem>>, vector<64x32xbf16>,
    %105 = vector.extract_strided_slice %27 {offsets = [192, 0], sizes = [64, 32], strides = [1, 1]} : vector<512x32xf32> to vector<64x32xf32>
    %106 = vector.extract_strided_slice %33 {offsets = [0, 192], sizes = [32, 64], strides = [1, 1]} : vector<32x512xf32> to vector<32x64xf32>
    %107 = vector.extract_strided_slice %17 {offsets = [192, 0], sizes = [64, 32], strides = [1, 1]} : vector<512x32xbf16> to vector<64x32xbf16>
    %108 = tpu.concatenate %106, %106, %106, %106 in 1 : vector<32x64xf32>, vector<32x64xf32>, vector<32x64xf32>, vector<32x64xf32> -> vector<32x256xf32>
    %109 = arith.mulf %108, %34 : vector<32x256xf32>
    %cst_52 = arith.constant dense<0.000000e+00> : vector<64x256xf32>
    %110 = tpu.matmul %105, %109, %cst_52 {dimension_numbers = #tpu.dot_dimension_numbers<[1], [0], [0], [1], [0, 0, 1, 1], [], []>} : vector<64x32xf32>, vector<32x256xf32>, vector<64x256xf32> -> vector<64x256xf32>
    %c3 = arith.constant 3 : index
    %c0_53 = arith.constant 0 : index
    %c0_54 = arith.constant 0 : index
    %111 = vector.load %arg3[%c3, %c0_53, %c0_54] : memref<8x64x256xf32, #tpu.memory_space<vmem>>, vector<1x64x256xf32>
    %112 = vector.shape_cast %111 : vector<1x64x256xf32> to vector<64x256xf32>
    %113 = arith.addf %110, %112 : vector<64x256xf32>
    %cst_55 = arith.constant dense<0xFF800000> : vector<64xf32>
    %114 = vector.multi_reduction <maximumf>, %113, %cst_55 [1] : vector<64x256xf32> to vector<64xf32>
    %115 = vector.shape_cast %114 : vector<64xf32> to vector<64x1xf32>
    %116 = vector.broadcast %115 : vector<64x1xf32> to vector<64x256xf32>
    %117 = arith.subf %113, %116 : vector<64x256xf32>
    %118 = math.exp %117 : vector<64x256xf32>
    %119 = arith.truncf %118 : vector<64x256xf32> to vector<64x256xbf16>
    %cst_56 = arith.constant dense<0.000000e+00> : vector<64x32xf32>
    %120 = tpu.matmul %119, %35, %cst_56 {dimension_numbers = #tpu.dot_dimension_numbers<[1], [0], [0], [1], [0, 0, 1, 1], [], []>} : vector<64x256xbf16>, vector<256x32xbf16>, vector<64x32xf32> -> vector<64x32xf32>
    %121 = tpu.concatenate %107, %107, %107, %107 in 0 : vector<64x32xbf16>, vector<64x32xbf16>, vector<64x32xbf16>, vector<64x32xbf16> -> vector<256x32xbf16>
    %122 = arith.mulf %121, %35 : vector<256x32xbf16>
    %cst_57 = arith.constant dense<0.000000e+00> : vector<64x32xf32>
    %123 = tpu.matmul %119, %122, %cst_57 {dimension_numbers = #tpu.dot_dimension_numbers<[1], [0], [0], [1], [0, 0, 1, 1], [], []>} : vector<64x256xbf16>, vector<256x32xbf16>, vector<64x32xf32> -> vector<64x32xf32>
    %124 = tpu.reciprocal %120 {approx = true} : vector<64x32xf32> -> vector<64x32xf32>
    %125 = arith.mulf %123, %124 : vector<64x32xf32>
    %126 = arith.truncf %125 : vector<64x32xf32> to vector<64x32xbf16>
    %c192 = arith.constant 192 : index
    %c0_58 = arith.constant 0 : index
    %127 = vector.load %arg24[%c192, %c0_58] : memref<512x32xbf16, #tpu.memory_space<vmem>>, vector<64x32xbf16>
    tpu.vector_store %arg24[%c192, %c0_58], %126 {strides = array<i32>} : memref<512x32xbf16, #tpu.memory_space<vmem>>, vector<64x32xbf16>,
    %128 = vector.extract_strided_slice %27 {offsets = [256, 0], sizes = [64, 32], strides = [1, 1]} : vector<512x32xf32> to vector<64x32xf32>
    %129 = vector.extract_strided_slice %33 {offsets = [0, 256], sizes = [32, 64], strides = [1, 1]} : vector<32x512xf32> to vector<32x64xf32>
    %130 = vector.extract_strided_slice %17 {offsets = [256, 0], sizes = [64, 32], strides = [1, 1]} : vector<512x32xbf16> to vector<64x32xbf16>
    %131 = tpu.concatenate %129, %129, %129, %129 in 1 : vector<32x64xf32>, vector<32x64xf32>, vector<32x64xf32>, vector<32x64xf32> -> vector<32x256xf32>
    %132 = arith.mulf %131, %34 : vector<32x256xf32>
    %cst_59 = arith.constant dense<0.000000e+00> : vector<64x256xf32>
    %133 = tpu.matmul %128, %132, %cst_59 {dimension_numbers = #tpu.dot_dimension_numbers<[1], [0], [0], [1], [0, 0, 1, 1], [], []>} : vector<64x32xf32>, vector<32x256xf32>, vector<64x256xf32> -> vector<64x256xf32>
    %c4 = arith.constant 4 : index
    %c0_60 = arith.constant 0 : index
    %c0_61 = arith.constant 0 : index
    %134 = vector.load %arg3[%c4, %c0_60, %c0_61] : memref<8x64x256xf32, #tpu.memory_space<vmem>>, vector<1x64x256xf32>
    %135 = vector.shape_cast %134 : vector<1x64x256xf32> to vector<64x256xf32>
    %136 = arith.addf %133, %135 : vector<64x256xf32>
    %cst_62 = arith.constant dense<0xFF800000> : vector<64xf32>
    %137 = vector.multi_reduction <maximumf>, %136, %cst_62 [1] : vector<64x256xf32> to vector<64xf32>
    %138 = vector.shape_cast %137 : vector<64xf32> to vector<64x1xf32>
    %139 = vector.broadcast %138 : vector<64x1xf32> to vector<64x256xf32>
    %140 = arith.subf %136, %139 : vector<64x256xf32>
    %141 = math.exp %140 : vector<64x256xf32>
    %142 = arith.truncf %141 : vector<64x256xf32> to vector<64x256xbf16>
    %cst_63 = arith.constant dense<0.000000e+00> : vector<64x32xf32>
    %143 = tpu.matmul %142, %35, %cst_63 {dimension_numbers = #tpu.dot_dimension_numbers<[1], [0], [0], [1], [0, 0, 1, 1], [], []>} : vector<64x256xbf16>, vector<256x32xbf16>, vector<64x32xf32> -> vector<64x32xf32>
    %144 = tpu.concatenate %130, %130, %130, %130 in 0 : vector<64x32xbf16>, vector<64x32xbf16>, vector<64x32xbf16>, vector<64x32xbf16> -> vector<256x32xbf16>
    %145 = arith.mulf %144, %35 : vector<256x32xbf16>
    %cst_64 = arith.constant dense<0.000000e+00> : vector<64x32xf32>
    %146 = tpu.matmul %142, %145, %cst_64 {dimension_numbers = #tpu.dot_dimension_numbers<[1], [0], [0], [1], [0, 0, 1, 1], [], []>} : vector<64x256xbf16>, vector<256x32xbf16>, vector<64x32xf32> -> vector<64x32xf32>
    %147 = tpu.reciprocal %143 {approx = true} : vector<64x32xf32> -> vector<64x32xf32>
    %148 = arith.mulf %146, %147 : vector<64x32xf32>
    %149 = arith.truncf %148 : vector<64x32xf32> to vector<64x32xbf16>
    %c256 = arith.constant 256 : index
    %c0_65 = arith.constant 0 : index
    %150 = vector.load %arg24[%c256, %c0_65] : memref<512x32xbf16, #tpu.memory_space<vmem>>, vector<64x32xbf16>
    tpu.vector_store %arg24[%c256, %c0_65], %149 {strides = array<i32>} : memref<512x32xbf16, #tpu.memory_space<vmem>>, vector<64x32xbf16>,
    %151 = vector.extract_strided_slice %27 {offsets = [320, 0], sizes = [64, 32], strides = [1, 1]} : vector<512x32xf32> to vector<64x32xf32>
    %152 = vector.extract_strided_slice %33 {offsets = [0, 320], sizes = [32, 64], strides = [1, 1]} : vector<32x512xf32> to vector<32x64xf32>
    %153 = vector.extract_strided_slice %17 {offsets = [320, 0], sizes = [64, 32], strides = [1, 1]} : vector<512x32xbf16> to vector<64x32xbf16>
    %154 = tpu.concatenate %152, %152, %152, %152 in 1 : vector<32x64xf32>, vector<32x64xf32>, vector<32x64xf32>, vector<32x64xf32> -> vector<32x256xf32>
    %155 = arith.mulf %154, %34 : vector<32x256xf32>
    %cst_66 = arith.constant dense<0.000000e+00> : vector<64x256xf32>
    %156 = tpu.matmul %151, %155, %cst_66 {dimension_numbers = #tpu.dot_dimension_numbers<[1], [0], [0], [1], [0, 0, 1, 1], [], []>} : vector<64x32xf32>, vector<32x256xf32>, vector<64x256xf32> -> vector<64x256xf32>
    %c5 = arith.constant 5 : index
    %c0_67 = arith.constant 0 : index
    %c0_68 = arith.constant 0 : index
    %157 = vector.load %arg3[%c5, %c0_67, %c0_68] : memref<8x64x256xf32, #tpu.memory_space<vmem>>, vector<1x64x256xf32>
    %158 = vector.shape_cast %157 : vector<1x64x256xf32> to vector<64x256xf32>
    %159 = arith.addf %156, %158 : vector<64x256xf32>
    %cst_69 = arith.constant dense<0xFF800000> : vector<64xf32>
    %160 = vector.multi_reduction <maximumf>, %159, %cst_69 [1] : vector<64x256xf32> to vector<64xf32>
    %161 = vector.shape_cast %160 : vector<64xf32> to vector<64x1xf32>
    %162 = vector.broadcast %161 : vector<64x1xf32> to vector<64x256xf32>
    %163 = arith.subf %159, %162 : vector<64x256xf32>
    %164 = math.exp %163 : vector<64x256xf32>
    %165 = arith.truncf %164 : vector<64x256xf32> to vector<64x256xbf16>
    %cst_70 = arith.constant dense<0.000000e+00> : vector<64x32xf32>
    %166 = tpu.matmul %165, %35, %cst_70 {dimension_numbers = #tpu.dot_dimension_numbers<[1], [0], [0], [1], [0, 0, 1, 1], [], []>} : vector<64x256xbf16>, vector<256x32xbf16>, vector<64x32xf32> -> vector<64x32xf32>
    %167 = tpu.concatenate %153, %153, %153, %153 in 0 : vector<64x32xbf16>, vector<64x32xbf16>, vector<64x32xbf16>, vector<64x32xbf16> -> vector<256x32xbf16>
    %168 = arith.mulf %167, %35 : vector<256x32xbf16>
    %cst_71 = arith.constant dense<0.000000e+00> : vector<64x32xf32>
    %169 = tpu.matmul %165, %168, %cst_71 {dimension_numbers = #tpu.dot_dimension_numbers<[1], [0], [0], [1], [0, 0, 1, 1], [], []>} : vector<64x256xbf16>, vector<256x32xbf16>, vector<64x32xf32> -> vector<64x32xf32>
    %170 = tpu.reciprocal %166 {approx = true} : vector<64x32xf32> -> vector<64x32xf32>
    %171 = arith.mulf %169, %170 : vector<64x32xf32>
    %172 = arith.truncf %171 : vector<64x32xf32> to vector<64x32xbf16>
    %c320 = arith.constant 320 : index
    %c0_72 = arith.constant 0 : index
    %173 = vector.load %arg24[%c320, %c0_72] : memref<512x32xbf16, #tpu.memory_space<vmem>>, vector<64x32xbf16>
    tpu.vector_store %arg24[%c320, %c0_72], %172 {strides = array<i32>} : memref<512x32xbf16, #tpu.memory_space<vmem>>, vector<64x32xbf16>,
    %174 = vector.extract_strided_slice %27 {offsets = [384, 0], sizes = [64, 32], strides = [1, 1]} : vector<512x32xf32> to vector<64x32xf32>
    %175 = vector.extract_strided_slice %33 {offsets = [0, 384], sizes = [32, 64], strides = [1, 1]} : vector<32x512xf32> to vector<32x64xf32>
    %176 = vector.extract_strided_slice %17 {offsets = [384, 0], sizes = [64, 32], strides = [1, 1]} : vector<512x32xbf16> to vector<64x32xbf16>
    %177 = tpu.concatenate %175, %175, %175, %175 in 1 : vector<32x64xf32>, vector<32x64xf32>, vector<32x64xf32>, vector<32x64xf32> -> vector<32x256xf32>
    %178 = arith.mulf %177, %34 : vector<32x256xf32>
    %cst_73 = arith.constant dense<0.000000e+00> : vector<64x256xf32>
    %179 = tpu.matmul %174, %178, %cst_73 {dimension_numbers = #tpu.dot_dimension_numbers<[1], [0], [0], [1], [0, 0, 1, 1], [], []>} : vector<64x32xf32>, vector<32x256xf32>, vector<64x256xf32> -> vector<64x256xf32>
    %c6 = arith.constant 6 : index
    %c0_74 = arith.constant 0 : index
    %c0_75 = arith.constant 0 : index
    %180 = vector.load %arg3[%c6, %c0_74, %c0_75] : memref<8x64x256xf32, #tpu.memory_space<vmem>>, vector<1x64x256xf32>
    %181 = vector.shape_cast %180 : vector<1x64x256xf32> to vector<64x256xf32>
    %182 = arith.addf %179, %181 : vector<64x256xf32>
    %cst_76 = arith.constant dense<0xFF800000> : vector<64xf32>
    %183 = vector.multi_reduction <maximumf>, %182, %cst_76 [1] : vector<64x256xf32> to vector<64xf32>
    %184 = vector.shape_cast %183 : vector<64xf32> to vector<64x1xf32>
    %185 = vector.broadcast %184 : vector<64x1xf32> to vector<64x256xf32>
    %186 = arith.subf %182, %185 : vector<64x256xf32>
    %187 = math.exp %186 : vector<64x256xf32>
    %188 = arith.truncf %187 : vector<64x256xf32> to vector<64x256xbf16>
    %cst_77 = arith.constant dense<0.000000e+00> : vector<64x32xf32>
    %189 = tpu.matmul %188, %35, %cst_77 {dimension_numbers = #tpu.dot_dimension_numbers<[1], [0], [0], [1], [0, 0, 1, 1], [], []>} : vector<64x256xbf16>, vector<256x32xbf16>, vector<64x32xf32> -> vector<64x32xf32>
    %190 = tpu.concatenate %176, %176, %176, %176 in 0 : vector<64x32xbf16>, vector<64x32xbf16>, vector<64x32xbf16>, vector<64x32xbf16> -> vector<256x32xbf16>
    %191 = arith.mulf %190, %35 : vector<256x32xbf16>
    %cst_78 = arith.constant dense<0.000000e+00> : vector<64x32xf32>
    %192 = tpu.matmul %188, %191, %cst_78 {dimension_numbers = #tpu.dot_dimension_numbers<[1], [0], [0], [1], [0, 0, 1, 1], [], []>} : vector<64x256xbf16>, vector<256x32xbf16>, vector<64x32xf32> -> vector<64x32xf32>
    %193 = tpu.reciprocal %189 {approx = true} : vector<64x32xf32> -> vector<64x32xf32>
    %194 = arith.mulf %192, %193 : vector<64x32xf32>
    %195 = arith.truncf %194 : vector<64x32xf32> to vector<64x32xbf16>
    %c384 = arith.constant 384 : index
    %c0_79 = arith.constant 0 : index
    %196 = vector.load %arg24[%c384, %c0_79] : memref<512x32xbf16, #tpu.memory_space<vmem>>, vector<64x32xbf16>
    tpu.vector_store %arg24[%c384, %c0_79], %195 {strides = array<i32>} : memref<512x32xbf16, #tpu.memory_space<vmem>>, vector<64x32xbf16>,
    %197 = vector.extract_strided_slice %27 {offsets = [448, 0], sizes = [64, 32], strides = [1, 1]} : vector<512x32xf32> to vector<64x32xf32>
    %198 = vector.extract_strided_slice %33 {offsets = [0, 448], sizes = [32, 64], strides = [1, 1]} : vector<32x512xf32> to vector<32x64xf32>
    %199 = vector.extract_strided_slice %17 {offsets = [448, 0], sizes = [64, 32], strides = [1, 1]} : vector<512x32xbf16> to vector<64x32xbf16>
    %200 = tpu.concatenate %198, %198, %198, %198 in 1 : vector<32x64xf32>, vector<32x64xf32>, vector<32x64xf32>, vector<32x64xf32> -> vector<32x256xf32>
    %201 = arith.mulf %200, %34 : vector<32x256xf32>
    %cst_80 = arith.constant dense<0.000000e+00> : vector<64x256xf32>
    %202 = tpu.matmul %197, %201, %cst_80 {dimension_numbers = #tpu.dot_dimension_numbers<[1], [0], [0], [1], [0, 0, 1, 1], [], []>} : vector<64x32xf32>, vector<32x256xf32>, vector<64x256xf32> -> vector<64x256xf32>
    %c7 = arith.constant 7 : index
    %c0_81 = arith.constant 0 : index
    %c0_82 = arith.constant 0 : index
    %203 = vector.load %arg3[%c7, %c0_81, %c0_82] : memref<8x64x256xf32, #tpu.memory_space<vmem>>, vector<1x64x256xf32>
    %204 = vector.shape_cast %203 : vector<1x64x256xf32> to vector<64x256xf32>
    %205 = arith.addf %202, %204 : vector<64x256xf32>
    %cst_83 = arith.constant dense<0xFF800000> : vector<64xf32>
    %206 = vector.multi_reduction <maximumf>, %205, %cst_83 [1] : vector<64x256xf32> to vector<64xf32>
    %207 = vector.shape_cast %206 : vector<64xf32> to vector<64x1xf32>
    %208 = vector.broadcast %207 : vector<64x1xf32> to vector<64x256xf32>
    %209 = arith.subf %205, %208 : vector<64x256xf32>
    %210 = math.exp %209 : vector<64x256xf32>
    %211 = arith.truncf %210 : vector<64x256xf32> to vector<64x256xbf16>
    %cst_84 = arith.constant dense<0.000000e+00> : vector<64x32xf32>
    %212 = tpu.matmul %211, %35, %cst_84 {dimension_numbers = #tpu.dot_dimension_numbers<[1], [0], [0], [1], [0, 0, 1, 1], [], []>} : vector<64x256xbf16>, vector<256x32xbf16>, vector<64x32xf32> -> vector<64x32xf32>
    %213 = tpu.concatenate %199, %199, %199, %199 in 0 : vector<64x32xbf16>, vector<64x32xbf16>, vector<64x32xbf16>, vector<64x32xbf16> -> vector<256x32xbf16>
    %214 = arith.mulf %213, %35 : vector<256x32xbf16>
    %cst_85 = arith.constant dense<0.000000e+00> : vector<64x32xf32>
    %215 = tpu.matmul %211, %214, %cst_85 {dimension_numbers = #tpu.dot_dimension_numbers<[1], [0], [0], [1], [0, 0, 1, 1], [], []>} : vector<64x256xbf16>, vector<256x32xbf16>, vector<64x32xf32> -> vector<64x32xf32>
    %216 = tpu.reciprocal %212 {approx = true} : vector<64x32xf32> -> vector<64x32xf32>
    %217 = arith.mulf %215, %216 : vector<64x32xf32>
    %218 = arith.truncf %217 : vector<64x32xf32> to vector<64x32xbf16>
    %c448 = arith.constant 448 : index
    %c0_86 = arith.constant 0 : index
    %219 = vector.load %arg24[%c448, %c0_86] : memref<512x32xbf16, #tpu.memory_space<vmem>>, vector<64x32xbf16>
    tpu.vector_store %arg24[%c448, %c0_86], %218 {strides = array<i32>} : memref<512x32xbf16, #tpu.memory_space<vmem>>, vector<64x32xbf16>,
    %c0_87 = arith.constant 0 : index
    %c0_88 = arith.constant 0 : index
    %220 = vector.load %arg24[%c0_87, %c0_88] : memref<512x32xbf16, #tpu.memory_space<vmem>>, vector<512x32xbf16>
    %c0_89 = arith.constant 0 : index
    %c0_90 = arith.constant 0 : index
    %221 = vector.load %arg13[%c0_89, %c0_90] : memref<32x32xbf16, #tpu.memory_space<vmem>>, vector<32x32xbf16>
    %cst_91 = arith.constant dense<0.000000e+00> : vector<32x512xf32>
    %222 = tpu.matmul %221, %220, %cst_91 {dimension_numbers = #tpu.dot_dimension_numbers<[1], [1], [0], [0], [0, 0, 1, 0], [], []>} : vector<32x32xbf16>, vector<512x32xbf16>, vector<32x512xf32> -> vector<32x512xf32>
    %c0_92 = arith.constant 0 : index
    %c0_93 = arith.constant 0 : index
    %223 = vector.load %arg14[%c0_92, %c0_93] : memref<32x1xf32, #tpu.memory_space<vmem>>, vector<32x1xf32>
    %224 = vector.broadcast %223 : vector<32x1xf32> to vector<32x512xf32>
    %225 = arith.addf %222, %224 : vector<32x512xf32>
    %c0_94 = arith.constant 0 : index
    %c0_95 = arith.constant 0 : index
    %226 = vector.load %arg15[%c0_94, %c0_95] : memref<32x1xf32, #tpu.memory_space<vmem>>, vector<32x1xf32>
    %c0_96 = arith.constant 0 : index
    %c0_97 = arith.constant 0 : index
    %227 = vector.load %arg16[%c0_96, %c0_97] : memref<32x1xf32, #tpu.memory_space<vmem>>, vector<32x1xf32>
    %cst_98 = arith.constant dense<0.000000e+00> : vector<512xf32>
    %228 = vector.multi_reduction <add>, %225, %cst_98 [0] : vector<32x512xf32> to vector<512xf32>
    %229 = vector.shape_cast %228 : vector<512xf32> to vector<1x512xf32>
    %cst_99 = arith.constant 3.200000e+01 : f32
    %230 = vector.broadcast %cst_99 : f32 to vector<1x512xf32>
    %231 = arith.divf %229, %230 : vector<1x512xf32>
    %232 = vector.broadcast %231 : vector<1x512xf32> to vector<32x512xf32>
    %233 = arith.subf %225, %232 : vector<32x512xf32>
    %234 = arith.mulf %233, %233 : vector<32x512xf32>
    %cst_100 = arith.constant dense<0.000000e+00> : vector<512xf32>
    %235 = vector.multi_reduction <add>, %234, %cst_100 [0] : vector<32x512xf32> to vector<512xf32>
    %236 = vector.shape_cast %235 : vector<512xf32> to vector<1x512xf32>
    %cst_101 = arith.constant 3.200000e+01 : f32
    %237 = vector.broadcast %cst_101 : f32 to vector<1x512xf32>
    %238 = arith.divf %236, %237 : vector<1x512xf32>
    %239 = vector.broadcast %231 : vector<1x512xf32> to vector<32x512xf32>
    %240 = arith.subf %225, %239 : vector<32x512xf32>
    %cst_102 = arith.constant 9.99999974E-6 : f32
    %241 = vector.broadcast %cst_102 : f32 to vector<1x512xf32>
    %242 = arith.addf %238, %241 : vector<1x512xf32>
    %243 = math.rsqrt %242 : vector<1x512xf32>
    %244 = vector.broadcast %243 : vector<1x512xf32> to vector<32x512xf32>
    %245 = arith.mulf %240, %244 : vector<32x512xf32>
    %246 = vector.broadcast %226 : vector<32x1xf32> to vector<32x512xf32>
    %247 = arith.mulf %245, %246 : vector<32x512xf32>
    %248 = vector.broadcast %227 : vector<32x1xf32> to vector<32x512xf32>
    %249 = arith.addf %247, %248 : vector<32x512xf32>
    %250 = arith.addf %3, %249 : vector<32x512xf32>
    %c0_103 = arith.constant 0 : index
    %c0_104 = arith.constant 0 : index
    %251 = vector.load %arg17[%c0_103, %c0_104] : memref<64x32xbf16, #tpu.memory_space<vmem>>, vector<64x32xbf16>
    %252 = arith.truncf %250 : vector<32x512xf32> to vector<32x512xbf16>
    %cst_105 = arith.constant dense<0.000000e+00> : vector<64x512xf32>
    %253 = tpu.matmul %251, %252, %cst_105 {dimension_numbers = #tpu.dot_dimension_numbers<[1], [0], [0], [1], [0, 0, 1, 1], [], []>} : vector<64x32xbf16>, vector<32x512xbf16>, vector<64x512xf32> -> vector<64x512xf32>
    %c0_106 = arith.constant 0 : index
    %c0_107 = arith.constant 0 : index
    %254 = vector.load %arg18[%c0_106, %c0_107] : memref<64x1xf32, #tpu.memory_space<vmem>>, vector<64x1xf32>
    %255 = vector.broadcast %254 : vector<64x1xf32> to vector<64x512xf32>
    %256 = arith.addf %253, %255 : vector<64x512xf32>
    %257 = arith.mulf %256, %256 : vector<64x512xf32>
    %258 = arith.mulf %256, %257 : vector<64x512xf32>
    %cst_108 = arith.constant 4.471500e-02 : f32
    %259 = vector.broadcast %cst_108 : f32 to vector<64x512xf32>
    %260 = arith.mulf %259, %258 : vector<64x512xf32>
    %261 = arith.addf %256, %260 : vector<64x512xf32>
    %cst_109 = arith.constant 0.797884583 : f32
    %262 = vector.broadcast %cst_109 : f32 to vector<64x512xf32>
    %263 = arith.mulf %262, %261 : vector<64x512xf32>
    %264 = math.tanh %263 : vector<64x512xf32>
    %cst_110 = arith.constant 1.000000e+00 : f32
    %265 = vector.broadcast %cst_110 : f32 to vector<64x512xf32>
    %266 = arith.addf %265, %264 : vector<64x512xf32>
    %cst_111 = arith.constant 5.000000e-01 : f32
    %267 = vector.broadcast %cst_111 : f32 to vector<64x512xf32>
    %268 = arith.mulf %267, %266 : vector<64x512xf32>
    %269 = arith.mulf %256, %268 : vector<64x512xf32>
    %c0_112 = arith.constant 0 : index
    %c0_113 = arith.constant 0 : index
    %270 = vector.load %arg19[%c0_112, %c0_113] : memref<32x64xbf16, #tpu.memory_space<vmem>>, vector<32x64xbf16>
    %271 = arith.truncf %269 : vector<64x512xf32> to vector<64x512xbf16>
    %cst_114 = arith.constant dense<0.000000e+00> : vector<32x512xf32>
    %272 = tpu.matmul %270, %271, %cst_114 {dimension_numbers = #tpu.dot_dimension_numbers<[1], [0], [0], [1], [0, 0, 1, 1], [], []>} : vector<32x64xbf16>, vector<64x512xbf16>, vector<32x512xf32> -> vector<32x512xf32>
    %c0_115 = arith.constant 0 : index
    %c0_116 = arith.constant 0 : index
    %273 = vector.load %arg20[%c0_115, %c0_116] : memref<32x1xf32, #tpu.memory_space<vmem>>, vector<32x1xf32>
    %274 = vector.broadcast %273 : vector<32x1xf32> to vector<32x512xf32>
    %275 = arith.addf %272, %274 : vector<32x512xf32>
    %c0_117 = arith.constant 0 : index
    %c0_118 = arith.constant 0 : index
    %276 = vector.load %arg21[%c0_117, %c0_118] : memref<32x1xf32, #tpu.memory_space<vmem>>, vector<32x1xf32>
    %c0_119 = arith.constant 0 : index
    %c0_120 = arith.constant 0 : index
    %277 = vector.load %arg22[%c0_119, %c0_120] : memref<32x1xf32, #tpu.memory_space<vmem>>, vector<32x1xf32>
    %cst_121 = arith.constant dense<0.000000e+00> : vector<512xf32>
    %278 = vector.multi_reduction <add>, %275, %cst_121 [0] : vector<32x512xf32> to vector<512xf32>
    %279 = vector.shape_cast %278 : vector<512xf32> to vector<1x512xf32>
    %cst_122 = arith.constant 3.200000e+01 : f32
    %280 = vector.broadcast %cst_122 : f32 to vector<1x512xf32>
    %281 = arith.divf %279, %280 : vector<1x512xf32>
    %282 = vector.broadcast %281 : vector<1x512xf32> to vector<32x512xf32>
    %283 = arith.subf %275, %282 : vector<32x512xf32>
    %284 = arith.mulf %283, %283 : vector<32x512xf32>
    %cst_123 = arith.constant dense<0.000000e+00> : vector<512xf32>
    %285 = vector.multi_reduction <add>, %284, %cst_123 [0] : vector<32x512xf32> to vector<512xf32>
    %286 = vector.shape_cast %285 : vector<512xf32> to vector<1x512xf32>
    %cst_124 = arith.constant 3.200000e+01 : f32
    %287 = vector.broadcast %cst_124 : f32 to vector<1x512xf32>
    %288 = arith.divf %286, %287 : vector<1x512xf32>
    %289 = vector.broadcast %281 : vector<1x512xf32> to vector<32x512xf32>
    %290 = arith.subf %275, %289 : vector<32x512xf32>
    %cst_125 = arith.constant 9.99999974E-6 : f32
    %291 = vector.broadcast %cst_125 : f32 to vector<1x512xf32>
    %292 = arith.addf %288, %291 : vector<1x512xf32>
    %293 = math.rsqrt %292 : vector<1x512xf32>
    %294 = vector.broadcast %293 : vector<1x512xf32> to vector<32x512xf32>
    %295 = arith.mulf %290, %294 : vector<32x512xf32>
    %296 = vector.broadcast %276 : vector<32x1xf32> to vector<32x512xf32>
    %297 = arith.mulf %295, %296 : vector<32x512xf32>
    %298 = vector.broadcast %277 : vector<32x1xf32> to vector<32x512xf32>
    %299 = arith.addf %297, %298 : vector<32x512xf32>
    %300 = arith.addf %250, %299 : vector<32x512xf32>
    %c0_126 = arith.constant 0 : index
    %c0_127 = arith.constant 0 : index
    %c0_128 = arith.constant 0 : index
    %301 = vector.load %arg23[%c0_126, %c0_127, %c0_128] : memref<1x32x512xf32, #tpu.memory_space<vmem>>, vector<1x32x512xf32>
    %302 = vector.shape_cast %301 : vector<1x32x512xf32> to vector<32x512xf32>
    %303 = vector.shape_cast %300 : vector<32x512xf32> to vector<1x32x512xf32>
    tpu.vector_store %arg23[%c0_126, %c0_127, %c0_128], %303 {strides = array<i32>} : memref<1x32x512xf32, #tpu.memory_space<vmem>>, vector<1x32x512xf32>,
    return
  }
  func.func @transform_0(%arg0: i32) -> (i32, i32, i32) {
    %c0_i32 = arith.constant 0 : i32
    %c0_i32_0 = arith.constant 0 : i32
    %c0_i32_1 = arith.constant 0 : i32
    return %arg0, %c0_i32, %c0_i32_0 : i32, i32, i32
  }
  func.func @transform_1(%arg0: i32) -> (i32, i32, i32) {
    %c0_i32 = arith.constant 0 : i32
    %c0_i32_0 = arith.constant 0 : i32
    %c0_i32_1 = arith.constant 0 : i32
    return %arg0, %c0_i32, %c0_i32_0 : i32, i32, i32
  }
  func.func @transform_2(%arg0: i32) -> (i32, i32, i32) {
    %c0_i32 = arith.constant 0 : i32
    %c0_i32_0 = arith.constant 0 : i32
    %c0_i32_1 = arith.constant 0 : i32
    %c0_i32_2 = arith.constant 0 : i32
    return %c0_i32, %c0_i32_0, %c0_i32_1 : i32, i32, i32
  }
  func.func @transform_3(%arg0: i32) -> (i32, i32) {
    %c0_i32 = arith.constant 0 : i32
    %c0_i32_0 = arith.constant 0 : i32
    %c0_i32_1 = arith.constant 0 : i32
    return %c0_i32, %c0_i32_0 : i32, i32
  }
  func.func @transform_4(%arg0: i32) -> (i32, i32) {
    %c0_i32 = arith.constant 0 : i32
    %c0_i32_0 = arith.constant 0 : i32
    %c0_i32_1 = arith.constant 0 : i32
    return %c0_i32, %c0_i32_0 : i32, i32
  }
  func.func @transform_5(%arg0: i32) -> (i32, i32) {
    %c0_i32 = arith.constant 0 : i32
    %c0_i32_0 = arith.constant 0 : i32
    %c0_i32_1 = arith.constant 0 : i32
    return %c0_i32, %c0_i32_0 : i32, i32
  }
  func.func @transform_6(%arg0: i32) -> (i32, i32) {
    %c0_i32 = arith.constant 0 : i32
    %c0_i32_0 = arith.constant 0 : i32
    %c0_i32_1 = arith.constant 0 : i32
    return %c0_i32, %c0_i32_0 : i32, i32
  }
  func.func @transform_7(%arg0: i32) -> (i32, i32) {
    %c0_i32 = arith.constant 0 : i32
    %c0_i32_0 = arith.constant 0 : i32
    %c0_i32_1 = arith.constant 0 : i32
    return %c0_i32, %c0_i32_0 : i32, i32
  }
  func.func @transform_8(%arg0: i32) -> (i32, i32) {
    %c0_i32 = arith.constant 0 : i32
    %c0_i32_0 = arith.constant 0 : i32
    %c0_i32_1 = arith.constant 0 : i32
    return %c0_i32, %c0_i32_0 : i32, i32
  }
  func.func @transform_9(%arg0: i32) -> (i32, i32) {
    %c0_i32 = arith.constant 0 : i32
    %c0_i32_0 = arith.constant 0 : i32
    %c0_i32_1 = arith.constant 0 : i32
    return %c0_i32, %c0_i32_0 : i32, i32
  }
  func.func @transform_10(%arg0: i32) -> (i32, i32) {
    %c0_i32 = arith.constant 0 : i32
    %c0_i32_0 = arith.constant 0 : i32
    %c0_i32_1 = arith.constant 0 : i32
    return %c0_i32, %c0_i32_0 : i32, i32
  }
  func.func @transform_11(%arg0: i32) -> (i32, i32) {
    %c0_i32 = arith.constant 0 : i32
    %c0_i32_0 = arith.constant 0 : i32
    %c0_i32_1 = arith.constant 0 : i32
    return %c0_i32, %c0_i32_0 : i32, i32
  }
  func.func @transform_12(%arg0: i32) -> (i32, i32) {
    %c0_i32 = arith.constant 0 : i32
    %c0_i32_0 = arith.constant 0 : i32
    %c0_i32_1 = arith.constant 0 : i32
    return %c0_i32, %c0_i32_0 : i32, i32
  }
  func.func @transform_13(%arg0: i32) -> (i32, i32) {
    %c0_i32 = arith.constant 0 : i32
    %c0_i32_0 = arith.constant 0 : i32
    %c0_i32_1 = arith.constant 0 : i32
    return %c0_i32, %c0_i32_0 : i32, i32
  }
  func.func @transform_14(%arg0: i32) -> (i32, i32) {
    %c0_i32 = arith.constant 0 : i32
    %c0_i32_0 = arith.constant 0 : i32
    %c0_i32_1 = arith.constant 0 : i32
    return %c0_i32, %c0_i32_0 : i32, i32
  }
  func.func @transform_15(%arg0: i32) -> (i32, i32) {
    %c0_i32 = arith.constant 0 : i32
    %c0_i32_0 = arith.constant 0 : i32
    %c0_i32_1 = arith.constant 0 : i32
    return %c0_i32, %c0_i32_0 : i32, i32
  }
  func.func @transform_16(%arg0: i32) -> (i32, i32) {
    %c0_i32 = arith.constant 0 : i32
    %c0_i32_0 = arith.constant 0 : i32
    %c0_i32_1 = arith.constant 0 : i32
    return %c0_i32, %c0_i32_0 : i32, i32
  }
  func.func @transform_17(%arg0: i32) -> (i32, i32) {
    %c0_i32 = arith.constant 0 : i32
    %c0_i32_0 = arith.constant 0 : i32
    %c0_i32_1 = arith.constant 0 : i32
    return %c0_i32, %c0_i32_0 : i32, i32
  }
  func.func @transform_18(%arg0: i32) -> (i32, i32) {
    %c0_i32 = arith.constant 0 : i32
    %c0_i32_0 = arith.constant 0 : i32
    %c0_i32_1 = arith.constant 0 : i32
    return %c0_i32, %c0_i32_0 : i32, i32
  }
  func.func @transform_19(%arg0: i32) -> (i32, i32) {
    %c0_i32 = arith.constant 0 : i32
    %c0_i32_0 = arith.constant 0 : i32
    %c0_i32_1 = arith.constant 0 : i32
    return %c0_i32, %c0_i32_0 : i32, i32
  }
  func.func @transform_20(%arg0: i32) -> (i32, i32) {
    %c0_i32 = arith.constant 0 : i32
    %c0_i32_0 = arith.constant 0 : i32
    %c0_i32_1 = arith.constant 0 : i32
    return %c0_i32, %c0_i32_0 : i32, i32
  }
  func.func @transform_21(%arg0: i32) -> (i32, i32) {
    %c0_i32 = arith.constant 0 : i32
    %c0_i32_0 = arith.constant 0 : i32
    %c0_i32_1 = arith.constant 0 : i32
    return %c0_i32, %c0_i32_0 : i32, i32
  }
  func.func @transform_22(%arg0: i32) -> (i32, i32, i32) {
    %c0_i32 = arith.constant 0 : i32
    %c0_i32_0 = arith.constant 0 : i32
    %c0_i32_1 = arith.constant 0 : i32
    return %arg0, %c0_i32, %c0_i32_0 : i32, i32, i32
  }
}

</mosaic_0001>

<bundles_post_ra>
// kernel: swin_block_forward.1
= control target key start
LH: loop header
LB: loop body
LE: loop exit
PB: predicated region body
PF: predicated region fallthrough
CT: control target
= control target key end

     0   :  { %s14997_s0 = inlined_call_operand.vmem [shape: f32[2,512,32], index: 0, kind: input, shape index: {}]   ;;  %s14998_s1 = inlined_call_operand.vmem [shape: f32[2,32,512], index: 1, kind: input, shape index: {}]   ;;  %s14999_s2 = inlined_call_operand.vmem [shape: f32[8,64,256], index: 2, kind: input, shape index: {}]   ;;  %s15000_s3 = inlined_call_operand.vmem [shape: f32[32,32], index: 3, kind: input, shape index: {}]   ;;  %s15001_s4 = inlined_call_operand.vmem [shape: f32[1,32], index: 4, kind: input, shape index: {}]   ;;  %s15002_s5 = inlined_call_operand.vmem [shape: f32[32,32], index: 5, kind: input, shape index: {}]   ;;  %s15003_s6 = inlined_call_operand.vmem [shape: bf16[32,32], index: 6, kind: input, shape index: {}]   ;;  %s15004_s7 = inlined_call_operand.vmem [shape: f32[1,32], index: 7, kind: input, shape index: {}]   ;;  %s15005_s8 = inlined_call_operand.vmem [shape: f32[32,32], index: 8, kind: input, shape index: {}]   ;;  %s15006_s9 = inlined_call_operand.vmem [shape: f32[1,32], index: 9, kind: input, shape index: {}]   ;;  %s15007_s10 = inlined_call_operand.vmem [shape: f32[32,256], index: 10, kind: input, shape index: {}]   ;;  %s15008_s11 = inlined_call_operand.vmem [shape: bf16[256,32], index: 11, kind: input, shape index: {}]   ;;  %s15009_s12 = inlined_call_operand.vmem [shape: bf16[32,32], index: 12, kind: input, shape index: {}]   ;;  %s15010_s13 = inlined_call_operand.vmem [shape: f32[32,1], index: 13, kind: input, shape index: {}]   ;;  %s15011_s14 = inlined_call_operand.vmem [shape: f32[32,1], index: 14, kind: input, shape index: {}]   ;;  %s15012_s15 = inlined_call_operand.vmem [shape: f32[32,1], index: 15, kind: input, shape index: {}]   ;;  %s15013_s16 = inlined_call_operand.vmem [shape: bf16[64,32], index: 16, kind: input, shape index: {}]   ;;  %s15014_s17 = inlined_call_operand.vmem [shape: f32[64,1], index: 17, kind: input, shape index: {}]   ;;  %s15015_s18 = inlined_call_operand.vmem [shape: bf16[32,64], index: 18, kind: input, shape index: {}]   ;;  %s15016_s19 = inlined_call_operand.vmem [shape: f32[32,1], index: 19, kind: input, shape index: {}]   ;;  %s15017_s20 = inlined_call_operand.vmem [shape: f32[32,1], index: 20, kind: input, shape index: {}]   ;;  %s15018_s21 = inlined_call_operand.vmem [shape: f32[32,1], index: 21, kind: input, shape index: {}]   ;;  %s15019_s22 = inlined_call_operand.vmem [shape: f32[2,32,512], index: 22, kind: output, shape index: {}]  }
   0x1   :  { %15128 = sst [smem:[#allocation149_spill]] %s14997_s0 }
   0x2   :  { %15129 = sst [smem:[#allocation150_spill]] %s14998_s1 }
   0x3   :  { %15130 = sst [smem:[#allocation151_spill]] %s14999_s2 }
   0x4   :  { %15131 = sst [smem:[#allocation152_spill]] %s15000_s3  ;;  %s10815_s3 = smov 0  }
   0x5   :  { %15132 = sst [smem:[#allocation153_spill]] %s15001_s4 }
   0x6   :  { %15133 = sst [smem:[#allocation154_spill]] %s15002_s5 }
   0x7   :  { %15134 = sst [smem:[#allocation155_spill]] %s15003_s6 }
   0x8 LB: > { %s8252_s28 = sadd.s32 4294967295, %s10695_s3   ;;  %p8256_p0 = scmp.ge.s32.totalorder %s10695_s3, 1  ;;  %s10695_s3 = sphi %s10815_s3, %s32_s3  }
   0x9   : > { %p622_p1 = scmp.lt.s32.totalorder %s10695_s3, 3 }
   0xb   : > { %p623_p2 = pnand %p8256_p0, %p622_p1 }
   0xd   : > { %626 = sbr.rel (%p623_p2) target bundleno = 5173 (0x1435), region = 108 }
  0x14   : > { %p689_p3 = scmp.lt.s32.totalorder %s8252_s28, 1  ;;  %v15024_v0 = vmov 0.0   ;;  %s15135_s4 = sld [smem:[#allocation152_spill]]  ;;  %vm796_vm0 = vcmask 261120   ;;  %vm3258_vm1 = vcmask 523264  }
  0x15   : > { %1454 = vmatprep.mubr.f32.mxu1 %v15024_v0  ;;  %s15136_s29 = sld [smem:[#allocation150_spill]]  ;;  %s15137_s1 = sld [smem:[#allocation149_spill]] }
  0x16   : > { %s15440_s28 = smov (!%p689_p3, %s8252_s28), 1  ;;  %s15139_s23 = sld [smem:[#allocation155_spill]] }
  0x17   : > { %s8662_s25 = sshll.u32 %s15440_s28, 9  ;;  %s15110_s26 = sshll.u32 %s15440_s28, 7 }
  0x18   : > { %s15140_s24 = sld [smem:[#allocation153_spill]]  ;;  %s15111_s27 = smov 64  }
  0x19   : > { %s15288_s0 = sld [smem:[#allocation151_spill]] }
  0x1a   : > { %v785_v1 = vld [vmem:[%s15135_s4] sm:$0xff]  ;;  %v786_v2 = vld [vmem:[%s15135_s4 + $0x8] sm:$0xff]  ;;  %v787_v4 = vld [vmem:[%s15135_s4 + $0x10] sm:$0xff] }
  0x1b   : > { %v9791_v3 = vpack.c.bf16 %v786_v2, %v785_v1  ;;  %v788_v5 = vld [vmem:[%s15135_s4 + $0x18] sm:$0xff]  ;;  %s10845_s30 = scalar_lea.vmem %s15136_s29, %s15110_s26  ;;  %s10856_s5 = scalar_lea.vmem %s15137_s1, %s8662_s25 }
  0x1c   : > { %v9795_v6 = vpack.c.bf16 %v788_v5, %v787_v4  ;;  %v770_v7 = vld [vmem:[%s10845_s30 + $0x8] sm:$0xff]  ;;  %v769_v9 = vld [vmem:[%s10845_s30] sm:$0xff]  ;;  %v772_v18 = vld [vmem:[%s10845_s30 + $0x18] sm:$0xff]  ;;  %s15138_s25 = sld [smem:[#allocation154_spill]]  ;;  %s15438_s4 = sshll.u32 %s15440_s28, 7 }
  0x1d   : > { %9792 = vmatprep.subr.bf16.mxu0 %v9791_v3  ;;  %v774_v8 = vld [vmem:[%s10845_s30 + $0x28] sm:$0xff]  ;;  %v773_v11 = vld [vmem:[%s10845_s30 + $0x20] sm:$0xff]  ;;  %v776_v19 = vld [vmem:[%s10845_s30 + $0x38] sm:$0xff] }
  0x1e   : > { %9794 = vmatpush3.bf16.msra.mxu0 %v9791_v3  ;;  %v9799_v10 = vpack.c.bf16 %v774_v8, %v770_v7  ;;  %v778_v12 = vld [vmem:[%s10845_s30 + $0x48] sm:$0xff]  ;;  %v9801_v14 = vpack.c.bf16 %v773_v11, %v769_v9  ;;  %v777_v16 = vld [vmem:[%s10845_s30 + $0x40] sm:$0xff]  ;;  %v771_v21 = vld [vmem:[%s10845_s30 + $0x10] sm:$0xff]  ;;  %v9807_v22 = vpack.c.bf16 %v776_v19, %v772_v18 }
  0x1f   : > { %9796 = vmatprep.subr.bf16.mxu0 %v9795_v6  ;;  %v782_v13 = vld [vmem:[%s10845_s30 + $0x68] sm:$0xff]  ;;  %v781_v17 = vld [vmem:[%s10845_s30 + $0x60] sm:$0xff]  ;;  %v775_v23 = vld [vmem:[%s10845_s30 + $0x30] sm:$0xff] }
  0x20   : > { %v9803_v15 = vpack.c.bf16 %v782_v13, %v778_v12  ;;  %9800 = vmatprep.subr.bf16.mxu1 %v9799_v10  ;;  %v9805_v20 = vpack.c.bf16 %v781_v17, %v777_v16  ;;  %v10865_v24 = vld [vmem:[%s10856_s5] sm:$0xff]  ;;  %v10868_v25 = vld [vmem:[%s10856_s5 + $0x8] sm:$0xff]  ;;  %v780_v26 = vld [vmem:[%s10845_s30 + $0x58] sm:$0xff]  ;;  %v9809_v30 = vpack.c.bf16 %v775_v23, %v771_v21 }
  0x21   : > { %9802 = vmatpush1.bf16.msra.mxu1 %v9801_v14  ;;  %v784_v27 = vld [vmem:[%s10845_s30 + $0x78] sm:$0xff]  ;;  %9523 = vmatprep.mubr.msk.f32.mxu0 %vm796_vm0, %v10865_v24  ;;  %v10875_v28 = vld [vmem:[%s10856_s5 + $0x10] sm:$0xff]  ;;  %v10890_v35 = vld [vmem:[%s10856_s5 + $0x20] sm:$0xff]  ;;  %v1568_v56 = vpack.c.bf16 %v10868_v25, %v10865_v24 }
  0x22   : > { %9798 = vmatpush3.bf16.msra.mxu0 %v9795_v6  ;;  %9804 = vmatprep.subr.bf16.mxu1 %v9803_v15  ;;  %v1374_v29 = vld [vmem:[%s15138_s25] sm:$0xff]  ;;  %v10885_v31 = vld [vmem:[%s10856_s5 + $0x18] sm:$0xff]  ;;  %v9811_v32 = vpack.c.bf16 %v784_v27, %v780_v26  ;;  %v779_v33 = vld [vmem:[%s10845_s30 + $0x50] sm:$0xff] }
  0x23   : > { %v783_v34 = vld [vmem:[%s10845_s30 + $0x70] sm:$0xff]  ;;  %v1375_v36 = vld [vmem:[%s15138_s25 + $0x8] sm:$0xff]  ;;  %v9932_v39 = vld [vmem:[%s15139_s23] sm:$0xff]   ;;  %v1569_v58 = vpack.c.bf16 %v10885_v31, %v10875_v28 }
  0x24   : > { %v9813_v37 = vpack.c.bf16 %v783_v34, %v779_v33  ;;  %v710_v38 = vld [vmem:[%s10856_s5 + $0x28] sm:$0xff]  ;;  %v10906_v40 = vld [vmem:[%s10856_s5 + $0x30] sm:$0xff]  ;;  %v712_v42 = vld [vmem:[%s10856_s5 + $0x38] sm:$0xff] }
  0x25   : > { %9524 = vmatmul.mubr.msk.f32.vlgmr.msra.gmra.mrb[0].mxu0 %vm796_vm0, %v10868_v25  ;;  %9806 = vmatpush1.bf16.msra.mxu1 %v9805_v20  ;;  %v1376_v41 = vld [vmem:[%s15138_s25 + $0x10] sm:$0xff]  ;;  %v713_v43 = vld [vmem:[%s10856_s5 + $0x40] sm:$0xff]  ;;  %v1377_v44 = vld [vmem:[%s15138_s25 + $0x18] sm:$0xff]  ;;  %v1570_v59 = vpack.c.bf16 %v710_v38, %v10890_v35  ;;  %v1571_v63 = vpack.c.bf16 %v712_v42, %v10906_v40 }
  0x26   : > { %9526 = vmatprep.mubr.msk.f32.mxu0 %vm796_vm0, %v10875_v28  ;;  %9808 = vmatprep.subr.bf16.mxu1 %v9807_v22  ;;  %v714_v45 = vld [vmem:[%s10856_s5 + $0x48] sm:$0xff]  ;;  %v10927_v46 = vld [vmem:[%s10856_s5 + $0x50] sm:$0xff]  ;;  %v716_v47 = vld [vmem:[%s10856_s5 + $0x58] sm:$0xff] }
  0x27   : > { %v9933_v48 = vld [vmem:[%s15139_s23 + $0x8] sm:$0xff]   ;;  %v717_v49 = vld [vmem:[%s10856_s5 + $0x60] sm:$0xff]  ;;  %v719_v51 = vld [vmem:[%s10856_s5 + $0x70] sm:$0xff]  ;;  %v1572_v1 = vpack.c.bf16 %v714_v45, %v713_v43  ;;  %v1573_v6 = vpack.c.bf16 %v716_v47, %v10927_v46 }
  0x28   : > { %8328 = vmatmul.mubr.msk.f32.vlgmr.msra.gmra.mrb[0].mxu1 %vm796_vm0, %v1374_v29  ;;  %v718_v50 = vld [vmem:[%s10856_s5 + $0x68] sm:$0xff]  ;;  %v720_v52 = vld [vmem:[%s10856_s5 + $0x78] sm:$0xff]  ;;  %v721_v53 = vld [vmem:[%s10856_s5 + $0x80] sm:$0xff] }
  0x29   : > { %9527 = vmatmul.mubr.msk.f32.gmra.mrb[2].mxu0 %vm796_vm0, %v10885_v31  ;;  %1460 = vmatprep.mubr.f32.mxu1 %v15024_v0  ;;  %v722_v54 = vld [vmem:[%s10856_s5 + $0x88] sm:$0xff]  ;;  %v723_v55 = vld [vmem:[%s10856_s5 + $0x90] sm:$0xff]  ;;  %v724_v57 = vld [vmem:[%s10856_s5 + $0x98] sm:$0xff]  ;;  %v1574_v7 = vpack.c.bf16 %v718_v50, %v717_v49  ;;  %v1575_v12 = vpack.c.bf16 %v720_v52, %v719_v51 }
  0x2a   : > { %9810 = vmatpush1.bf16.msra.mxu1 %v9809_v30  ;;  %9529 = vmatprep.mubr.msk.f32.mxu0 %vm796_vm0, %v10890_v35  ;;  %v725_v60 = vld [vmem:[%s10856_s5 + $0xa0] sm:$0xff]  ;;  %v726_v61 = vld [vmem:[%s10856_s5 + $0xa8] sm:$0xff]  ;;  %v727_v62 = vld [vmem:[%s10856_s5 + $0xb0] sm:$0xff]  ;;  %v1576_v13 = vpack.c.bf16 %v722_v54, %v721_v53  ;;  %v1577_v18 = vpack.c.bf16 %v724_v57, %v723_v55 }
  0x2b   : > { %9812 = vmatprep.subr.bf16.mxu1 %v9811_v32  ;;  %v728_v2 = vld [vmem:[%s10856_s5 + $0xb8] sm:$0xff]  ;;  %v729_v3 = vld [vmem:[%s10856_s5 + $0xc0] sm:$0xff]  ;;  %v730_v4 = vld [vmem:[%s10856_s5 + $0xc8] sm:$0xff]  ;;  %v1578_v19 = vpack.c.bf16 %v726_v61, %v725_v60 }
  0x2c   : > { %8329 = vmatmul.mubr.msk.f32.gmra.mrb[2].mxu1 %vm796_vm0, %v1375_v36  ;;  %v10985_v5 = vld [vmem:[%s10856_s5 + $0xd0] sm:$0xff]  ;;  %v732_v8 = vld [vmem:[%s10856_s5 + $0xd8] sm:$0xff]  ;;  %v733_v9 = vld [vmem:[%s10856_s5 + $0xe0] sm:$0xff]  ;;  %v1579_v24 = vpack.c.bf16 %v728_v2, %v727_v62  ;;  %v1580_v25 = vpack.c.bf16 %v730_v4, %v729_v3 }
  0x2d   : > { %9530 = vmatmul.mubr.msk.f32.gmra.mrb[4].mxu0 %vm796_vm0, %v710_v38  ;;  %1466 = vmatprep.mubr.f32.mxu1 %v15024_v0  ;;  %v734_v10 = vld [vmem:[%s10856_s5 + $0xe8] sm:$0xff]  ;;  %v10999_v11 = vld [vmem:[%s10856_s5 + $0xf0] sm:$0xff]  ;;  %v736_v14 = vld [vmem:[%s10856_s5 + $0xf8] sm:$0xff]  ;;  %v1581_v32 = vpack.c.bf16 %v732_v8, %v10985_v5 }
  0x2e   : > { %9814 = vmatpush1.bf16.msra.mxu1 %v9813_v37  ;;  %9532 = vmatprep.mubr.msk.f32.mxu0 %vm796_vm0, %v10906_v40  ;;  %v737_v15 = vld [vmem:[%s10856_s5 + $0x100] sm:$0xff]  ;;  %v738_v16 = vld [vmem:[%s10856_s5 + $0x108] sm:$0xff]  ;;  %v11012_v17 = vld [vmem:[%s10856_s5 + $0x110] sm:$0xff]  ;;  %v1582_v34 = vpack.c.bf16 %v734_v10, %v733_v9 }
  0x2f   : > { %9619 = vmatprep.subr.bf16.mxu1 %v9932_v39  ;;  %v740_v20 = vld [vmem:[%s10856_s5 + $0x118] sm:$0xff]  ;;  %v741_v21 = vld [vmem:[%s10856_s5 + $0x120] sm:$0xff]  ;;  %v742_v22 = vld [vmem:[%s10856_s5 + $0x128] sm:$0xff] }
  0x30   : > { %8330 = vmatmul.mubr.msk.f32.gmra.mrb[4].mxu1 %vm796_vm0, %v1376_v41  ;;  %v11025_v23 = vld [vmem:[%s10856_s5 + $0x130] sm:$0xff]  ;;  %v744_v26 = vld [vmem:[%s10856_s5 + $0x138] sm:$0xff]  ;;  %v745_v27 = vld [vmem:[%s10856_s5 + $0x140] sm:$0xff] }
  0x31   : > { %9533 = vmatmul.mubr.msk.f32.gmra.mrb[6].mxu0 %vm796_vm0, %v712_v42  ;;  %1472 = vmatprep.mubr.f32.mxu1 %v15024_v0  ;;  %v746_v28 = vld [vmem:[%s10856_s5 + $0x148] sm:$0xff]  ;;  %v11043_v30 = vld [vmem:[%s15005_s8] sm:$0xff]  ;;  %v748_v35 = vld [vmem:[%s10856_s5 + $0x158] sm:$0xff]  ;;  %v1583_v42 = vpack.c.bf16 %v736_v14, %v10999_v11 }
  0x32   : > { %9535 = vmatprep.mubr.msk.f32.mxu0 %vm796_vm0, %v713_v43  ;;  %v11048_v31 = vld [vmem:[%s15005_s8 + $0x8] sm:$0xff]  ;;  %v11061_v37 = vld [vmem:[%s15005_s8 + $0x10] sm:$0xff]  ;;  %v11066_v38 = vld [vmem:[%s15005_s8 + $0x18] sm:$0xff]  ;;  %v1584_v43 = vpack.c.bf16 %v738_v16, %v737_v15 }
  0x33   : > { %v9815_v33 = vpack.c.bf16 %v11048_v31, %v11043_v30  ;;  %v750_v40 = vld [vmem:[%s10856_s5 + $0x168] sm:$0xff] }
  0x34   : > { %8331 = vmatmul.mubr.msk.f32.gmra.mrb[6].mxu1 %vm796_vm0, %v1377_v44 }
  0x35   : > { %9536 = vmatmul.mubr.msk.f32.gmra.mrb[8].mxu0 %vm796_vm0, %v714_v45  ;;  %1543 = vmatprep.mubr.f32.mxu1 %v15024_v0  ;;  %v753_v45 = vld [vmem:[%s10856_s5 + $0x180] sm:$0xff] }
  0x36   : > { %9538 = vmatprep.mubr.msk.f32.mxu0 %vm796_vm0, %v10927_v46  ;;  %9816 = vmatprep.subr.bf16.mxu0 %v9815_v33  ;;  %v754_v46 = vld [vmem:[%s10856_s5 + $0x188] sm:$0xff] }
  0x37   : > { %9818 = vmatpush3.bf16.msra.mxu0 %v9815_v33 }
  0x38   : > { %8332 = vmatmul.mubr.msk.f32.vlgmr.msra.gmra.mrb[8].mxu1 %vm796_vm0, %v1374_v29  ;;  %v11038_v29 = vld [vmem:[%s10856_s5 + $0x150] sm:$0xff] }
  0x39   : > { %9539 = vmatmul.mubr.msk.f32.gmra.mrb[10].mxu0 %vm796_vm0, %v716_v47  ;;  %1549 = vmatprep.mubr.f32.mxu1 %v15024_v0  ;;  %v755_v47 = vld [vmem:[%s10856_s5 + $0x190] sm:$0xff] }
  0x3a   : > { %9620 = vmatpush3.bf16.msra.mxu1 %v9932_v39  ;;  %9541 = vmatprep.mubr.msk.f32.mxu0 %vm796_vm0, %v717_v49  ;;  %v9819_v39 = vpack.c.bf16 %v11066_v38, %v11061_v37  ;;  %v1586_v49 = vpack.c.bf16 %v742_v22, %v741_v21 }
  0x3b   : > { %9621 = vmatprep.subr.bf16.mxu1 %v9933_v48 }
  0x3c   : > { %8333 = vmatmul.mubr.msk.f32.gmra.mrb[10].mxu1 %vm796_vm0, %v1375_v36  ;;  %v749_v36 = vld [vmem:[%s10856_s5 + $0x160] sm:$0xff]  ;;  %9820 = vmatprep.subr.bf16.mxu0 %v9819_v39 }
  0x3d   : > { %9542 = vmatmul.mubr.msk.f32.gmra.mrb[12].mxu0 %vm796_vm0, %v718_v50  ;;  %1555 = vmatprep.mubr.f32.mxu1 %v15024_v0  ;;  %v756_v50 = vld [vmem:[%s10856_s5 + $0x198] sm:$0xff] }
  0x3e   : > { %9622 = vmatpush3.bf16.msra.mxu1 %v9933_v48  ;;  %9544 = vmatprep.mubr.msk.f32.mxu0 %vm796_vm0, %v719_v51  ;;  %v1585_v48 = vpack.c.bf16 %v740_v20, %v11012_v17  ;;  %v757_v51 = vld [vmem:[%s10856_s5 + $0x1a0] sm:$0xff] }
  0x3f   : > { %9822 = vmatpush3.bf16.msra.mxu0 %v9819_v39 }
  0x40   : > { %8334 = vmatmul.mubr.msk.f32.gmra.mrb[12].mxu1 %vm796_vm0, %v1376_v41  ;;  %v751_v41 = vld [vmem:[%s10856_s5 + $0x170] sm:$0xff] }
  0x41   : > { %9545 = vmatmul.mubr.msk.f32.gmra.mrb[14].mxu0 %vm796_vm0, %v720_v52  ;;  %1561 = vmatprep.mubr.f32.mxu1 %v15024_v0  ;;  %v758_v52 = vld [vmem:[%s10856_s5 + $0x1a8] sm:$0xff] }
  0x42   : > { %9547 = vmatprep.mubr.msk.f32.mxu0 %vm796_vm0, %v721_v53  ;;  %v759_v53 = vld [vmem:[%s10856_s5 + $0x1b0] sm:$0xff] }
  0x44   : > { %8335 = vmatmul.mubr.msk.f32.gmra.mrb[14].mxu1 %vm796_vm0, %v1377_v44  ;;  %v752_v44 = vld [vmem:[%s10856_s5 + $0x178] sm:$0xff] }
  0x45   : > { %9548 = vmatmul.mubr.msk.f32.gmra.mrb[16].mxu0 %vm796_vm0, %v722_v54  ;;  %9623 = vmatprep.mubr.msk.bf16.mxu1 %vm796_vm0, %v1568_v56  ;;  %v1587_v54 = vpack.c.bf16 %v744_v26, %v11025_v23  ;;  %v760_v56 = vld [vmem:[%s10856_s5 + $0x1b8] sm:$0xff] }
  0x46   : > { %9550 = vmatprep.mubr.msk.f32.mxu0 %vm796_vm0, %v723_v55  ;;  %v1588_v55 = vpack.c.bf16 %v746_v28, %v745_v27 }
  0x48   : > { %9624 = vmatmul.mubr.msk.bf16.vlgmr.msra.gmra.mrb[16].mxu1 %vm796_vm0, %v1569_v58  ;;  %v762_v58 = vld [vmem:[%s10856_s5 + $0x1c8] sm:$0xff] }
  0x49   : > { %9551 = vmatmul.mubr.msk.f32.gmra.mrb[18].mxu0 %vm796_vm0, %v724_v57  ;;  %9627 = vmatprep.mubr.msk.bf16.mxu1 %vm796_vm0, %v1570_v59  ;;  %v761_v57 = vld [vmem:[%s10856_s5 + $0x1c0] sm:$0xff]  ;;  %v763_v59 = vld [vmem:[%s10856_s5 + $0x1d0] sm:$0xff] }
  0x4a   : > { %9553 = vmatprep.mubr.msk.f32.mxu0 %vm796_vm0, %v725_v60  ;;  %v1589_v60 = vpack.c.bf16 %v748_v35, %v11038_v29 }
  0x4d   : > { %9554 = vmatmul.mubr.msk.f32.gmra.mrb[20].mxu0 %vm796_vm0, %v726_v61  ;;  %v1590_v61 = vpack.c.bf16 %v750_v40, %v749_v36 }
  0x4e   : > { %9556 = vmatprep.mubr.msk.f32.mxu0 %vm796_vm0, %v727_v62  ;;  %v764_v62 = vld [vmem:[%s10856_s5 + $0x1d8] sm:$0xff] }
  0x50   : > { %9628 = vmatmul.mubr.msk.bf16.gmra.mrb[20].mxu1 %vm796_vm0, %v1571_v63  ;;  %v765_v63 = vld [vmem:[%s10856_s5 + $0x1e0] sm:$0xff] }
  0x51   : > { %9557 = vmatmul.mubr.msk.f32.gmra.mrb[22].mxu0 %vm796_vm0, %v728_v2  ;;  %9631 = vmatprep.mubr.msk.bf16.mxu1 %vm796_vm0, %v1572_v1  ;;  %v766_v1 = vld [vmem:[%s10856_s5 + $0x1e8] sm:$0xff]  ;;  %v767_v2 = vld [vmem:[%s10856_s5 + $0x1f0] sm:$0xff] }
  0x52   : > { %9559 = vmatprep.mubr.msk.f32.mxu0 %vm796_vm0, %v729_v3  ;;  %v1591_v3 = vpack.c.bf16 %v752_v44, %v751_v41 }
  0x55   : > { %9560 = vmatmul.mubr.msk.f32.gmra.mrb[24].mxu0 %vm796_vm0, %v730_v4  ;;  %v1592_v4 = vpack.c.bf16 %v754_v46, %v753_v45 }
  0x56   : > { %9562 = vmatprep.mubr.msk.f32.mxu0 %vm796_vm0, %v10985_v5  ;;  %v768_v5 = vld [vmem:[%s10856_s5 + $0x1f8] sm:$0xff]  ;;  %s15304_s5 = smov 64  }
  0x58   : > { %9632 = vmatmul.mubr.msk.bf16.gmra.mrb[24].mxu1 %vm796_vm0, %v1573_v6  ;;  %v1593_v6 = vpack.c.bf16 %v756_v50, %v755_v47 }
  0x59   : > { %9563 = vmatmul.mubr.msk.f32.gmra.mrb[26].mxu0 %vm796_vm0, %v732_v8  ;;  %9635 = vmatprep.mubr.msk.bf16.mxu1 %vm796_vm0, %v1574_v7  ;;  %v1594_v7 = vpack.c.bf16 %v758_v52, %v757_v51  ;;  %v1595_v8 = vpack.c.bf16 %v760_v56, %v759_v53 }
  0x5a   : > { %9565 = vmatprep.mubr.msk.f32.mxu0 %vm796_vm0, %v733_v9  ;;  %v1596_v9 = vpack.c.bf16 %v762_v58, %v761_v57 }
  0x5d   : > { %9566 = vmatmul.mubr.msk.f32.gmra.mrb[28].mxu0 %vm796_vm0, %v734_v10  ;;  %v1597_v10 = vpack.c.bf16 %v764_v62, %v763_v59 }
  0x5e   : > { %9568 = vmatprep.mubr.msk.f32.mxu0 %vm796_vm0, %v10999_v11  ;;  %v1598_v11 = vpack.c.bf16 %v766_v1, %v765_v63 }
  0x60   : > { %9636 = vmatmul.mubr.msk.bf16.gmra.mrb[28].mxu1 %vm796_vm0, %v1575_v12  ;;  %v1599_v12 = vpack.c.bf16 %v768_v5, %v767_v2 }
  0x61   : > { %9569 = vmatmul.mubr.msk.f32.gmra.mrb[30].mxu0 %vm796_vm0, %v736_v14  ;;  %9639 = vmatprep.mubr.msk.bf16.mxu1 %vm796_vm0, %v1576_v13  ;;  %v11137_v13 = vld [vmem:[%s15140_s24] ss:$0 sm:$0xff] }
  0x62   : > { %9571 = vmatprep.mubr.msk.f32.mxu0 %vm796_vm0, %v737_v15 }
  0x65   : > { %9572 = vmatmul.mubr.msk.f32.gmra.mrb[32].mxu0 %vm796_vm0, %v738_v16 }
  0x66   : > { %9574 = vmatprep.mubr.msk.f32.mxu0 %vm796_vm0, %v11012_v17 }
  0x68   : > { %9640 = vmatmul.mubr.msk.bf16.gmra.mrb[32].mxu1 %vm796_vm0, %v1577_v18 }
  0x69   : > { %9575 = vmatmul.mubr.msk.f32.gmra.mrb[34].mxu0 %vm796_vm0, %v740_v20  ;;  %9643 = vmatprep.mubr.msk.bf16.mxu1 %vm796_vm0, %v1578_v19 }
  0x6a   : > { %9577 = vmatprep.mubr.msk.f32.mxu0 %vm796_vm0, %v741_v21 }
  0x6d   : > { %9578 = vmatmul.mubr.msk.f32.gmra.mrb[36].mxu0 %vm796_vm0, %v742_v22 }
  0x6e   : > { %9580 = vmatprep.mubr.msk.f32.mxu0 %vm796_vm0, %v11025_v23 }
  0x70   : > { %9644 = vmatmul.mubr.msk.bf16.gmra.mrb[36].mxu1 %vm796_vm0, %v1579_v24 }
  0x71   : > { %9581 = vmatmul.mubr.msk.f32.gmra.mrb[38].mxu0 %vm796_vm0, %v744_v26  ;;  %9647 = vmatprep.mubr.msk.bf16.mxu1 %vm796_vm0, %v1580_v25 }
  0x72   : > { %9583 = vmatprep.mubr.msk.f32.mxu0 %vm796_vm0, %v745_v27 }
  0x75   : > { %9584 = vmatmul.mubr.msk.f32.gmra.mrb[40].mxu0 %vm796_vm0, %v746_v28 }
  0x76   : > { %9586 = vmatprep.mubr.msk.f32.mxu0 %vm796_vm0, %v11038_v29 }
  0x78   : > { %9648 = vmatmul.mubr.msk.bf16.gmra.mrb[40].mxu1 %vm796_vm0, %v1581_v32 }
  0x79   : > { %9587 = vmatmul.mubr.msk.f32.gmra.mrb[42].mxu0 %vm796_vm0, %v748_v35  ;;  %9651 = vmatprep.mubr.msk.bf16.mxu1 %vm796_vm0, %v1582_v34 }
  0x7a   : > { %9589 = vmatprep.mubr.msk.f32.mxu0 %vm796_vm0, %v749_v36 }
  0x7d   : > { %9590 = vmatmul.mubr.msk.f32.gmra.mrb[44].mxu0 %vm796_vm0, %v750_v40 }
  0x7e   : > { %9592 = vmatprep.mubr.msk.f32.mxu0 %vm796_vm0, %v751_v41 }
  0x80   : > { %9652 = vmatmul.mubr.msk.bf16.gmra.mrb[44].mxu1 %vm796_vm0, %v1583_v42 }
  0x81   : > { %9593 = vmatmul.mubr.msk.f32.gmra.mrb[46].mxu0 %vm796_vm0, %v752_v44  ;;  %9655 = vmatprep.mubr.msk.bf16.mxu1 %vm796_vm0, %v1584_v43 }
  0x82   : > { %9595 = vmatprep.mubr.msk.f32.mxu0 %vm796_vm0, %v753_v45 }
  0x85   : > { %9596 = vmatmul.mubr.msk.f32.gmra.mrb[48].mxu0 %vm796_vm0, %v754_v46 }
  0x86   : > { %9598 = vmatprep.mubr.msk.f32.mxu0 %vm796_vm0, %v755_v47 }
  0x88   : > { %9656 = vmatmul.mubr.msk.bf16.gmra.mrb[48].mxu1 %vm796_vm0, %v1585_v48 }
  0x89   : > { %9599 = vmatmul.mubr.msk.f32.gmra.mrb[50].mxu0 %vm796_vm0, %v756_v50  ;;  %9659 = vmatprep.mubr.msk.bf16.mxu1 %vm796_vm0, %v1586_v49 }
  0x8a   : > { %9601 = vmatprep.mubr.msk.f32.mxu0 %vm796_vm0, %v757_v51 }
  0x8d   : > { %9602 = vmatmul.mubr.msk.f32.gmra.mrb[52].mxu0 %vm796_vm0, %v758_v52 }
  0x8e   : > { %9604 = vmatprep.mubr.msk.f32.mxu0 %vm796_vm0, %v759_v53 }
  0x90   : > { %9660 = vmatmul.mubr.msk.bf16.gmra.mrb[52].mxu1 %vm796_vm0, %v1587_v54 }
  0x91   : > { %9605 = vmatmul.mubr.msk.f32.gmra.mrb[54].mxu0 %vm796_vm0, %v760_v56  ;;  %9663 = vmatprep.mubr.msk.bf16.mxu1 %vm796_vm0, %v1588_v55 }
  0x92   : > { %9607 = vmatprep.mubr.msk.f32.mxu0 %vm796_vm0, %v761_v57 }
  0x95   : > { %9608 = vmatmul.mubr.msk.f32.gmra.mrb[56].mxu0 %vm796_vm0, %v762_v58 }
  0x96   : > { %9610 = vmatprep.mubr.msk.f32.mxu0 %vm796_vm0, %v763_v59 }
  0x98   : > { %9664 = vmatmul.mubr.msk.bf16.gmra.mrb[56].mxu1 %vm796_vm0, %v1589_v60 }
  0x99   : > { %9611 = vmatmul.mubr.msk.f32.gmra.mrb[58].mxu0 %vm796_vm0, %v764_v62  ;;  %9667 = vmatprep.mubr.msk.bf16.mxu1 %vm796_vm0, %v1590_v61 }
  0x9a   : > { %9613 = vmatprep.mubr.msk.f32.mxu0 %vm796_vm0, %v765_v63 }
  0x9d   : > { %9614 = vmatmul.mubr.msk.f32.gmra.mrb[60].mxu0 %vm796_vm0, %v766_v1 }
  0x9e   : > { %9616 = vmatprep.mubr.msk.f32.mxu0 %vm796_vm0, %v767_v2 }
  0xa0   : > { %9668 = vmatmul.mubr.msk.bf16.gmra.mrb[60].mxu1 %vm796_vm0, %v1591_v3 }
  0xa1   : > { %9617 = vmatmul.mubr.msk.f32.gmra.mrb[62].mxu0 %vm796_vm0, %v768_v5  ;;  %9671 = vmatprep.mubr.msk.bf16.mxu1 %vm796_vm0, %v1592_v4 }
  0xa8   : > { %9672 = vmatmul.mubr.msk.bf16.gmra.mrb[64].mxu1 %vm796_vm0, %v1593_v6 }
  0xa9   : > { %9675 = vmatprep.mubr.msk.bf16.mxu1 %vm796_vm0, %v1594_v7 }
  0xb0   : > { %9676 = vmatmul.mubr.msk.bf16.gmra.mrb[68].mxu1 %vm796_vm0, %v1595_v8 }
  0xb1   : > { %9679 = vmatprep.mubr.msk.bf16.mxu1 %vm796_vm0, %v1596_v9 }
  0xb8   : > { %9680 = vmatmul.mubr.msk.bf16.gmra.mrb[72].mxu1 %vm796_vm0, %v1597_v10 }
  0xb9   : > { %9683 = vmatprep.mubr.msk.bf16.mxu1 %vm796_vm0, %v1598_v11 }
  0xc0   : > { %9684 = vmatmul.mubr.msk.bf16.gmra.mrb[76].mxu1 %vm796_vm0, %v1599_v12 }
  0xc1   : > { %3040 = vmatprep.mubr.f32.mxu1 %v15024_v0 }
  0xf8   : > { %v9525_v14 = vpop.f32.mrb[0].mxu0 }
  0xf9   : > { %v11140_v15 = vadd.f32 %v9525_v14, %v11137_v13  ;;  %v1055_v16 = vpop.f32.mrb[1].mxu0 }
  0xfa   : > { %v11143_v17 = vadd.f32 %v11137_v13, %v1055_v16 }
  0xfb   : > { %v2045_v18 = vmul.f32 %v11140_v15, %v11140_v15  ;;  %v11147_v19 = vpop.f32.mrb[0].mxu1 }
  0xfc   : > { %v2044_v20 = vmul.f32 %v11143_v17, %v11143_v17  ;;  %v9528_v21 = vpop.f32.mrb[2].mxu0  ;;  %v11151_v22 = vpop.f32.mrb[1].mxu1  ;;  %v2948_v32 = vmul.f32 %v11147_v19, %v11147_v19 }
  0xfd   : > { %v11154_v23 = vadd.f32 %v9528_v21, %v11137_v13  ;;  %v1065_v24 = vpop.f32.mrb[3].mxu0  ;;  %v2949_v39 = vmul.f32 %v11151_v22, %v11151_v22 }
  0xfe   : > { %9695 = vmatprep.mubr.msk.f32.mxu0 %vm796_vm0, %v2044_v20  ;;  %v11158_v25 = vadd.f32 %v11137_v13, %v1065_v24 }
  0xff   : > { %9696 = vmatmul.mubr.msk.f32.vlgmr.msra.gmra.mrb[64].mxu0 %vm796_vm0, %v2045_v18  ;;  %v2047_v26 = vmul.f32 %v11154_v23, %v11154_v23  ;;  %v11163_v27 = vpop.f32.mrb[2].mxu1 }
 0x100   : > { %v2046_v28 = vmul.f32 %v11158_v25, %v11158_v25  ;;  %v9531_v29 = vpop.f32.mrb[4].mxu0  ;;  %v2952_v33 = vmul.f32 %v11163_v27, %v11163_v27  ;;  %v11171_v34 = vpop.f32.mrb[3].mxu1 }
 0x101   : > { %v11174_v35 = vadd.f32 %v9531_v29, %v11137_v13  ;;  %v1075_v36 = vpop.f32.mrb[5].mxu0  ;;  %v2953_v40 = vmul.f32 %v11171_v34, %v11171_v34 }
 0x102   : > { %9698 = vmatprep.mubr.msk.f32.mxu0 %vm796_vm0, %v2046_v28  ;;  %v11182_v41 = vadd.f32 %v11137_v13, %v1075_v36  ;;  %v9825_v42 = vpack.c.bf16 %v2952_v33, %v2948_v32 }
 0x103   : > { %9699 = vmatmul.mubr.msk.f32.gmra.mrb[66].mxu0 %vm796_vm0, %v2047_v26  ;;  %v2049_v43 = vmul.f32 %v11174_v35, %v11174_v35  ;;  %v11187_v44 = vpop.f32.mrb[4].mxu1  ;;  %v9823_v45 = vpack.c.bf16 %v2953_v40, %v2949_v39 }
 0x104   : > { %v2048_v46 = vmul.f32 %v11182_v41, %v11182_v41  ;;  %v9534_v47 = vpop.f32.mrb[6].mxu0  ;;  %v11191_v48 = vpop.f32.mrb[5].mxu1  ;;  %v2956_v56 = vmul.f32 %v11187_v44, %v11187_v44 }
 0x105   : > { %v11194_v49 = vadd.f32 %v9534_v47, %v11137_v13  ;;  %v1085_v50 = vpop.f32.mrb[7].mxu0  ;;  %9824 = vmatprep.subr.bf16.mxu1 %v9823_v45  ;;  %v2957_v61 = vmul.f32 %v11191_v48, %v11191_v48 }
 0x106   : > { %9701 = vmatprep.mubr.msk.f32.mxu0 %vm796_vm0, %v2048_v46  ;;  %v11198_v51 = vadd.f32 %v11137_v13, %v1085_v50  ;;  %9826 = vmatpush1.bf16.msra.mxu1 %v9825_v42 }
 0x107   : > { %9702 = vmatmul.mubr.msk.f32.gmra.mrb[68].mxu0 %vm796_vm0, %v2049_v43  ;;  %v2051_v52 = vmul.f32 %v11194_v49, %v11194_v49  ;;  %v11203_v53 = vpop.f32.mrb[6].mxu1 }
 0x108   : > { %v2050_v54 = vmul.f32 %v11198_v51, %v11198_v51  ;;  %v9537_v55 = vpop.f32.mrb[8].mxu0  ;;  %v2960_v57 = vmul.f32 %v11203_v53, %v11203_v53  ;;  %v11211_v58 = vpop.f32.mrb[7].mxu1 }
 0x109   : > { %v11214_v59 = vadd.f32 %v9537_v55, %v11137_v13  ;;  %v1095_v60 = vpop.f32.mrb[9].mxu0  ;;  %v2961_v62 = vmul.f32 %v11211_v58, %v11211_v58 }
 0x10a   : > { %9704 = vmatprep.mubr.msk.f32.mxu0 %vm796_vm0, %v2050_v54  ;;  %v11222_v63 = vadd.f32 %v11137_v13, %v1095_v60  ;;  %v9829_v1 = vpack.c.bf16 %v2960_v57, %v2956_v56 }
 0x10b   : > { %15141 = vst [vmem:[#allocation3_spill] sm:$0xff] %v11214_v59  ;;  %9705 = vmatmul.mubr.msk.f32.gmra.mrb[70].mxu0 %vm796_vm0, %v2051_v52  ;;  %v2053_v2 = vmul.f32 %v11214_v59, %v11214_v59  ;;  %v9827_v3 = vpack.c.bf16 %v2961_v62, %v2957_v61  ;;  %v11227_v4 = vpop.f32.mrb[8].mxu1 }
 0x10c   : > { %15142 = vst [vmem:[#allocation4_spill] sm:$0xff] %v11222_v63  ;;  %v2052_v5 = vmul.f32 %v11222_v63, %v11222_v63  ;;  %v9540_v6 = vpop.f32.mrb[10].mxu0  ;;  %v11231_v7 = vpop.f32.mrb[9].mxu1  ;;  %v2950_v11 = vmul.f32 %v11227_v4, %v11227_v4 }
 0x10d   : > { %v11234_v8 = vadd.f32 %v9540_v6, %v11137_v13  ;;  %v1105_v9 = vpop.f32.mrb[11].mxu0  ;;  %9828 = vmatprep.subr.bf16.mxu1 %v9827_v3  ;;  %v2951_v14 = vmul.f32 %v11231_v7, %v11231_v7 }
 0x10e   : > { %v11237_v10 = vadd.f32 %v11137_v13, %v1105_v9  ;;  %9707 = vmatprep.mubr.msk.f32.mxu0 %vm796_vm0, %v2052_v5  ;;  %9830 = vmatpush1.bf16.msra.mxu1 %v9829_v1  ;;  %v11316_v9 = vld [vmem:[%s15004_s7] ss:$0 sm:$0xff] }
 0x10f   : > { %15143 = vst [vmem:[#allocation5_spill] sm:$0xff] %v11234_v8  ;;  %v2055_v12 = vmul.f32 %v11234_v8, %v11234_v8  ;;  %9708 = vmatmul.mubr.msk.f32.gmra.mrb[72].mxu0 %vm796_vm0, %v2053_v2  ;;  %v11247_v16 = vpop.f32.mrb[10].mxu1 }
 0x110   : > { %15144 = vst [vmem:[#allocation6_spill] sm:$0xff] %v11237_v10  ;;  %v2054_v18 = vmul.f32 %v11237_v10, %v11237_v10  ;;  %v9543_v20 = vpop.f32.mrb[12].mxu0  ;;  %v2954_v21 = vmul.f32 %v11247_v16, %v11247_v16  ;;  %v11253_v24 = vpop.f32.mrb[11].mxu1 }
 0x111   : > { %v11256_v26 = vadd.f32 %v9543_v20, %v11137_v13  ;;  %v1115_v28 = vpop.f32.mrb[13].mxu0  ;;  %8436 = vmatmul.mubr.msk.f32.vlgmr.msra.gmra.mrb[80].mxu1 %vm796_vm0, %v11043_v30  ;;  %v2955_v29 = vmul.f32 %v11253_v24, %v11253_v24 }
 0x112   : > { %v11263_v32 = vadd.f32 %v11137_v13, %v1115_v28  ;;  %9710 = vmatprep.mubr.msk.f32.mxu0 %vm796_vm0, %v2054_v18  ;;  %3046 = vmatprep.mubr.f32.mxu1 %v15024_v0  ;;  %v9833_v33 = vpack.c.bf16 %v2954_v21, %v2950_v11 }
 0x113   : > { %15145 = vst [vmem:[#allocation7_spill] sm:$0xff] %v11256_v26  ;;  %9711 = vmatmul.mubr.msk.f32.gmra.mrb[74].mxu0 %vm796_vm0, %v2055_v12  ;;  %v11268_v36 = vpop.f32.mrb[12].mxu1  ;;  %v9831_v39 = vpack.c.bf16 %v2955_v29, %v2951_v14  ;;  %v2057_v45 = vmul.f32 %v11256_v26, %v11256_v26 }
 0x114   : > { %15146 = vst [vmem:[#allocation8_spill] sm:$0xff] %v11263_v32  ;;  %v2056_v40 = vmul.f32 %v11263_v32, %v11263_v32  ;;  %v9546_v42 = vpop.f32.mrb[14].mxu0  ;;  %v11272_v43 = vpop.f32.mrb[13].mxu1  ;;  %v2958_v52 = vmul.f32 %v11268_v36, %v11268_v36 }
 0x115   : > { %v11277_v46 = vadd.f32 %v9546_v42, %v11137_v13  ;;  %v1125_v47 = vpop.f32.mrb[15].mxu0  ;;  %8437 = vmatmul.mubr.msk.f32.gmra.mrb[82].mxu1 %vm796_vm0, %v11048_v31  ;;  %9832 = vmatprep.subr.bf16.mxu1 %v9831_v39  ;;  %v2959_v54 = vmul.f32 %v11272_v43, %v11272_v43 }
 0x116   : > { %v11282_v50 = vadd.f32 %v11137_v13, %v1125_v47  ;;  %3052 = vmatprep.mubr.f32.mxu1 %v15024_v0  ;;  %9834 = vmatpush1.bf16.msra.mxu1 %v9833_v33 }
 0x117   : > { %15147 = vst [vmem:[#allocation9_spill] sm:$0xff] %v11277_v46  ;;  %v11289_v55 = vpop.f32.mrb[14].mxu1  ;;  %9713 = vmatprep.mubr.msk.f32.mxu0 %vm796_vm0, %v2056_v40  ;;  %v2059_v62 = vmul.f32 %v11277_v46, %v11277_v46 }
 0x118   : > { %15148 = vst [vmem:[#allocation10_spill] sm:$0xff] %v11282_v50  ;;  %v2058_v56 = vmul.f32 %v11282_v50, %v11282_v50  ;;  %v9549_v57 = vpop.f32.mrb[16].mxu0  ;;  %v2962_v60 = vmul.f32 %v11289_v55, %v11289_v55  ;;  %v11296_v61 = vpop.f32.mrb[15].mxu1  ;;  %9714 = vmatmul.mubr.msk.f32.gmra.mrb[76].mxu0 %vm796_vm0, %v2057_v45 }
 0x119   : > { %v11302_v1 = vadd.f32 %v9549_v57, %v11137_v13  ;;  %v1135_v2 = vpop.f32.mrb[17].mxu0  ;;  %v2963_v3 = vmul.f32 %v11296_v61, %v11296_v61  ;;  %8438 = vmatmul.mubr.msk.f32.gmra.mrb[84].mxu1 %vm796_vm0, %v11061_v37  ;;  %v11342_v57 = vld [vmem:[%s15008_s11 + $0x40] sm:$0xff]  }
 0x11a   : > { %v11309_v5 = vadd.f32 %v11137_v13, %v1135_v2  ;;  %9716 = vmatprep.mubr.msk.f32.mxu0 %vm796_vm0, %v2058_v56  ;;  %3058 = vmatprep.mubr.f32.mxu1 %v15024_v0  ;;  %v9837_v6 = vpack.c.bf16 %v2962_v60, %v2958_v52  ;;  %v9935_v60 = vld [vmem:[%s15008_s11] sm:$0xff]  }
 0x11b   : > { %15149 = vst [vmem:[#allocation11_spill] sm:$0xff] %v11302_v1  ;;  %v9835_v11 = vpack.c.bf16 %v2963_v3, %v2959_v54  ;;  %v9625_v18 = vpop.f32.mrb[16].mxu1  ;;  %v2061_v20 = vmul.f32 %v11302_v1, %v11302_v1 }
 0x11c   : > { %15150 = vst [vmem:[#allocation12_spill] sm:$0xff] %v11309_v5  ;;  %v2060_v12 = vmul.f32 %v11309_v5, %v11309_v5  ;;  %v9552_v14 = vpop.f32.mrb[18].mxu0  ;;  %9717 = vmatmul.mubr.msk.f32.gmra.mrb[78].mxu0 %vm796_vm0, %v2059_v62  ;;  %v1762_v29 = vadd.f32 %v9625_v18, %v11316_v9  ;;  %v1753_v33 = vpop.f32.mrb[17].mxu1 }
 0x11d   : > { %v11324_v21 = vadd.f32 %v9552_v14, %v11137_v13  ;;  %v1145_v28 = vpop.f32.mrb[19].mxu0  ;;  %8439 = vmatmul.mubr.msk.f32.gmra.mrb[86].mxu1 %vm796_vm0, %v11066_v38  ;;  %9836 = vmatprep.subr.bf16.mxu1 %v9835_v11  ;;  %v1754_v40 = vadd.f32 %v11316_v9, %v1753_v33  ;;  %v9626_v42 = vpop.f32.mrb[18].mxu1  ;;  %v9936_v11 = vld [vmem:[%s15008_s11 + $0x48] sm:$0xff]  }
 0x11e   : > { %v11330_v39 = vadd.f32 %v11137_v13, %v1145_v28  ;;  %9838 = vmatpush1.bf16.msra.mxu1 %v9837_v6  ;;  %3129 = vmatprep.mubr.f32.mxu1 %v15024_v0  ;;  %v1765_v45 = vadd.f32 %v9626_v42, %v11316_v9  ;;  %v1756_v47 = vpop.f32.mrb[19].mxu1 }
 0x11f   : > { %15151 = vst [vmem:[#allocation13_spill] sm:$0xff] %v11324_v21  ;;  %9719 = vmatprep.mubr.msk.f32.mxu0 %vm796_vm0, %v2060_v12  ;;  %v1757_v56 = vadd.f32 %v11316_v9, %v1756_v47  ;;  %v2063_v62 = vmul.f32 %v11324_v21, %v11324_v21 }
 0x120   : > { %15152 = vst [vmem:[#allocation14_spill] sm:$0xff] %v11330_v39  ;;  %v2062_v52 = vmul.f32 %v11330_v39, %v11330_v39  ;;  %v9555_v54 = vpop.f32.mrb[20].mxu0  ;;  %9720 = vmatmul.mubr.msk.f32.gmra.mrb[80].mxu0 %vm796_vm0, %v2061_v20  ;;  %v11353_v6 = vpack.c.bf16 %v1765_v45, %v1762_v29 }
 0x121   : > { %v11351_v2 = vadd.f32 %v9555_v54, %v11137_v13  ;;  %v1155_v3 = vpop.f32.mrb[21].mxu0  ;;  %8440 = vmatmul.mubr.msk.f32.vlgmr.msra.gmra.mrb[88].mxu1 %vm796_vm0, %v11043_v30  ;;  %v11364_v14 = vpack.c.bf16 %v1757_v56, %v1754_v40  ;;  %v9937_v30 = vld [vmem:[%s15008_s11 + $0x8] sm:$0xff]  }
 0x122   : > { %v11361_v12 = vadd.f32 %v11137_v13, %v1155_v3  ;;  %9722 = vmatprep.mubr.msk.f32.mxu0 %vm796_vm0, %v2062_v52  ;;  %3135 = vmatprep.mubr.f32.mxu1 %v15024_v0  ;;  %v3674_v54 = vmul.bf16 %v9936_v11, %v11353_v6 }
 0x123   : > { %15153 = vst [vmem:[#allocation15_spill] sm:$0xff] %v11351_v2  ;;  %v9629_v28 = vpop.f32.mrb[20].mxu1  ;;  %v3673_v29 = vmul.bf16 %v11342_v57, %v11364_v14  ;;  %v3665_v33 = vmul.bf16 %v9935_v60, %v11364_v14  ;;  %v2065_v40 = vmul.f32 %v11351_v2, %v11351_v2 }
 0x124   : > { %15154 = vst [vmem:[#allocation16_spill] sm:$0xff] %v11361_v12  ;;  %v2064_v18 = vmul.f32 %v11361_v12, %v11361_v12  ;;  %v9558_v20 = vpop.f32.mrb[22].mxu0  ;;  %9723 = vmatmul.mubr.msk.f32.gmra.mrb[82].mxu0 %vm796_vm0, %v2063_v62  ;;  %v1778_v47 = vadd.f32 %v9629_v28, %v11316_v9  ;;  %v1769_v52 = vpop.f32.mrb[21].mxu1 }
 0x125   : > { %v11379_v42 = vadd.f32 %v9558_v20, %v11137_v13  ;;  %v1165_v45 = vpop.f32.mrb[23].mxu0  ;;  %8441 = vmatmul.mubr.msk.f32.gmra.mrb[90].mxu1 %vm796_vm0, %v11048_v31  ;;  %v1770_v60 = vadd.f32 %v11316_v9, %v1769_v52  ;;  %v9630_v62 = vpop.f32.mrb[22].mxu1  ;;  %8875 = vmatprep.subr.bf16.mxu0 %v3673_v29  ;;  %v9939_v52 = vld [vmem:[%s15008_s11 + $0x10] sm:$0xff]  }
 0x126   : > { %v11386_v56 = vadd.f32 %v11137_v13, %v1165_v45  ;;  %9725 = vmatprep.mubr.msk.f32.mxu0 %vm796_vm0, %v2064_v18  ;;  %3141 = vmatprep.mubr.f32.mxu1 %v15024_v0  ;;  %v1781_v3 = vadd.f32 %v9630_v62, %v11316_v9  ;;  %v1772_v20 = vpop.f32.mrb[23].mxu1  ;;  %v3666_v45 = vmul.bf16 %v9937_v30, %v11353_v6  ;;  %v9938_v18 = vld [vmem:[%s15008_s11 + $0x50] sm:$0xff]   ;;  %v9940_v30 = vld [vmem:[%s15008_s11 + $0x58] sm:$0xff]  }
 0x127   : > { %15155 = vst [vmem:[#allocation17_spill] sm:$0xff] %v11379_v42  ;;  %v1773_v31 = vadd.f32 %v11316_v9, %v1772_v20  ;;  %8876 = vmatpush3.bf16.msra.mxu0 %v3665_v33  ;;  %v2067_v29 = vmul.f32 %v11379_v42, %v11379_v42 }
 0x128   : > { %15156 = vst [vmem:[#allocation18_spill] sm:$0xff] %v11386_v56  ;;  %v2066_v11 = vmul.f32 %v11386_v56, %v11386_v56  ;;  %v9561_v28 = vpop.f32.mrb[24].mxu0  ;;  %9726 = vmatmul.mubr.msk.f32.gmra.mrb[84].mxu0 %vm796_vm0, %v2065_v40  ;;  %v11408_v33 = vpack.c.bf16 %v1781_v3, %v1778_v47  ;;  %8877 = vmatprep.subr.bf16.mxu0 %v3674_v54 }
 0x129   : > { %v11406_v62 = vadd.f32 %v9561_v28, %v11137_v13  ;;  %v1175_v20 = vpop.f32.mrb[25].mxu0  ;;  %8442 = vmatmul.mubr.msk.f32.gmra.mrb[92].mxu1 %vm796_vm0, %v11061_v37  ;;  %v11419_v40 = vpack.c.bf16 %v1773_v31, %v1770_v60  ;;  %v15159_v28 = vmov 0.0   ;;  %v9941_v37 = vld [vmem:[%s15008_s11 + $0x18] sm:$0xff]   ;;  %v9942_v60 = vld [vmem:[%s15008_s11 + $0x60] sm:$0xff]  }
 0x12a   : > { %v11416_v0 = vadd.f32 %v11137_v13, %v1175_v20  ;;  %9728 = vmatprep.mubr.msk.f32.mxu0 %vm796_vm0, %v2066_v11  ;;  %3147 = vmatprep.mubr.f32.mxu1 %v15159_v28  ;;  %v3676_v20 = vmul.bf16 %v9940_v30, %v11408_v33 }
 0x12b   : > { %15157 = vst [vmem:[#allocation19_spill] sm:$0xff] %v11406_v62  ;;  %v9633_v3 = vpop.f32.mrb[24].mxu1  ;;  %8878 = vmatpush3.bf16.msra.mxu0 %v3666_v45  ;;  %v3675_v42 = vmul.bf16 %v9938_v18, %v11419_v40  ;;  %v3667_v56 = vmul.bf16 %v9939_v52, %v11419_v40  ;;  %v2069_v11 = vmul.f32 %v11406_v62, %v11406_v62 }
 0x12c   : > { %15158 = vst [vmem:[#allocation20_spill] sm:$0xff] %v11416_v0  ;;  %v2068_v47 = vmul.f32 %v11416_v0, %v11416_v0  ;;  %v9564_v54 = vpop.f32.mrb[26].mxu0  ;;  %9729 = vmatmul.mubr.msk.f32.gmra.mrb[86].mxu0 %vm796_vm0, %v2067_v29  ;;  %v1794_v18 = vadd.f32 %v9633_v3, %v11316_v9  ;;  %v1785_v52 = vpop.f32.mrb[25].mxu1 }
 0x12d   : > { %v11436_v31 = vadd.f32 %v9564_v54, %v11137_v13  ;;  %v1185_v45 = vpop.f32.mrb[27].mxu0  ;;  %8443 = vmatmul.mubr.msk.f32.gmra.mrb[94].mxu1 %vm796_vm0, %v11066_v38  ;;  %v1786_v62 = vadd.f32 %v11316_v9, %v1785_v52  ;;  %v9634_v29 = vpop.f32.mrb[26].mxu1  ;;  %8879 = vmatprep.subr.bf16.mxu0 %v3675_v42  ;;  %v9943_v52 = vld [vmem:[%s15008_s11 + $0x20] sm:$0xff]   ;;  %v9944_v42 = vld [vmem:[%s15008_s11 + $0x68] sm:$0xff]  }
 0x12e   : > { %v11443_v0 = vadd.f32 %v11137_v13, %v1185_v45  ;;  %9731 = vmatprep.mubr.msk.f32.mxu0 %vm796_vm0, %v2068_v47  ;;  %v1797_v54 = vadd.f32 %v9634_v29, %v11316_v9  ;;  %v1788_v2 = vpop.f32.mrb[27].mxu1  ;;  %3375 = vmatprep.mubr.f32.mxu1 %v15159_v28  ;;  %v3668_v45 = vmul.bf16 %v9941_v37, %v11408_v33 }
 0x12f   : > { %15160 = vst [vmem:[#allocation21_spill] sm:$0xff] %v11436_v31  ;;  %v1789_v38 = vadd.f32 %v11316_v9, %v1788_v2  ;;  %8880 = vmatpush3.bf16.msra.mxu0 %v3667_v56  ;;  %v3677_v47 = vmul.bf16 %v9942_v60, %v11364_v14  ;;  %v2071_v29 = vmul.f32 %v11436_v31, %v11436_v31 }
 0x130   : > { %15161 = vst [vmem:[#allocation22_spill] sm:$0xff] %v11443_v0  ;;  %v2070_v30 = vmul.f32 %v11443_v0, %v11443_v0  ;;  %v9567_v3 = vpop.f32.mrb[28].mxu0  ;;  %9732 = vmatmul.mubr.msk.f32.gmra.mrb[88].mxu0 %vm796_vm0, %v2069_v11  ;;  %v11466_v37 = vpack.c.bf16 %v1797_v54, %v1794_v18  ;;  %8881 = vmatprep.subr.bf16.mxu0 %v3676_v20  ;;  %v9945_v18 = vld [vmem:[%s15008_s11 + $0x28] sm:$0xff]   ;;  %v9946_v20 = vld [vmem:[%s15008_s11 + $0x70] sm:$0xff]  }
 0x131   : > { %v11464_v2 = vadd.f32 %v9567_v3, %v11137_v13  ;;  %v1195_v56 = vpop.f32.mrb[29].mxu0  ;;  %v11472_v0 = vpack.c.bf16 %v1789_v38, %v1786_v62  ;;  %v3669_v11 = vmul.bf16 %v9943_v52, %v11364_v14  ;;  %v3678_v3 = vmul.bf16 %v9944_v42, %v11353_v6 }
 0x132   : > { %15163 = vst [vmem:[#allocation24_spill] sm:$0xff] %v11466_v37  ;;  %v11469_v60 = vadd.f32 %v11137_v13, %v1195_v56  ;;  %9734 = vmatprep.mubr.msk.f32.mxu0 %vm796_vm0, %v2070_v30 }
 0x133   : > { %15162 = vst [vmem:[#allocation23_spill] sm:$0xff] %v11464_v2  ;;  %v9637_v21 = vpop.f32.mrb[28].mxu1  ;;  %8882 = vmatpush3.bf16.msra.mxu0 %v3668_v45  ;;  %v2073_v62 = vmul.f32 %v11464_v2, %v11464_v2 }
 0x134   : > { %15164 = vst [vmem:[#allocation25_spill] sm:$0xff] %v11469_v60  ;;  %v2072_v12 = vmul.f32 %v11469_v60, %v11469_v60  ;;  %v9570_v31 = vpop.f32.mrb[30].mxu0  ;;  %9735 = vmatmul.mubr.msk.f32.gmra.mrb[90].mxu0 %vm796_vm0, %v2071_v29  ;;  %v1810_v14 = vadd.f32 %v9637_v21, %v11316_v9  ;;  %v1801_v38 = vpop.f32.mrb[29].mxu1  ;;  %8883 = vmatprep.subr.bf16.mxu0 %v3677_v47 }
 0x135   : > { %v11488_v54 = vadd.f32 %v9570_v31, %v11137_v13  ;;  %v1205_v30 = vpop.f32.mrb[31].mxu0  ;;  %v1802_v52 = vadd.f32 %v11316_v9, %v1801_v38  ;;  %v9638_v42 = vpop.f32.mrb[30].mxu1  ;;  %v3670_v21 = vmul.bf16 %v9945_v18, %v11353_v6  ;;  %v3679_v47 = vmul.bf16 %v9946_v20, %v11419_v40 }
 0x136   : > { %v11492_v45 = vadd.f32 %v11137_v13, %v1205_v30  ;;  %9737 = vmatprep.mubr.msk.f32.mxu0 %vm796_vm0, %v2072_v12  ;;  %v1813_v56 = vadd.f32 %v9638_v42, %v11316_v9  ;;  %v1804_v2 = vpop.f32.mrb[31].mxu1  ;;  %v9947_v12 = vld [vmem:[%s15008_s11 + $0x30] sm:$0xff]   ;;  %v9948_v30 = vld [vmem:[%s15008_s11 + $0x78] sm:$0xff]  }
 0x137   : > { %15165 = vst [vmem:[#allocation26_spill] sm:$0xff] %v11488_v54  ;;  %v1805_v60 = vadd.f32 %v11316_v9, %v1804_v2  ;;  %8884 = vmatpush3.bf16.msra.mxu0 %v3669_v11  ;;  %v2075_v38 = vmul.f32 %v11488_v54, %v11488_v54 }
 0x138   : > { %15166 = vst [vmem:[#allocation27_spill] sm:$0xff] %v11492_v45  ;;  %v2074_v31 = vmul.f32 %v11492_v45, %v11492_v45  ;;  %v9573_v29 = vpop.f32.mrb[32].mxu0  ;;  %9738 = vmatmul.mubr.msk.f32.gmra.mrb[92].mxu0 %vm796_vm0, %v2073_v62  ;;  %v11514_v6 = vpack.c.bf16 %v1813_v56, %v1810_v14  ;;  %8885 = vmatprep.subr.bf16.mxu0 %v3678_v3  ;;  %v11529_v3 = vld [vmem:[%s15008_s11 + $0x38] sm:$0xff]  }
 0x139   : > { %v11512_v2 = vadd.f32 %v9573_v29, %v11137_v13  ;;  %v1215_v11 = vpop.f32.mrb[33].mxu0  ;;  %v11520_v20 = vpack.c.bf16 %v1805_v60, %v1802_v52  ;;  %v3671_v62 = vmul.bf16 %v9947_v12, %v11419_v40  ;;  %v3680_v29 = vmul.bf16 %v9948_v30, %v11408_v33 }
 0x13a   : > { %15168 = vst [vmem:[#allocation29_spill] sm:$0xff] %v11514_v6  ;;  %v11517_v18 = vadd.f32 %v11137_v13, %v1215_v11  ;;  %9740 = vmatprep.mubr.msk.f32.mxu0 %vm796_vm0, %v2074_v31 }
 0x13b   : > { %15167 = vst [vmem:[#allocation28_spill] sm:$0xff] %v11512_v2  ;;  %15170 = vst [vmem:[#allocation31_spill] sm:$0xff] %v11520_v20  ;;  %v9641_v45 = vpop.f32.mrb[32].mxu1  ;;  %8886 = vmatpush3.bf16.msra.mxu0 %v3670_v21  ;;  %v2077_v14 = vmul.f32 %v11512_v2, %v11512_v2 }
 0x13c   : > { %15169 = vst [vmem:[#allocation30_spill] sm:$0xff] %v11517_v18  ;;  %v2076_v42 = vmul.f32 %v11517_v18, %v11517_v18  ;;  %v9576_v54 = vpop.f32.mrb[34].mxu0  ;;  %9741 = vmatmul.mubr.msk.f32.gmra.mrb[94].mxu0 %vm796_vm0, %v2075_v38  ;;  %v1826_v56 = vadd.f32 %v9641_v45, %v11316_v9  ;;  %v1817_v31 = vpop.f32.mrb[33].mxu1  ;;  %8887 = vmatprep.subr.bf16.mxu0 %v3679_v47 }
 0x13d   : > { %v11535_v60 = vadd.f32 %v9576_v54, %v11137_v13  ;;  %v1225_v52 = vpop.f32.mrb[35].mxu0  ;;  %v1818_v21 = vadd.f32 %v11316_v9, %v1817_v31  ;;  %v9642_v12 = vpop.f32.mrb[34].mxu1  ;;  %v3672_v45 = vmul.bf16 %v11529_v3, %v11408_v33 }
 0x13e   : > { %v11539_v40 = vadd.f32 %v11137_v13, %v1225_v52  ;;  %9743 = vmatprep.mubr.msk.f32.mxu0 %vm796_vm0, %v2076_v42  ;;  %v1829_v30 = vadd.f32 %v9642_v12, %v11316_v9  ;;  %v1820_v11 = vpop.f32.mrb[35].mxu1 }
 0x13f   : > { %15171 = vst [vmem:[#allocation32_spill] sm:$0xff] %v11535_v60  ;;  %v1821_v2 = vadd.f32 %v11316_v9, %v1820_v11  ;;  %8888 = vmatpush3.bf16.msra.mxu0 %v3671_v62  ;;  %v2079_v47 = vmul.f32 %v11535_v60, %v11535_v60 }
 0x140   : > { %15172 = vst [vmem:[#allocation33_spill] sm:$0xff] %v11539_v40  ;;  %v2078_v54 = vmul.f32 %v11539_v40, %v11539_v40  ;;  %v9579_v38 = vpop.f32.mrb[36].mxu0  ;;  %9744 = vmatmul.mubr.msk.f32.gmra.mrb[96].mxu0 %vm796_vm0, %v2077_v14  ;;  %v11555_v31 = vpack.c.bf16 %v1829_v30, %v1826_v56  ;;  %8889 = vmatprep.subr.bf16.mxu0 %v3680_v29 }
 0x141   : > { %v11553_v42 = vadd.f32 %v9579_v38, %v11137_v13  ;;  %v1235_v52 = vpop.f32.mrb[37].mxu0  ;;  %v11560_v11 = vpack.c.bf16 %v1821_v2, %v1818_v21 }
 0x142   : > { %15174 = vst [vmem:[#allocation35_spill] sm:$0xff] %v11555_v31  ;;  %v11558_v12 = vadd.f32 %v11137_v13, %v1235_v52  ;;  %9746 = vmatprep.mubr.msk.f32.mxu0 %vm796_vm0, %v2078_v54 }
 0x143   : > { %15173 = vst [vmem:[#allocation34_spill] sm:$0xff] %v11553_v42  ;;  %15176 = vst [vmem:[#allocation37_spill] sm:$0xff] %v11560_v11  ;;  %v9645_v62 = vpop.f32.mrb[36].mxu1  ;;  %8890 = vmatpush3.bf16.msra.mxu0 %v3672_v45  ;;  %v2081_v14 = vmul.f32 %v11553_v42, %v11553_v42 }
 0x144   : > { %15175 = vst [vmem:[#allocation36_spill] sm:$0xff] %v11558_v12  ;;  %v2080_v33 = vmul.f32 %v11558_v12, %v11558_v12  ;;  %v9582_v60 = vpop.f32.mrb[38].mxu0  ;;  %v1842_v56 = vadd.f32 %v9645_v62, %v11316_v9  ;;  %9747 = vmatmul.mubr.msk.f32.gmra.mrb[98].mxu0 %vm796_vm0, %v2079_v47  ;;  %v1833_v2 = vpop.f32.mrb[37].mxu1  ;;  %8915 = vmatprep.subr.bf16.mxu0 %v11342_v57 }
 0x145   : > { %v11570_v29 = vadd.f32 %v9582_v60, %v11137_v13  ;;  %v1245_v21 = vpop.f32.mrb[39].mxu0  ;;  %v1834_v30 = vadd.f32 %v11316_v9, %v1833_v2  ;;  %v9646_v38 = vpop.f32.mrb[38].mxu1 }
 0x146   : > { %v11575_v54 = vadd.f32 %v11137_v13, %v1245_v21  ;;  %9749 = vmatprep.mubr.msk.f32.mxu0 %vm796_vm0, %v2080_v33  ;;  %v1845_v45 = vadd.f32 %v9646_v38, %v11316_v9  ;;  %v1836_v52 = vpop.f32.mrb[39].mxu1 }
 0x147   : > { %15177 = vst [vmem:[#allocation38_spill] sm:$0xff] %v11570_v29  ;;  %v1837_v60 = vadd.f32 %v11316_v9, %v1836_v52  ;;  %v2083_v57 = vmul.f32 %v11570_v29, %v11570_v29 }
 0x148   : > { %15178 = vst [vmem:[#allocation39_spill] sm:$0xff] %v11575_v54  ;;  %v2082_v47 = vmul.f32 %v11575_v54, %v11575_v54  ;;  %v9585_v62 = vpop.f32.mrb[40].mxu0  ;;  %v11584_v42 = vpack.c.bf16 %v1845_v45, %v1842_v56  ;;  %9750 = vmatmul.mubr.msk.f32.gmra.mrb[100].mxu0 %vm796_vm0, %v2081_v14 }
 0x149   : > { %v11588_v2 = vadd.f32 %v9585_v62, %v11137_v13  ;;  %v1255_v33 = vpop.f32.mrb[41].mxu0  ;;  %v11590_v21 = vpack.c.bf16 %v1837_v60, %v1834_v30 }
 0x14a   : > { %15179 = vst [vmem:[#allocation40_spill] sm:$0xff] %v11584_v42  ;;  %v11593_v38 = vadd.f32 %v11137_v13, %v1255_v33  ;;  %9752 = vmatprep.mubr.msk.f32.mxu0 %vm796_vm0, %v2082_v47 }
 0x14b   : > { %15180 = vst [vmem:[#allocation41_spill] sm:$0xff] %v11588_v2  ;;  %15181 = vst [vmem:[#allocation42_spill] sm:$0xff] %v11590_v21  ;;  %v9649_v52 = vpop.f32.mrb[40].mxu1  ;;  %v2085_v14 = vmul.f32 %v11588_v2, %v11588_v2 }
 0x14c   : > { %15182 = vst [vmem:[#allocation43_spill] sm:$0xff] %v11593_v38  ;;  %v2084_v54 = vmul.f32 %v11593_v38, %v11593_v38  ;;  %v9588_v29 = vpop.f32.mrb[42].mxu0  ;;  %v1858_v56 = vadd.f32 %v9649_v52, %v11316_v9  ;;  %v1849_v45 = vpop.f32.mrb[41].mxu1  ;;  %9753 = vmatmul.mubr.msk.f32.gmra.mrb[102].mxu0 %vm796_vm0, %v2083_v57 }
 0x14d   : > { %v11603_v30 = vadd.f32 %v9588_v29, %v11137_v13  ;;  %v1265_v60 = vpop.f32.mrb[43].mxu0  ;;  %v1850_v62 = vadd.f32 %v11316_v9, %v1849_v45  ;;  %v9650_v47 = vpop.f32.mrb[42].mxu1 }
 0x14e   : > { %v11607_v33 = vadd.f32 %v11137_v13, %v1265_v60  ;;  %9755 = vmatprep.mubr.msk.f32.mxu0 %vm796_vm0, %v2084_v54  ;;  %v1861_v52 = vadd.f32 %v9650_v47, %v11316_v9  ;;  %v1852_v38 = vpop.f32.mrb[43].mxu1 }
 0x14f   : > { %15183 = vst [vmem:[#allocation44_spill] sm:$0xff] %v11603_v30  ;;  %v1853_v2 = vadd.f32 %v11316_v9, %v1852_v38  ;;  %v2087_v45 = vmul.f32 %v11603_v30, %v11603_v30 }
 0x150   : > { %15184 = vst [vmem:[#allocation45_spill] sm:$0xff] %v11607_v33  ;;  %v2086_v57 = vmul.f32 %v11607_v33, %v11607_v33  ;;  %v9591_v12 = vpop.f32.mrb[44].mxu0  ;;  %v11614_v29 = vpack.c.bf16 %v1861_v52, %v1858_v56  ;;  %9756 = vmatmul.mubr.msk.f32.gmra.mrb[104].mxu0 %vm796_vm0, %v2085_v14 }
 0x151   : > { %v11620_v60 = vadd.f32 %v9591_v12, %v11137_v13  ;;  %v1275_v54 = vpop.f32.mrb[45].mxu0  ;;  %v11622_v40 = vpack.c.bf16 %v1853_v2, %v1850_v62 }
 0x152   : > { %15185 = vst [vmem:[#allocation46_spill] sm:$0xff] %v11614_v29  ;;  %v11625_v47 = vadd.f32 %v11137_v13, %v1275_v54  ;;  %9758 = vmatprep.mubr.msk.f32.mxu0 %vm796_vm0, %v2086_v57 }
 0x153   : > { %15186 = vst [vmem:[#allocation47_spill] sm:$0xff] %v11620_v60  ;;  %15187 = vst [vmem:[#allocation48_spill] sm:$0xff] %v11622_v40  ;;  %v9653_v38 = vpop.f32.mrb[44].mxu1  ;;  %v2089_v12 = vmul.f32 %v11620_v60, %v11620_v60 }
 0x154   : > { %15188 = vst [vmem:[#allocation49_spill] sm:$0xff] %v11625_v47  ;;  %v2088_v56 = vmul.f32 %v11625_v47, %v11625_v47  ;;  %v9594_v52 = vpop.f32.mrb[46].mxu0  ;;  %v1874_v30 = vadd.f32 %v9653_v38, %v11316_v9  ;;  %v1865_v33 = vpop.f32.mrb[45].mxu1  ;;  %9759 = vmatmul.mubr.msk.f32.gmra.mrb[106].mxu0 %vm796_vm0, %v2087_v45 }
 0x155   : > { %v11635_v2 = vadd.f32 %v9594_v52, %v11137_v13  ;;  %v1285_v14 = vpop.f32.mrb[47].mxu0  ;;  %v1866_v62 = vadd.f32 %v11316_v9, %v1865_v33  ;;  %v9654_v57 = vpop.f32.mrb[46].mxu1 }
 0x156   : > { %v11639_v54 = vadd.f32 %v11137_v13, %v1285_v14  ;;  %9761 = vmatprep.mubr.msk.f32.mxu0 %vm796_vm0, %v2088_v56  ;;  %v1877_v38 = vadd.f32 %v9654_v57, %v11316_v9  ;;  %v1868_v47 = vpop.f32.mrb[47].mxu1 }
 0x157   : > { %15189 = vst [vmem:[#allocation50_spill] sm:$0xff] %v11635_v2  ;;  %v1869_v18 = vadd.f32 %v11316_v9, %v1868_v47  ;;  %v2091_v33 = vmul.f32 %v11635_v2, %v11635_v2 }
 0x158   : > { %15190 = vst [vmem:[#allocation51_spill] sm:$0xff] %v11639_v54  ;;  %v2090_v45 = vmul.f32 %v11639_v54, %v11639_v54  ;;  %v9597_v60 = vpop.f32.mrb[48].mxu0  ;;  %v11646_v52 = vpack.c.bf16 %v1877_v38, %v1874_v30  ;;  %9762 = vmatmul.mubr.msk.f32.gmra.mrb[108].mxu0 %vm796_vm0, %v2089_v12 }
 0x159   : > { %v11652_v14 = vadd.f32 %v9597_v60, %v11137_v13  ;;  %v1295_v56 = vpop.f32.mrb[49].mxu0  ;;  %v11654_v29 = vpack.c.bf16 %v1869_v18, %v1866_v62 }
 0x15a   : > { %15191 = vst [vmem:[#allocation52_spill] sm:$0xff] %v11646_v52  ;;  %v11657_v57 = vadd.f32 %v11137_v13, %v1295_v56  ;;  %9764 = vmatprep.mubr.msk.f32.mxu0 %vm796_vm0, %v2090_v45 }
 0x15b   : > { %15192 = vst [vmem:[#allocation53_spill] sm:$0xff] %v11652_v14  ;;  %15193 = vst [vmem:[#allocation54_spill] sm:$0xff] %v11654_v29  ;;  %v9657_v47 = vpop.f32.mrb[48].mxu1  ;;  %v2093_v60 = vmul.f32 %v11652_v14, %v11652_v14 }
 0x15c   : > { %15194 = vst [vmem:[#allocation55_spill] sm:$0xff] %v11657_v57  ;;  %v2092_v30 = vmul.f32 %v11657_v57, %v11657_v57  ;;  %v9600_v38 = vpop.f32.mrb[50].mxu0  ;;  %v1890_v2 = vadd.f32 %v9657_v47, %v11316_v9  ;;  %v1881_v54 = vpop.f32.mrb[49].mxu1  ;;  %9765 = vmatmul.mubr.msk.f32.gmra.mrb[110].mxu0 %vm796_vm0, %v2091_v33 }
 0x15d   : > { %v11667_v18 = vadd.f32 %v9600_v38, %v11137_v13  ;;  %v1305_v12 = vpop.f32.mrb[51].mxu0  ;;  %v1882_v62 = vadd.f32 %v11316_v9, %v1881_v54  ;;  %v9658_v45 = vpop.f32.mrb[50].mxu1 }
 0x15e   : > { %v11671_v56 = vadd.f32 %v11137_v13, %v1305_v12  ;;  %9767 = vmatprep.mubr.msk.f32.mxu0 %vm796_vm0, %v2092_v30  ;;  %v1893_v47 = vadd.f32 %v9658_v45, %v11316_v9  ;;  %v1884_v57 = vpop.f32.mrb[51].mxu1 }
 0x15f   : > { %15195 = vst [vmem:[#allocation56_spill] sm:$0xff] %v11667_v18  ;;  %v1885_v52 = vadd.f32 %v11316_v9, %v1884_v57  ;;  %v2095_v54 = vmul.f32 %v11667_v18, %v11667_v18 }
 0x160   : > { %15196 = vst [vmem:[#allocation57_spill] sm:$0xff] %v11671_v56  ;;  %v2094_v33 = vmul.f32 %v11671_v56, %v11671_v56  ;;  %v9603_v14 = vpop.f32.mrb[52].mxu0  ;;  %v11678_v38 = vpack.c.bf16 %v1893_v47, %v1890_v2  ;;  %9768 = vmatmul.mubr.msk.f32.gmra.mrb[112].mxu0 %vm796_vm0, %v2093_v60 }
 0x161   : > { %v11684_v12 = vadd.f32 %v9603_v14, %v11137_v13  ;;  %v1315_v30 = vpop.f32.mrb[53].mxu0  ;;  %v11686_v29 = vpack.c.bf16 %v1885_v52, %v1882_v62 }
 0x162   : > { %15197 = vst [vmem:[#allocation58_spill] sm:$0xff] %v11678_v38  ;;  %v11689_v45 = vadd.f32 %v11137_v13, %v1315_v30  ;;  %9770 = vmatprep.mubr.msk.f32.mxu0 %vm796_vm0, %v2094_v33 }
 0x163   : > { %15198 = vst [vmem:[#allocation59_spill] sm:$0xff] %v11684_v12  ;;  %15199 = vst [vmem:[#allocation60_spill] sm:$0xff] %v11686_v29  ;;  %v9661_v57 = vpop.f32.mrb[52].mxu1  ;;  %v2097_v14 = vmul.f32 %v11684_v12, %v11684_v12 }
 0x164   : > { %15200 = vst [vmem:[#allocation61_spill] sm:$0xff] %v11689_v45  ;;  %v2096_v2 = vmul.f32 %v11689_v45, %v11689_v45  ;;  %v9606_v47 = vpop.f32.mrb[54].mxu0  ;;  %v1906_v18 = vadd.f32 %v9661_v57, %v11316_v9  ;;  %v1897_v56 = vpop.f32.mrb[53].mxu1  ;;  %9771 = vmatmul.mubr.msk.f32.gmra.mrb[114].mxu0 %vm796_vm0, %v2095_v54 }
 0x165   : > { %v11699_v52 = vadd.f32 %v9606_v47, %v11137_v13  ;;  %v1325_v60 = vpop.f32.mrb[55].mxu0  ;;  %v1898_v62 = vadd.f32 %v11316_v9, %v1897_v56  ;;  %v9662_v33 = vpop.f32.mrb[54].mxu1 }
 0x166   : > { %v11703_v30 = vadd.f32 %v11137_v13, %v1325_v60  ;;  %9773 = vmatprep.mubr.msk.f32.mxu0 %vm796_vm0, %v2096_v2  ;;  %v1909_v57 = vadd.f32 %v9662_v33, %v11316_v9  ;;  %v1900_v45 = vpop.f32.mrb[55].mxu1 }
 0x167   : > { %15201 = vst [vmem:[#allocation62_spill] sm:$0xff] %v11699_v52  ;;  %v1901_v38 = vadd.f32 %v11316_v9, %v1900_v45  ;;  %v2099_v56 = vmul.f32 %v11699_v52, %v11699_v52 }
 0x168   : > { %15202 = vst [vmem:[#allocation63_spill] sm:$0xff] %v11703_v30  ;;  %v2098_v54 = vmul.f32 %v11703_v30, %v11703_v30  ;;  %v9609_v12 = vpop.f32.mrb[56].mxu0  ;;  %v11710_v47 = vpack.c.bf16 %v1909_v57, %v1906_v18  ;;  %9774 = vmatmul.mubr.msk.f32.gmra.mrb[116].mxu0 %vm796_vm0, %v2097_v14 }
 0x169   : > { %v11716_v60 = vadd.f32 %v9609_v12, %v11137_v13  ;;  %v1335_v2 = vpop.f32.mrb[57].mxu0  ;;  %v11718_v29 = vpack.c.bf16 %v1901_v38, %v1898_v62 }
 0x16a   : > { %15203 = vst [vmem:[#allocation64_spill] sm:$0xff] %v11710_v47  ;;  %v11721_v33 = vadd.f32 %v11137_v13, %v1335_v2  ;;  %9776 = vmatprep.mubr.msk.f32.mxu0 %vm796_vm0, %v2098_v54 }
 0x16b   : > { %15204 = vst [vmem:[#allocation65_spill] sm:$0xff] %v11716_v60  ;;  %15205 = vst [vmem:[#allocation66_spill] sm:$0xff] %v11718_v29  ;;  %v9665_v45 = vpop.f32.mrb[56].mxu1  ;;  %v2101_v12 = vmul.f32 %v11716_v60, %v11716_v60 }
 0x16c   : > { %15206 = vst [vmem:[#allocation67_spill] sm:$0xff] %v11721_v33  ;;  %v2100_v18 = vmul.f32 %v11721_v33, %v11721_v33  ;;  %v9612_v57 = vpop.f32.mrb[58].mxu0  ;;  %v1922_v52 = vadd.f32 %v9665_v45, %v11316_v9  ;;  %v1913_v30 = vpop.f32.mrb[57].mxu1  ;;  %9777 = vmatmul.mubr.msk.f32.gmra.mrb[118].mxu0 %vm796_vm0, %v2099_v56 }
 0x16d   : > { %v11731_v38 = vadd.f32 %v9612_v57, %v11137_v13  ;;  %v1345_v14 = vpop.f32.mrb[59].mxu0  ;;  %v1914_v62 = vadd.f32 %v11316_v9, %v1913_v30  ;;  %v9666_v54 = vpop.f32.mrb[58].mxu1 }
 0x16e   : > { %v11735_v2 = vadd.f32 %v11137_v13, %v1345_v14  ;;  %9779 = vmatprep.mubr.msk.f32.mxu0 %vm796_vm0, %v2100_v18  ;;  %v1925_v45 = vadd.f32 %v9666_v54, %v11316_v9  ;;  %v1916_v33 = vpop.f32.mrb[59].mxu1 }
 0x16f   : > { %15207 = vst [vmem:[#allocation68_spill] sm:$0xff] %v11731_v38  ;;  %v1917_v47 = vadd.f32 %v11316_v9, %v1916_v33  ;;  %v2103_v30 = vmul.f32 %v11731_v38, %v11731_v38 }
 0x170   : > { %15208 = vst [vmem:[#allocation69_spill] sm:$0xff] %v11735_v2  ;;  %v2102_v56 = vmul.f32 %v11735_v2, %v11735_v2  ;;  %v9615_v60 = vpop.f32.mrb[60].mxu0  ;;  %v11742_v57 = vpack.c.bf16 %v1925_v45, %v1922_v52  ;;  %9780 = vmatmul.mubr.msk.f32.gmra.mrb[120].mxu0 %vm796_vm0, %v2101_v12 }
 0x171   : > { %v11748_v14 = vadd.f32 %v9615_v60, %v11137_v13  ;;  %v1355_v18 = vpop.f32.mrb[61].mxu0  ;;  %v11750_v29 = vpack.c.bf16 %v1917_v47, %v1914_v62 }
 0x172   : > { %15209 = vst [vmem:[#allocation70_spill] sm:$0xff] %v11742_v57  ;;  %v11753_v54 = vadd.f32 %v11137_v13, %v1355_v18  ;;  %9782 = vmatprep.mubr.msk.f32.mxu0 %vm796_vm0, %v2102_v56 }
 0x173   : > { %15210 = vst [vmem:[#allocation71_spill] sm:$0xff] %v11748_v14  ;;  %15211 = vst [vmem:[#allocation72_spill] sm:$0xff] %v11750_v29  ;;  %v9669_v33 = vpop.f32.mrb[60].mxu1  ;;  %v2105_v60 = vmul.f32 %v11748_v14, %v11748_v14 }
 0x174   : > { %15212 = vst [vmem:[#allocation73_spill] sm:$0xff] %v11753_v54  ;;  %v2104_v52 = vmul.f32 %v11753_v54, %v11753_v54  ;;  %v9618_v45 = vpop.f32.mrb[62].mxu0  ;;  %v1938_v38 = vadd.f32 %v9669_v33, %v11316_v9  ;;  %v1929_v2 = vpop.f32.mrb[61].mxu1  ;;  %9783 = vmatmul.mubr.msk.f32.gmra.mrb[122].mxu0 %vm796_vm0, %v2103_v30 }
 0x175   : > { %v11763_v47 = vadd.f32 %v9618_v45, %v11137_v13  ;;  %v1365_v12 = vpop.f32.mrb[63].mxu0  ;;  %v1930_v62 = vadd.f32 %v11316_v9, %v1929_v2  ;;  %v9670_v56 = vpop.f32.mrb[62].mxu1 }
 0x176   : > { %v11767_v18 = vadd.f32 %v11137_v13, %v1365_v12  ;;  %9785 = vmatprep.mubr.msk.f32.mxu0 %vm796_vm0, %v2104_v52  ;;  %v1941_v33 = vadd.f32 %v9670_v56, %v11316_v9  ;;  %v1932_v54 = vpop.f32.mrb[63].mxu1 }
 0x177   : > { %15213 = vst [vmem:[#allocation74_spill] sm:$0xff] %v11763_v47  ;;  %v1933_v57 = vadd.f32 %v11316_v9, %v1932_v54  ;;  %v2107_v45 = vmul.f32 %v11763_v47, %v11763_v47 }
 0x178   : > { %15214 = vst [vmem:[#allocation75_spill] sm:$0xff] %v11767_v18  ;;  %v2106_v30 = vmul.f32 %v11767_v18, %v11767_v18  ;;  %v11774_v14 = vpack.c.bf16 %v1941_v33, %v1938_v38  ;;  %9786 = vmatmul.mubr.msk.f32.gmra.mrb[124].mxu0 %vm796_vm0, %v2105_v60 }
 0x179   : > { %v11779_v2 = vpack.c.bf16 %v1933_v57, %v1930_v62 }
 0x17a   : > { %15215 = vst [vmem:[#allocation76_spill] sm:$0xff] %v11774_v14  ;;  %9788 = vmatprep.mubr.msk.f32.mxu0 %vm796_vm0, %v2106_v30 }
 0x17b   : > { %15216 = vst [vmem:[#allocation77_spill] sm:$0xff] %v11779_v2  ;;  %v9673_v13 = vpop.f32.mrb[64].mxu1 }
 0x17c   : > { %v1954_v52 = vadd.f32 %v9673_v13, %v11316_v9  ;;  %v1945_v12 = vpop.f32.mrb[65].mxu1  ;;  %9789 = vmatmul.mubr.msk.f32.gmra.mrb[126].mxu0 %vm796_vm0, %v2107_v45 }
 0x17d   : > { %v1946_v54 = vadd.f32 %v11316_v9, %v1945_v12  ;;  %v9674_v56 = vpop.f32.mrb[66].mxu1 }
 0x17e   : > { %v1957_v38 = vadd.f32 %v9674_v56, %v11316_v9  ;;  %v1948_v33 = vpop.f32.mrb[67].mxu1 }
 0x17f   : > { %v1949_v47 = vadd.f32 %v11316_v9, %v1948_v33 }
 0x180   : > { %v11787_v18 = vpack.c.bf16 %v1957_v38, %v1954_v52 }
 0x181   : > { %v11789_v57 = vpack.c.bf16 %v1949_v47, %v1946_v54 }
 0x182   : > { %15217 = vst [vmem:[#allocation78_spill] sm:$0xff] %v11787_v18 }
 0x183   : > { %15218 = vst [vmem:[#allocation79_spill] sm:$0xff] %v11789_v57  ;;  %v9677_v60 = vpop.f32.mrb[68].mxu1 }
 0x184   : > { %v1970_v62 = vadd.f32 %v9677_v60, %v11316_v9  ;;  %v1961_v30 = vpop.f32.mrb[69].mxu1 }
 0x185   : > { %v1962_v13 = vadd.f32 %v11316_v9, %v1961_v30  ;;  %v9678_v14 = vpop.f32.mrb[70].mxu1 }
 0x186   : > { %v1973_v45 = vadd.f32 %v9678_v14, %v11316_v9  ;;  %v1964_v12 = vpop.f32.mrb[71].mxu1 }
 0x187   : > { %v1965_v2 = vadd.f32 %v11316_v9, %v1964_v12 }
 0x188   : > { %v11795_v56 = vpack.c.bf16 %v1973_v45, %v1970_v62 }
 0x189   : > { %v11797_v29 = vpack.c.bf16 %v1965_v2, %v1962_v13 }
 0x18a   : > { %15219 = vst [vmem:[#allocation80_spill] sm:$0xff] %v11795_v56 }
 0x18b   : > { %15220 = vst [vmem:[#allocation81_spill] sm:$0xff] %v11797_v29  ;;  %v9681_v52 = vpop.f32.mrb[72].mxu1 }
 0x18c   : > { %v1986_v47 = vadd.f32 %v9681_v52, %v11316_v9  ;;  %v1977_v54 = vpop.f32.mrb[73].mxu1 }
 0x18d   : > { %v1978_v38 = vadd.f32 %v11316_v9, %v1977_v54  ;;  %v9682_v33 = vpop.f32.mrb[74].mxu1 }
 0x18e   : > { %v1989_v60 = vadd.f32 %v9682_v33, %v11316_v9  ;;  %v1980_v30 = vpop.f32.mrb[75].mxu1 }
 0x18f   : > { %v1981_v18 = vadd.f32 %v11316_v9, %v1980_v30 }
 0x190   : > { %v11803_v14 = vpack.c.bf16 %v1989_v60, %v1986_v47 }
 0x191   : > { %v11805_v57 = vpack.c.bf16 %v1981_v18, %v1978_v38 }
 0x192   : > { %15221 = vst [vmem:[#allocation82_spill] sm:$0xff] %v11803_v14 }
 0x193   : > { %15222 = vst [vmem:[#allocation83_spill] sm:$0xff] %v11805_v57  ;;  %v9685_v62 = vpop.f32.mrb[76].mxu1 }
 0x194   : > { %v2002_v2 = vadd.f32 %v9685_v62, %v11316_v9  ;;  %v1993_v13 = vpop.f32.mrb[77].mxu1 }
 0x195   : > { %v1994_v45 = vadd.f32 %v11316_v9, %v1993_v13  ;;  %v9686_v12 = vpop.f32.mrb[78].mxu1 }
 0x196   : > { %v2005_v52 = vadd.f32 %v9686_v12, %v11316_v9  ;;  %v1996_v54 = vpop.f32.mrb[79].mxu1 }
 0x197   : > { %v1997_v56 = vadd.f32 %v11316_v9, %v1996_v54 }
 0x198   : > { %v11811_v33 = vpack.c.bf16 %v2005_v52, %v2002_v2 }
 0x199   : > { %v11813_v29 = vpack.c.bf16 %v1997_v56, %v1994_v45 }
 0x19a   : > { %15223 = vst [vmem:[#allocation84_spill] sm:$0xff] %v11811_v33 }
 0x19b   : > { %15224 = vst [vmem:[#allocation85_spill] sm:$0xff] %v11813_v29 }
 0x1d2   : > { %v11815_v47 = vpop.f32.mrb[64].mxu0 }
 0x1d3   : > { %v11817_v18 = vpop.f32.mrb[65].mxu0 }
 0x1d6   : > { %v11819_v38 = vpop.f32.mrb[66].mxu0 }
 0x1d7   : > { %v11821_v60 = vpop.f32.mrb[67].mxu0 }
 0x1da   : > { %v11823_v30 = vpop.f32.mrb[68].mxu0 }
 0x1db   : > { %v11825_v62 = vpop.f32.mrb[69].mxu0 }
 0x1de   : > { %v11827_v13 = vpop.f32.mrb[70].mxu0 }
 0x1df   : > { %v11829_v12 = vpop.f32.mrb[71].mxu0 }
 0x1e2   : > { %v11831_v9 = vpop.f32.mrb[72].mxu0 }
 0x1e3   : > { %v11833_v56 = vpop.f32.mrb[73].mxu0 }
 0x1e4   : > { %v3042_v2 = vpop.f32.mrb[80].mxu1 }
 0x1e5   : > { %v3154_v45 = vmax.f32 %v3042_v2, 1e-24  ;;  %v3044_v52 = vpop.f32.mrb[81].mxu1 }
 0x1e6   : > { %v11835_v54 = vpop.f32.mrb[74].mxu0  ;;  %v3155_v33 = vmax.f32 %v3044_v52, 1e-24 }
 0x1e7   : > { %v11837_v29 = vpop.f32.mrb[75].mxu0  ;;  %9958 = vrsqrt.f32 %v3154_v45 }
 0x1e8   : > { %9960 = vrsqrt.f32 %v3155_v33  ;;  %v3048_v14 = vpop.f32.mrb[82].mxu1 }
 0x1e9   : > { %v3158_v57 = vmax.f32 %v3048_v14, 1e-24  ;;  %v3050_v40 = vpop.f32.mrb[83].mxu1 }
 0x1ea   : > { %v3159_v42 = vmax.f32 %v3050_v40, 1e-24 }
 0x1eb   : > { %9962 = vrsqrt.f32 %v3158_v57  ;;  %v11839_v39 = vpop.f32.mrb[76].mxu0 }
 0x1ec   : > { %15225 = vst [vmem:[#allocation86_spill] sm:$0xff] %v11839_v39  ;;  %9964 = vrsqrt.f32 %v3159_v42  ;;  %v3054_v21 = vpop.f32.mrb[84].mxu1  ;;  %v11841_v1 = vpop.f32.mrb[77].mxu0 }
 0x1ed   : > { %v3162_v2 = vmax.f32 %v3054_v21, 1e-24  ;;  %v3056_v31 = vpop.f32.mrb[85].mxu1 }
 0x1ee   : > { %v3163_v5 = vmax.f32 %v3056_v31, 1e-24 }
 0x1ef   : > { %9966 = vrsqrt.f32 %v3162_v2  ;;  %v11843_v52 = vpop.f32.mrb[78].mxu0 }
 0x1f0   : > { %15226 = vst [vmem:[#allocation87_spill] sm:$0xff] %v11843_v52  ;;  %9968 = vrsqrt.f32 %v3163_v5  ;;  %v3060_v45 = vpop.f32.mrb[86].mxu1  ;;  %v11845_v33 = vpop.f32.mrb[79].mxu0 }
 0x1f1   : > { %15227 = vst [vmem:[#allocation88_spill] sm:$0xff] %v11845_v33  ;;  %v9959_v14 = vpop.eup %9958  ;;  %v3166_v11 = vmax.f32 %v3060_v45, 1e-24  ;;  %v3062_v40 = vpop.f32.mrb[87].mxu1 }
 0x1f2   : > { %v9961_v57 = vpop.eup %9960  ;;  %v3167_v46 = vmax.f32 %v3062_v40, 1e-24  ;;  %v11848_v42 = vmul.f32 %v9959_v14, %v11147_v19 }
 0x1f3   : > { %9970 = vrsqrt.f32 %v3166_v11  ;;  %v11850_v50 = vpop.f32.mrb[80].mxu0  ;;  %v11853_v31 = vmul.f32 %v9961_v57, %v11151_v22 }
 0x1f4   : > { %15228 = vst [vmem:[#allocation89_spill] sm:$0xff] %v11850_v50  ;;  %9972 = vrsqrt.f32 %v3167_v46  ;;  %3246 = vrot.lane.b32.xlu0 %v11848_v42, %s15111_s27  ;;  %v3131_v5 = vpop.f32.mrb[88].mxu1  ;;  %v11857_v21 = vpop.f32.mrb[81].mxu0 }
 0x1f5   : > { %15229 = vst [vmem:[#allocation90_spill] sm:$0xff] %v11853_v31  ;;  %15230 = vst [vmem:[#allocation91_spill] sm:$0xff] %v11857_v21  ;;  %v9963_v2 = vpop.eup %9962  ;;  %v3156_v45 = vmax.f32 %v3131_v5, 1e-24  ;;  %v3133_v40 = vpop.f32.mrb[89].mxu1 }
 0x1f6   : > { %v9965_v26 = vpop.eup %9964  ;;  %v3157_v19 = vmax.f32 %v3133_v40, 1e-24  ;;  %v11860_v11 = vmul.f32 %v9963_v2, %v11163_v27 }
 0x1f7   : > { %9974 = vrsqrt.f32 %v3156_v45  ;;  %v11862_v14 = vpop.f32.mrb[82].mxu0  ;;  %v11865_v22 = vmul.f32 %v9965_v26, %v11171_v34 }
 0x1f8   : > { %15231 = vst [vmem:[#allocation92_spill] sm:$0xff] %v11862_v14  ;;  %9976 = vrsqrt.f32 %v3157_v19  ;;  %3248 = vrot.lane.b32.xlu0 %v11860_v11, %s15111_s27  ;;  %v3137_v46 = vpop.f32.mrb[90].mxu1  ;;  %v11869_v57 = vpop.f32.mrb[83].mxu0 }
 0x1f9   : > { %15232 = vst [vmem:[#allocation93_spill] sm:$0xff] %v11865_v22  ;;  %15233 = vst [vmem:[#allocation94_spill] sm:$0xff] %v11869_v57  ;;  %v9967_v5 = vpop.eup %9966  ;;  %v3160_v50 = vmax.f32 %v3137_v46, 1e-24  ;;  %v3139_v21 = vpop.f32.mrb[91].mxu1 }
 0x1fa   : > { %v9969_v40 = vpop.eup %9968  ;;  %v3161_v31 = vmax.f32 %v3139_v21, 1e-24  ;;  %v11872_v27 = vmul.f32 %v9967_v5, %v11187_v44 }
 0x1fb   : > { %9978 = vrsqrt.f32 %v3160_v50  ;;  %v11874_v2 = vpop.f32.mrb[84].mxu0  ;;  %v11877_v34 = vmul.f32 %v9969_v40, %v11191_v48 }
 0x1fc   : > { %15234 = vst [vmem:[#allocation95_spill] sm:$0xff] %v11874_v2  ;;  %9980 = vrsqrt.f32 %v3161_v31  ;;  %3250 = vrot.lane.b32.xlu1 %v11872_v27, %s15111_s27  ;;  %v3143_v26 = vpop.f32.mrb[92].mxu1  ;;  %v11881_v45 = vpop.f32.mrb[85].mxu0 }
 0x1fd   : > { %15235 = vst [vmem:[#allocation96_spill] sm:$0xff] %v11877_v34  ;;  %15236 = vst [vmem:[#allocation97_spill] sm:$0xff] %v11881_v45  ;;  %v9971_v19 = vpop.eup %9970  ;;  %v3164_v46 = vmax.f32 %v3143_v26, 1e-24  ;;  %v3145_v14 = vpop.f32.mrb[93].mxu1 }
 0x1fe   : > { %v9973_v21 = vpop.eup %9972  ;;  %v3165_v57 = vmax.f32 %v3145_v14, 1e-24  ;;  %v11884_v44 = vmul.f32 %v9971_v19, %v11203_v53 }
 0x1ff   : > { %9982 = vrsqrt.f32 %v3164_v46  ;;  %v11886_v50 = vpop.f32.mrb[86].mxu0  ;;  %v11889_v48 = vmul.f32 %v9973_v21, %v11211_v58 }
 0x200   : > { %15237 = vst [vmem:[#allocation98_spill] sm:$0xff] %v11886_v50  ;;  %9984 = vrsqrt.f32 %v3165_v57  ;;  %3252 = vrot.lane.b32.xlu1 %v11884_v44, %s15111_s27  ;;  %v3149_v31 = vpop.f32.mrb[94].mxu1  ;;  %v11893_v5 = vpop.f32.mrb[87].mxu0  ;;  %s14932_s27 = scalar_lea.vmem %s15019_s22, %s15438_s4 }
 0x201   : > { %15238 = vst [vmem:[#allocation99_spill] sm:$0xff] %v11889_v48  ;;  %15239 = vst [vmem:[#allocation100_spill] sm:$0xff] %v11893_v5  ;;  %v9975_v40 = vpop.eup %9974  ;;  %v3168_v26 = vmax.f32 %v3149_v31, 1e-24  ;;  %v3151_v2 = vpop.f32.mrb[95].mxu1 }
 0x202   : > { %v9977_v14 = vpop.eup %9976  ;;  %v3169_v45 = vmax.f32 %v3151_v2, 1e-24  ;;  %v11896_v53 = vmul.f32 %v9975_v40, %v11227_v4 }
 0x203   : > { %9986 = vrsqrt.f32 %v3168_v26  ;;  %v11898_v19 = vpop.f32.mrb[88].mxu0  ;;  %v11901_v58 = vmul.f32 %v9977_v14, %v11231_v7 }
 0x204   : > { %15240 = vst [vmem:[#allocation101_spill] sm:$0xff] %v11896_v53  ;;  %15241 = vst [vmem:[#allocation102_spill] sm:$0xff] %v11898_v19  ;;  %9988 = vrsqrt.f32 %v3169_v45  ;;  %v11903_v57 = vpop.f32.mrb[89].mxu0 }
 0x205   : > { %15242 = vst [vmem:[#allocation103_spill] sm:$0xff] %v11901_v58  ;;  %15243 = vst [vmem:[#allocation104_spill] sm:$0xff] %v11903_v57  ;;  %v9979_v46 = vpop.eup %9978  ;;  %v2690_v57 = vmax.f32 %v11823_v30, 1e-24  ;;  %v12096_v30 = vld [vmem:[%s15008_s11] sm:$0xff]  }
 0x206   : > { %v9981_v21 = vpop.eup %9980  ;;  %v11906_v50 = vmul.f32 %v9979_v46, %v11247_v16 }
 0x207   : > { %v11908_v31 = vpop.f32.mrb[90].mxu0  ;;  %v11911_v2 = vmul.f32 %v9981_v21, %v11253_v24 }
 0x208   : > { %15244 = vst [vmem:[#allocation105_spill] sm:$0xff] %v11906_v50  ;;  %15245 = vst [vmem:[#allocation106_spill] sm:$0xff] %v11908_v31  ;;  %v11913_v4 = vpop.f32.mrb[91].mxu0 }
 0x209   : > { %15246 = vst [vmem:[#allocation107_spill] sm:$0xff] %v11911_v2  ;;  %15247 = vst [vmem:[#allocation108_spill] sm:$0xff] %v11913_v4  ;;  %v9983_v40 = vpop.eup %9982 }
 0x20a   : > { %v9985_v26 = vpop.eup %9984  ;;  %v11916_v7 = vmul.f32 %v9983_v40, %v11268_v36 }
 0x20b   : > { %v11918_v45 = vpop.f32.mrb[92].mxu0  ;;  %v11921_v14 = vmul.f32 %v9985_v26, %v11272_v43 }
 0x20c   : > { %15248 = vst [vmem:[#allocation109_spill] sm:$0xff] %v11916_v7  ;;  %15249 = vst [vmem:[#allocation110_spill] sm:$0xff] %v11918_v45  ;;  %v11923_v58 = vpop.f32.mrb[93].mxu0 }
 0x20d   : > { %15250 = vst [vmem:[#allocation111_spill] sm:$0xff] %v11921_v14  ;;  %15251 = vst [vmem:[#allocation112_spill] sm:$0xff] %v11923_v58  ;;  %v9987_v16 = vpop.eup %9986 }
 0x20e   : > { %v9989_v46 = vpop.eup %9988  ;;  %v11926_v50 = vmul.f32 %v9987_v16, %v11289_v55 }
 0x20f   : > { %v11928_v24 = vpop.f32.mrb[94].mxu0  ;;  %v11931_v21 = vmul.f32 %v9989_v46, %v11296_v61 }
 0x210   : > { %15252 = vst [vmem:[#allocation113_spill] sm:$0xff] %v11926_v50  ;;  %15253 = vst [vmem:[#allocation114_spill] sm:$0xff] %v11928_v24  ;;  %v11933_v2 = vpop.f32.mrb[95].mxu0  ;;  %v2687_v24 = vmax.f32 %v11821_v60, 1e-24  ;;  %v12051_v60 = vld [vmem:[%s15007_s10 + $0x28] sm:$0xff] }
 0x211   : > { %15254 = vst [vmem:[#allocation115_spill] sm:$0xff] %v11931_v21  ;;  %15255 = vst [vmem:[#allocation116_spill] sm:$0xff] %v11933_v2  ;;  %v2689_v2 = vmax.f32 %v11825_v62, 1e-24 }
 0x213   : > { %v11935_v36 = vpop.f32.mrb[96].mxu0 }
 0x214   : > { %15256 = vst [vmem:[#allocation117_spill] sm:$0xff] %v11935_v36  ;;  %v11937_v40 = vpop.f32.mrb[97].mxu0 }
 0x215   : > { %15257 = vst [vmem:[#allocation118_spill] sm:$0xff] %v11937_v40 }
 0x217   : > { %v11939_v43 = vpop.f32.mrb[98].mxu0 }
 0x218   : > { %15258 = vst [vmem:[#allocation119_spill] sm:$0xff] %v11939_v43  ;;  %v11941_v26 = vpop.f32.mrb[99].mxu0 }
 0x219   : > { %15259 = vst [vmem:[#allocation120_spill] sm:$0xff] %v11941_v26 }
 0x21b   : > { %v11943_v14 = vpop.f32.mrb[100].mxu0 }
 0x21c   : > { %15260 = vst [vmem:[#allocation121_spill] sm:$0xff] %v11943_v14  ;;  %v11945_v7 = vpop.f32.mrb[101].mxu0 }
 0x21d   : > { %15261 = vst [vmem:[#allocation122_spill] sm:$0xff] %v11945_v7 }
 0x21f   : > { %v11947_v55 = vpop.f32.mrb[102].mxu0 }
 0x220   : > { %15262 = vst [vmem:[#allocation123_spill] sm:$0xff] %v11947_v55  ;;  %v11949_v16 = vpop.f32.mrb[103].mxu0 }
 0x221   : > { %15263 = vst [vmem:[#allocation124_spill] sm:$0xff] %v11949_v16 }
 0x223   : > { %v11951_v61 = vpop.f32.mrb[104].mxu0 }
 0x224   : > { %15264 = vst [vmem:[#allocation125_spill] sm:$0xff] %v11951_v61  ;;  %v11953_v46 = vpop.f32.mrb[105].mxu0 }
 0x225   : > { %15265 = vst [vmem:[#allocation126_spill] sm:$0xff] %v11953_v46 }
 0x227   : > { %v11955_v21 = vpop.f32.mrb[106].mxu0 }
 0x228   : > { %15266 = vst [vmem:[#allocation127_spill] sm:$0xff] %v11955_v21  ;;  %v11957_v36 = vpop.f32.mrb[107].mxu0 }
 0x229   : > { %15267 = vst [vmem:[#allocation128_spill] sm:$0xff] %v11957_v36 }
 0x22b   : > { %v11959_v40 = vpop.f32.mrb[108].mxu0 }
 0x22c   : > { %15268 = vst [vmem:[#allocation129_spill] sm:$0xff] %v11959_v40  ;;  %v11961_v43 = vpop.f32.mrb[109].mxu0 }
 0x22d   : > { %15269 = vst [vmem:[#allocation130_spill] sm:$0xff] %v11961_v43 }
 0x22f   : > { %v11963_v26 = vpop.f32.mrb[110].mxu0 }
 0x230   : > { %15270 = vst [vmem:[#allocation131_spill] sm:$0xff] %v11963_v26  ;;  %v11965_v14 = vpop.f32.mrb[111].mxu0 }
 0x231   : > { %15271 = vst [vmem:[#allocation132_spill] sm:$0xff] %v11965_v14 }
 0x233   : > { %v11967_v7 = vpop.f32.mrb[112].mxu0 }
 0x234   : > { %15272 = vst [vmem:[#allocation133_spill] sm:$0xff] %v11967_v7  ;;  %v11969_v55 = vpop.f32.mrb[113].mxu0 }
 0x235   : > { %15273 = vst [vmem:[#allocation134_spill] sm:$0xff] %v11969_v55 }
 0x237   : > { %v11971_v16 = vpop.f32.mrb[114].mxu0 }
 0x238   : > { %15274 = vst [vmem:[#allocation135_spill] sm:$0xff] %v11971_v16  ;;  %v11973_v61 = vpop.f32.mrb[115].mxu0 }
 0x239   : > { %15275 = vst [vmem:[#allocation136_spill] sm:$0xff] %v11973_v61 }
 0x23b   : > { %v11975_v46 = vpop.f32.mrb[116].mxu0 }
 0x23c   : > { %15276 = vst [vmem:[#allocation137_spill] sm:$0xff] %v11975_v46  ;;  %v11977_v21 = vpop.f32.mrb[117].mxu0 }
 0x23d   : > { %15277 = vst [vmem:[#allocation138_spill] sm:$0xff] %v11977_v21 }
 0x23f   : > { %v11979_v36 = vpop.f32.mrb[118].mxu0 }
 0x240   : > { %15278 = vst [vmem:[#allocation139_spill] sm:$0xff] %v11979_v36  ;;  %v11981_v40 = vpop.f32.mrb[119].mxu0  ;;  %v2685_v36 = vmax.f32 %v11817_v18, 1e-24 }
 0x241   : > { %15279 = vst [vmem:[#allocation140_spill] sm:$0xff] %v11981_v40 }
 0x242   : > { %9990 = vrsqrt.f32 %v2685_v36 }
 0x243   : > { %v11983_v43 = vpop.f32.mrb[120].mxu0 }
 0x244   : > { %15280 = vst [vmem:[#allocation141_spill] sm:$0xff] %v11983_v43  ;;  %v11985_v26 = vpop.f32.mrb[121].mxu0  ;;  %v3202_v43 = vld [vmem:[%s15007_s10] sm:$0xff] }
 0x245   : > { %15281 = vst [vmem:[#allocation142_spill] sm:$0xff] %v11985_v26 }
 0x247   : > { %v11987_v14 = vpop.f32.mrb[122].mxu0 }
 0x248   : > { %15282 = vst [vmem:[#allocation143_spill] sm:$0xff] %v11987_v14  ;;  %v11989_v7 = vpop.f32.mrb[123].mxu0  ;;  %v12006_v14 = vld [vmem:[%s15007_s10 + $0x8] sm:$0xff] }
 0x249   : > { %15283 = vst [vmem:[#allocation144_spill] sm:$0xff] %v11989_v7 }
 0x24b   : > { %v11991_v55 = vpop.f32.mrb[124].mxu0 }
 0x24c   : > { %15284 = vst [vmem:[#allocation145_spill] sm:$0xff] %v11991_v55  ;;  %v11993_v16 = vpop.f32.mrb[125].mxu0 }
 0x24d   : > { %15285 = vst [vmem:[#allocation146_spill] sm:$0xff] %v11993_v16  ;;  %v12021_v16 = vld [vmem:[%s15007_s10 + $0x18] sm:$0xff] }
 0x24f   : > { %v11995_v61 = vpop.f32.mrb[126].mxu0 }
 0x250   : > { %15286 = vst [vmem:[#allocation147_spill] sm:$0xff] %v11995_v61  ;;  %v11997_v46 = vpop.f32.mrb[127].mxu0  ;;  %v2686_v61 = vmax.f32 %v11815_v47, 1e-24 }
 0x251   : > { %15287 = vst [vmem:[#allocation148_spill] sm:$0xff] %v11997_v46  ;;  %v3204_v46 = vld [vmem:[%s15007_s10 + $0x10] sm:$0xff] }
 0x252   : > { %9992 = vrsqrt.f32 %v2686_v61  ;;  %v12071_v61 = vld [vmem:[%s15006_s9] ss:$0 sm:$0xff] }
 0x253   : > { %9994 = vrsqrt.f32 %v2687_v24 }
 0x266   : > { %v3247_v40 = vpop.permute.xlu0 %3246 }
 0x267   : > { %v3259_v55 = vsel %vm3258_vm1, %v11848_v42, %v3247_v40  ;;  %v12013_v18 = vsel %vm3258_vm1, %v3247_v40, %v11848_v42 }
 0x268   : > { %v3263_v26 = vmul.f32 %v3259_v55, %v3202_v43  ;;  %v3264_v21 = vmul.f32 %v3259_v55, %v12006_v14  ;;  %v12031_v36 = vmul.f32 %v12013_v18, %v3202_v43  ;;  %v2688_v43 = vmax.f32 %v11819_v38, 1e-24  ;;  %v12064_v38 = vld [vmem:[%s15007_s10 + $0x38] sm:$0xff] }
 0x26a   : > { %v3249_v7 = vpop.permute.xlu0 %3248  ;;  %9996 = vrsqrt.f32 %v2688_v43 }
 0x26b   : > { %v3260_v47 = vsel %vm3258_vm1, %v11860_v11, %v3249_v7  ;;  %v12028_v42 = vsel %vm3258_vm1, %v3249_v7, %v11860_v11  ;;  %v12045_v7 = vld [vmem:[%s15007_s10 + $0x20] sm:$0xff]  ;;  %9998 = vrsqrt.f32 %v2689_v2 }
 0x26c   : > { %v3265_v40 = vmul.f32 %v3260_v47, %v3204_v46  ;;  %v3266_v50 = vmul.f32 %v3260_v47, %v12021_v16  ;;  %v12035_v53 = vmul.f32 %v12028_v42, %v3204_v46  ;;  %10000 = vrsqrt.f32 %v2690_v57  ;;  %v12113_v57 = vld [vmem:[%s15008_s11 + $0x8] sm:$0xff]  }
 0x26e   : > { %v9841_v55 = vpack.c.bf16 %v3265_v40, %v3263_v26  ;;  %v12040_v45 = vpop.permute.xlu1 %3250  ;;  %v9839_v11 = vpack.c.bf16 %v3266_v50, %v3264_v21  ;;  %v12059_v50 = vld [vmem:[%s15007_s10 + $0x30] sm:$0xff]  ;;  %v9991_v21 = vpop.eup %9990 }
 0x26f   : > { %v3261_v26 = vsel %vm3258_vm1, %v11872_v27, %v12040_v45  ;;  %v2820_v58 = vmul.f32 %v9991_v21, %v12071_v61  ;;  %v9993_v19 = vpop.eup %9992  ;;  %v12129_v21 = vld [vmem:[%s15008_s11 + $0x10] sm:$0xff]  }
 0x270   : > { %9840 = vmatprep.subr.bf16.mxu1 %v9839_v11  ;;  %v3267_v47 = vmul.f32 %v3261_v26, %v12045_v7  ;;  %v3268_v40 = vmul.f32 %v3261_v26, %v12051_v60  ;;  %v12087_v26 = vld [vmem:[%s15008_s11 + $0x40] sm:$0xff]   ;;  %v2821_v62 = vmul.f32 %v9993_v19, %v12071_v61  ;;  %v9995_v43 = vpop.eup %9994  ;;  %v12104_v19 = vld [vmem:[%s15008_s11 + $0x48] sm:$0xff]  }
 0x271   : > { %9842 = vmatpush1.bf16.msra.mxu1 %v9841_v55  ;;  %v2884_v5 = vmul.f32 %v2820_v58, %v11143_v17  ;;  %v2692_v58 = vmax.f32 %v11827_v13, 1e-24 }
 0x272   : > { %v12066_v24 = vpop.permute.xlu1 %3252  ;;  %v2885_v17 = vmul.f32 %v2821_v62, %v11140_v15 }
 0x273   : > { %v3262_v46 = vsel %vm3258_vm1, %v11884_v44, %v12066_v24 }
 0x274   : > { %v3269_v55 = vmul.f32 %v3262_v46, %v12059_v50  ;;  %v3270_v11 = vmul.f32 %v3262_v46, %v12064_v38  ;;  %v12137_v46 = vld [vmem:[%s15008_s11 + $0x58] sm:$0xff]  }
 0x276   : > { %v9845_v31 = vpack.c.bf16 %v3269_v55, %v3267_v47  ;;  %v9843_v4 = vpack.c.bf16 %v3270_v11, %v3268_v40  ;;  %v12145_v55 = vld [vmem:[%s15008_s11 + $0x18] sm:$0xff]   ;;  %v12153_v11 = vld [vmem:[%s15008_s11 + $0x60] sm:$0xff]  }
 0x278   : > { %9844 = vmatprep.subr.bf16.mxu1 %v9843_v4  ;;  %v2691_v4 = vmax.f32 %v11829_v12, 1e-24  ;;  %v2822_v12 = vmul.f32 %v9995_v43, %v12071_v61 }
 0x279   : > { %9846 = vmatpush1.bf16.msra.mxu1 %v9845_v31  ;;  %v12121_v31 = vld [vmem:[%s15008_s11 + $0x50] sm:$0xff]  }
 0x27a   : > { %8835 = vmatprep.subr.bf16.mxu1 %v12087_v26  ;;  %10002 = vrsqrt.f32 %v2691_v4  ;;  %v2886_v15 = vmul.f32 %v2822_v12, %v11158_v25  ;;  %v12161_v4 = vld [vmem:[%s15008_s11 + $0x20] sm:$0xff]  }
 0x27b   : > { %10004 = vrsqrt.f32 %v2692_v58  ;;  %v12177_v58 = vld [vmem:[%s15008_s11 + $0x28] sm:$0xff]  }
 0x27c   : > { %8444 = vmatmul.mubr.msk.f32.vlgmr.msra.gmra.mrb[96].mxu1 %vm796_vm0, %v2884_v5  ;;  %v9997_v5 = vpop.eup %9996 }
 0x27d   : > { %8836 = vmatpush3.bf16.msra.mxu1 %v12096_v30  ;;  %3381 = vmatprep.mubr.f32.mxu1 %v15159_v28  ;;  %v2823_v13 = vmul.f32 %v9997_v5, %v12071_v61  ;;  %v9999_v2 = vpop.eup %9998 }
 0x27e   : > { %8837 = vmatprep.subr.bf16.mxu1 %v12104_v19  ;;  %v2824_v47 = vmul.f32 %v9999_v2, %v12071_v61  ;;  %v10001_v40 = vpop.eup %10000  ;;  %v3777_v2 = vmul.f32 %v12028_v42, %v12021_v16  ;;  %v12205_v16 = vld [vmem:[%s15008_s11 + $0x78] sm:$0xff]  }
 0x27f   : > { %v2887_v25 = vmul.f32 %v2823_v13, %v11154_v23  ;;  %v2825_v62 = vmul.f32 %v10001_v40, %v12071_v61  ;;  %v3271_v40 = vld [vmem:[%s15288_s0] sm:$0xff] }
 0x280   : > { %8445 = vmatmul.mubr.msk.f32.gmra.mrb[98].mxu1 %vm796_vm0, %v2885_v17  ;;  %v2888_v23 = vmul.f32 %v2824_v47, %v11182_v41  ;;  %v12169_v17 = vld [vmem:[%s15008_s11 + $0x68] sm:$0xff]  }
 0x281   : > { %8838 = vmatpush3.bf16.msra.mxu1 %v12113_v57  ;;  %3387 = vmatprep.mubr.f32.mxu1 %v15159_v28  ;;  %v2889_v41 = vmul.f32 %v2825_v62, %v11174_v35 }
 0x282   : > { %8839 = vmatprep.subr.bf16.mxu1 %v12121_v31 }
 0x284   : > { %8446 = vmatmul.mubr.msk.f32.gmra.mrb[100].mxu1 %vm796_vm0, %v2886_v15  ;;  %v10003_v43 = vpop.eup %10002  ;;  %v12185_v15 = vld [vmem:[%s15008_s11 + $0x70] sm:$0xff]  }
 0x285   : > { %8840 = vmatpush3.bf16.msra.mxu1 %v12129_v21  ;;  %3393 = vmatprep.mubr.f32.mxu1 %v15159_v28  ;;  %v2826_v12 = vmul.f32 %v10003_v43, %v12071_v61  ;;  %v10005_v5 = vpop.eup %10004  ;;  %v3273_v43 = vld [vmem:[%s15288_s0 + $0x10] sm:$0xff] }
 0x286   : > { %8841 = vmatprep.subr.bf16.mxu1 %v12137_v46  ;;  %v2827_v13 = vmul.f32 %v10005_v5, %v12071_v61 }
 0x287   : > { %v2890_v35 = vmul.f32 %v2826_v12, %v11198_v51  ;;  %v3775_v51 = vmul.f32 %v12013_v18, %v12006_v14 }
 0x288   : > { %8447 = vmatmul.mubr.msk.f32.gmra.mrb[102].mxu1 %vm796_vm0, %v2887_v25  ;;  %v12195_v25 = vld [vmem:[%s15008_s11 + $0x30] sm:$0xff]   ;;  %v2891_v47 = vmul.f32 %v2827_v13, %v11194_v49  ;;  %v3272_v49 = vld [vmem:[%s15288_s0 + $0x8] sm:$0xff] }
 0x289   : > { %8842 = vmatpush3.bf16.msra.mxu1 %v12145_v55  ;;  %3399 = vmatprep.mubr.f32.mxu1 %v15159_v28  ;;  %v9847_v42 = vpack.c.bf16 %v3777_v2, %v3775_v51  ;;  %v3275_v2 = vld [vmem:[%s15288_s0 + $0x20] sm:$0xff]  ;;  %v3276_v51 = vld [vmem:[%s15288_s0 + $0x28] sm:$0xff] }
 0x28a   : > { %8843 = vmatprep.subr.bf16.mxu1 %v12153_v11 }
 0x28c   : > { %8448 = vmatmul.mubr.msk.f32.gmra.mrb[104].mxu1 %vm796_vm0, %v2888_v23 }
 0x28d   : > { %8844 = vmatpush3.bf16.msra.mxu1 %v12161_v4  ;;  %3405 = vmatprep.mubr.f32.mxu1 %v15159_v28 }
 0x28e   : > { %8845 = vmatprep.subr.bf16.mxu1 %v12169_v17 }
 0x290   : > { %8449 = vmatmul.mubr.msk.f32.gmra.mrb[106].mxu1 %vm796_vm0, %v2889_v41 }
 0x291   : > { %8846 = vmatpush3.bf16.msra.mxu1 %v12177_v58  ;;  %3411 = vmatprep.mubr.f32.mxu1 %v15159_v28 }
 0x292   : > { %8847 = vmatprep.subr.bf16.mxu1 %v12185_v15 }
 0x294   : > { %8450 = vmatmul.mubr.msk.f32.gmra.mrb[108].mxu1 %vm796_vm0, %v2890_v35 }
 0x295   : > { %8848 = vmatpush3.bf16.msra.mxu1 %v12195_v25  ;;  %3417 = vmatprep.mubr.f32.mxu1 %v15159_v28 }
 0x296   : > { %8849 = vmatprep.subr.bf16.mxu1 %v12205_v16 }
 0x298   : > { %8451 = vmatmul.mubr.msk.f32.gmra.mrb[110].mxu1 %vm796_vm0, %v2891_v47 }
 0x299   : > { %8850 = vmatpush3.bf16.msra.mxu1 %v11529_v3  ;;  %v3274_v3 = vld [vmem:[%s15288_s0 + $0x18] sm:$0xff] }
 0x29a   : > { %9848 = vmatprep.subr.bf16.mxu1 %v9847_v42 }
 0x34f   : > { %v3377_v14 = vpop.f32.mrb[96].mxu1 }
 0x350   : > { %v12216_v18 = vadd.f32 %v3377_v14, %v3271_v40  ;;  %v3379_v23 = vpop.f32.mrb[97].mxu1 }
 0x351   : > { %v12218_v62 = vadd.f32 %v3379_v23, %v3272_v49  ;;  %v3277_v23 = vld [vmem:[%s15288_s0 + $0x30] sm:$0xff] }
 0x353   : > { %v3383_v41 = vpop.f32.mrb[98].mxu1  ;;  %v3424_v12 = vmax.f32 %v12216_v18, %v12218_v62 }
 0x354   : > { %v12228_v5 = vadd.f32 %v3383_v41, %v3273_v43  ;;  %v3385_v35 = vpop.f32.mrb[99].mxu1  ;;  %v3278_v43 = vld [vmem:[%s15288_s0 + $0x38] sm:$0xff] }
 0x355   : > { %v3386_v13 = vadd.f32 %v3385_v35, %v3274_v3  ;;  %3425 = vmax.xlane.f32.xlu0 %v3424_v12 }
 0x357   : > { %v3389_v47 = vpop.f32.mrb[100].mxu1  ;;  %v3427_v42 = vmax.f32 %v12228_v5, %v3386_v13 }
 0x358   : > { %v12237_v40 = vadd.f32 %v3389_v47, %v3275_v2  ;;  %v3391_v49 = vpop.f32.mrb[101].mxu1  ;;  %v3279_v2 = vld [vmem:[%s15288_s0 + $0x40] sm:$0xff] }
 0x359   : > { %v3392_v14 = vadd.f32 %v3391_v49, %v3276_v51  ;;  %3428 = vmax.xlane.f32.xlu1 %v3427_v42  ;;  %v3280_v51 = vld [vmem:[%s15288_s0 + $0x48] sm:$0xff] }
 0x35b   : > { %v3395_v3 = vpop.f32.mrb[102].mxu1  ;;  %v3430_v41 = vmax.f32 %v12237_v40, %v3392_v14 }
 0x35c   : > { %v3396_v12 = vadd.f32 %v3395_v3, %v3277_v23  ;;  %v3397_v35 = vpop.f32.mrb[103].mxu1  ;;  %v3281_v23 = vld [vmem:[%s15288_s0 + $0x50] sm:$0xff] }
 0x35d   : > { %v3398_v48 = vadd.f32 %v3397_v35, %v3278_v43  ;;  %3431 = vmax.xlane.f32.xlu0 %v3430_v41  ;;  %v3282_v43 = vld [vmem:[%s15288_s0 + $0x58] sm:$0xff] }
 0x35f   : > { %v3401_v47 = vpop.f32.mrb[104].mxu1  ;;  %v3433_v42 = vmax.f32 %v3396_v12, %v3398_v48 }
 0x360   : > { %v12252_v49 = vadd.f32 %v3401_v47, %v3279_v2  ;;  %v3403_v34 = vpop.f32.mrb[105].mxu1 }
 0x361   : > { %v12254_v22 = vadd.f32 %v3403_v34, %v3280_v51  ;;  %3434 = vmax.xlane.f32.xlu0 %v3433_v42  ;;  %v3283_v34 = vld [vmem:[%s15288_s0 + $0x60] sm:$0xff]  ;;  %v3284_v51 = vld [vmem:[%s15288_s0 + $0x68] sm:$0xff] }
 0x363   : > { %v3407_v3 = vpop.f32.mrb[106].mxu1  ;;  %v3436_v41 = vmax.f32 %v12252_v49, %v12254_v22 }
 0x364   : > { %v12264_v35 = vadd.f32 %v3407_v3, %v3281_v23  ;;  %v3409_v2 = vpop.f32.mrb[107].mxu1 }
 0x365   : > { %v12266_v47 = vadd.f32 %v3409_v2, %v3282_v43  ;;  %3437 = vmax.xlane.f32.xlu1 %v3436_v41  ;;  %v3285_v43 = vld [vmem:[%s15288_s0 + $0x70] sm:$0xff]  ;;  %v3286_v41 = vld [vmem:[%s15288_s0 + $0x78] sm:$0xff] }
 0x367   : > { %v3413_v42 = vpop.f32.mrb[108].mxu1  ;;  %v3439_v32 = vmax.f32 %v12264_v35, %v12266_v47 }
 0x368   : > { %v12276_v8 = vadd.f32 %v3413_v42, %v3283_v34  ;;  %v3415_v23 = vpop.f32.mrb[109].mxu1 }
 0x369   : > { %v12278_v3 = vadd.f32 %v3415_v23, %v3284_v51  ;;  %3440 = vmax.xlane.f32.xlu0 %v3439_v32 }
 0x36b   : > { %v3419_v2 = vpop.f32.mrb[110].mxu1  ;;  %v3442_v6 = vmax.f32 %v12276_v8, %v12278_v3 }
 0x36c   : > { %v12288_v10 = vadd.f32 %v3419_v2, %v3285_v43  ;;  %v3421_v34 = vpop.f32.mrb[111].mxu1 }
 0x36d   : > { %v12290_v42 = vadd.f32 %v3421_v34, %v3286_v41  ;;  %3443 = vmax.xlane.f32.xlu1 %v3442_v6 }
 0x36f   : > { %v3445_v32 = vmax.f32 %v12288_v10, %v12290_v42 }
 0x371   : > { %3446 = vmax.xlane.f32.xlu0 %v3445_v32 }
 0x3e2   : > { %v3426_v51 = vpop.xlane.xlu0 %3425 }
 0x3e3   : > { %v3448_v23 = vsub.f32 %v12216_v18, %v3426_v51  ;;  %v3449_v52 = vsub.f32 %v12218_v62, %v3426_v51 }
 0x3e5   : > { %v3464_v20 = vmul.f32 1.442695, %v3448_v23  ;;  %v3466_v59 = vmul.f32 1.442695, %v3449_v52 }
 0x3e6   : > { %v3429_v33 = vpop.xlane.xlu1 %3428 }
 0x3e7   : > { %v3450_v37 = vsub.f32 %v12228_v5, %v3429_v33  ;;  %v3451_v43 = vsub.f32 %v3386_v13, %v3429_v33  ;;  %10006 = vpow2.f32 %v3464_v20 }
 0x3e8   : > { %10008 = vpow2.f32 %v3466_v59  ;;  %v3773_v59 = vsel %vm3258_vm1, %v12066_v24, %v11884_v44 }
 0x3e9   : > { %v3468_v2 = vmul.f32 1.442695, %v3450_v37  ;;  %v3470_v41 = vmul.f32 1.442695, %v3451_v43 }
 0x3ea   : > { %v3432_v6 = vpop.xlane.xlu0 %3431 }
 0x3eb   : > { %10010 = vpow2.f32 %v3468_v2  ;;  %v3452_v34 = vsub.f32 %v12237_v40, %v3432_v6  ;;  %v3453_v32 = vsub.f32 %v3392_v14, %v3432_v6  ;;  %v3781_v14 = vmul.f32 %v3773_v59, %v12064_v38 }
 0x3ec   : > { %10012 = vpow2.f32 %v3470_v41  ;;  %v3780_v41 = vmul.f32 %v3773_v59, %v12059_v50 }
 0x3ed   : > { %v3472_v63 = vmul.f32 1.442695, %v3452_v34  ;;  %v3474_v18 = vmul.f32 1.442695, %v3453_v32 }
 0x3ee   : > { %v3435_v39 = vpop.xlane.xlu0 %3434 }
 0x3ef   : > { %v3454_v62 = vsub.f32 %v3396_v12, %v3435_v39  ;;  %v3455_v51 = vsub.f32 %v3398_v48, %v3435_v39  ;;  %10014 = vpow2.f32 %v3472_v63  ;;  %v3772_v63 = vsel %vm3258_vm1, %v12040_v45, %v11872_v27 }
 0x3f0   : > { %10016 = vpow2.f32 %v3474_v18 }
 0x3f1   : > { %v3476_v52 = vmul.f32 1.442695, %v3454_v62  ;;  %v3478_v23 = vmul.f32 1.442695, %v3455_v51  ;;  %v10007_v20 = vpop.eup %10006 }
 0x3f2   : > { %v3438_v33 = vpop.xlane.xlu1 %3437  ;;  %v10009_v13 = vpop.eup %10008 }
 0x3f3   : > { %10018 = vpow2.f32 %v3476_v52  ;;  %v3456_v37 = vsub.f32 %v12252_v49, %v3438_v33  ;;  %v3457_v5 = vsub.f32 %v12254_v22, %v3438_v33  ;;  %v3779_v22 = vmul.f32 %v3772_v63, %v12051_v60 }
 0x3f4   : > { %10020 = vpow2.f32 %v3478_v23 }
 0x3f5   : > { %v10011_v40 = vpop.eup %10010  ;;  %v3480_v39 = vmul.f32 1.442695, %v3456_v37  ;;  %v3482_v12 = vmul.f32 1.442695, %v3457_v5  ;;  %v9851_v27 = vpack.c.bf16 %v3781_v14, %v3779_v22  ;;  %v2693_v5 = vmax.f32 %v11833_v56, 1e-24 }
 0x3f6   : > { %v10013_v48 = vpop.eup %10012  ;;  %v3441_v43 = vpop.xlane.xlu0 %3440  ;;  %v3496_v2 = vpack.c.bf16 %v10011_v40, %v10007_v20  ;;  %v15290_v22 = vld [vmem:[#allocation86_spill] sm:$0xff] }
 0x3f7   : > { %v3458_v44 = vsub.f32 %v12264_v35, %v3441_v43  ;;  %v3459_v24 = vsub.f32 %v12266_v47, %v3441_v43  ;;  %v3497_v49 = vpack.c.bf16 %v10013_v48, %v10009_v13  ;;  %10022 = vpow2.f32 %v3480_v39 }
 0x3f8   : > { %10024 = vpow2.f32 %v3482_v12  ;;  %v3778_v35 = vmul.f32 %v3772_v63, %v12045_v7  ;;  %v15289_v47 = vpack.c.bf16 %v12035_v53, %v12031_v36  ;;  %v4089_v53 = vmul.bf16 %v12087_v26, %v11472_v0 }
 0x3f9   : > { %v3484_v6 = vmul.f32 1.442695, %v3458_v44  ;;  %v3486_v34 = vmul.f32 1.442695, %v3459_v24  ;;  %3632 = vmatprep.mubr.bf16.mxu1 %v3497_v49  ;;  %3713 = vmatprep.mubr.bf16.mxu0 %v3497_v49  ;;  %v10015_v38 = vpop.eup %10014  ;;  %v2694_v63 = vmax.f32 %v11831_v9, 1e-24 }
 0x3fa   : > { %3633 = vmatmul.mubr.bf16.vlgmr.msra.gmra.mrb[112].mxu1 %v3496_v2  ;;  %3714 = vmatmul.mubr.bf16.vlgmr.msra.gmra.mrb[128].mxu0 %v3496_v2  ;;  %v3444_v45 = vpop.xlane.xlu1 %3443  ;;  %v10017_v32 = vpop.eup %10016  ;;  %v9853_v62 = vpack.c.bf16 %v3780_v41, %v3778_v35  ;;  %v2695_v48 = vmax.f32 %v11837_v29, 1e-24  ;;  %v2696_v2 = vmax.f32 %v11835_v54, 1e-24  ;;  %v2697_v29 = vmax.f32 %v11841_v1, 1e-24 }
 0x3fb   : > { %10026 = vpow2.f32 %v3484_v6  ;;  %9850 = vmatpush1.bf16.msra.mxu1 %v15289_v47  ;;  %v3460_v60 = vsub.f32 %v12276_v8, %v3444_v45  ;;  %v3461_v50 = vsub.f32 %v12278_v3, %v3444_v45  ;;  %8916 = vmatpush3.bf16.msra.mxu0 %v12096_v30  ;;  %v2698_v41 = vmax.f32 %v15290_v22, 1e-24  ;;  %v12346_v6 = vld [vmem:[%s15008_s11 + $0x38] sm:$0xff]   ;;  %v15291_v1 = vld [vmem:[#allocation4_spill] sm:$0xff] }
 0x3fc   : > { %10028 = vpow2.f32 %v3486_v34  ;;  %9852 = vmatprep.subr.bf16.mxu1 %v9851_v27  ;;  %8917 = vmatprep.subr.bf16.mxu0 %v12104_v19  ;;  %v15292_v35 = vld [vmem:[#allocation24_spill] sm:$0xff] }
 0x3fd   : > { %v10019_v18 = vpop.eup %10018  ;;  %v3488_v51 = vmul.f32 1.442695, %v3460_v60  ;;  %v3490_v52 = vmul.f32 1.442695, %v3461_v50  ;;  %v4090_v47 = vmul.bf16 %v12104_v19, %v15292_v35  ;;  %v15293_v60 = vld [vmem:[#allocation88_spill] sm:$0xff] }
 0x3fe   : > { %v10021_v7 = vpop.eup %10020  ;;  %v3447_v36 = vpop.xlane.xlu0 %3446  ;;  %v3498_v23 = vpack.c.bf16 %v10019_v18, %v10015_v38  ;;  %v4081_v38 = vmul.bf16 %v12096_v30, %v11472_v0  ;;  %v2699_v50 = vmax.f32 %v15293_v60, 1e-24  ;;  %v4082_v30 = vmul.bf16 %v12113_v57, %v15292_v35 }
 0x3ff   : > { %9854 = vmatpush1.bf16.msra.mxu1 %v9853_v62  ;;  %v3462_v8 = vsub.f32 %v12288_v10, %v3447_v36  ;;  %v3463_v3 = vsub.f32 %v12290_v42, %v3447_v36  ;;  %v3499_v33 = vpack.c.bf16 %v10021_v7, %v10017_v32  ;;  %8918 = vmatpush3.bf16.msra.mxu0 %v12113_v57  ;;  %10030 = vpow2.f32 %v3488_v51  ;;  %v15294_v32 = vld [vmem:[#allocation3_spill] sm:$0xff]  ;;  %v15297_v36 = vld [vmem:[#allocation6_spill] sm:$0xff] }
 0x400   : > { %8955 = vmatprep.subr.bf16.mxu1 %v4089_v53  ;;  %8919 = vmatprep.subr.bf16.mxu0 %v12121_v31  ;;  %10032 = vpow2.f32 %v3490_v52  ;;  %v15295_v7 = vld [vmem:[#allocation31_spill] sm:$0xff] }
 0x401   : > { %v3492_v20 = vmul.f32 1.442695, %v3462_v8  ;;  %v3494_v59 = vmul.f32 1.442695, %v3463_v3  ;;  %3640 = vmatprep.mubr.bf16.mxu1 %v3499_v33  ;;  %3721 = vmatprep.mubr.bf16.mxu0 %v3499_v33  ;;  %v10023_v37 = vpop.eup %10022  ;;  %v4091_v19 = vmul.bf16 %v12121_v31, %v15295_v7  ;;  %v15296_v52 = vld [vmem:[#allocation87_spill] sm:$0xff]  ;;  %v4083_v57 = vmul.bf16 %v12129_v21, %v15295_v7  ;;  %v15298_v33 = vld [vmem:[#allocation29_spill] sm:$0xff] }
 0x402   : > { %3641 = vmatmul.mubr.bf16.gmra.mrb[116].mxu1 %v3498_v23  ;;  %3722 = vmatmul.mubr.bf16.gmra.mrb[132].mxu0 %v3498_v23  ;;  %v10025_v10 = vpop.eup %10024  ;;  %v2700_v53 = vmax.f32 %v15296_v52, 1e-24  ;;  %v4092_v31 = vmul.bf16 %v12137_v46, %v15298_v33 }
 0x403   : > { %10034 = vpow2.f32 %v3492_v20  ;;  %8920 = vmatpush3.bf16.msra.mxu0 %v12129_v21  ;;  %v15299_v20 = vld [vmem:[#allocation5_spill] sm:$0xff]  ;;  %v4093_v21 = vmul.bf16 %v12153_v11, %v11472_v0 }
 0x404   : > { %10036 = vpow2.f32 %v3494_v59  ;;  %8921 = vmatprep.subr.bf16.mxu0 %v12137_v46  ;;  %v15300_v46 = vld [vmem:[#allocation8_spill] sm:$0xff] }
 0x405   : > { %v10027_v42 = vpop.eup %10026  ;;  %10038 = vrsqrt.f32 %v2693_v5 }
 0x406   : > { %v10029_v13 = vpop.eup %10028  ;;  %v3500_v40 = vpack.c.bf16 %v10027_v42, %v10023_v37  ;;  %10040 = vrsqrt.f32 %v2694_v63  ;;  %v4085_v63 = vmul.bf16 %v12161_v4, %v11472_v0  ;;  %v4095_v0 = vmul.bf16 %v12185_v15, %v15295_v7 }
 0x407   : > { %v3501_v39 = vpack.c.bf16 %v10029_v13, %v10025_v10  ;;  %8922 = vmatpush3.bf16.msra.mxu0 %v12145_v55  ;;  %10042 = vrsqrt.f32 %v2695_v48  ;;  %v4084_v10 = vmul.bf16 %v12145_v55, %v15298_v33  ;;  %v4094_v55 = vmul.bf16 %v12169_v17, %v15292_v35 }
 0x408   : > { %8923 = vmatprep.subr.bf16.mxu0 %v12153_v11  ;;  %10044 = vrsqrt.f32 %v2696_v2  ;;  %v15301_v11 = vld [vmem:[#allocation7_spill] sm:$0xff]  ;;  %v4088_v2 = vmul.bf16 %v12346_v6, %v15298_v33 }
 0x409   : > { %3648 = vmatprep.mubr.bf16.mxu1 %v3501_v39  ;;  %3729 = vmatprep.mubr.bf16.mxu0 %v3501_v39  ;;  %v10031_v56 = vpop.eup %10030  ;;  %10046 = vrsqrt.f32 %v2697_v29 }
 0x40a   : > { %3649 = vmatmul.mubr.bf16.gmra.mrb[120].mxu1 %v3500_v40  ;;  %3730 = vmatmul.mubr.bf16.gmra.mrb[136].mxu0 %v3500_v40  ;;  %v10033_v14 = vpop.eup %10032  ;;  %10048 = vrsqrt.f32 %v2698_v41 }
 0x40b   : > { %8924 = vmatpush3.bf16.msra.mxu0 %v12161_v4  ;;  %10050 = vrsqrt.f32 %v2699_v50  ;;  %v15302_v4 = vld [vmem:[#allocation10_spill] sm:$0xff] }
 0x40c   : > { %8925 = vmatprep.subr.bf16.mxu0 %v12169_v17  ;;  %10052 = vrsqrt.f32 %v2700_v53 }
 0x40d   : > { %v10035_v9 = vpop.eup %10034 }
 0x40e   : > { %v10037_v12 = vpop.eup %10036  ;;  %v3502_v43 = vpack.c.bf16 %v10035_v9, %v10031_v56 }
 0x40f   : > { %v3503_v44 = vpack.c.bf16 %v10037_v12, %v10033_v14  ;;  %8926 = vmatpush3.bf16.msra.mxu0 %v12177_v58  ;;  %v10039_v24 = vpop.eup %10038  ;;  %v4086_v14 = vmul.bf16 %v12177_v58, %v15292_v35  ;;  %v4087_v12 = vmul.bf16 %v12195_v25, %v15295_v7  ;;  %v4096_v58 = vmul.bf16 %v12205_v16, %v15298_v33 }
 0x410   : > { %8927 = vmatprep.subr.bf16.mxu0 %v12185_v15  ;;  %v2828_v54 = vmul.f32 %v10039_v24, %v12071_v61  ;;  %v10041_v49 = vpop.eup %10040  ;;  %v15303_v15 = vld [vmem:[#allocation9_spill] sm:$0xff] }
 0x411   : > { %3656 = vmatprep.mubr.bf16.mxu1 %v3503_v44  ;;  %3737 = vmatprep.mubr.bf16.mxu0 %v3503_v44  ;;  %v2829_v27 = vmul.f32 %v10041_v49, %v12071_v61  ;;  %v10043_v45 = vpop.eup %10042 }
 0x412   : > { %3657 = vmatmul.mubr.bf16.gmra.mrb[124].mxu1 %v3502_v43  ;;  %3738 = vmatmul.mubr.bf16.gmra.mrb[140].mxu0 %v3502_v43  ;;  %v2892_v34 = vmul.f32 %v2828_v54, %v15291_v1  ;;  %v2830_v62 = vmul.f32 %v10043_v45, %v12071_v61  ;;  %v10045_v51 = vpop.eup %10044 }
 0x413   : > { %3887 = vmatprep.mubr.f32.mxu1 %v15159_v28  ;;  %8928 = vmatpush3.bf16.msra.mxu0 %v12195_v25  ;;  %v2893_v18 = vmul.f32 %v2829_v27, %v15294_v32  ;;  %v2831_v8 = vmul.f32 %v10045_v51, %v12071_v61  ;;  %v10047_v3 = vpop.eup %10046 }
 0x414   : > { %8929 = vmatprep.subr.bf16.mxu0 %v12205_v16  ;;  %v2894_v23 = vmul.f32 %v2830_v62, %v15297_v36  ;;  %v2832_v37 = vmul.f32 %v10047_v3, %v12071_v61  ;;  %v10049_v5 = vpop.eup %10048 }
 0x415   : > { %v2895_v59 = vmul.f32 %v2831_v8, %v15299_v20  ;;  %v2833_v13 = vmul.f32 %v10049_v5, %v12071_v61  ;;  %v10051_v40 = vpop.eup %10050 }
 0x416   : > { %v2896_v42 = vmul.f32 %v2832_v37, %v15300_v46  ;;  %v2834_v56 = vmul.f32 %v10051_v40, %v12071_v61  ;;  %v10053_v48 = vpop.eup %10052 }
 0x417   : > { %8930 = vmatpush3.bf16.msra.mxu0 %v12346_v6  ;;  %v2897_v39 = vmul.f32 %v2833_v13, %v15301_v11  ;;  %v2835_v9 = vmul.f32 %v10053_v48, %v12071_v61 }
 0x418   : > { %v2898_v17 = vmul.f32 %v2834_v56, %v15302_v4 }
 0x419   : > { %v2899_v43 = vmul.f32 %v2835_v9, %v15303_v15 }
 0x41a   : > { %8484 = vmatmul.mubr.msk.f32.vlgmr.msra.gmra.mrb[128].mxu1 %vm796_vm0, %v2892_v34 }
 0x41b   : > { %8956 = vmatpush3.bf16.msra.mxu1 %v4081_v38  ;;  %3893 = vmatprep.mubr.f32.mxu1 %v15159_v28 }
 0x41c   : > { %8957 = vmatprep.subr.bf16.mxu1 %v4090_v47 }
 0x41e   : > { %8485 = vmatmul.mubr.msk.f32.gmra.mrb[130].mxu1 %vm796_vm0, %v2893_v18 }
 0x41f   : > { %8958 = vmatpush3.bf16.msra.mxu1 %v4082_v30  ;;  %3899 = vmatprep.mubr.f32.mxu1 %v15159_v28 }
 0x420   : > { %8959 = vmatprep.subr.bf16.mxu1 %v4091_v19 }
 0x422   : > { %8486 = vmatmul.mubr.msk.f32.gmra.mrb[132].mxu1 %vm796_vm0, %v2894_v23 }
 0x423   : > { %8960 = vmatpush3.bf16.msra.mxu1 %v4083_v57  ;;  %3905 = vmatprep.mubr.f32.mxu1 %v15159_v28 }
 0x424   : > { %8961 = vmatprep.subr.bf16.mxu1 %v4092_v31 }
 0x426   : > { %8487 = vmatmul.mubr.msk.f32.gmra.mrb[134].mxu1 %vm796_vm0, %v2895_v59 }
 0x427   : > { %8962 = vmatpush3.bf16.msra.mxu1 %v4084_v10  ;;  %3911 = vmatprep.mubr.f32.mxu1 %v15159_v28 }
 0x428   : > { %8963 = vmatprep.subr.bf16.mxu1 %v4093_v21 }
 0x42a   : > { %8488 = vmatmul.mubr.msk.f32.gmra.mrb[136].mxu1 %vm796_vm0, %v2896_v42 }
 0x42b   : > { %8964 = vmatpush3.bf16.msra.mxu1 %v4085_v63  ;;  %3917 = vmatprep.mubr.f32.mxu1 %v15159_v28 }
 0x42c   : > { %8965 = vmatprep.subr.bf16.mxu1 %v4094_v55 }
 0x42e   : > { %8489 = vmatmul.mubr.msk.f32.gmra.mrb[138].mxu1 %vm796_vm0, %v2897_v39 }
 0x42f   : > { %8966 = vmatpush3.bf16.msra.mxu1 %v4086_v14  ;;  %3923 = vmatprep.mubr.f32.mxu1 %v15159_v28 }
 0x430   : > { %8967 = vmatprep.subr.bf16.mxu1 %v4095_v0 }
 0x432   : > { %8490 = vmatmul.mubr.msk.f32.gmra.mrb[140].mxu1 %vm796_vm0, %v2898_v17 }
 0x433   : > { %8968 = vmatpush3.bf16.msra.mxu1 %v4087_v12  ;;  %3929 = vmatprep.mubr.f32.mxu1 %v15159_v28 }
 0x434   : > { %8969 = vmatprep.subr.bf16.mxu1 %v4096_v58 }
 0x436   : > { %8491 = vmatmul.mubr.msk.f32.gmra.mrb[142].mxu1 %vm796_vm0, %v2899_v43  ;;  %v8468_v43 = vld [vmem:[%s15288_s0 + $0x80] sm:$0xff] }
 0x437   : > { %8970 = vmatpush3.bf16.msra.mxu1 %v4088_v2 }
 0x438   : > { %8995 = vmatprep.subr.bf16.mxu1 %v12087_v26 }
 0x4cd   : > { %v8851_v61 = vpop.f32.mrb[112].mxu1  ;;  %v8891_v25 = vpop.f32.mrb[128].mxu0 }
 0x4ce   : > { %v8852_v44 = vpop.f32.mrb[113].mxu1  ;;  %v8892_v24 = vpop.f32.mrb[129].mxu0 }
 0x4cf   : > { %v8853_v29 = vadd.f32 %v8852_v44, %v8851_v61  ;;  %v8893_v54 = vadd.f32 %v8892_v24, %v8891_v25  ;;  %v8854_v49 = vpop.f32.mrb[114].mxu1  ;;  %v8894_v22 = vpop.f32.mrb[130].mxu0  ;;  %v8469_v61 = vld [vmem:[%s15288_s0 + $0x88] sm:$0xff] }
 0x4d0   : > { %v8855_v41 = vpop.f32.mrb[115].mxu1  ;;  %v8895_v1 = vpop.f32.mrb[131].mxu0 }
 0x4d1   : > { %10054 = vrcp.f32 %v8853_v29  ;;  %v8856_v34 = vadd.f32 %v8855_v41, %v8854_v49  ;;  %v8896_v27 = vadd.f32 %v8895_v1, %v8894_v22  ;;  %v8470_v22 = vld [vmem:[%s15288_s0 + $0x90] sm:$0xff]  ;;  %v8471_v1 = vld [vmem:[%s15288_s0 + $0x98] sm:$0xff] }
 0x4d3   : > { %10056 = vrcp.f32 %v8856_v34 }
 0x4d5   : > { %v8857_v45 = vpop.f32.mrb[116].mxu1  ;;  %v8897_v38 = vpop.f32.mrb[132].mxu0 }
 0x4d6   : > { %v8858_v35 = vpop.f32.mrb[117].mxu1  ;;  %v8898_v47 = vpop.f32.mrb[133].mxu0 }
 0x4d7   : > { %v8859_v60 = vadd.f32 %v8858_v35, %v8857_v45  ;;  %v8899_v26 = vadd.f32 %v8898_v47, %v8897_v38  ;;  %v8860_v50 = vpop.f32.mrb[118].mxu1  ;;  %v8900_v32 = vpop.f32.mrb[134].mxu0 }
 0x4d8   : > { %v8861_v18 = vpop.f32.mrb[119].mxu1  ;;  %v8901_v62 = vpop.f32.mrb[135].mxu0 }
 0x4d9   : > { %10058 = vrcp.f32 %v8859_v60  ;;  %v8862_v51 = vadd.f32 %v8861_v18, %v8860_v50  ;;  %v8902_v30 = vadd.f32 %v8901_v62, %v8900_v32  ;;  %v8472_v60 = vld [vmem:[%s15288_s0 + $0xa0] sm:$0xff]  ;;  %v8473_v50 = vld [vmem:[%s15288_s0 + $0xa8] sm:$0xff] }
 0x4db   : > { %v10055_v7 = vpop.eup %10054  ;;  %10060 = vrcp.f32 %v8862_v51 }
 0x4dc   : > { %v3754_v19 = vmul.f32 %v10055_v7, %v8893_v54 }
 0x4dd   : > { %v10057_v52 = vpop.eup %10056  ;;  %v8863_v53 = vpop.f32.mrb[120].mxu1 }
 0x4de   : > { %v8903_v36 = vpop.f32.mrb[136].mxu0  ;;  %v3755_v23 = vmul.f32 %v10057_v52, %v8896_v27  ;;  %v8864_v8 = vpop.f32.mrb[121].mxu1  ;;  %v8474_v52 = vld [vmem:[%s15288_s0 + $0xb0] sm:$0xff] }
 0x4df   : > { %v8904_v3 = vpop.f32.mrb[137].mxu0  ;;  %v8865_v57 = vadd.f32 %v8864_v8, %v8863_v53  ;;  %v8866_v31 = vpop.f32.mrb[122].mxu1 }
 0x4e0   : > { %v8905_v33 = vadd.f32 %v8904_v3, %v8903_v36  ;;  %v8906_v20 = vpop.f32.mrb[138].mxu0  ;;  %v3762_v59 = vpack.c.bf16 %v3755_v23, %v3754_v19  ;;  %v8867_v37 = vpop.f32.mrb[123].mxu1  ;;  %v8475_v36 = vld [vmem:[%s15288_s0 + $0xb8] sm:$0xff] }
 0x4e1   : > { %v8907_v5 = vpop.f32.mrb[139].mxu0  ;;  %10062 = vrcp.f32 %v8865_v57  ;;  %v8868_v10 = vadd.f32 %v8867_v37, %v8866_v31  ;;  %v8478_v37 = vld [vmem:[%s15288_s0 + $0xd0] sm:$0xff] }
 0x4e2   : > { %v8908_v21 = vadd.f32 %v8907_v5, %v8906_v20  ;;  %3766 = vst.msk [vmem:[#allocation2] sm:$0xff] %vm796_vm0, %v3762_v59  ;;  %v8479_v5 = vld [vmem:[%s15288_s0 + $0xd8] sm:$0xff] }
 0x4e3   : > { %v10059_v46 = vpop.eup %10058  ;;  %10064 = vrcp.f32 %v8868_v10 }
 0x4e4   : > { %v3756_v42 = vmul.f32 %v10059_v46, %v8899_v26 }
 0x4e5   : > { %v10061_v13 = vpop.eup %10060  ;;  %v8869_v40 = vpop.f32.mrb[124].mxu1 }
 0x4e6   : > { %v8909_v63 = vpop.f32.mrb[140].mxu0  ;;  %v3757_v55 = vmul.f32 %v10061_v13, %v8902_v30  ;;  %v8870_v11 = vpop.f32.mrb[125].mxu1 }
 0x4e7   : > { %v8910_v39 = vpop.f32.mrb[141].mxu0  ;;  %v8871_v56 = vadd.f32 %v8870_v11, %v8869_v40  ;;  %v8872_v14 = vpop.f32.mrb[126].mxu1  ;;  %v8483_v11 = vld [vmem:[%s15288_s0 + $0xf8] sm:$0xff] }
 0x4e8   : > { %v8911_v48 = vadd.f32 %v8910_v39, %v8909_v63  ;;  %v8912_v0 = vpop.f32.mrb[142].mxu0  ;;  %v3763_v4 = vpack.c.bf16 %v3757_v55, %v3756_v42  ;;  %v8873_v17 = vpop.f32.mrb[127].mxu1  ;;  %v8482_v55 = vld [vmem:[%s15288_s0 + $0xf0] sm:$0xff] }
 0x4e9   : > { %v8913_v9 = vpop.f32.mrb[143].mxu0  ;;  %10066 = vrcp.f32 %v8871_v56  ;;  %v8874_v12 = vadd.f32 %v8873_v17, %v8872_v14  ;;  %v15306_v17 = vld [vmem:[#allocation93_spill] sm:$0xff] }
 0x4ea   : > { %v8914_v58 = vadd.f32 %v8913_v9, %v8912_v0  ;;  %3767 = vst.msk [vmem:[#allocation2 + $0x8] sm:$0xff] %vm796_vm0, %v3763_v4  ;;  %v15305_v0 = vld [vmem:[#allocation90_spill] sm:$0xff]  ;;  %v8476_v9 = vld [vmem:[%s15288_s0 + $0xc0] sm:$0xff] }
 0x4eb   : > { %v10063_v15 = vpop.eup %10062  ;;  %10068 = vrcp.f32 %v8874_v12  ;;  %v8477_v12 = vld [vmem:[%s15288_s0 + $0xc8] sm:$0xff] }
 0x4ec   : > { %v3758_v2 = vmul.f32 %v10063_v15, %v8905_v33 }
 0x4ed   : > { %v10065_v25 = vpop.eup %10064  ;;  %v3889_v44 = vpop.f32.mrb[128].mxu1 }
 0x4ee   : > { %v3759_v24 = vmul.f32 %v10065_v25, %v8908_v21  ;;  %v12420_v29 = vadd.f32 %v8468_v43, %v3889_v44  ;;  %v3891_v54 = vpop.f32.mrb[129].mxu1  ;;  %v8480_v43 = vld [vmem:[%s15288_s0 + $0xe0] sm:$0xff] }
 0x4ef   : > { %v12422_v49 = vadd.f32 %v8469_v61, %v3891_v54  ;;  %v15307_v54 = vld [vmem:[#allocation96_spill] sm:$0xff] }
 0x4f0   : > { %v3764_v41 = vpack.c.bf16 %v3759_v24, %v3758_v2  ;;  %v8481_v2 = vld [vmem:[%s15288_s0 + $0xe8] sm:$0xff] }
 0x4f1   : > { %v3895_v34 = vpop.f32.mrb[130].mxu1  ;;  %v3936_v27 = vmax.f32 %v12420_v29, %v12422_v49 }
 0x4f2   : > { %3768 = vst.msk [vmem:[#allocation2 + $0x10] sm:$0xff] %vm796_vm0, %v3764_v41  ;;  %v12433_v45 = vadd.f32 %v8470_v22, %v3895_v34  ;;  %v3897_v38 = vpop.f32.mrb[131].mxu1  ;;  %v15308_v22 = vld [vmem:[#allocation99_spill] sm:$0xff] }
 0x4f3   : > { %v10067_v35 = vpop.eup %10066  ;;  %v12435_v47 = vadd.f32 %v8471_v1, %v3897_v38  ;;  %3937 = vmax.xlane.f32.xlu1 %v3936_v27 }
 0x4f4   : > { %v3760_v26 = vmul.f32 %v10067_v35, %v8911_v48 }
 0x4f5   : > { %v10069_v32 = vpop.eup %10068  ;;  %v3901_v18 = vpop.f32.mrb[132].mxu1  ;;  %v3939_v62 = vmax.f32 %v12433_v45, %v12435_v47 }
 0x4f6   : > { %v3761_v51 = vmul.f32 %v10069_v32, %v8914_v58  ;;  %v12445_v30 = vadd.f32 %v8472_v60, %v3901_v18  ;;  %v3903_v7 = vpop.f32.mrb[133].mxu1 }
 0x4f7   : > { %v12447_v19 = vadd.f32 %v8473_v50, %v3903_v7  ;;  %3940 = vmax.xlane.f32.xlu0 %v3939_v62 }
 0x4f8   : > { %v3765_v53 = vpack.c.bf16 %v3761_v51, %v3760_v26 }
 0x4f9   : > { %v3907_v23 = vpop.f32.mrb[134].mxu1  ;;  %v3942_v8 = vmax.f32 %v12445_v30, %v12447_v19 }
 0x4fa   : > { %3769 = vst.msk [vmem:[#allocation2 + $0x18] sm:$0xff] %vm796_vm0, %v3765_v53  ;;  %v12458_v3 = vadd.f32 %v8474_v52, %v3907_v23  ;;  %v3909_v57 = vpop.f32.mrb[135].mxu1 }
 0x4fb   : > { %v12460_v33 = vadd.f32 %v8475_v36, %v3909_v57  ;;  %3943 = vmax.xlane.f32.xlu1 %v3942_v8 }
 0x4fd   : > { %v3913_v31 = vpop.f32.mrb[136].mxu1  ;;  %v3945_v20 = vmax.f32 %v12458_v3, %v12460_v33 }
 0x4fe   : > { %v3915_v59 = vpop.f32.mrb[137].mxu1  ;;  %v12498_v58 = vadd.f32 %v8476_v9, %v3913_v31 }
 0x4ff   : > { %3946 = vmax.xlane.f32.xlu0 %v3945_v20  ;;  %v12500_v15 = vadd.f32 %v8477_v12, %v3915_v59  ;;  %v12539_v59 = vld [vmem:[%s15008_s11 + $0x48] sm:$0xff]  }
 0x500   : > { %v10603_v12 = vld [vmem:[%s15007_s10 + $0x8] sm:$0xff] }
 0x501   : > { %v3919_v10 = vpop.f32.mrb[138].mxu1  ;;  %v3948_v44 = vmax.f32 %v12498_v58, %v12500_v15 }
 0x502   : > { %v12470_v21 = vadd.f32 %v8478_v37, %v3919_v10  ;;  %v3921_v46 = vpop.f32.mrb[139].mxu1 }
 0x503   : > { %v12472_v42 = vadd.f32 %v8479_v5, %v3921_v46 }
 0x505   : > { %v3925_v13 = vpop.f32.mrb[140].mxu1  ;;  %v3951_v40 = vmax.f32 %v12470_v21, %v12472_v42 }
 0x506   : > { %v3927_v63 = vpop.f32.mrb[141].mxu1  ;;  %v12508_v61 = vadd.f32 %v8480_v43, %v3925_v13 }
 0x507   : > { %3952 = vmax.xlane.f32.xlu0 %v3951_v40  ;;  %v12510_v25 = vadd.f32 %v8481_v2, %v3927_v63  ;;  %v12547_v40 = vld [vmem:[%s15008_s11 + $0x8] sm:$0xff]   ;;  %v12569_v2 = vld [vmem:[%s15008_s11 + $0x10] sm:$0xff]  }
 0x509   : > { %v3931_v39 = vpop.f32.mrb[142].mxu1  ;;  %v3954_v24 = vmax.f32 %v12508_v61, %v12510_v25 }
 0x50a   : > { %v12482_v56 = vadd.f32 %v8482_v55, %v3931_v39  ;;  %v3933_v48 = vpop.f32.mrb[143].mxu1 }
 0x50b   : > { %v12484_v14 = vadd.f32 %v8483_v11, %v3933_v48  ;;  %v12555_v11 = vld [vmem:[%s15008_s11 + $0x50] sm:$0xff]  }
 0x50c   : > { %4190 = vrot.lane.b32.xlu1 %v15305_v0, %s15304_s5 }
 0x50d   : > { %v3957_v4 = vmax.f32 %v12482_v56, %v12484_v14 }
 0x50f   : > { %3958 = vmax.xlane.f32.xlu0 %v3957_v4  ;;  %v10602_v4 = vld [vmem:[%s15007_s10] sm:$0xff] }
 0x525   : > { %4192 = vrot.lane.b32.xlu0 %v15306_v17, %s15304_s5 }
 0x530   : > { %3949 = vmax.xlane.f32.xlu1 %v3948_v44 }
 0x534   : > { %3955 = vmax.xlane.f32.xlu1 %v3954_v24 }
 0x545   : > { %4194 = vrot.lane.b32.xlu1 %v15307_v54, %s15304_s5 }
 0x549   : > { %4196 = vrot.lane.b32.xlu1 %v15308_v22, %s15304_s5 }
 0x580   : > { %v3938_v41 = vpop.xlane.xlu1 %3937 }
 0x581   : > { %v3960_v1 = vsub.f32 %v12420_v29, %v3938_v41  ;;  %v3961_v34 = vsub.f32 %v12422_v49, %v3938_v41  ;;  %v10605_v41 = vld [vmem:[%s15007_s10 + $0x10] sm:$0xff] }
 0x583   : > { %v3976_v27 = vmul.f32 1.442695, %v3960_v1  ;;  %v3978_v38 = vmul.f32 1.442695, %v3961_v34  ;;  %v10606_v34 = vld [vmem:[%s15007_s10 + $0x18] sm:$0xff] }
 0x584   : > { %v3941_v35 = vpop.xlane.xlu0 %3940 }
 0x585   : > { %v3962_v60 = vsub.f32 %v12433_v45, %v3941_v35  ;;  %v3963_v26 = vsub.f32 %v12435_v47, %v3941_v35  ;;  %10070 = vpow2.f32 %v3976_v27  ;;  %v12589_v35 = vld [vmem:[%s15008_s11 + $0x58] sm:$0xff]  }
 0x586   : > { %10072 = vpow2.f32 %v3978_v38 }
 0x587   : > { %v3980_v50 = vmul.f32 1.442695, %v3962_v60  ;;  %v3982_v32 = vmul.f32 1.442695, %v3963_v26 }
 0x588   : > { %v3944_v18 = vpop.xlane.xlu1 %3943 }
 0x589   : > { %10074 = vpow2.f32 %v3980_v50  ;;  %v3964_v62 = vsub.f32 %v12445_v30, %v3944_v18  ;;  %v3965_v51 = vsub.f32 %v12447_v19, %v3944_v18  ;;  %v12597_v50 = vld [vmem:[%s15008_s11 + $0x18] sm:$0xff]   ;;  %v12609_v18 = vld [vmem:[%s15008_s11 + $0x20] sm:$0xff]  }
 0x58a   : > { %10076 = vpow2.f32 %v3982_v32  ;;  %v12603_v32 = vld [vmem:[%s15008_s11 + $0x60] sm:$0xff]  }
 0x58b   : > { %v3984_v29 = vmul.f32 1.442695, %v3964_v62  ;;  %v3986_v49 = vmul.f32 1.442695, %v3965_v51  ;;  %v12615_v62 = vld [vmem:[%s15008_s11 + $0x68] sm:$0xff]  }
 0x58c   : > { %v3947_v7 = vpop.xlane.xlu0 %3946  ;;  %v4191_v5 = vpop.permute.xlu1 %4190  ;;  %v12621_v51 = vld [vmem:[%s15008_s11 + $0x28] sm:$0xff]  }
 0x58d   : > { %v3966_v52 = vsub.f32 %v12458_v3, %v3947_v7  ;;  %v3967_v45 = vsub.f32 %v12460_v33, %v3947_v7  ;;  %10078 = vpow2.f32 %v3984_v29  ;;  %v12533_v33 = vld [vmem:[%s15008_s11] sm:$0xff]   ;;  %v4202_v55 = vsel %vm3258_vm1, %v15305_v0, %v4191_v5  ;;  %v12627_v29 = vld [vmem:[%s15008_s11 + $0x70] sm:$0xff]  }
 0x58e   : > { %10080 = vpow2.f32 %v3986_v49  ;;  %v4618_v39 = vsel %vm3258_vm1, %v4191_v5, %v15305_v0  ;;  %v4206_v9 = vmul.f32 %v10602_v4, %v4202_v55  ;;  %v4207_v43 = vmul.f32 %v10603_v12, %v4202_v55  ;;  %v12633_v7 = vld [vmem:[%s15008_s11 + $0x30] sm:$0xff]   ;;  %v12664_v55 = vld [vmem:[%s15007_s10 + $0x28] sm:$0xff] }
 0x58f   : > { %v3988_v47 = vmul.f32 1.442695, %v3966_v52  ;;  %v3990_v53 = vmul.f32 1.442695, %v3967_v45  ;;  %v10071_v36 = vpop.eup %10070  ;;  %v12576_v24 = vmul.f32 %v10602_v4, %v4618_v39  ;;  %v4623_v52 = vmul.f32 %v10603_v12, %v4618_v39 }
 0x590   : > { %v10073_v23 = vpop.eup %10072 }
 0x591   : > { %10082 = vpow2.f32 %v3988_v47 }
 0x592   : > { %10084 = vpow2.f32 %v3990_v53 }
 0x593   : > { %v10075_v8 = vpop.eup %10074 }
 0x594   : > { %v10077_v30 = vpop.eup %10076  ;;  %v4008_v57 = vpack.c.bf16 %v10075_v8, %v10071_v36  ;;  %v12528_v31 = vpop.xlane.xlu0 %3952 }
 0x595   : > { %v4009_v19 = vpack.c.bf16 %v10077_v30, %v10073_v23  ;;  %v3970_v47 = vsub.f32 %v12470_v21, %v12528_v31  ;;  %v3971_v53 = vsub.f32 %v12472_v42, %v12528_v31 }
 0x597   : > { %4048 = vmatprep.mubr.bf16.mxu0 %v4009_v19  ;;  %4129 = vmatprep.mubr.bf16.mxu1 %v4009_v19  ;;  %v10079_v3 = vpop.eup %10078  ;;  %v3996_v36 = vmul.f32 1.442695, %v3970_v47  ;;  %v3998_v23 = vmul.f32 1.442695, %v3971_v53  ;;  %v12689_v47 = vld [vmem:[%s15008_s11 + $0x40] sm:$0xff]   ;;  %v15311_v53 = vld [vmem:[#allocation37_spill] sm:$0xff] }
 0x598   : > { %4049 = vmatmul.mubr.bf16.vlgmr.msra.gmra.mrb[144].mxu0 %v4008_v57  ;;  %4130 = vmatmul.mubr.bf16.vlgmr.msra.gmra.mrb[144].mxu1 %v4008_v57  ;;  %v10081_v20 = vpop.eup %10080 }
 0x599   : > { %8996 = vmatpush3.bf16.msra.mxu1 %v12533_v33  ;;  %10086 = vpow2.f32 %v3996_v36  ;;  %v4521_v36 = vmul.bf16 %v12689_v47, %v15311_v53 }
 0x59a   : > { %8997 = vmatprep.subr.bf16.mxu1 %v12539_v59  ;;  %10088 = vpow2.f32 %v3998_v23  ;;  %v15312_v23 = vld [vmem:[#allocation94_spill] sm:$0xff] }
 0x59b   : > { %v10083_v37 = vpop.eup %10082 }
 0x59c   : > { %v10085_v10 = vpop.eup %10084  ;;  %v12542_v46 = vpop.xlane.xlu0 %3958  ;;  %v4010_v13 = vpack.c.bf16 %v10083_v37, %v10079_v3 }
 0x59d   : > { %8998 = vmatpush3.bf16.msra.mxu1 %v12547_v40  ;;  %v4011_v63 = vpack.c.bf16 %v10085_v10, %v10081_v20  ;;  %v3975_v30 = vsub.f32 %v12484_v14, %v12542_v46  ;;  %v3974_v31 = vsub.f32 %v12482_v56, %v12542_v46 }
 0x59e   : > { %8999 = vmatprep.subr.bf16.mxu1 %v12555_v11 }
 0x59f   : > { %4056 = vmatprep.mubr.bf16.mxu0 %v4011_v63  ;;  %4137 = vmatprep.mubr.bf16.mxu1 %v4011_v63  ;;  %v4006_v37 = vmul.f32 1.442695, %v3975_v30  ;;  %v15309_v63 = vld [vmem:[#allocation91_spill] sm:$0xff] }
 0x5a0   : > { %4057 = vmatmul.mubr.bf16.gmra.mrb[148].mxu0 %v4010_v13  ;;  %4138 = vmatmul.mubr.bf16.gmra.mrb[148].mxu1 %v4010_v13  ;;  %v4193_v48 = vpop.permute.xlu0 %4192 }
 0x5a1   : > { %9000 = vmatpush3.bf16.msra.mxu1 %v12569_v2  ;;  %v4203_v0 = vsel %vm3258_vm1, %v15306_v17, %v4193_v48  ;;  %v4619_v44 = vsel %vm3258_vm1, %v4193_v48, %v15306_v17  ;;  %v12670_v48 = vld [vmem:[%s15007_s10 + $0x30] sm:$0xff] }
 0x5a2   : > { %v4208_v1 = vmul.f32 %v10605_v41, %v4203_v0  ;;  %v4209_v27 = vmul.f32 %v10606_v34, %v4203_v0  ;;  %v12584_v38 = vmul.f32 %v10605_v41, %v4619_v44  ;;  %9001 = vmatprep.subr.bf16.mxu1 %v12589_v35  ;;  %v4625_v49 = vmul.f32 %v10606_v34, %v4619_v44  ;;  %v12682_v0 = vld [vmem:[%s15007_s10 + $0x20] sm:$0xff] }
 0x5a4   : > { %v9857_v17 = vpack.c.bf16 %v4208_v1, %v4206_v9  ;;  %v9865_v60 = vpack.c.bf16 %v12584_v38, %v12576_v24  ;;  %v9855_v26 = vpack.c.bf16 %v4209_v27, %v4207_v43  ;;  %v9863_v45 = vpack.c.bf16 %v4625_v49, %v4623_v52  ;;  %v12676_v9 = vld [vmem:[%s15007_s10 + $0x38] sm:$0xff]  ;;  %v15310_v27 = vld [vmem:[#allocation89_spill] sm:$0xff] }
 0x5a5   : > { %9002 = vmatpush3.bf16.msra.mxu1 %v12597_v50 }
 0x5a6   : > { %9856 = vmatprep.subr.bf16.mxu0 %v9855_v26  ;;  %9003 = vmatprep.subr.bf16.mxu1 %v12603_v32 }
 0x5a7   : > { %9858 = vmatpush1.bf16.msra.mxu0 %v9857_v17  ;;  %v2702_v17 = vmax.f32 %v15310_v27, 1e-24 }
 0x5a9   : > { %9004 = vmatpush3.bf16.msra.mxu1 %v12609_v18 }
 0x5aa   : > { %9005 = vmatprep.subr.bf16.mxu1 %v12615_v62 }
 0x5ad   : > { %9006 = vmatpush3.bf16.msra.mxu1 %v12621_v51 }
 0x5ae   : > { %9007 = vmatprep.subr.bf16.mxu1 %v12627_v29 }
 0x5b1   : > { %9008 = vmatpush3.bf16.msra.mxu1 %v12633_v7 }
 0x5b2   : > { %9009 = vmatprep.subr.bf16.mxu1 %v12205_v16 }
 0x5b5   : > { %9010 = vmatpush3.bf16.msra.mxu1 %v12346_v6 }
 0x5b6   : > { %9864 = vmatprep.subr.bf16.mxu1 %v9863_v45 }
 0x5bd   : > { %v3950_v8 = vpop.xlane.xlu1 %3949 }
 0x5be   : > { %v3968_v57 = vsub.f32 %v12498_v58, %v3950_v8  ;;  %v3969_v16 = vsub.f32 %v12500_v15, %v3950_v8  ;;  %v4004_v15 = vmul.f32 1.442695, %v3974_v31  ;;  %v2703_v8 = vmax.f32 %v15312_v23, 1e-24  ;;  %v12700_v31 = vld [vmem:[%s15006_s9] ss:$0 sm:$0xff] }
 0x5c0   : > { %v3992_v19 = vmul.f32 1.442695, %v3968_v57  ;;  %v3994_v3 = vmul.f32 1.442695, %v3969_v16 }
 0x5c1   : > { %v3956_v20 = vpop.xlane.xlu1 %3955 }
 0x5c2   : > { %10090 = vpow2.f32 %v3992_v19  ;;  %v3972_v21 = vsub.f32 %v12508_v61, %v3956_v20  ;;  %v3973_v42 = vsub.f32 %v12510_v25, %v3956_v20  ;;  %v10087_v61 = vpop.eup %10086  ;;  %v2701_v25 = vmax.f32 %v15309_v63, 1e-24  ;;  %v15313_v19 = vld [vmem:[#allocation92_spill] sm:$0xff] }
 0x5c3   : > { %10092 = vpow2.f32 %v3994_v3  ;;  %v10089_v46 = vpop.eup %10088  ;;  %v2704_v3 = vmax.f32 %v15313_v19, 1e-24  ;;  %v15324_v19 = vld [vmem:[#allocation13_spill] sm:$0xff] }
 0x5c4   : > { %v4002_v14 = vmul.f32 1.442695, %v3973_v42  ;;  %10094 = vpow2.f32 %v4006_v37  ;;  %v4000_v58 = vmul.f32 1.442695, %v3972_v21  ;;  %v15314_v21 = vld [vmem:[#allocation97_spill] sm:$0xff] }
 0x5c5   : > { %v12650_v5 = vpop.permute.xlu1 %4194  ;;  %v2705_v42 = vmax.f32 %v15314_v21, 1e-24 }
 0x5c6   : > { %10096 = vpow2.f32 %v4002_v14  ;;  %v4204_v10 = vsel %vm3258_vm1, %v15307_v54, %v12650_v5 }
 0x5c7   : > { %10098 = vpow2.f32 %v4000_v58  ;;  %v4211_v39 = vmul.f32 %v12664_v55, %v4204_v10  ;;  %v4210_v44 = vmul.f32 %v12682_v0, %v4204_v10 }
 0x5c8   : > { %10100 = vpow2.f32 %v4004_v15  ;;  %v15315_v15 = vld [vmem:[#allocation95_spill] sm:$0xff] }
 0x5c9   : > { %v12655_v13 = vpop.permute.xlu1 %4196  ;;  %10102 = vrsqrt.f32 %v2701_v25  ;;  %v2706_v10 = vmax.f32 %v15315_v15, 1e-24 }
 0x5ca   : > { %v4205_v56 = vsel %vm3258_vm1, %v15308_v22, %v12655_v13  ;;  %10104 = vrsqrt.f32 %v2702_v17  ;;  %v15320_v17 = vld [vmem:[#allocation42_spill] sm:$0xff] }
 0x5cb   : > { %v4212_v4 = vmul.f32 %v12670_v48, %v4205_v56  ;;  %v4213_v12 = vmul.f32 %v12676_v9, %v4205_v56  ;;  %10106 = vrsqrt.f32 %v2703_v8 }
 0x5cc   : > { %v10091_v43 = vpop.eup %10090  ;;  %10108 = vrsqrt.f32 %v2704_v3 }
 0x5cd   : > { %v10093_v41 = vpop.eup %10092  ;;  %v9859_v1 = vpack.c.bf16 %v4213_v12, %v4211_v39  ;;  %v4012_v34 = vpack.c.bf16 %v10087_v61, %v10091_v43  ;;  %v9861_v26 = vpack.c.bf16 %v4212_v4, %v4210_v44  ;;  %10110 = vrsqrt.f32 %v2705_v42  ;;  %v15316_v61 = vld [vmem:[#allocation12_spill] sm:$0xff]  ;;  %v15317_v39 = vld [vmem:[#allocation35_spill] sm:$0xff] }
 0x5ce   : > { %v4013_v49 = vpack.c.bf16 %v10089_v46, %v10093_v41  ;;  %v10095_v52 = vpop.eup %10094  ;;  %v4513_v46 = vmul.bf16 %v12533_v33, %v15311_v53  ;;  %v4522_v4 = vmul.bf16 %v12539_v59, %v15317_v39  ;;  %10112 = vrsqrt.f32 %v2706_v10  ;;  %v15318_v12 = vld [vmem:[#allocation100_spill] sm:$0xff]  ;;  %v15319_v44 = vld [vmem:[#allocation11_spill] sm:$0xff] }
 0x5cf   : > { %9860 = vmatprep.subr.bf16.mxu0 %v9859_v1  ;;  %v2707_v43 = vmax.f32 %v15318_v12, 1e-24  ;;  %v4514_v27 = vmul.bf16 %v12547_v40, %v15317_v39  ;;  %v4525_v42 = vmul.bf16 %v12603_v32, %v15311_v53  ;;  %v4518_v12 = vmul.bf16 %v12621_v51, %v15317_v39 }
 0x5d0   : > { %4064 = vmatprep.mubr.bf16.mxu0 %v4013_v49  ;;  %4145 = vmatprep.mubr.bf16.mxu1 %v4013_v49  ;;  %v10097_v45 = vpop.eup %10096  ;;  %v15321_v49 = vld [vmem:[#allocation98_spill] sm:$0xff] }
 0x5d1   : > { %4065 = vmatmul.mubr.bf16.gmra.mrb[152].mxu0 %v4012_v34  ;;  %4146 = vmatmul.mubr.bf16.gmra.mrb[152].mxu1 %v4012_v34  ;;  %v4015_v30 = vpack.c.bf16 %v10095_v52, %v10097_v45  ;;  %v10099_v57 = vpop.eup %10098  ;;  %v2708_v52 = vmax.f32 %v15321_v49, 1e-24  ;;  %10114 = vrsqrt.f32 %v2707_v43  ;;  %v15322_v45 = vld [vmem:[#allocation14_spill] sm:$0xff] }
 0x5d2   : > { %9862 = vmatpush1.bf16.msra.mxu0 %v9861_v26  ;;  %v10101_v16 = vpop.eup %10100  ;;  %v4523_v26 = vmul.bf16 %v12555_v11, %v15320_v17  ;;  %v15327_v43 = vld [vmem:[#allocation18_spill] sm:$0xff] }
 0x5d3   : > { %9035 = vmatprep.subr.bf16.mxu0 %v4521_v36  ;;  %4072 = vmatprep.mubr.bf16.mxu0 %v4015_v30  ;;  %v4014_v20 = vpack.c.bf16 %v10101_v16, %v10099_v57  ;;  %v10103_v37 = vpop.eup %10102  ;;  %v15323_v57 = vld [vmem:[#allocation40_spill] sm:$0xff]  ;;  %10116 = vrsqrt.f32 %v2708_v52 }
 0x5d4   : > { %4153 = vmatprep.mubr.bf16.mxu1 %v4015_v30  ;;  %v2836_v14 = vmul.f32 %v12700_v31, %v10103_v37  ;;  %v10105_v58 = vpop.eup %10104  ;;  %v4515_v30 = vmul.bf16 %v12569_v2, %v15320_v17  ;;  %v4524_v16 = vmul.bf16 %v12589_v35, %v15323_v57  ;;  %v4516_v21 = vmul.bf16 %v12597_v50, %v15323_v57 }
 0x5d5   : > { %v2837_v25 = vmul.f32 %v12700_v31, %v10105_v58  ;;  %v10107_v56 = vpop.eup %10106  ;;  %v4520_v49 = vmul.bf16 %v12346_v6, %v15323_v57 }
 0x5d6   : > { %v2900_v63 = vmul.f32 %v2836_v14, %v15316_v61  ;;  %v2838_v1 = vmul.f32 %v12700_v31, %v10107_v56  ;;  %v10109_v34 = vpop.eup %10108  ;;  %v15325_v14 = vld [vmem:[#allocation16_spill] sm:$0xff]  ;;  %v4517_v61 = vmul.bf16 %v12609_v18, %v15311_v53  ;;  %v4527_v53 = vmul.bf16 %v12627_v29, %v15320_v17 }
 0x5d7   : > { %v2901_v41 = vmul.f32 %v2837_v25, %v15319_v44  ;;  %v2839_v23 = vmul.f32 %v12700_v31, %v10109_v34  ;;  %v10111_v8 = vpop.eup %10110  ;;  %v15326_v25 = vld [vmem:[#allocation15_spill] sm:$0xff] }
 0x5d8   : > { %v2902_v36 = vmul.f32 %v2838_v1, %v15322_v45  ;;  %v10113_v37 = vpop.eup %10112  ;;  %v4519_v1 = vmul.bf16 %v12633_v7, %v15320_v17 }
 0x5d9   : > { %4073 = vmatmul.mubr.bf16.gmra.mrb[156].mxu0 %v4014_v20  ;;  %4154 = vmatmul.mubr.bf16.gmra.mrb[156].mxu1 %v4014_v20  ;;  %v2903_v3 = vmul.f32 %v2839_v23, %v15324_v19  ;;  %v2840_v20 = vmul.f32 %v12700_v31, %v10111_v8  ;;  %v2841_v15 = vmul.f32 %v12700_v31, %v10113_v37 }
 0x5da   : > { %4319 = vmatprep.mubr.f32.mxu0 %v15159_v28 }
 0x5db   : > { %v2904_v58 = vmul.f32 %v2840_v20, %v15325_v14  ;;  %v10115_v10 = vpop.eup %10114  ;;  %v2905_v56 = vmul.f32 %v2841_v15, %v15326_v25 }
 0x5e1   : > { %8508 = vmatmul.mubr.msk.f32.vlgmr.msra.gmra.mrb[160].mxu0 %vm796_vm0, %v2900_v63  ;;  %v4526_v63 = vmul.bf16 %v12615_v62, %v15317_v39  ;;  %v12762_v39 = vld [vmem:[%s15008_s11 + $0x78] sm:$0xff]  }
 0x5e2   : > { %9036 = vmatpush3.bf16.msra.mxu0 %v4513_v46  ;;  %4325 = vmatprep.mubr.f32.mxu0 %v15159_v28  ;;  %v2842_v46 = vmul.f32 %v12700_v31, %v10115_v10  ;;  %v4528_v34 = vmul.bf16 %v12762_v39, %v15323_v57 }
 0x5e3   : > { %9037 = vmatprep.subr.bf16.mxu0 %v4522_v4  ;;  %v10117_v4 = vpop.eup %10116 }
 0x5e4   : > { %v2906_v44 = vmul.f32 %v2842_v46, %v15327_v43 }
 0x5e5   : > { %8509 = vmatmul.mubr.msk.f32.gmra.mrb[162].mxu0 %vm796_vm0, %v2901_v41  ;;  %v2843_v41 = vmul.f32 %v12700_v31, %v10117_v4 }
 0x5e6   : > { %9038 = vmatpush3.bf16.msra.mxu0 %v4514_v27  ;;  %4331 = vmatprep.mubr.f32.mxu0 %v15159_v28  ;;  %v15328_v27 = vld [vmem:[#allocation17_spill] sm:$0xff] }
 0x5e7   : > { %9039 = vmatprep.subr.bf16.mxu0 %v4523_v26  ;;  %v2907_v26 = vmul.f32 %v2843_v41, %v15328_v27 }
 0x5e9   : > { %8510 = vmatmul.mubr.msk.f32.gmra.mrb[164].mxu0 %vm796_vm0, %v2902_v36 }
 0x5ea   : > { %9040 = vmatpush3.bf16.msra.mxu0 %v4515_v30  ;;  %4337 = vmatprep.mubr.f32.mxu0 %v15159_v28 }
 0x5eb   : > { %9041 = vmatprep.subr.bf16.mxu0 %v4524_v16 }
 0x5ed   : > { %8511 = vmatmul.mubr.msk.f32.gmra.mrb[166].mxu0 %vm796_vm0, %v2903_v3 }
 0x5ee   : > { %9042 = vmatpush3.bf16.msra.mxu0 %v4516_v21  ;;  %4343 = vmatprep.mubr.f32.mxu0 %v15159_v28 }
 0x5ef   : > { %9043 = vmatprep.subr.bf16.mxu0 %v4525_v42 }
 0x5f1   : > { %8512 = vmatmul.mubr.msk.f32.gmra.mrb[168].mxu0 %vm796_vm0, %v2904_v58 }
 0x5f2   : > { %9044 = vmatpush3.bf16.msra.mxu0 %v4517_v61  ;;  %4349 = vmatprep.mubr.f32.mxu0 %v15159_v28 }
 0x5f3   : > { %9045 = vmatprep.subr.bf16.mxu0 %v4526_v63 }
 0x5f5   : > { %8513 = vmatmul.mubr.msk.f32.gmra.mrb[170].mxu0 %vm796_vm0, %v2905_v56 }
 0x5f6   : > { %9046 = vmatpush3.bf16.msra.mxu0 %v4518_v12  ;;  %4355 = vmatprep.mubr.f32.mxu0 %v15159_v28 }
 0x5f7   : > { %9047 = vmatprep.subr.bf16.mxu0 %v4527_v53 }
 0x5f9   : > { %8514 = vmatmul.mubr.msk.f32.gmra.mrb[172].mxu0 %vm796_vm0, %v2906_v44 }
 0x5fa   : > { %9048 = vmatpush3.bf16.msra.mxu0 %v4519_v1  ;;  %4361 = vmatprep.mubr.f32.mxu0 %v15159_v28 }
 0x5fb   : > { %9049 = vmatprep.subr.bf16.mxu0 %v4528_v34 }
 0x5fd   : > { %8515 = vmatmul.mubr.msk.f32.gmra.mrb[174].mxu0 %vm796_vm0, %v2907_v26 }
 0x5fe   : > { %9050 = vmatpush3.bf16.msra.mxu0 %v4520_v49 }
 0x5ff   : > { %9075 = vmatprep.subr.bf16.mxu0 %v12689_v47 }
 0x66b   : > { %v8931_v17 = vpop.f32.mrb[144].mxu0  ;;  %v8971_v52 = vpop.f32.mrb[144].mxu1 }
 0x66c   : > { %v8932_v45 = vpop.f32.mrb[145].mxu0  ;;  %v8972_v36 = vpop.f32.mrb[145].mxu1 }
 0x66d   : > { %v8933_v23 = vadd.f32 %v8932_v45, %v8931_v17  ;;  %v8973_v8 = vadd.f32 %v8972_v36, %v8971_v52  ;;  %v8934_v30 = vpop.f32.mrb[146].mxu0  ;;  %v8974_v16 = vpop.f32.mrb[146].mxu1 }
 0x66e   : > { %v8935_v19 = vpop.f32.mrb[147].mxu0  ;;  %v8975_v3 = vpop.f32.mrb[147].mxu1 }
 0x66f   : > { %10118 = vrcp.f32 %v8933_v23  ;;  %v8936_v20 = vadd.f32 %v8935_v19, %v8934_v30  ;;  %v8976_v37 = vadd.f32 %v8975_v3, %v8974_v16 }
 0x671   : > { %10120 = vrcp.f32 %v8936_v20 }
 0x673   : > { %v8937_v6 = vpop.f32.mrb[148].mxu0  ;;  %v8977_v57 = vpop.f32.mrb[148].mxu1 }
 0x674   : > { %v8938_v21 = vpop.f32.mrb[149].mxu0  ;;  %v8978_v42 = vpop.f32.mrb[149].mxu1 }
 0x675   : > { %v8939_v14 = vadd.f32 %v8938_v21, %v8937_v6  ;;  %v8979_v58 = vadd.f32 %v8978_v42, %v8977_v57  ;;  %v8940_v15 = vpop.f32.mrb[150].mxu0  ;;  %v8980_v10 = vpop.f32.mrb[150].mxu1 }
 0x676   : > { %v8941_v61 = vpop.f32.mrb[151].mxu0  ;;  %v8981_v63 = vpop.f32.mrb[151].mxu1 }
 0x677   : > { %10122 = vrcp.f32 %v8939_v14  ;;  %v8942_v25 = vadd.f32 %v8941_v61, %v8940_v15  ;;  %v8982_v56 = vadd.f32 %v8981_v63, %v8980_v10 }
 0x679   : > { %v10119_v46 = vpop.eup %10118  ;;  %10124 = vrcp.f32 %v8942_v25 }
 0x67a   : > { %v4170_v4 = vmul.f32 %v10119_v46, %v8973_v8 }
 0x67b   : > { %v10121_v12 = vpop.eup %10120 }
 0x67c   : > { %v4171_v53 = vmul.f32 %v10121_v12, %v8976_v37 }
 0x67e   : > { %v4178_v43 = vpack.c.bf16 %v4171_v53, %v4170_v4  ;;  %v8493_v4 = vld [vmem:[%s15288_s0 + $0x108] sm:$0xff] }
 0x680   : > { %4182 = vst.msk [vmem:[#allocation2 + $0x20] sm:$0xff] %vm796_vm0, %v4178_v43 }
 0x681   : > { %v10123_v44 = vpop.eup %10122 }
 0x682   : > { %v4172_v41 = vmul.f32 %v10123_v44, %v8979_v58 }
 0x683   : > { %v10125_v1 = vpop.eup %10124 }
 0x684   : > { %v4173_v34 = vmul.f32 %v10125_v1, %v8982_v56  ;;  %v8492_v56 = vld [vmem:[%s15288_s0 + $0x100] sm:$0xff] }
 0x686   : > { %v4179_v27 = vpack.c.bf16 %v4173_v34, %v4172_v41  ;;  %v8494_v34 = vld [vmem:[%s15288_s0 + $0x110] sm:$0xff] }
 0x688   : > { %4183 = vst.msk [vmem:[#allocation2 + $0x28] sm:$0xff] %vm796_vm0, %v4179_v27 }
 0x6a4   : > { %v8943_v26 = vpop.f32.mrb[152].mxu0  ;;  %v8983_v49 = vpop.f32.mrb[152].mxu1 }
 0x6a5   : > { %v8944_v17 = vpop.f32.mrb[153].mxu0  ;;  %v8984_v52 = vpop.f32.mrb[153].mxu1 }
 0x6a6   : > { %v8945_v45 = vadd.f32 %v8944_v17, %v8943_v26  ;;  %v8985_v36 = vadd.f32 %v8984_v52, %v8983_v49  ;;  %v8946_v23 = vpop.f32.mrb[154].mxu0  ;;  %v8986_v8 = vpop.f32.mrb[154].mxu1  ;;  %v8495_v26 = vld [vmem:[%s15288_s0 + $0x118] sm:$0xff] }
 0x6a7   : > { %v8947_v30 = vpop.f32.mrb[155].mxu0  ;;  %v8987_v16 = vpop.f32.mrb[155].mxu1 }
 0x6a8   : > { %10126 = vrcp.f32 %v8945_v45  ;;  %v8948_v19 = vadd.f32 %v8947_v30, %v8946_v23  ;;  %v8988_v3 = vadd.f32 %v8987_v16, %v8986_v8  ;;  %v8496_v8 = vld [vmem:[%s15288_s0 + $0x120] sm:$0xff]  ;;  %v8497_v16 = vld [vmem:[%s15288_s0 + $0x128] sm:$0xff] }
 0x6aa   : > { %10128 = vrcp.f32 %v8948_v19 }
 0x6ac   : > { %v8949_v20 = vpop.f32.mrb[156].mxu0  ;;  %v8989_v37 = vpop.f32.mrb[156].mxu1 }
 0x6ad   : > { %v8950_v6 = vpop.f32.mrb[157].mxu0  ;;  %v8990_v57 = vpop.f32.mrb[157].mxu1 }
 0x6ae   : > { %v8951_v21 = vadd.f32 %v8950_v6, %v8949_v20  ;;  %v8991_v42 = vadd.f32 %v8990_v57, %v8989_v37  ;;  %v8952_v14 = vpop.f32.mrb[158].mxu0  ;;  %v8992_v58 = vpop.f32.mrb[158].mxu1 }
 0x6af   : > { %v8953_v15 = vpop.f32.mrb[159].mxu0  ;;  %v8993_v10 = vpop.f32.mrb[159].mxu1 }
 0x6b0   : > { %10130 = vrcp.f32 %v8951_v21  ;;  %v8954_v61 = vadd.f32 %v8953_v15, %v8952_v14  ;;  %v8994_v63 = vadd.f32 %v8993_v10, %v8992_v58  ;;  %v8499_v58 = vld [vmem:[%s15288_s0 + $0x138] sm:$0xff] }
 0x6b2   : > { %v10127_v25 = vpop.eup %10126  ;;  %10132 = vrcp.f32 %v8954_v61 }
 0x6b3   : > { %v4174_v46 = vmul.f32 %v10127_v25, %v8985_v36 }
 0x6b4   : > { %v10129_v12 = vpop.eup %10128  ;;  %v4321_v53 = vpop.f32.mrb[160].mxu0 }
 0x6b5   : > { %v4175_v43 = vmul.f32 %v10129_v12, %v8988_v3  ;;  %v12780_v44 = vadd.f32 %v8492_v56, %v4321_v53  ;;  %v4323_v41 = vpop.f32.mrb[161].mxu0  ;;  %v8500_v56 = vld [vmem:[%s15288_s0 + $0x140] sm:$0xff] }
 0x6b6   : > { %v12782_v1 = vadd.f32 %v8493_v4, %v4323_v41 }
 0x6b7   : > { %v4180_v27 = vpack.c.bf16 %v4175_v43, %v4174_v46  ;;  %v8501_v46 = vld [vmem:[%s15288_s0 + $0x148] sm:$0xff] }
 0x6b8   : > { %v4327_v49 = vpop.f32.mrb[162].mxu0  ;;  %v4368_v17 = vmax.f32 %v12780_v44, %v12782_v1 }
 0x6b9   : > { %4184 = vst.msk [vmem:[#allocation2 + $0x30] sm:$0xff] %vm796_vm0, %v4180_v27  ;;  %v12793_v52 = vadd.f32 %v8494_v34, %v4327_v49  ;;  %v4329_v45 = vpop.f32.mrb[163].mxu0  ;;  %v8502_v34 = vld [vmem:[%s15288_s0 + $0x150] sm:$0xff]  ;;  %v8503_v27 = vld [vmem:[%s15288_s0 + $0x158] sm:$0xff] }
 0x6ba   : > { %v10131_v36 = vpop.eup %10130  ;;  %v12795_v23 = vadd.f32 %v8495_v26, %v4329_v45  ;;  %4369 = vmax.xlane.f32.xlu0 %v4368_v17 }
 0x6bb   : > { %v4176_v30 = vmul.f32 %v10131_v36, %v8991_v42  ;;  %v8498_v42 = vld [vmem:[%s15288_s0 + $0x130] sm:$0xff] }
 0x6bc   : > { %v10133_v19 = vpop.eup %10132  ;;  %v4333_v3 = vpop.f32.mrb[164].mxu0  ;;  %v4371_v20 = vmax.f32 %v12793_v52, %v12795_v23 }
 0x6bd   : > { %v4177_v37 = vmul.f32 %v10133_v19, %v8994_v63  ;;  %v12805_v6 = vadd.f32 %v8496_v8, %v4333_v3  ;;  %v4335_v57 = vpop.f32.mrb[165].mxu0  ;;  %v8504_v8 = vld [vmem:[%s15288_s0 + $0x160] sm:$0xff] }
 0x6be   : > { %v12807_v21 = vadd.f32 %v8497_v16, %v4335_v57  ;;  %4372 = vmax.xlane.f32.xlu1 %v4371_v20  ;;  %v8506_v57 = vld [vmem:[%s15288_s0 + $0x170] sm:$0xff] }
 0x6bf   : > { %v4181_v14 = vpack.c.bf16 %v4177_v37, %v4176_v30  ;;  %v8505_v30 = vld [vmem:[%s15288_s0 + $0x168] sm:$0xff] }
 0x6c0   : > { %v4339_v15 = vpop.f32.mrb[166].mxu0  ;;  %v4374_v10 = vmax.f32 %v12805_v6, %v12807_v21 }
 0x6c1   : > { %4185 = vst.msk [vmem:[#allocation2 + $0x38] sm:$0xff] %vm796_vm0, %v4181_v14  ;;  %v4340_v61 = vadd.f32 %v8498_v42, %v4339_v15  ;;  %v4341_v63 = vpop.f32.mrb[167].mxu0  ;;  %v8507_v42 = vld [vmem:[%s15288_s0 + $0x178] sm:$0xff] }
 0x6c2   : > { %v4342_v25 = vadd.f32 %v8499_v58, %v4341_v63  ;;  %4375 = vmax.xlane.f32.xlu0 %v4374_v10 }
 0x6c4   : > { %v4345_v4 = vpop.f32.mrb[168].mxu0  ;;  %v4377_v12 = vmax.f32 %v4340_v61, %v4342_v25 }
 0x6c5   : > { %v12824_v53 = vadd.f32 %v8500_v56, %v4345_v4  ;;  %v4347_v43 = vpop.f32.mrb[169].mxu0 }
 0x6c6   : > { %v12826_v41 = vadd.f32 %v8501_v46, %v4347_v43  ;;  %4378 = vmax.xlane.f32.xlu0 %v4377_v12 }
 0x6c8   : > { %v4351_v26 = vpop.f32.mrb[170].mxu0  ;;  %v4380_v49 = vmax.f32 %v12824_v53, %v12826_v41 }
 0x6c9   : > { %v12836_v17 = vadd.f32 %v8502_v34, %v4351_v26  ;;  %v4353_v45 = vpop.f32.mrb[171].mxu0 }
 0x6ca   : > { %v12838_v36 = vadd.f32 %v8503_v27, %v4353_v45  ;;  %4381 = vmax.xlane.f32.xlu1 %v4380_v49 }
 0x6cc   : > { %v4357_v16 = vpop.f32.mrb[172].mxu0  ;;  %v4383_v19 = vmax.f32 %v12836_v17, %v12838_v36 }
 0x6cd   : > { %v12848_v3 = vadd.f32 %v8504_v8, %v4357_v16  ;;  %v4359_v20 = vpop.f32.mrb[173].mxu0 }
 0x6ce   : > { %v12850_v37 = vadd.f32 %v8505_v30, %v4359_v20  ;;  %4384 = vmax.xlane.f32.xlu0 %v4383_v19 }
 0x6d0   : > { %v4363_v14 = vpop.f32.mrb[174].mxu0  ;;  %v4386_v58 = vmax.f32 %v12848_v3, %v12850_v37 }
 0x6d1   : > { %v12860_v15 = vadd.f32 %v8506_v57, %v4363_v14  ;;  %v4365_v10 = vpop.f32.mrb[175].mxu0 }
 0x6d2   : > { %v12862_v63 = vadd.f32 %v8507_v42, %v4365_v10  ;;  %4387 = vmax.xlane.f32.xlu1 %v4386_v58  ;;  %v4621_v10 = vsel %vm3258_vm1, %v12655_v13, %v15308_v22 }
 0x6d4   : > { %v4389_v56 = vmax.f32 %v12860_v15, %v12862_v63 }
 0x6d6   : > { %4390 = vmax.xlane.f32.xlu0 %v4389_v56 }
 0x747   : > { %v4370_v46 = vpop.xlane.xlu0 %4369 }
 0x748   : > { %v4392_v4 = vsub.f32 %v12780_v44, %v4370_v46  ;;  %v4393_v12 = vsub.f32 %v12782_v1, %v4370_v46 }
 0x74a   : > { %v4408_v43 = vmul.f32 1.442695, %v4392_v4  ;;  %v4410_v34 = vmul.f32 1.442695, %v4393_v12  ;;  %v4629_v12 = vmul.f32 %v12676_v9, %v4621_v10 }
 0x74b   : > { %v4373_v27 = vpop.xlane.xlu1 %4372 }
 0x74c   : > { %v4394_v26 = vsub.f32 %v12793_v52, %v4373_v27  ;;  %v4395_v49 = vsub.f32 %v12795_v23, %v4373_v27  ;;  %10134 = vpow2.f32 %v4408_v43 }
 0x74d   : > { %10136 = vpow2.f32 %v4410_v34 }
 0x74e   : > { %v4412_v45 = vmul.f32 1.442695, %v4394_v26  ;;  %v4414_v8 = vmul.f32 1.442695, %v4395_v49  ;;  %v4628_v26 = vmul.f32 %v12670_v48, %v4621_v10  ;;  %v15331_v10 = vld [vmem:[#allocation102_spill] sm:$0xff] }
 0x74f   : > { %v4376_v30 = vpop.xlane.xlu0 %4375 }
 0x750   : > { %10138 = vpow2.f32 %v4412_v45  ;;  %v4396_v16 = vsub.f32 %v12805_v6, %v4376_v30  ;;  %v4397_v19 = vsub.f32 %v12807_v21, %v4376_v30 }
 0x751   : > { %10140 = vpow2.f32 %v4414_v8 }
 0x752   : > { %v4416_v44 = vmul.f32 1.442695, %v4396_v16  ;;  %v4418_v1 = vmul.f32 1.442695, %v4397_v19 }
 0x753   : > { %v4379_v20 = vpop.xlane.xlu0 %4378 }
 0x754   : > { %v4398_v57 = vsub.f32 %v4340_v61, %v4379_v20  ;;  %v4399_v42 = vsub.f32 %v4342_v25, %v4379_v20  ;;  %10142 = vpow2.f32 %v4416_v44  ;;  %v4620_v61 = vsel %vm3258_vm1, %v12650_v5, %v15307_v54  ;;  %v15329_v44 = vld [vmem:[#allocation48_spill] sm:$0xff] }
 0x755   : > { %10144 = vpow2.f32 %v4418_v1  ;;  %v4937_v24 = vmul.bf16 %v12689_v47, %v15329_v44 }
 0x756   : > { %v4420_v52 = vmul.f32 1.442695, %v4398_v57  ;;  %v4422_v14 = vmul.f32 1.442695, %v4399_v42  ;;  %v10135_v58 = vpop.eup %10134 }
 0x757   : > { %v4382_v23 = vpop.xlane.xlu1 %4381  ;;  %v10137_v56 = vpop.eup %10136 }
 0x758   : > { %10146 = vpow2.f32 %v4420_v52  ;;  %v4400_v6 = vsub.f32 %v12824_v53, %v4382_v23  ;;  %v4401_v21 = vsub.f32 %v12826_v41, %v4382_v23  ;;  %v4627_v41 = vmul.f32 %v12664_v55, %v4620_v61  ;;  %v15330_v52 = vld [vmem:[#allocation104_spill] sm:$0xff] }
 0x759   : > { %10148 = vpow2.f32 %v4422_v14  ;;  %v2709_v14 = vmax.f32 %v15330_v52, 1e-24 }
 0x75a   : > { %v10139_v46 = vpop.eup %10138  ;;  %v4424_v25 = vmul.f32 1.442695, %v4400_v6  ;;  %v4426_v43 = vmul.f32 1.442695, %v4401_v21  ;;  %v9867_v5 = vpack.c.bf16 %v4629_v12, %v4627_v41  ;;  %v2710_v6 = vmax.f32 %v15331_v10, 1e-24 }
 0x75b   : > { %v10141_v4 = vpop.eup %10140  ;;  %v4385_v34 = vpop.xlane.xlu0 %4384  ;;  %v4440_v27 = vpack.c.bf16 %v10139_v46, %v10135_v58  ;;  %v15332_v46 = vld [vmem:[#allocation108_spill] sm:$0xff] }
 0x75c   : > { %v4402_v22 = vsub.f32 %v12836_v17, %v4385_v34  ;;  %v4403_v13 = vsub.f32 %v12838_v36, %v4385_v34  ;;  %v4441_v53 = vpack.c.bf16 %v10141_v4, %v10137_v56  ;;  %10150 = vpow2.f32 %v4424_v25  ;;  %v15333_v34 = vld [vmem:[#allocation106_spill] sm:$0xff] }
 0x75d   : > { %10152 = vpow2.f32 %v4426_v43  ;;  %v4626_v17 = vmul.f32 %v12682_v0, %v4620_v61  ;;  %v2711_v61 = vmax.f32 %v15332_v46, 1e-24  ;;  %v4933_v46 = vmul.bf16 %v12609_v18, %v15329_v44 }
 0x75e   : > { %v4428_v49 = vmul.f32 1.442695, %v4402_v22  ;;  %v4430_v45 = vmul.f32 1.442695, %v4403_v13  ;;  %4480 = vmatprep.mubr.bf16.mxu1 %v4441_v53  ;;  %4561 = vmatprep.mubr.bf16.mxu0 %v4441_v53  ;;  %v10143_v9 = vpop.eup %10142  ;;  %v15334_v53 = vld [vmem:[#allocation112_spill] sm:$0xff] }
 0x75f   : > { %4481 = vmatmul.mubr.bf16.vlgmr.msra.gmra.mrb[160].mxu1 %v4440_v27  ;;  %4562 = vmatmul.mubr.bf16.vlgmr.msra.gmra.mrb[176].mxu0 %v4440_v27  ;;  %v4388_v54 = vpop.xlane.xlu1 %4387  ;;  %v10145_v36 = vpop.eup %10144  ;;  %v9869_v30 = vpack.c.bf16 %v4628_v26, %v4626_v17  ;;  %v2712_v27 = vmax.f32 %v15333_v34, 1e-24  ;;  %v2713_v41 = vmax.f32 %v15334_v53, 1e-24 }
 0x760   : > { %10154 = vpow2.f32 %v4428_v49  ;;  %9866 = vmatpush1.bf16.msra.mxu1 %v9865_v60  ;;  %v4404_v55 = vsub.f32 %v12848_v3, %v4388_v54  ;;  %v4405_v48 = vsub.f32 %v12850_v37, %v4388_v54  ;;  %9076 = vmatpush3.bf16.msra.mxu0 %v12533_v33 }
 0x761   : > { %10156 = vpow2.f32 %v4430_v45  ;;  %9868 = vmatprep.subr.bf16.mxu1 %v9867_v5  ;;  %9077 = vmatprep.subr.bf16.mxu0 %v12539_v59  ;;  %v15335_v45 = vld [vmem:[#allocation110_spill] sm:$0xff] }
 0x762   : > { %v10147_v8 = vpop.eup %10146  ;;  %v4432_v16 = vmul.f32 1.442695, %v4404_v55  ;;  %v4434_v19 = vmul.f32 1.442695, %v4405_v48  ;;  %v2714_v54 = vmax.f32 %v15335_v45, 1e-24 }
 0x763   : > { %v10149_v0 = vpop.eup %10148  ;;  %v4391_v38 = vpop.xlane.xlu0 %4390  ;;  %v4442_v60 = vpack.c.bf16 %v10147_v8, %v10143_v9  ;;  %v12920_v5 = vld [vmem:[%s15008_s11 + $0x38] sm:$0xff]   ;;  %v15336_v9 = vld [vmem:[#allocation20_spill] sm:$0xff] }
 0x764   : > { %9870 = vmatpush1.bf16.msra.mxu1 %v9869_v30  ;;  %v4406_v3 = vsub.f32 %v12860_v15, %v4391_v38  ;;  %v4407_v37 = vsub.f32 %v12862_v63, %v4391_v38  ;;  %v4443_v1 = vpack.c.bf16 %v10149_v0, %v10145_v36  ;;  %9078 = vmatpush3.bf16.msra.mxu0 %v12547_v40  ;;  %10158 = vpow2.f32 %v4432_v16  ;;  %v15337_v8 = vld [vmem:[#allocation46_spill] sm:$0xff]  ;;  %v15338_v16 = vld [vmem:[#allocation116_spill] sm:$0xff] }
 0x765   : > { %9115 = vmatprep.subr.bf16.mxu1 %v4937_v24  ;;  %9079 = vmatprep.subr.bf16.mxu0 %v12555_v11  ;;  %10160 = vpow2.f32 %v4434_v19  ;;  %v4929_v36 = vmul.bf16 %v12533_v33, %v15329_v44  ;;  %v4938_v30 = vmul.bf16 %v12539_v59, %v15337_v8  ;;  %v2715_v0 = vmax.f32 %v15338_v16, 1e-24  ;;  %v15339_v19 = vld [vmem:[#allocation19_spill] sm:$0xff] }
 0x766   : > { %v4436_v20 = vmul.f32 1.442695, %v4406_v3  ;;  %v4438_v57 = vmul.f32 1.442695, %v4407_v37  ;;  %4488 = vmatprep.mubr.bf16.mxu1 %v4443_v1  ;;  %4569 = vmatprep.mubr.bf16.mxu0 %v4443_v1  ;;  %v10151_v42 = vpop.eup %10150  ;;  %v4930_v33 = vmul.bf16 %v12547_v40, %v15337_v8  ;;  %v15340_v3 = vld [vmem:[#allocation54_spill] sm:$0xff] }
 0x767   : > { %4489 = vmatmul.mubr.bf16.gmra.mrb[164].mxu1 %v4442_v60  ;;  %4570 = vmatmul.mubr.bf16.gmra.mrb[180].mxu0 %v4442_v60  ;;  %v10153_v15 = vpop.eup %10152  ;;  %v4939_v59 = vmul.bf16 %v12555_v11, %v15340_v3  ;;  %v15341_v37 = vld [vmem:[#allocation114_spill] sm:$0xff]  ;;  %v4931_v40 = vmul.bf16 %v12569_v2, %v15340_v3  ;;  %v4935_v34 = vmul.bf16 %v12633_v7, %v15340_v3 }
 0x768   : > { %10162 = vpow2.f32 %v4436_v20  ;;  %9080 = vmatpush3.bf16.msra.mxu0 %v12569_v2  ;;  %v2716_v1 = vmax.f32 %v15341_v37, 1e-24  ;;  %v15342_v20 = vld [vmem:[#allocation22_spill] sm:$0xff]  ;;  %v4941_v2 = vmul.bf16 %v12603_v32, %v15329_v44 }
 0x769   : > { %10164 = vpow2.f32 %v4438_v57  ;;  %9081 = vmatprep.subr.bf16.mxu0 %v12589_v35 }
 0x76a   : > { %v10155_v63 = vpop.eup %10154  ;;  %10166 = vrsqrt.f32 %v2709_v14  ;;  %v15343_v14 = vld [vmem:[#allocation52_spill] sm:$0xff] }
 0x76b   : > { %v10157_v23 = vpop.eup %10156  ;;  %v4444_v58 = vpack.c.bf16 %v10155_v63, %v10151_v42  ;;  %10168 = vrsqrt.f32 %v2710_v6  ;;  %v4940_v11 = vmul.bf16 %v12589_v35, %v15343_v14  ;;  %v4932_v10 = vmul.bf16 %v12597_v50, %v15343_v14  ;;  %v15345_v35 = vld [vmem:[#allocation25_spill] sm:$0xff] }
 0x76c   : > { %v4445_v21 = vpack.c.bf16 %v10157_v23, %v10153_v15  ;;  %9082 = vmatpush3.bf16.msra.mxu0 %v12597_v50  ;;  %10170 = vrsqrt.f32 %v2711_v61  ;;  %v15344_v15 = vld [vmem:[#allocation21_spill] sm:$0xff]  ;;  %v4942_v50 = vmul.bf16 %v12615_v62, %v15337_v8 }
 0x76d   : > { %9083 = vmatprep.subr.bf16.mxu0 %v12603_v32  ;;  %10172 = vrsqrt.f32 %v2712_v27  ;;  %v15346_v32 = vld [vmem:[#allocation23_spill] sm:$0xff] }
 0x76e   : > { %4496 = vmatprep.mubr.bf16.mxu1 %v4445_v21  ;;  %4577 = vmatprep.mubr.bf16.mxu0 %v4445_v21  ;;  %v10159_v56 = vpop.eup %10158  ;;  %10174 = vrsqrt.f32 %v2713_v41 }
 0x76f   : > { %4497 = vmatmul.mubr.bf16.gmra.mrb[168].mxu1 %v4444_v58  ;;  %4578 = vmatmul.mubr.bf16.gmra.mrb[184].mxu0 %v4444_v58  ;;  %v10161_v25 = vpop.eup %10160  ;;  %10176 = vrsqrt.f32 %v2714_v54 }
 0x770   : > { %9084 = vmatpush3.bf16.msra.mxu0 %v12609_v18  ;;  %10178 = vrsqrt.f32 %v2715_v0  ;;  %v4943_v18 = vmul.bf16 %v12627_v29, %v15340_v3 }
 0x771   : > { %9085 = vmatprep.subr.bf16.mxu0 %v12615_v62  ;;  %10180 = vrsqrt.f32 %v2716_v1  ;;  %v15347_v62 = vld [vmem:[#allocation27_spill] sm:$0xff] }
 0x772   : > { %v10163_v4 = vpop.eup %10162 }
 0x773   : > { %v10165_v12 = vpop.eup %10164  ;;  %v4446_v43 = vpack.c.bf16 %v10163_v4, %v10159_v56 }
 0x774   : > { %v4447_v22 = vpack.c.bf16 %v10165_v12, %v10161_v25  ;;  %9086 = vmatpush3.bf16.msra.mxu0 %v12621_v51  ;;  %v10167_v13 = vpop.eup %10166  ;;  %v4934_v12 = vmul.bf16 %v12621_v51, %v15337_v8  ;;  %v4944_v51 = vmul.bf16 %v12762_v39, %v15343_v14 }
 0x775   : > { %9087 = vmatprep.subr.bf16.mxu0 %v12627_v29  ;;  %v2844_v26 = vmul.f32 %v12700_v31, %v10167_v13  ;;  %v10169_v49 = vpop.eup %10168  ;;  %v15348_v29 = vld [vmem:[#allocation26_spill] sm:$0xff] }
 0x776   : > { %4504 = vmatprep.mubr.bf16.mxu1 %v4447_v22  ;;  %4585 = vmatprep.mubr.bf16.mxu0 %v4447_v22  ;;  %v2845_v55 = vmul.f32 %v12700_v31, %v10169_v49  ;;  %v10171_v48 = vpop.eup %10170  ;;  %v4936_v22 = vmul.bf16 %v12920_v5, %v15343_v14 }
 0x777   : > { %4505 = vmatmul.mubr.bf16.gmra.mrb[172].mxu1 %v4446_v43  ;;  %4586 = vmatmul.mubr.bf16.gmra.mrb[188].mxu0 %v4446_v43  ;;  %v2908_v17 = vmul.f32 %v2844_v26, %v15336_v9  ;;  %v2846_v38 = vmul.f32 %v12700_v31, %v10171_v48  ;;  %v10173_v60 = vpop.eup %10172 }
 0x778   : > { %4735 = vmatprep.mubr.f32.mxu1 %v15159_v28  ;;  %9088 = vmatpush3.bf16.msra.mxu0 %v12633_v7  ;;  %v2909_v24 = vmul.f32 %v2845_v55, %v15339_v19  ;;  %v2847_v42 = vmul.f32 %v12700_v31, %v10173_v60  ;;  %v10175_v52 = vpop.eup %10174 }
 0x779   : > { %9089 = vmatprep.subr.bf16.mxu0 %v12762_v39  ;;  %v2910_v57 = vmul.f32 %v2846_v38, %v15342_v20  ;;  %v2848_v23 = vmul.f32 %v12700_v31, %v10175_v52  ;;  %v10177_v58 = vpop.eup %10176 }
 0x77a   : > { %v2911_v63 = vmul.f32 %v2847_v42, %v15344_v15  ;;  %v2849_v21 = vmul.f32 %v12700_v31, %v10177_v58  ;;  %v10179_v56 = vpop.eup %10178 }
 0x77b   : > { %v2912_v6 = vmul.f32 %v2848_v23, %v15345_v35  ;;  %v2850_v25 = vmul.f32 %v12700_v31, %v10179_v56  ;;  %v10181_v4 = vpop.eup %10180 }
 0x77c   : > { %9090 = vmatpush3.bf16.msra.mxu0 %v12920_v5  ;;  %v2913_v61 = vmul.f32 %v2849_v21, %v15346_v32  ;;  %v2851_v43 = vmul.f32 %v12700_v31, %v10181_v4 }
 0x77d   : > { %v2914_v44 = vmul.f32 %v2850_v25, %v15347_v62 }
 0x77e   : > { %v2915_v27 = vmul.f32 %v2851_v43, %v15348_v29  ;;  %v8516_v29 = vld [vmem:[%s15288_s0 + $0x180] sm:$0xff] }
 0x77f   : > { %8532 = vmatmul.mubr.msk.f32.vlgmr.msra.gmra.mrb[176].mxu1 %vm796_vm0, %v2908_v17 }
 0x780   : > { %9116 = vmatpush3.bf16.msra.mxu1 %v4929_v36  ;;  %4741 = vmatprep.mubr.f32.mxu1 %v15159_v28 }
 0x781   : > { %9117 = vmatprep.subr.bf16.mxu1 %v4938_v30 }
 0x783   : > { %8533 = vmatmul.mubr.msk.f32.gmra.mrb[178].mxu1 %vm796_vm0, %v2909_v24 }
 0x784   : > { %9118 = vmatpush3.bf16.msra.mxu1 %v4930_v33  ;;  %4747 = vmatprep.mubr.f32.mxu1 %v15159_v28 }
 0x785   : > { %9119 = vmatprep.subr.bf16.mxu1 %v4939_v59 }
 0x787   : > { %8534 = vmatmul.mubr.msk.f32.gmra.mrb[180].mxu1 %vm796_vm0, %v2910_v57 }
 0x788   : > { %9120 = vmatpush3.bf16.msra.mxu1 %v4931_v40  ;;  %4753 = vmatprep.mubr.f32.mxu1 %v15159_v28 }
 0x789   : > { %9121 = vmatprep.subr.bf16.mxu1 %v4940_v11 }
 0x78b   : > { %8535 = vmatmul.mubr.msk.f32.gmra.mrb[182].mxu1 %vm796_vm0, %v2911_v63 }
 0x78c   : > { %9122 = vmatpush3.bf16.msra.mxu1 %v4932_v10  ;;  %4759 = vmatprep.mubr.f32.mxu1 %v15159_v28 }
 0x78d   : > { %9123 = vmatprep.subr.bf16.mxu1 %v4941_v2 }
 0x78f   : > { %8536 = vmatmul.mubr.msk.f32.gmra.mrb[184].mxu1 %vm796_vm0, %v2912_v6 }
 0x790   : > { %9124 = vmatpush3.bf16.msra.mxu1 %v4933_v46  ;;  %4765 = vmatprep.mubr.f32.mxu1 %v15159_v28 }
 0x791   : > { %9125 = vmatprep.subr.bf16.mxu1 %v4942_v50 }
 0x793   : > { %8537 = vmatmul.mubr.msk.f32.gmra.mrb[186].mxu1 %vm796_vm0, %v2913_v61 }
 0x794   : > { %9126 = vmatpush3.bf16.msra.mxu1 %v4934_v12  ;;  %4771 = vmatprep.mubr.f32.mxu1 %v15159_v28 }
 0x795   : > { %9127 = vmatprep.subr.bf16.mxu1 %v4943_v18 }
 0x797   : > { %8538 = vmatmul.mubr.msk.f32.gmra.mrb[188].mxu1 %vm796_vm0, %v2914_v44 }
 0x798   : > { %9128 = vmatpush3.bf16.msra.mxu1 %v4935_v34  ;;  %4777 = vmatprep.mubr.f32.mxu1 %v15159_v28 }
 0x799   : > { %9129 = vmatprep.subr.bf16.mxu1 %v4944_v51 }
 0x79b   : > { %8539 = vmatmul.mubr.msk.f32.gmra.mrb[190].mxu1 %vm796_vm0, %v2915_v27 }
 0x79c   : > { %9130 = vmatpush3.bf16.msra.mxu1 %v4936_v22  ;;  %v8517_v22 = vld [vmem:[%s15288_s0 + $0x188] sm:$0xff] }
 0x79d   : > { %9155 = vmatprep.subr.bf16.mxu1 %v12689_v47 }
 0x832   : > { %v9011_v7 = vpop.f32.mrb[160].mxu1  ;;  %v9051_v31 = vpop.f32.mrb[176].mxu0 }
 0x833   : > { %v9012_v13 = vpop.f32.mrb[161].mxu1  ;;  %v9052_v53 = vpop.f32.mrb[177].mxu0 }
 0x834   : > { %v9013_v41 = vadd.f32 %v9012_v13, %v9011_v7  ;;  %v9053_v39 = vadd.f32 %v9052_v53, %v9051_v31  ;;  %v9014_v26 = vpop.f32.mrb[162].mxu1  ;;  %v9054_v49 = vpop.f32.mrb[178].mxu0 }
 0x835   : > { %v9015_v45 = vpop.f32.mrb[163].mxu1  ;;  %v9055_v54 = vpop.f32.mrb[179].mxu0 }
 0x836   : > { %10182 = vrcp.f32 %v9013_v41  ;;  %v9016_v9 = vadd.f32 %v9015_v45, %v9014_v26  ;;  %v9056_v17 = vadd.f32 %v9055_v54, %v9054_v49  ;;  %v8518_v26 = vld [vmem:[%s15288_s0 + $0x190] sm:$0xff]  ;;  %v8519_v45 = vld [vmem:[%s15288_s0 + $0x198] sm:$0xff] }
 0x838   : > { %10184 = vrcp.f32 %v9016_v9 }
 0x83a   : > { %v9017_v55 = vpop.f32.mrb[164].mxu1  ;;  %v9057_v48 = vpop.f32.mrb[180].mxu0 }
 0x83b   : > { %v9018_v36 = vpop.f32.mrb[165].mxu1  ;;  %v9058_v8 = vpop.f32.mrb[181].mxu0 }
 0x83c   : > { %v9019_v30 = vadd.f32 %v9018_v36, %v9017_v55  ;;  %v9059_v47 = vadd.f32 %v9058_v8, %v9057_v48  ;;  %v9020_v16 = vpop.f32.mrb[166].mxu1  ;;  %v9060_v0 = vpop.f32.mrb[182].mxu0  ;;  %v8520_v8 = vld [vmem:[%s15288_s0 + $0x1a0] sm:$0xff] }
 0x83d   : > { %v9021_v19 = vpop.f32.mrb[167].mxu1  ;;  %v9061_v24 = vpop.f32.mrb[183].mxu0 }
 0x83e   : > { %10186 = vrcp.f32 %v9019_v30  ;;  %v9022_v38 = vadd.f32 %v9021_v19, %v9020_v16  ;;  %v9062_v60 = vadd.f32 %v9061_v24, %v9060_v0 }
 0x840   : > { %v10183_v33 = vpop.eup %10182  ;;  %10188 = vrcp.f32 %v9022_v38 }
 0x841   : > { %v4602_v3 = vmul.f32 %v10183_v33, %v9053_v39 }
 0x842   : > { %v10185_v59 = vpop.eup %10184  ;;  %v9023_v37 = vpop.f32.mrb[168].mxu1 }
 0x843   : > { %v9063_v1 = vpop.f32.mrb[184].mxu0  ;;  %v4603_v20 = vmul.f32 %v10185_v59, %v9056_v17  ;;  %v9024_v57 = vpop.f32.mrb[169].mxu1 }
 0x844   : > { %v9064_v42 = vpop.f32.mrb[185].mxu0  ;;  %v9025_v52 = vadd.f32 %v9024_v57, %v9023_v37  ;;  %v9026_v14 = vpop.f32.mrb[170].mxu1  ;;  %v8523_v37 = vld [vmem:[%s15288_s0 + $0x1b8] sm:$0xff] }
 0x845   : > { %v9065_v40 = vadd.f32 %v9064_v42, %v9063_v1  ;;  %v9066_v11 = vpop.f32.mrb[186].mxu0  ;;  %v4610_v15 = vpack.c.bf16 %v4603_v20, %v4602_v3  ;;  %v9027_v63 = vpop.f32.mrb[171].mxu1  ;;  %v8522_v3 = vld [vmem:[%s15288_s0 + $0x1b0] sm:$0xff] }
 0x846   : > { %v9067_v23 = vpop.f32.mrb[187].mxu0  ;;  %10190 = vrcp.f32 %v9025_v52  ;;  %v9028_v58 = vadd.f32 %v9027_v63, %v9026_v14  ;;  %v8527_v63 = vld [vmem:[%s15288_s0 + $0x1d8] sm:$0xff] }
 0x847   : > { %v9068_v10 = vadd.f32 %v9067_v23, %v9066_v11  ;;  %4614 = vst.msk [vmem:[#allocation2 + $0x40] sm:$0xff] %vm796_vm0, %v4610_v15  ;;  %v8526_v15 = vld [vmem:[%s15288_s0 + $0x1d0] sm:$0xff] }
 0x848   : > { %v10187_v2 = vpop.eup %10186  ;;  %10192 = vrcp.f32 %v9028_v58 }
 0x849   : > { %v4604_v35 = vmul.f32 %v10187_v2, %v9059_v47  ;;  %v8521_v47 = vld [vmem:[%s15288_s0 + $0x1a8] sm:$0xff] }
 0x84a   : > { %v10189_v6 = vpop.eup %10188  ;;  %v9029_v21 = vpop.f32.mrb[172].mxu1 }
 0x84b   : > { %v9069_v56 = vpop.f32.mrb[188].mxu0  ;;  %v4605_v46 = vmul.f32 %v10189_v6, %v9062_v60  ;;  %v9030_v50 = vpop.f32.mrb[173].mxu1 }
 0x84c   : > { %v9070_v32 = vpop.f32.mrb[189].mxu0  ;;  %v9031_v61 = vadd.f32 %v9030_v50, %v9029_v21  ;;  %v9032_v4 = vpop.f32.mrb[174].mxu1 }
 0x84d   : > { %v9071_v25 = vadd.f32 %v9070_v32, %v9069_v56  ;;  %v9072_v12 = vpop.f32.mrb[190].mxu0  ;;  %v4611_v18 = vpack.c.bf16 %v4605_v46, %v4604_v35  ;;  %v9033_v62 = vpop.f32.mrb[175].mxu1  ;;  %v8530_v56 = vld [vmem:[%s15288_s0 + $0x1f0] sm:$0xff]  ;;  %v8531_v46 = vld [vmem:[%s15288_s0 + $0x1f8] sm:$0xff] }
 0x84e   : > { %v9073_v44 = vpop.f32.mrb[191].mxu0  ;;  %10194 = vrcp.f32 %v9031_v61  ;;  %v9034_v43 = vadd.f32 %v9033_v62, %v9032_v4  ;;  %v15349_v4 = vld [vmem:[#allocation101_spill] sm:$0xff]  ;;  %v8524_v62 = vld [vmem:[%s15288_s0 + $0x1c0] sm:$0xff] }
 0x84f   : > { %v9074_v34 = vadd.f32 %v9073_v44, %v9072_v12  ;;  %4615 = vst.msk [vmem:[#allocation2 + $0x48] sm:$0xff] %vm796_vm0, %v4611_v18  ;;  %v15350_v18 = vld [vmem:[#allocation105_spill] sm:$0xff]  ;;  %v8525_v44 = vld [vmem:[%s15288_s0 + $0x1c8] sm:$0xff] }
 0x850   : > { %v10191_v51 = vpop.eup %10190  ;;  %10196 = vrcp.f32 %v9034_v43 }
 0x851   : > { %v4606_v27 = vmul.f32 %v10191_v51, %v9065_v40  ;;  %v8528_v51 = vld [vmem:[%s15288_s0 + $0x1e0] sm:$0xff] }
 0x852   : > { %v10193_v7 = vpop.eup %10192  ;;  %v4737_v31 = vpop.f32.mrb[176].mxu1 }
 0x853   : > { %v4607_v13 = vmul.f32 %v10193_v7, %v9068_v10  ;;  %v12994_v53 = vadd.f32 %v8516_v29, %v4737_v31  ;;  %v4739_v41 = vpop.f32.mrb[177].mxu1  ;;  %v8529_v29 = vld [vmem:[%s15288_s0 + $0x1e8] sm:$0xff] }
 0x854   : > { %v12996_v39 = vadd.f32 %v8517_v22, %v4739_v41  ;;  %v15352_v41 = vld [vmem:[#allocation113_spill] sm:$0xff] }
 0x855   : > { %v4612_v49 = vpack.c.bf16 %v4607_v13, %v4606_v27  ;;  %v15351_v13 = vld [vmem:[#allocation109_spill] sm:$0xff] }
 0x856   : > { %v4743_v54 = vpop.f32.mrb[178].mxu1  ;;  %v4784_v9 = vmax.f32 %v12994_v53, %v12996_v39 }
 0x857   : > { %4616 = vst.msk [vmem:[#allocation2 + $0x50] sm:$0xff] %vm796_vm0, %v4612_v49  ;;  %v13007_v17 = vadd.f32 %v8518_v26, %v4743_v54  ;;  %v4745_v55 = vpop.f32.mrb[179].mxu1 }
 0x858   : > { %v10195_v48 = vpop.eup %10194  ;;  %v13009_v36 = vadd.f32 %v8519_v45, %v4745_v55  ;;  %4785 = vmax.xlane.f32.xlu1 %v4784_v9 }
 0x859   : > { %v4608_v30 = vmul.f32 %v10195_v48, %v9071_v25 }
 0x85a   : > { %v10197_v16 = vpop.eup %10196  ;;  %v4749_v0 = vpop.f32.mrb[180].mxu1  ;;  %v4787_v19 = vmax.f32 %v13007_v17, %v13009_v36 }
 0x85b   : > { %v4609_v24 = vmul.f32 %v10197_v16, %v9074_v34  ;;  %v13019_v38 = vadd.f32 %v8520_v8, %v4749_v0  ;;  %v4751_v60 = vpop.f32.mrb[181].mxu1 }
 0x85c   : > { %v13021_v33 = vadd.f32 %v8521_v47, %v4751_v60  ;;  %4788 = vmax.xlane.f32.xlu0 %v4787_v19 }
 0x85d   : > { %v4613_v59 = vpack.c.bf16 %v4609_v24, %v4608_v30 }
 0x85e   : > { %v4755_v1 = vpop.f32.mrb[182].mxu1  ;;  %v4790_v20 = vmax.f32 %v13019_v38, %v13021_v33 }
 0x85f   : > { %4617 = vst.msk [vmem:[#allocation2 + $0x58] sm:$0xff] %vm796_vm0, %v4613_v59  ;;  %v13032_v57 = vadd.f32 %v8522_v3, %v4755_v1  ;;  %v4757_v42 = vpop.f32.mrb[183].mxu1 }
 0x860   : > { %v13034_v52 = vadd.f32 %v8523_v37, %v4757_v42  ;;  %4791 = vmax.xlane.f32.xlu1 %v4790_v20 }
 0x862   : > { %v4761_v40 = vpop.f32.mrb[184].mxu1  ;;  %v4793_v14 = vmax.f32 %v13032_v57, %v13034_v52 }
 0x863   : > { %v4763_v11 = vpop.f32.mrb[185].mxu1  ;;  %v13072_v43 = vadd.f32 %v8524_v62, %v4761_v40  ;;  %v10628_v62 = vld [vmem:[%s15007_s10 + $0x8] sm:$0xff] }
 0x864   : > { %4794 = vmax.xlane.f32.xlu0 %v4793_v14  ;;  %v13074_v34 = vadd.f32 %v8525_v44, %v4763_v11  ;;  %v13113_v14 = vld [vmem:[%s15008_s11 + $0x48] sm:$0xff]  }
 0x866   : > { %v4767_v23 = vpop.f32.mrb[186].mxu1  ;;  %v4796_v7 = vmax.f32 %v13072_v43, %v13074_v34 }
 0x867   : > { %v13044_v58 = vadd.f32 %v8526_v15, %v4767_v23  ;;  %v4769_v10 = vpop.f32.mrb[187].mxu1 }
 0x868   : > { %v13046_v2 = vadd.f32 %v8527_v63, %v4769_v10 }
 0x86a   : > { %v4773_v35 = vpop.f32.mrb[188].mxu1  ;;  %v4799_v6 = vmax.f32 %v13044_v58, %v13046_v2 }
 0x86b   : > { %v4775_v21 = vpop.f32.mrb[189].mxu1  ;;  %v13082_v27 = vadd.f32 %v8528_v51, %v4773_v35  ;;  %v13121_v35 = vld [vmem:[%s15008_s11 + $0x8] sm:$0xff]   ;;  %v13143_v51 = vld [vmem:[%s15008_s11 + $0x10] sm:$0xff]  }
 0x86c   : > { %4800 = vmax.xlane.f32.xlu0 %v4799_v6  ;;  %v13084_v22 = vadd.f32 %v8529_v29, %v4775_v21 }
 0x86e   : > { %v4779_v50 = vpop.f32.mrb[190].mxu1  ;;  %v4802_v31 = vmax.f32 %v13082_v27, %v13084_v22 }
 0x86f   : > { %v13056_v32 = vadd.f32 %v8530_v56, %v4779_v50  ;;  %v4781_v61 = vpop.f32.mrb[191].mxu1  ;;  %v13129_v56 = vld [vmem:[%s15008_s11 + $0x50] sm:$0xff]  }
 0x870   : > { %v13058_v25 = vadd.f32 %v8531_v46, %v4781_v61  ;;  %v10627_v61 = vld [vmem:[%s15007_s10] sm:$0xff] }
 0x871   : > { %5038 = vrot.lane.b32.xlu1 %v15349_v4, %s15304_s5 }
 0x872   : > { %v4805_v12 = vmax.f32 %v13056_v32, %v13058_v25 }
 0x874   : > { %4806 = vmax.xlane.f32.xlu0 %v4805_v12 }
 0x88a   : > { %5040 = vrot.lane.b32.xlu0 %v15350_v18, %s15304_s5 }
 0x895   : > { %4797 = vmax.xlane.f32.xlu1 %v4796_v7 }
 0x899   : > { %4803 = vmax.xlane.f32.xlu1 %v4802_v31  ;;  %v10630_v31 = vld [vmem:[%s15007_s10 + $0x10] sm:$0xff] }
 0x8aa   : > { %5042 = vrot.lane.b32.xlu1 %v15351_v13, %s15304_s5 }
 0x8ae   : > { %5044 = vrot.lane.b32.xlu1 %v15352_v41, %s15304_s5 }
 0x8e5   : > { %v4786_v26 = vpop.xlane.xlu1 %4785 }
 0x8e6   : > { %v4808_v49 = vsub.f32 %v12994_v53, %v4786_v26  ;;  %v4809_v45 = vsub.f32 %v12996_v39, %v4786_v26 }
 0x8e8   : > { %v4824_v54 = vmul.f32 1.442695, %v4808_v49  ;;  %v4826_v9 = vmul.f32 1.442695, %v4809_v45  ;;  %v10631_v49 = vld [vmem:[%s15007_s10 + $0x18] sm:$0xff] }
 0x8e9   : > { %v4789_v55 = vpop.xlane.xlu0 %4788 }
 0x8ea   : > { %v4810_v48 = vsub.f32 %v13007_v17, %v4789_v55  ;;  %v4811_v8 = vsub.f32 %v13009_v36, %v4789_v55  ;;  %10198 = vpow2.f32 %v4824_v54 }
 0x8eb   : > { %10200 = vpow2.f32 %v4826_v9  ;;  %v13163_v9 = vld [vmem:[%s15008_s11 + $0x58] sm:$0xff]  }
 0x8ec   : > { %v4828_v30 = vmul.f32 1.442695, %v4810_v48  ;;  %v4830_v47 = vmul.f32 1.442695, %v4811_v8  ;;  %v13171_v8 = vld [vmem:[%s15008_s11 + $0x18] sm:$0xff]  }
 0x8ed   : > { %v4792_v16 = vpop.xlane.xlu1 %4791 }
 0x8ee   : > { %10202 = vpow2.f32 %v4828_v30  ;;  %v4812_v0 = vsub.f32 %v13019_v38, %v4792_v16  ;;  %v4813_v19 = vsub.f32 %v13021_v33, %v4792_v16  ;;  %v13177_v30 = vld [vmem:[%s15008_s11 + $0x60] sm:$0xff]   ;;  %v13189_v16 = vld [vmem:[%s15008_s11 + $0x68] sm:$0xff]  }
 0x8ef   : > { %10204 = vpow2.f32 %v4830_v47  ;;  %v13183_v47 = vld [vmem:[%s15008_s11 + $0x20] sm:$0xff]  }
 0x8f0   : > { %v4832_v53 = vmul.f32 1.442695, %v4812_v0  ;;  %v4834_v39 = vmul.f32 1.442695, %v4813_v19  ;;  %v13195_v0 = vld [vmem:[%s15008_s11 + $0x28] sm:$0xff]   ;;  %v13201_v19 = vld [vmem:[%s15008_s11 + $0x70] sm:$0xff]  }
 0x8f1   : > { %v4795_v24 = vpop.xlane.xlu0 %4794  ;;  %v5039_v15 = vpop.permute.xlu1 %5038 }
 0x8f2   : > { %v4814_v60 = vsub.f32 %v13032_v57, %v4795_v24  ;;  %v4815_v17 = vsub.f32 %v13034_v52, %v4795_v24  ;;  %10206 = vpow2.f32 %v4832_v53  ;;  %v13107_v52 = vld [vmem:[%s15008_s11] sm:$0xff]   ;;  %v5050_v21 = vsel %vm3258_vm1, %v15349_v4, %v5039_v15 }
 0x8f3   : > { %10208 = vpow2.f32 %v4834_v39  ;;  %v5466_v46 = vsel %vm3258_vm1, %v5039_v15, %v15349_v4  ;;  %v5054_v12 = vmul.f32 %v10627_v61, %v5050_v21  ;;  %v5055_v44 = vmul.f32 %v10628_v62, %v5050_v21  ;;  %v13207_v39 = vld [vmem:[%s15008_s11 + $0x30] sm:$0xff]   ;;  %v15353_v21 = vld [vmem:[#allocation118_spill] sm:$0xff] }
 0x8f4   : > { %v4836_v36 = vmul.f32 1.442695, %v4814_v60  ;;  %v4838_v3 = vmul.f32 1.442695, %v4815_v17  ;;  %v10199_v59 = vpop.eup %10198  ;;  %v13150_v7 = vmul.f32 %v10627_v61, %v5466_v46  ;;  %v5471_v24 = vmul.f32 %v10628_v62, %v5466_v46  ;;  %v13213_v60 = vld [vmem:[%s15008_s11 + $0x78] sm:$0xff]   ;;  %v13243_v46 = vld [vmem:[%s15007_s10 + $0x28] sm:$0xff] }
 0x8f5   : > { %v10201_v37 = vpop.eup %10200  ;;  %v13249_v61 = vld [vmem:[%s15007_s10 + $0x30] sm:$0xff]  ;;  %v13255_v62 = vld [vmem:[%s15007_s10 + $0x38] sm:$0xff] }
 0x8f6   : > { %10210 = vpow2.f32 %v4836_v36 }
 0x8f7   : > { %10212 = vpow2.f32 %v4838_v3 }
 0x8f8   : > { %v10203_v1 = vpop.eup %10202 }
 0x8f9   : > { %v10205_v38 = vpop.eup %10204  ;;  %v4856_v20 = vpack.c.bf16 %v10203_v1, %v10199_v59  ;;  %v13102_v42 = vpop.xlane.xlu0 %4800 }
 0x8fa   : > { %v4857_v33 = vpack.c.bf16 %v10205_v38, %v10201_v37  ;;  %v4818_v36 = vsub.f32 %v13044_v58, %v13102_v42  ;;  %v4819_v3 = vsub.f32 %v13046_v2, %v13102_v42 }
 0x8fc   : > { %4896 = vmatprep.mubr.bf16.mxu0 %v4857_v33  ;;  %4977 = vmatprep.mubr.bf16.mxu1 %v4857_v33  ;;  %v10207_v57 = vpop.eup %10206  ;;  %v4844_v59 = vmul.f32 1.442695, %v4818_v36  ;;  %v4846_v37 = vmul.f32 1.442695, %v4819_v3  ;;  %v13268_v3 = vld [vmem:[%s15008_s11 + $0x40] sm:$0xff]  }
 0x8fd   : > { %4897 = vmatmul.mubr.bf16.vlgmr.msra.gmra.mrb[192].mxu0 %v4856_v20  ;;  %4978 = vmatmul.mubr.bf16.vlgmr.msra.gmra.mrb[192].mxu1 %v4856_v20  ;;  %v10209_v40 = vpop.eup %10208 }
 0x8fe   : > { %9156 = vmatpush3.bf16.msra.mxu1 %v13107_v52  ;;  %10214 = vpow2.f32 %v4844_v59  ;;  %v15355_v59 = vld [vmem:[#allocation60_spill] sm:$0xff] }
 0x8ff   : > { %9157 = vmatprep.subr.bf16.mxu1 %v13113_v14  ;;  %10216 = vpow2.f32 %v4846_v37  ;;  %v5369_v37 = vmul.bf16 %v13268_v3, %v15355_v59 }
 0x900   : > { %v10211_v11 = vpop.eup %10210 }
 0x901   : > { %v10213_v63 = vpop.eup %10212  ;;  %v13116_v23 = vpop.xlane.xlu0 %4806  ;;  %v4858_v10 = vpack.c.bf16 %v10211_v11, %v10207_v57 }
 0x902   : > { %9158 = vmatpush3.bf16.msra.mxu1 %v13121_v35  ;;  %v4859_v6 = vpack.c.bf16 %v10213_v63, %v10209_v40  ;;  %v4823_v38 = vsub.f32 %v13058_v25, %v13116_v23  ;;  %v4822_v42 = vsub.f32 %v13056_v32, %v13116_v23 }
 0x903   : > { %9159 = vmatprep.subr.bf16.mxu1 %v13129_v56 }
 0x904   : > { %4904 = vmatprep.mubr.bf16.mxu0 %v4859_v6  ;;  %4985 = vmatprep.mubr.bf16.mxu1 %v4859_v6  ;;  %v4854_v15 = vmul.f32 1.442695, %v4823_v38 }
 0x905   : > { %4905 = vmatmul.mubr.bf16.gmra.mrb[196].mxu0 %v4858_v10  ;;  %4986 = vmatmul.mubr.bf16.gmra.mrb[196].mxu1 %v4858_v10  ;;  %v5041_v50 = vpop.permute.xlu0 %5040 }
 0x906   : > { %9160 = vmatpush3.bf16.msra.mxu1 %v13143_v51  ;;  %v5051_v4 = vsel %vm3258_vm1, %v15350_v18, %v5041_v50  ;;  %v5467_v29 = vsel %vm3258_vm1, %v5041_v50, %v15350_v18 }
 0x907   : > { %v5056_v26 = vmul.f32 %v10630_v31, %v5051_v4  ;;  %v5057_v45 = vmul.f32 %v10631_v49, %v5051_v4  ;;  %v13158_v54 = vmul.f32 %v10630_v31, %v5467_v29  ;;  %9161 = vmatprep.subr.bf16.mxu1 %v13163_v9  ;;  %v5473_v53 = vmul.f32 %v10631_v49, %v5467_v29  ;;  %v13261_v29 = vld [vmem:[%s15007_s10 + $0x20] sm:$0xff] }
 0x909   : > { %v9873_v18 = vpack.c.bf16 %v5056_v26, %v5054_v12  ;;  %v9881_v55 = vpack.c.bf16 %v13158_v54, %v13150_v7  ;;  %v9871_v48 = vpack.c.bf16 %v5057_v45, %v5055_v44  ;;  %v9879_v17 = vpack.c.bf16 %v5473_v53, %v5471_v24 }
 0x90a   : > { %9162 = vmatpush3.bf16.msra.mxu1 %v13171_v8 }
 0x90b   : > { %9872 = vmatprep.subr.bf16.mxu0 %v9871_v48  ;;  %9163 = vmatprep.subr.bf16.mxu1 %v13177_v30 }
 0x90c   : > { %9874 = vmatpush1.bf16.msra.mxu0 %v9873_v18  ;;  %v15354_v18 = vld [vmem:[#allocation117_spill] sm:$0xff] }
 0x90d   : > { %v2718_v48 = vmax.f32 %v15354_v18, 1e-24 }
 0x90e   : > { %9164 = vmatpush3.bf16.msra.mxu1 %v13183_v47 }
 0x90f   : > { %9165 = vmatprep.subr.bf16.mxu1 %v13189_v16 }
 0x912   : > { %9166 = vmatpush3.bf16.msra.mxu1 %v13195_v0 }
 0x913   : > { %9167 = vmatprep.subr.bf16.mxu1 %v13201_v19 }
 0x916   : > { %9168 = vmatpush3.bf16.msra.mxu1 %v13207_v39 }
 0x917   : > { %9169 = vmatprep.subr.bf16.mxu1 %v13213_v60 }
 0x91a   : > { %9170 = vmatpush3.bf16.msra.mxu1 %v12920_v5 }
 0x91b   : > { %9880 = vmatprep.subr.bf16.mxu1 %v9879_v17 }
 0x922   : > { %v4798_v1 = vpop.xlane.xlu1 %4797 }
 0x923   : > { %v4816_v20 = vsub.f32 %v13072_v43, %v4798_v1  ;;  %v4817_v33 = vsub.f32 %v13074_v34, %v4798_v1  ;;  %v4852_v34 = vmul.f32 1.442695, %v4822_v42  ;;  %v15356_v1 = vld [vmem:[#allocation120_spill] sm:$0xff] }
 0x924   : > { %v2719_v38 = vmax.f32 %v15356_v1, 1e-24 }
 0x925   : > { %v4840_v57 = vmul.f32 1.442695, %v4816_v20  ;;  %v4842_v40 = vmul.f32 1.442695, %v4817_v33 }
 0x926   : > { %v4804_v11 = vpop.xlane.xlu1 %4803 }
 0x927   : > { %10218 = vpow2.f32 %v4840_v57  ;;  %v4820_v58 = vsub.f32 %v13082_v27, %v4804_v11  ;;  %v4821_v2 = vsub.f32 %v13084_v22, %v4804_v11  ;;  %v10215_v27 = vpop.eup %10214  ;;  %v2717_v22 = vmax.f32 %v15353_v21, 1e-24  ;;  %v15360_v21 = vld [vmem:[#allocation30_spill] sm:$0xff] }
 0x928   : > { %10220 = vpow2.f32 %v4842_v40  ;;  %v10217_v23 = vpop.eup %10216  ;;  %v15357_v40 = vld [vmem:[#allocation119_spill] sm:$0xff] }
 0x929   : > { %v4850_v25 = vmul.f32 1.442695, %v4821_v2  ;;  %10222 = vpow2.f32 %v4854_v15  ;;  %v4848_v43 = vmul.f32 1.442695, %v4820_v58  ;;  %v2720_v11 = vmax.f32 %v15357_v40, 1e-24 }
 0x92a   : > { %v13229_v63 = vpop.permute.xlu1 %5042  ;;  %v15358_v2 = vld [vmem:[#allocation122_spill] sm:$0xff] }
 0x92b   : > { %10224 = vpow2.f32 %v4850_v25  ;;  %v5052_v10 = vsel %vm3258_vm1, %v15351_v13, %v13229_v63  ;;  %v2721_v42 = vmax.f32 %v15358_v2, 1e-24  ;;  %v13279_v25 = vld [vmem:[%s15006_s9] ss:$0 sm:$0xff] }
 0x92c   : > { %10226 = vpow2.f32 %v4848_v43  ;;  %v5059_v50 = vmul.f32 %v13243_v46, %v5052_v10  ;;  %v5058_v31 = vmul.f32 %v13261_v29, %v5052_v10  ;;  %v15359_v10 = vld [vmem:[#allocation121_spill] sm:$0xff] }
 0x92d   : > { %10228 = vpow2.f32 %v4852_v34 }
 0x92e   : > { %v13234_v6 = vpop.permute.xlu1 %5044  ;;  %10230 = vrsqrt.f32 %v2717_v22 }
 0x92f   : > { %v5053_v32 = vsel %vm3258_vm1, %v15352_v41, %v13234_v6  ;;  %10232 = vrsqrt.f32 %v2718_v48 }
 0x930   : > { %v5060_v12 = vmul.f32 %v13249_v61, %v5053_v32  ;;  %v5061_v44 = vmul.f32 %v13255_v62, %v5053_v32  ;;  %10234 = vrsqrt.f32 %v2719_v38 }
 0x931   : > { %v10219_v4 = vpop.eup %10218  ;;  %10236 = vrsqrt.f32 %v2720_v11  ;;  %v15368_v11 = vld [vmem:[#allocation32_spill] sm:$0xff] }
 0x932   : > { %v10221_v26 = vpop.eup %10220  ;;  %v9875_v49 = vpack.c.bf16 %v5061_v44, %v5059_v50  ;;  %v4860_v45 = vpack.c.bf16 %v10215_v27, %v10219_v4  ;;  %v9877_v53 = vpack.c.bf16 %v5060_v12, %v5058_v31  ;;  %v2722_v27 = vmax.f32 %v15359_v10, 1e-24  ;;  %v15361_v12 = vld [vmem:[#allocation58_spill] sm:$0xff]  ;;  %v15362_v4 = vld [vmem:[#allocation124_spill] sm:$0xff] }
 0x933   : > { %v4861_v24 = vpack.c.bf16 %v10217_v23, %v10221_v26  ;;  %v10223_v17 = vpop.eup %10222  ;;  %10238 = vrsqrt.f32 %v2721_v42  ;;  %v5361_v50 = vmul.bf16 %v13107_v52, %v15355_v59  ;;  %v5370_v44 = vmul.bf16 %v13113_v14, %v15361_v12  ;;  %v15363_v26 = vld [vmem:[#allocation28_spill] sm:$0xff] }
 0x934   : > { %9876 = vmatprep.subr.bf16.mxu0 %v9875_v49  ;;  %10240 = vrsqrt.f32 %v2722_v27  ;;  %v2723_v31 = vmax.f32 %v15362_v4, 1e-24  ;;  %v5362_v48 = vmul.bf16 %v13121_v35, %v15361_v12 }
 0x935   : > { %4912 = vmatprep.mubr.bf16.mxu0 %v4861_v24  ;;  %4993 = vmatprep.mubr.bf16.mxu1 %v4861_v24  ;;  %v10225_v36 = vpop.eup %10224 }
 0x936   : > { %4913 = vmatmul.mubr.bf16.gmra.mrb[200].mxu0 %v4860_v45  ;;  %4994 = vmatmul.mubr.bf16.gmra.mrb[200].mxu1 %v4860_v45  ;;  %v4863_v20 = vpack.c.bf16 %v10223_v17, %v10225_v36  ;;  %v10227_v33 = vpop.eup %10226  ;;  %v15365_v17 = vld [vmem:[#allocation123_spill] sm:$0xff]  ;;  %10242 = vrsqrt.f32 %v2723_v31  ;;  %v5366_v31 = vmul.bf16 %v13195_v0, %v15361_v12 }
 0x937   : > { %9878 = vmatpush1.bf16.msra.mxu0 %v9877_v53  ;;  %v10229_v57 = vpop.eup %10228  ;;  %v15364_v53 = vld [vmem:[#allocation66_spill] sm:$0xff]  ;;  %v2724_v36 = vmax.f32 %v15365_v17, 1e-24 }
 0x938   : > { %9195 = vmatprep.subr.bf16.mxu0 %v5369_v37  ;;  %4920 = vmatprep.mubr.bf16.mxu0 %v4863_v20  ;;  %v4862_v15 = vpack.c.bf16 %v10229_v57, %v10227_v33  ;;  %v10231_v58 = vpop.eup %10230  ;;  %v5371_v24 = vmul.bf16 %v13129_v56, %v15364_v53  ;;  %v15366_v37 = vld [vmem:[#allocation33_spill] sm:$0xff]  ;;  %v5363_v33 = vmul.bf16 %v13143_v51, %v15364_v53  ;;  %v15367_v57 = vld [vmem:[#allocation64_spill] sm:$0xff] }
 0x939   : > { %5001 = vmatprep.mubr.bf16.mxu1 %v4863_v20  ;;  %v2852_v43 = vmul.f32 %v13279_v25, %v10231_v58  ;;  %v10233_v34 = vpop.eup %10232  ;;  %v5372_v40 = vmul.bf16 %v13163_v9, %v15367_v57  ;;  %10244 = vrsqrt.f32 %v2724_v36  ;;  %v5364_v42 = vmul.bf16 %v13171_v8, %v15367_v57 }
 0x93a   : > { %v2853_v32 = vmul.f32 %v13279_v25, %v10233_v34  ;;  %v10235_v23 = vpop.eup %10234  ;;  %v15369_v34 = vld [vmem:[#allocation36_spill] sm:$0xff]  ;;  %v5368_v17 = vmul.bf16 %v12920_v5, %v15367_v57 }
 0x93b   : > { %v2916_v22 = vmul.f32 %v2852_v43, %v15360_v21  ;;  %v2854_v45 = vmul.f32 %v13279_v25, %v10235_v23  ;;  %v10237_v18 = vpop.eup %10236  ;;  %v5373_v43 = vmul.bf16 %v13177_v30, %v15355_v59  ;;  %v15370_v23 = vld [vmem:[#allocation34_spill] sm:$0xff] }
 0x93c   : > { %v2917_v49 = vmul.f32 %v2853_v32, %v15363_v26  ;;  %v2855_v38 = vmul.f32 %v13279_v25, %v10237_v18  ;;  %v5374_v32 = vmul.bf16 %v13189_v16, %v15361_v12  ;;  %v15371_v26 = vld [vmem:[#allocation39_spill] sm:$0xff]  ;;  %v5367_v18 = vmul.bf16 %v13207_v39, %v15364_v53 }
 0x93d   : > { %v2918_v1 = vmul.f32 %v2854_v45, %v15366_v37  ;;  %v10239_v20 = vpop.eup %10238  ;;  %v5376_v12 = vmul.bf16 %v13213_v60, %v15367_v57 }
 0x93e   : > { %4921 = vmatmul.mubr.bf16.gmra.mrb[204].mxu0 %v4862_v15  ;;  %5002 = vmatmul.mubr.bf16.gmra.mrb[204].mxu1 %v4862_v15  ;;  %v2919_v15 = vmul.f32 %v2855_v38, %v15368_v11  ;;  %v2856_v58 = vmul.f32 %v13279_v25, %v10239_v20  ;;  %v10241_v2 = vpop.eup %10240 }
 0x93f   : > { %5167 = vmatprep.mubr.f32.mxu0 %v15159_v28  ;;  %v2857_v27 = vmul.f32 %v13279_v25, %v10241_v2 }
 0x940   : > { %v2920_v10 = vmul.f32 %v2856_v58, %v15369_v34  ;;  %v10243_v21 = vpop.eup %10242 }
 0x943   : > { %v10245_v4 = vpop.eup %10244 }
 0x944   : > { %v2859_v45 = vmul.f32 %v13279_v25, %v10245_v4 }
 0x946   : > { %8556 = vmatmul.mubr.msk.f32.vlgmr.msra.gmra.mrb[208].mxu0 %vm796_vm0, %v2916_v22  ;;  %v5365_v22 = vmul.bf16 %v13183_v47, %v15355_v59  ;;  %v5375_v59 = vmul.bf16 %v13201_v19, %v15364_v53 }
 0x947   : > { %9196 = vmatpush3.bf16.msra.mxu0 %v5361_v50  ;;  %5173 = vmatprep.mubr.f32.mxu0 %v15159_v28  ;;  %v2921_v50 = vmul.f32 %v2857_v27, %v15370_v23 }
 0x948   : > { %9197 = vmatprep.subr.bf16.mxu0 %v5370_v44  ;;  %v2858_v44 = vmul.f32 %v13279_v25, %v10243_v21 }
 0x94a   : > { %8557 = vmatmul.mubr.msk.f32.gmra.mrb[210].mxu0 %vm796_vm0, %v2917_v49  ;;  %v2922_v49 = vmul.f32 %v2858_v44, %v15371_v26 }
 0x94b   : > { %9198 = vmatpush3.bf16.msra.mxu0 %v5362_v48  ;;  %5179 = vmatprep.mubr.f32.mxu0 %v15159_v28  ;;  %v15372_v48 = vld [vmem:[#allocation38_spill] sm:$0xff] }
 0x94c   : > { %9199 = vmatprep.subr.bf16.mxu0 %v5371_v24  ;;  %v2923_v24 = vmul.f32 %v2859_v45, %v15372_v48 }
 0x94e   : > { %8558 = vmatmul.mubr.msk.f32.gmra.mrb[212].mxu0 %vm796_vm0, %v2918_v1 }
 0x94f   : > { %9200 = vmatpush3.bf16.msra.mxu0 %v5363_v33  ;;  %5185 = vmatprep.mubr.f32.mxu0 %v15159_v28 }
 0x950   : > { %9201 = vmatprep.subr.bf16.mxu0 %v5372_v40 }
 0x952   : > { %8559 = vmatmul.mubr.msk.f32.gmra.mrb[214].mxu0 %vm796_vm0, %v2919_v15 }
 0x953   : > { %9202 = vmatpush3.bf16.msra.mxu0 %v5364_v42  ;;  %5191 = vmatprep.mubr.f32.mxu0 %v15159_v28 }
 0x954   : > { %9203 = vmatprep.subr.bf16.mxu0 %v5373_v43 }
 0x956   : > { %8560 = vmatmul.mubr.msk.f32.gmra.mrb[216].mxu0 %vm796_vm0, %v2920_v10 }
 0x957   : > { %9204 = vmatpush3.bf16.msra.mxu0 %v5365_v22  ;;  %5197 = vmatprep.mubr.f32.mxu0 %v15159_v28 }
 0x958   : > { %9205 = vmatprep.subr.bf16.mxu0 %v5374_v32 }
 0x95a   : > { %8561 = vmatmul.mubr.msk.f32.gmra.mrb[218].mxu0 %vm796_vm0, %v2921_v50 }
 0x95b   : > { %9206 = vmatpush3.bf16.msra.mxu0 %v5366_v31  ;;  %5203 = vmatprep.mubr.f32.mxu0 %v15159_v28 }
 0x95c   : > { %9207 = vmatprep.subr.bf16.mxu0 %v5375_v59 }
 0x95e   : > { %8562 = vmatmul.mubr.msk.f32.gmra.mrb[220].mxu0 %vm796_vm0, %v2922_v49 }
 0x95f   : > { %9208 = vmatpush3.bf16.msra.mxu0 %v5367_v18  ;;  %5209 = vmatprep.mubr.f32.mxu0 %v15159_v28 }
 0x960   : > { %9209 = vmatprep.subr.bf16.mxu0 %v5376_v12 }
 0x962   : > { %8563 = vmatmul.mubr.msk.f32.gmra.mrb[222].mxu0 %vm796_vm0, %v2923_v24 }
 0x963   : > { %9210 = vmatpush3.bf16.msra.mxu0 %v5368_v17 }
 0x964   : > { %9235 = vmatprep.subr.bf16.mxu0 %v13268_v3 }
 0x9d0   : > { %v9091_v53 = vpop.f32.mrb[192].mxu0  ;;  %v9131_v36 = vpop.f32.mrb[192].mxu1 }
 0x9d1   : > { %v9092_v37 = vpop.f32.mrb[193].mxu0  ;;  %v9132_v1 = vpop.f32.mrb[193].mxu1 }
 0x9d2   : > { %v9093_v38 = vadd.f32 %v9092_v37, %v9091_v53  ;;  %v9133_v20 = vadd.f32 %v9132_v1, %v9131_v36  ;;  %v9094_v33 = vpop.f32.mrb[194].mxu0  ;;  %v9134_v40 = vpop.f32.mrb[194].mxu1 }
 0x9d3   : > { %v9095_v11 = vpop.f32.mrb[195].mxu0  ;;  %v9135_v15 = vpop.f32.mrb[195].mxu1 }
 0x9d4   : > { %10246 = vrcp.f32 %v9093_v38  ;;  %v9096_v58 = vadd.f32 %v9095_v11, %v9094_v33  ;;  %v9136_v2 = vadd.f32 %v9135_v15, %v9134_v40 }
 0x9d6   : > { %10248 = vrcp.f32 %v9096_v58 }
 0x9d8   : > { %v9097_v5 = vpop.f32.mrb[196].mxu0  ;;  %v9137_v57 = vpop.f32.mrb[196].mxu1 }
 0x9d9   : > { %v9098_v42 = vpop.f32.mrb[197].mxu0  ;;  %v9138_v43 = vpop.f32.mrb[197].mxu1 }
 0x9da   : > { %v9099_v34 = vadd.f32 %v9098_v42, %v9097_v5  ;;  %v9139_v10 = vadd.f32 %v9138_v43, %v9137_v57  ;;  %v9100_v27 = vpop.f32.mrb[198].mxu0  ;;  %v9140_v21 = vpop.f32.mrb[198].mxu1 }
 0x9db   : > { %v9101_v22 = vpop.f32.mrb[199].mxu0  ;;  %v9141_v32 = vpop.f32.mrb[199].mxu1 }
 0x9dc   : > { %10250 = vrcp.f32 %v9099_v34  ;;  %v9102_v23 = vadd.f32 %v9101_v22, %v9100_v27  ;;  %v9142_v50 = vadd.f32 %v9141_v32, %v9140_v21 }
 0x9de   : > { %v10247_v44 = vpop.eup %10246  ;;  %10252 = vrcp.f32 %v9102_v23 }
 0x9df   : > { %v5018_v4 = vmul.f32 %v10247_v44, %v9133_v20 }
 0x9e0   : > { %v10249_v31 = vpop.eup %10248 }
 0x9e1   : > { %v5019_v59 = vmul.f32 %v10249_v31, %v9136_v2 }
 0x9e3   : > { %v5026_v26 = vpack.c.bf16 %v5019_v59, %v5018_v4  ;;  %v8541_v4 = vld [vmem:[%s15288_s0 + $0x208] sm:$0xff] }
 0x9e5   : > { %5030 = vst.msk [vmem:[#allocation2 + $0x60] sm:$0xff] %vm796_vm0, %v5026_v26 }
 0x9e6   : > { %v10251_v49 = vpop.eup %10250 }
 0x9e7   : > { %v5020_v45 = vmul.f32 %v10251_v49, %v9139_v10 }
 0x9e8   : > { %v10253_v18 = vpop.eup %10252 }
 0x9e9   : > { %v5021_v12 = vmul.f32 %v10253_v18, %v9142_v50  ;;  %v8540_v50 = vld [vmem:[%s15288_s0 + $0x200] sm:$0xff] }
 0x9eb   : > { %v5027_v48 = vpack.c.bf16 %v5021_v12, %v5020_v45  ;;  %v8542_v12 = vld [vmem:[%s15288_s0 + $0x210] sm:$0xff] }
 0x9ed   : > { %5031 = vst.msk [vmem:[#allocation2 + $0x68] sm:$0xff] %vm796_vm0, %v5027_v48 }
 0xa09   : > { %v9103_v24 = vpop.f32.mrb[200].mxu0  ;;  %v9143_v17 = vpop.f32.mrb[200].mxu1 }
 0xa0a   : > { %v9104_v53 = vpop.f32.mrb[201].mxu0  ;;  %v9144_v36 = vpop.f32.mrb[201].mxu1 }
 0xa0b   : > { %v9105_v37 = vadd.f32 %v9104_v53, %v9103_v24  ;;  %v9145_v1 = vadd.f32 %v9144_v36, %v9143_v17  ;;  %v9106_v38 = vpop.f32.mrb[202].mxu0  ;;  %v9146_v20 = vpop.f32.mrb[202].mxu1  ;;  %v8543_v24 = vld [vmem:[%s15288_s0 + $0x218] sm:$0xff] }
 0xa0c   : > { %v9107_v33 = vpop.f32.mrb[203].mxu0  ;;  %v9147_v40 = vpop.f32.mrb[203].mxu1 }
 0xa0d   : > { %10254 = vrcp.f32 %v9105_v37  ;;  %v9108_v11 = vadd.f32 %v9107_v33, %v9106_v38  ;;  %v9148_v15 = vadd.f32 %v9147_v40, %v9146_v20  ;;  %v8544_v20 = vld [vmem:[%s15288_s0 + $0x220] sm:$0xff]  ;;  %v8545_v40 = vld [vmem:[%s15288_s0 + $0x228] sm:$0xff] }
 0xa0f   : > { %10256 = vrcp.f32 %v9108_v11 }
 0xa11   : > { %v9109_v58 = vpop.f32.mrb[204].mxu0  ;;  %v9149_v2 = vpop.f32.mrb[204].mxu1 }
 0xa12   : > { %v9110_v5 = vpop.f32.mrb[205].mxu0  ;;  %v9150_v57 = vpop.f32.mrb[205].mxu1 }
 0xa13   : > { %v9111_v42 = vadd.f32 %v9110_v5, %v9109_v58  ;;  %v9151_v43 = vadd.f32 %v9150_v57, %v9149_v2  ;;  %v9112_v34 = vpop.f32.mrb[206].mxu0  ;;  %v9152_v10 = vpop.f32.mrb[206].mxu1 }
 0xa14   : > { %v9113_v27 = vpop.f32.mrb[207].mxu0  ;;  %v9153_v21 = vpop.f32.mrb[207].mxu1 }
 0xa15   : > { %10258 = vrcp.f32 %v9111_v42  ;;  %v9114_v22 = vadd.f32 %v9113_v27, %v9112_v34  ;;  %v9154_v32 = vadd.f32 %v9153_v21, %v9152_v10  ;;  %v8547_v10 = vld [vmem:[%s15288_s0 + $0x238] sm:$0xff] }
 0xa17   : > { %v10255_v23 = vpop.eup %10254  ;;  %10260 = vrcp.f32 %v9114_v22 }
 0xa18   : > { %v5022_v44 = vmul.f32 %v10255_v23, %v9145_v1 }
 0xa19   : > { %v10257_v31 = vpop.eup %10256  ;;  %v5169_v59 = vpop.f32.mrb[208].mxu0 }
 0xa1a   : > { %v5023_v26 = vmul.f32 %v10257_v31, %v9148_v15  ;;  %v13354_v49 = vadd.f32 %v8540_v50, %v5169_v59  ;;  %v5171_v45 = vpop.f32.mrb[209].mxu0  ;;  %v8548_v50 = vld [vmem:[%s15288_s0 + $0x240] sm:$0xff] }
 0xa1b   : > { %v13356_v18 = vadd.f32 %v8541_v4, %v5171_v45 }
 0xa1c   : > { %v5028_v48 = vpack.c.bf16 %v5023_v26, %v5022_v44  ;;  %v8549_v44 = vld [vmem:[%s15288_s0 + $0x248] sm:$0xff] }
 0xa1d   : > { %v5175_v17 = vpop.f32.mrb[210].mxu0  ;;  %v5216_v53 = vmax.f32 %v13354_v49, %v13356_v18 }
 0xa1e   : > { %5032 = vst.msk [vmem:[#allocation2 + $0x70] sm:$0xff] %vm796_vm0, %v5028_v48  ;;  %v13367_v36 = vadd.f32 %v8542_v12, %v5175_v17  ;;  %v5177_v37 = vpop.f32.mrb[211].mxu0  ;;  %v8550_v12 = vld [vmem:[%s15288_s0 + $0x250] sm:$0xff]  ;;  %v8551_v48 = vld [vmem:[%s15288_s0 + $0x258] sm:$0xff] }
 0xa1f   : > { %v10259_v1 = vpop.eup %10258  ;;  %v13369_v38 = vadd.f32 %v8543_v24, %v5177_v37  ;;  %5217 = vmax.xlane.f32.xlu0 %v5216_v53 }
 0xa20   : > { %v5024_v33 = vmul.f32 %v10259_v1, %v9151_v43  ;;  %v8546_v43 = vld [vmem:[%s15288_s0 + $0x230] sm:$0xff] }
 0xa21   : > { %v10261_v11 = vpop.eup %10260  ;;  %v5181_v15 = vpop.f32.mrb[212].mxu0  ;;  %v5219_v58 = vmax.f32 %v13367_v36, %v13369_v38 }
 0xa22   : > { %v5025_v2 = vmul.f32 %v10261_v11, %v9154_v32  ;;  %v13379_v5 = vadd.f32 %v8544_v20, %v5181_v15  ;;  %v5183_v57 = vpop.f32.mrb[213].mxu0  ;;  %v8552_v20 = vld [vmem:[%s15288_s0 + $0x260] sm:$0xff] }
 0xa23   : > { %v13381_v42 = vadd.f32 %v8545_v40, %v5183_v57  ;;  %5220 = vmax.xlane.f32.xlu1 %v5219_v58  ;;  %v8554_v57 = vld [vmem:[%s15288_s0 + $0x270] sm:$0xff] }
 0xa24   : > { %v5029_v34 = vpack.c.bf16 %v5025_v2, %v5024_v33  ;;  %v8553_v33 = vld [vmem:[%s15288_s0 + $0x268] sm:$0xff] }
 0xa25   : > { %v5187_v27 = vpop.f32.mrb[214].mxu0  ;;  %v5222_v21 = vmax.f32 %v13379_v5, %v13381_v42 }
 0xa26   : > { %5033 = vst.msk [vmem:[#allocation2 + $0x78] sm:$0xff] %vm796_vm0, %v5029_v34  ;;  %v5188_v22 = vadd.f32 %v8546_v43, %v5187_v27  ;;  %v5189_v32 = vpop.f32.mrb[215].mxu0  ;;  %v8555_v43 = vld [vmem:[%s15288_s0 + $0x278] sm:$0xff] }
 0xa27   : > { %v5190_v23 = vadd.f32 %v8547_v10, %v5189_v32  ;;  %5223 = vmax.xlane.f32.xlu0 %v5222_v21 }
 0xa29   : > { %v5193_v4 = vpop.f32.mrb[216].mxu0  ;;  %v5225_v31 = vmax.f32 %v5188_v22, %v5190_v23 }
 0xa2a   : > { %v13398_v59 = vadd.f32 %v8548_v50, %v5193_v4  ;;  %v5195_v26 = vpop.f32.mrb[217].mxu0 }
 0xa2b   : > { %v13400_v45 = vadd.f32 %v8549_v44, %v5195_v26  ;;  %5226 = vmax.xlane.f32.xlu0 %v5225_v31 }
 0xa2d   : > { %v5199_v24 = vpop.f32.mrb[218].mxu0  ;;  %v5228_v17 = vmax.f32 %v13398_v59, %v13400_v45 }
 0xa2e   : > { %v13410_v53 = vadd.f32 %v8550_v12, %v5199_v24  ;;  %v5201_v37 = vpop.f32.mrb[219].mxu0 }
 0xa2f   : > { %v13412_v1 = vadd.f32 %v8551_v48, %v5201_v37  ;;  %5229 = vmax.xlane.f32.xlu1 %v5228_v17 }
 0xa31   : > { %v5205_v40 = vpop.f32.mrb[220].mxu0  ;;  %v5231_v11 = vmax.f32 %v13410_v53, %v13412_v1 }
 0xa32   : > { %v13422_v15 = vadd.f32 %v8552_v20, %v5205_v40  ;;  %v5207_v58 = vpop.f32.mrb[221].mxu0 }
 0xa33   : > { %v13424_v2 = vadd.f32 %v8553_v33, %v5207_v58  ;;  %5232 = vmax.xlane.f32.xlu0 %v5231_v11 }
 0xa35   : > { %v5211_v34 = vpop.f32.mrb[222].mxu0  ;;  %v5234_v10 = vmax.f32 %v13422_v15, %v13424_v2 }
 0xa36   : > { %v13434_v27 = vadd.f32 %v8554_v57, %v5211_v34  ;;  %v5213_v21 = vpop.f32.mrb[223].mxu0 }
 0xa37   : > { %v13436_v32 = vadd.f32 %v8555_v43, %v5213_v21  ;;  %5235 = vmax.xlane.f32.xlu1 %v5234_v10  ;;  %v5469_v21 = vsel %vm3258_vm1, %v13234_v6, %v15352_v41 }
 0xa39   : > { %v5237_v50 = vmax.f32 %v13434_v27, %v13436_v32 }
 0xa3b   : > { %5238 = vmax.xlane.f32.xlu0 %v5237_v50 }
 0xaac   : > { %v5218_v44 = vpop.xlane.xlu0 %5217 }
 0xaad   : > { %v5240_v4 = vsub.f32 %v13354_v49, %v5218_v44  ;;  %v5241_v31 = vsub.f32 %v13356_v18, %v5218_v44 }
 0xaaf   : > { %v5256_v26 = vmul.f32 1.442695, %v5240_v4  ;;  %v5258_v12 = vmul.f32 1.442695, %v5241_v31  ;;  %v5477_v31 = vmul.f32 %v13255_v62, %v5469_v21 }
 0xab0   : > { %v5221_v48 = vpop.xlane.xlu1 %5220 }
 0xab1   : > { %v5242_v24 = vsub.f32 %v13367_v36, %v5221_v48  ;;  %v5243_v17 = vsub.f32 %v13369_v38, %v5221_v48  ;;  %10262 = vpow2.f32 %v5256_v26 }
 0xab2   : > { %10264 = vpow2.f32 %v5258_v12 }
 0xab3   : > { %v5260_v37 = vmul.f32 1.442695, %v5242_v24  ;;  %v5262_v20 = vmul.f32 1.442695, %v5243_v17  ;;  %v5476_v24 = vmul.f32 %v13249_v61, %v5469_v21  ;;  %v15375_v21 = vld [vmem:[#allocation125_spill] sm:$0xff] }
 0xab4   : > { %v5224_v33 = vpop.xlane.xlu0 %5223 }
 0xab5   : > { %10266 = vpow2.f32 %v5260_v37  ;;  %v5244_v40 = vsub.f32 %v13379_v5, %v5224_v33  ;;  %v5245_v11 = vsub.f32 %v13381_v42, %v5224_v33 }
 0xab6   : > { %10268 = vpow2.f32 %v5262_v20 }
 0xab7   : > { %v5264_v49 = vmul.f32 1.442695, %v5244_v40  ;;  %v5266_v18 = vmul.f32 1.442695, %v5245_v11 }
 0xab8   : > { %v5227_v58 = vpop.xlane.xlu0 %5226 }
 0xab9   : > { %v5246_v57 = vsub.f32 %v5188_v22, %v5227_v58  ;;  %v5247_v43 = vsub.f32 %v5190_v23, %v5227_v58  ;;  %10270 = vpow2.f32 %v5264_v49  ;;  %v5468_v22 = vsel %vm3258_vm1, %v13229_v63, %v15351_v13  ;;  %v15373_v49 = vld [vmem:[#allocation72_spill] sm:$0xff] }
 0xaba   : > { %10272 = vpow2.f32 %v5266_v18  ;;  %v5785_v7 = vmul.bf16 %v13268_v3, %v15373_v49 }
 0xabb   : > { %v5268_v36 = vmul.f32 1.442695, %v5246_v57  ;;  %v5270_v34 = vmul.f32 1.442695, %v5247_v43  ;;  %v10263_v10 = vpop.eup %10262 }
 0xabc   : > { %v5230_v38 = vpop.xlane.xlu1 %5229  ;;  %v10265_v50 = vpop.eup %10264 }
 0xabd   : > { %10274 = vpow2.f32 %v5268_v36  ;;  %v5248_v5 = vsub.f32 %v13398_v59, %v5230_v38  ;;  %v5249_v42 = vsub.f32 %v13400_v45, %v5230_v38  ;;  %v5475_v45 = vmul.f32 %v13243_v46, %v5468_v22  ;;  %v15374_v36 = vld [vmem:[#allocation126_spill] sm:$0xff] }
 0xabe   : > { %10276 = vpow2.f32 %v5270_v34  ;;  %v2725_v34 = vmax.f32 %v15374_v36, 1e-24 }
 0xabf   : > { %v10267_v44 = vpop.eup %10266  ;;  %v5272_v23 = vmul.f32 1.442695, %v5248_v5  ;;  %v5274_v26 = vmul.f32 1.442695, %v5249_v42  ;;  %v9883_v63 = vpack.c.bf16 %v5477_v31, %v5475_v45  ;;  %v2726_v5 = vmax.f32 %v15375_v21, 1e-24 }
 0xac0   : > { %v10269_v4 = vpop.eup %10268  ;;  %v5233_v12 = vpop.xlane.xlu0 %5232  ;;  %v5288_v48 = vpack.c.bf16 %v10267_v44, %v10263_v10  ;;  %v15376_v44 = vld [vmem:[#allocation128_spill] sm:$0xff] }
 0xac1   : > { %v5250_v41 = vsub.f32 %v13410_v53, %v5233_v12  ;;  %v5251_v6 = vsub.f32 %v13412_v1, %v5233_v12  ;;  %v5289_v59 = vpack.c.bf16 %v10269_v4, %v10265_v50  ;;  %10278 = vpow2.f32 %v5272_v23  ;;  %v15377_v12 = vld [vmem:[#allocation127_spill] sm:$0xff] }
 0xac2   : > { %10280 = vpow2.f32 %v5274_v26  ;;  %v5474_v53 = vmul.f32 %v13261_v29, %v5468_v22  ;;  %v2727_v22 = vmax.f32 %v15376_v44, 1e-24  ;;  %v5781_v44 = vmul.bf16 %v13183_v47, %v15373_v49 }
 0xac3   : > { %v5276_v17 = vmul.f32 1.442695, %v5250_v41  ;;  %v5278_v37 = vmul.f32 1.442695, %v5251_v6  ;;  %5328 = vmatprep.mubr.bf16.mxu1 %v5289_v59  ;;  %5409 = vmatprep.mubr.bf16.mxu0 %v5289_v59  ;;  %v10271_v62 = vpop.eup %10270  ;;  %v15378_v59 = vld [vmem:[#allocation130_spill] sm:$0xff] }
 0xac4   : > { %5329 = vmatmul.mubr.bf16.vlgmr.msra.gmra.mrb[208].mxu1 %v5288_v48  ;;  %5410 = vmatmul.mubr.bf16.vlgmr.msra.gmra.mrb[224].mxu0 %v5288_v48  ;;  %v5236_v13 = vpop.xlane.xlu1 %5235  ;;  %v10273_v1 = vpop.eup %10272  ;;  %v9885_v33 = vpack.c.bf16 %v5476_v24, %v5474_v53  ;;  %v2728_v48 = vmax.f32 %v15377_v12, 1e-24  ;;  %v2729_v45 = vmax.f32 %v15378_v59, 1e-24 }
 0xac5   : > { %10282 = vpow2.f32 %v5276_v17  ;;  %9882 = vmatpush1.bf16.msra.mxu1 %v9881_v55  ;;  %v5252_v46 = vsub.f32 %v13422_v15, %v5236_v13  ;;  %v5253_v61 = vsub.f32 %v13424_v2, %v5236_v13  ;;  %9236 = vmatpush3.bf16.msra.mxu0 %v13107_v52 }
 0xac6   : > { %10284 = vpow2.f32 %v5278_v37  ;;  %9884 = vmatprep.subr.bf16.mxu1 %v9883_v63  ;;  %9237 = vmatprep.subr.bf16.mxu0 %v13113_v14  ;;  %v15379_v37 = vld [vmem:[#allocation129_spill] sm:$0xff]  ;;  %v13494_v63 = vld [vmem:[%s15008_s11 + $0x38] sm:$0xff]  }
 0xac7   : > { %v10275_v20 = vpop.eup %10274  ;;  %v5280_v40 = vmul.f32 1.442695, %v5252_v46  ;;  %v5282_v11 = vmul.f32 1.442695, %v5253_v61  ;;  %v2730_v13 = vmax.f32 %v15379_v37, 1e-24 }
 0xac8   : > { %v10277_v29 = vpop.eup %10276  ;;  %v5239_v54 = vpop.xlane.xlu0 %5238  ;;  %v5290_v55 = vpack.c.bf16 %v10275_v20, %v10271_v62  ;;  %v15380_v62 = vld [vmem:[#allocation43_spill] sm:$0xff]  ;;  %v15381_v20 = vld [vmem:[#allocation70_spill] sm:$0xff] }
 0xac9   : > { %9886 = vmatpush1.bf16.msra.mxu1 %v9885_v33  ;;  %v5254_v15 = vsub.f32 %v13434_v27, %v5239_v54  ;;  %v5255_v2 = vsub.f32 %v13436_v32, %v5239_v54  ;;  %v5291_v18 = vpack.c.bf16 %v10277_v29, %v10273_v1  ;;  %9238 = vmatpush3.bf16.msra.mxu0 %v13121_v35  ;;  %10286 = vpow2.f32 %v5280_v40  ;;  %v15382_v40 = vld [vmem:[#allocation132_spill] sm:$0xff] }
 0xaca   : > { %9275 = vmatprep.subr.bf16.mxu1 %v5785_v7  ;;  %9239 = vmatprep.subr.bf16.mxu0 %v13129_v56  ;;  %10288 = vpow2.f32 %v5282_v11  ;;  %v5777_v1 = vmul.bf16 %v13107_v52, %v15373_v49  ;;  %v5786_v33 = vmul.bf16 %v13113_v14, %v15381_v20  ;;  %v2731_v29 = vmax.f32 %v15382_v40, 1e-24  ;;  %v15383_v11 = vld [vmem:[#allocation41_spill] sm:$0xff] }
 0xacb   : > { %v5284_v58 = vmul.f32 1.442695, %v5254_v15  ;;  %v5286_v57 = vmul.f32 1.442695, %v5255_v2  ;;  %5336 = vmatprep.mubr.bf16.mxu1 %v5291_v18  ;;  %5417 = vmatprep.mubr.bf16.mxu0 %v5291_v18  ;;  %v10279_v43 = vpop.eup %10278  ;;  %v5778_v52 = vmul.bf16 %v13121_v35, %v15381_v20  ;;  %v15384_v15 = vld [vmem:[#allocation77_spill] sm:$0xff]  ;;  %v15385_v2 = vld [vmem:[#allocation131_spill] sm:$0xff] }
 0xacc   : > { %5337 = vmatmul.mubr.bf16.gmra.mrb[212].mxu1 %v5290_v55  ;;  %5418 = vmatmul.mubr.bf16.gmra.mrb[228].mxu0 %v5290_v55  ;;  %v10281_v27 = vpop.eup %10280  ;;  %v5787_v14 = vmul.bf16 %v13129_v56, %v15384_v15  ;;  %v2732_v18 = vmax.f32 %v15385_v2, 1e-24  ;;  %v5779_v35 = vmul.bf16 %v13143_v51, %v15384_v15  ;;  %v5783_v12 = vmul.bf16 %v13207_v39, %v15384_v15 }
 0xacd   : > { %10290 = vpow2.f32 %v5284_v58  ;;  %9240 = vmatpush3.bf16.msra.mxu0 %v13143_v51  ;;  %v15386_v58 = vld [vmem:[#allocation45_spill] sm:$0xff]  ;;  %v5789_v51 = vmul.bf16 %v13177_v30, %v15373_v49 }
 0xace   : > { %10292 = vpow2.f32 %v5286_v57  ;;  %9241 = vmatprep.subr.bf16.mxu0 %v13163_v9 }
 0xacf   : > { %v10283_v32 = vpop.eup %10282  ;;  %10294 = vrsqrt.f32 %v2725_v34  ;;  %v15387_v34 = vld [vmem:[#allocation76_spill] sm:$0xff] }
 0xad0   : > { %v10285_v38 = vpop.eup %10284  ;;  %v5292_v10 = vpack.c.bf16 %v10283_v32, %v10279_v43  ;;  %10296 = vrsqrt.f32 %v2726_v5  ;;  %v5788_v56 = vmul.bf16 %v13163_v9, %v15387_v34  ;;  %v5780_v21 = vmul.bf16 %v13171_v8, %v15387_v34  ;;  %v15389_v9 = vld [vmem:[#allocation49_spill] sm:$0xff] }
 0xad1   : > { %v5293_v42 = vpack.c.bf16 %v10285_v38, %v10281_v27  ;;  %9242 = vmatpush3.bf16.msra.mxu0 %v13171_v8  ;;  %10298 = vrsqrt.f32 %v2727_v22  ;;  %v15388_v27 = vld [vmem:[#allocation44_spill] sm:$0xff]  ;;  %v5790_v8 = vmul.bf16 %v13189_v16, %v15381_v20 }
 0xad2   : > { %9243 = vmatprep.subr.bf16.mxu0 %v13177_v30  ;;  %10300 = vrsqrt.f32 %v2728_v48  ;;  %v15390_v30 = vld [vmem:[#allocation47_spill] sm:$0xff] }
 0xad3   : > { %5344 = vmatprep.mubr.bf16.mxu1 %v5293_v42  ;;  %5425 = vmatprep.mubr.bf16.mxu0 %v5293_v42  ;;  %v10287_v50 = vpop.eup %10286  ;;  %10302 = vrsqrt.f32 %v2729_v45 }
 0xad4   : > { %5345 = vmatmul.mubr.bf16.gmra.mrb[216].mxu1 %v5292_v10  ;;  %5426 = vmatmul.mubr.bf16.gmra.mrb[232].mxu0 %v5292_v10  ;;  %v10289_v23 = vpop.eup %10288  ;;  %10304 = vrsqrt.f32 %v2730_v13 }
 0xad5   : > { %9244 = vmatpush3.bf16.msra.mxu0 %v13183_v47  ;;  %10306 = vrsqrt.f32 %v2731_v29  ;;  %v5791_v47 = vmul.bf16 %v13201_v19, %v15384_v15 }
 0xad6   : > { %9245 = vmatprep.subr.bf16.mxu0 %v13189_v16  ;;  %10308 = vrsqrt.f32 %v2732_v18  ;;  %v15391_v16 = vld [vmem:[#allocation51_spill] sm:$0xff] }
 0xad7   : > { %v10291_v4 = vpop.eup %10290 }
 0xad8   : > { %v10293_v31 = vpop.eup %10292  ;;  %v5294_v26 = vpack.c.bf16 %v10291_v4, %v10287_v50 }
 0xad9   : > { %v5295_v41 = vpack.c.bf16 %v10293_v31, %v10289_v23  ;;  %9246 = vmatpush3.bf16.msra.mxu0 %v13195_v0  ;;  %v10295_v6 = vpop.eup %10294  ;;  %v5782_v31 = vmul.bf16 %v13195_v0, %v15381_v20  ;;  %v5792_v0 = vmul.bf16 %v13213_v60, %v15387_v34 }
 0xada   : > { %9247 = vmatprep.subr.bf16.mxu0 %v13201_v19  ;;  %v2860_v24 = vmul.f32 %v13279_v25, %v10295_v6  ;;  %v10297_v17 = vpop.eup %10296  ;;  %v15392_v19 = vld [vmem:[#allocation50_spill] sm:$0xff] }
 0xadb   : > { %5352 = vmatprep.mubr.bf16.mxu1 %v5295_v41  ;;  %5433 = vmatprep.mubr.bf16.mxu0 %v5295_v41  ;;  %v2861_v46 = vmul.f32 %v13279_v25, %v10297_v17  ;;  %v10299_v61 = vpop.eup %10298  ;;  %v5784_v41 = vmul.bf16 %v13494_v63, %v15387_v34 }
 0xadc   : > { %5353 = vmatmul.mubr.bf16.gmra.mrb[220].mxu1 %v5294_v26  ;;  %5434 = vmatmul.mubr.bf16.gmra.mrb[236].mxu0 %v5294_v26  ;;  %v2924_v53 = vmul.f32 %v2860_v24, %v15380_v62  ;;  %v2862_v54 = vmul.f32 %v13279_v25, %v10299_v61  ;;  %v10301_v55 = vpop.eup %10300 }
 0xadd   : > { %5583 = vmatprep.mubr.f32.mxu1 %v15159_v28  ;;  %9248 = vmatpush3.bf16.msra.mxu0 %v13207_v39  ;;  %v2925_v7 = vmul.f32 %v2861_v46, %v15383_v11  ;;  %v2863_v43 = vmul.f32 %v13279_v25, %v10301_v55  ;;  %v10303_v36 = vpop.eup %10302 }
 0xade   : > { %9249 = vmatprep.subr.bf16.mxu0 %v13213_v60  ;;  %v2926_v57 = vmul.f32 %v2862_v54, %v15386_v58  ;;  %v2864_v38 = vmul.f32 %v13279_v25, %v10303_v36  ;;  %v10305_v10 = vpop.eup %10304 }
 0xadf   : > { %v2927_v32 = vmul.f32 %v2863_v43, %v15388_v27  ;;  %v2865_v42 = vmul.f32 %v13279_v25, %v10305_v10  ;;  %v10307_v50 = vpop.eup %10306 }
 0xae0   : > { %v2928_v5 = vmul.f32 %v2864_v38, %v15389_v9  ;;  %v2866_v23 = vmul.f32 %v13279_v25, %v10307_v50  ;;  %v10309_v4 = vpop.eup %10308 }
 0xae1   : > { %9250 = vmatpush3.bf16.msra.mxu0 %v13494_v63  ;;  %v2929_v22 = vmul.f32 %v2865_v42, %v15390_v30  ;;  %v2867_v26 = vmul.f32 %v13279_v25, %v10309_v4 }
 0xae2   : > { %v2930_v49 = vmul.f32 %v2866_v23, %v15391_v16 }
 0xae3   : > { %v2931_v48 = vmul.f32 %v2867_v26, %v15392_v19  ;;  %v8564_v19 = vld [vmem:[%s15288_s0 + $0x280] sm:$0xff] }
 0xae4   : > { %8580 = vmatmul.mubr.msk.f32.vlgmr.msra.gmra.mrb[224].mxu1 %vm796_vm0, %v2924_v53 }
 0xae5   : > { %9276 = vmatpush3.bf16.msra.mxu1 %v5777_v1  ;;  %5589 = vmatprep.mubr.f32.mxu1 %v15159_v28 }
 0xae6   : > { %9277 = vmatprep.subr.bf16.mxu1 %v5786_v33 }
 0xae8   : > { %8581 = vmatmul.mubr.msk.f32.gmra.mrb[226].mxu1 %vm796_vm0, %v2925_v7 }
 0xae9   : > { %9278 = vmatpush3.bf16.msra.mxu1 %v5778_v52  ;;  %5595 = vmatprep.mubr.f32.mxu1 %v15159_v28 }
 0xaea   : > { %9279 = vmatprep.subr.bf16.mxu1 %v5787_v14 }
 0xaec   : > { %8582 = vmatmul.mubr.msk.f32.gmra.mrb[228].mxu1 %vm796_vm0, %v2926_v57 }
 0xaed   : > { %9280 = vmatpush3.bf16.msra.mxu1 %v5779_v35  ;;  %5601 = vmatprep.mubr.f32.mxu1 %v15159_v28 }
 0xaee   : > { %9281 = vmatprep.subr.bf16.mxu1 %v5788_v56 }
 0xaf0   : > { %8583 = vmatmul.mubr.msk.f32.gmra.mrb[230].mxu1 %vm796_vm0, %v2927_v32 }
 0xaf1   : > { %9282 = vmatpush3.bf16.msra.mxu1 %v5780_v21  ;;  %5607 = vmatprep.mubr.f32.mxu1 %v15159_v28 }
 0xaf2   : > { %9283 = vmatprep.subr.bf16.mxu1 %v5789_v51 }
 0xaf4   : > { %8584 = vmatmul.mubr.msk.f32.gmra.mrb[232].mxu1 %vm796_vm0, %v2928_v5 }
 0xaf5   : > { %9284 = vmatpush3.bf16.msra.mxu1 %v5781_v44  ;;  %5613 = vmatprep.mubr.f32.mxu1 %v15159_v28 }
 0xaf6   : > { %9285 = vmatprep.subr.bf16.mxu1 %v5790_v8 }
 0xaf8   : > { %8585 = vmatmul.mubr.msk.f32.gmra.mrb[234].mxu1 %vm796_vm0, %v2929_v22 }
 0xaf9   : > { %9286 = vmatpush3.bf16.msra.mxu1 %v5782_v31  ;;  %5619 = vmatprep.mubr.f32.mxu1 %v15159_v28 }
 0xafa   : > { %9287 = vmatprep.subr.bf16.mxu1 %v5791_v47 }
 0xafc   : > { %8586 = vmatmul.mubr.msk.f32.gmra.mrb[236].mxu1 %vm796_vm0, %v2930_v49 }
 0xafd   : > { %9288 = vmatpush3.bf16.msra.mxu1 %v5783_v12  ;;  %5625 = vmatprep.mubr.f32.mxu1 %v15159_v28 }
 0xafe   : > { %9289 = vmatprep.subr.bf16.mxu1 %v5792_v0 }
 0xb00   : > { %8587 = vmatmul.mubr.msk.f32.gmra.mrb[238].mxu1 %vm796_vm0, %v2931_v48 }
 0xb01   : > { %9290 = vmatpush3.bf16.msra.mxu1 %v5784_v41  ;;  %v8565_v41 = vld [vmem:[%s15288_s0 + $0x288] sm:$0xff] }
 0xb02   : > { %9315 = vmatprep.subr.bf16.mxu1 %v13268_v3 }
 0xb97   : > { %v9171_v39 = vpop.f32.mrb[208].mxu1  ;;  %v9211_v25 = vpop.f32.mrb[224].mxu0 }
 0xb98   : > { %v9172_v6 = vpop.f32.mrb[209].mxu1  ;;  %v9212_v59 = vpop.f32.mrb[225].mxu0 }
 0xb99   : > { %v9173_v45 = vadd.f32 %v9172_v6, %v9171_v39  ;;  %v9213_v60 = vadd.f32 %v9212_v59, %v9211_v25  ;;  %v9174_v24 = vpop.f32.mrb[210].mxu1  ;;  %v9214_v17 = vpop.f32.mrb[226].mxu0 }
 0xb9a   : > { %v9175_v37 = vpop.f32.mrb[211].mxu1  ;;  %v9215_v13 = vpop.f32.mrb[227].mxu0 }
 0xb9b   : > { %10310 = vrcp.f32 %v9173_v45  ;;  %v9176_v62 = vadd.f32 %v9175_v37, %v9174_v24  ;;  %v9216_v53 = vadd.f32 %v9215_v13, %v9214_v17  ;;  %v8566_v24 = vld [vmem:[%s15288_s0 + $0x290] sm:$0xff]  ;;  %v8567_v37 = vld [vmem:[%s15288_s0 + $0x298] sm:$0xff] }
 0xb9d   : > { %10312 = vrcp.f32 %v9176_v62 }
 0xb9f   : > { %v9177_v46 = vpop.f32.mrb[212].mxu1  ;;  %v9217_v61 = vpop.f32.mrb[228].mxu0 }
 0xba0   : > { %v9178_v1 = vpop.f32.mrb[213].mxu1  ;;  %v9218_v20 = vpop.f32.mrb[229].mxu0 }
 0xba1   : > { %v9179_v33 = vadd.f32 %v9178_v1, %v9177_v46  ;;  %v9219_v3 = vadd.f32 %v9218_v20, %v9217_v61  ;;  %v9180_v40 = vpop.f32.mrb[214].mxu1  ;;  %v9220_v29 = vpop.f32.mrb[230].mxu0  ;;  %v8568_v20 = vld [vmem:[%s15288_s0 + $0x2a0] sm:$0xff] }
 0xba2   : > { %v9181_v11 = vpop.f32.mrb[215].mxu1  ;;  %v9221_v7 = vpop.f32.mrb[231].mxu0 }
 0xba3   : > { %10314 = vrcp.f32 %v9179_v33  ;;  %v9182_v54 = vadd.f32 %v9181_v11, %v9180_v40  ;;  %v9222_v55 = vadd.f32 %v9221_v7, %v9220_v29 }
 0xba5   : > { %v10311_v52 = vpop.eup %10310  ;;  %10316 = vrcp.f32 %v9182_v54 }
 0xba6   : > { %v5450_v15 = vmul.f32 %v10311_v52, %v9213_v60 }
 0xba7   : > { %v10313_v14 = vpop.eup %10312  ;;  %v9183_v2 = vpop.f32.mrb[216].mxu1 }
 0xba8   : > { %v9223_v18 = vpop.f32.mrb[232].mxu0  ;;  %v5451_v58 = vmul.f32 %v10313_v14, %v9216_v53  ;;  %v9184_v57 = vpop.f32.mrb[217].mxu1 }
 0xba9   : > { %v9224_v43 = vpop.f32.mrb[233].mxu0  ;;  %v9185_v36 = vadd.f32 %v9184_v57, %v9183_v2  ;;  %v9186_v34 = vpop.f32.mrb[218].mxu1  ;;  %v8571_v2 = vld [vmem:[%s15288_s0 + $0x2b8] sm:$0xff] }
 0xbaa   : > { %v9225_v35 = vadd.f32 %v9224_v43, %v9223_v18  ;;  %v9226_v56 = vpop.f32.mrb[234].mxu0  ;;  %v5458_v27 = vpack.c.bf16 %v5451_v58, %v5450_v15  ;;  %v9187_v32 = vpop.f32.mrb[219].mxu1  ;;  %v8570_v15 = vld [vmem:[%s15288_s0 + $0x2b0] sm:$0xff] }
 0xbab   : > { %v9227_v38 = vpop.f32.mrb[235].mxu0  ;;  %10318 = vrcp.f32 %v9185_v36  ;;  %v9188_v10 = vadd.f32 %v9187_v32, %v9186_v34  ;;  %v8575_v32 = vld [vmem:[%s15288_s0 + $0x2d8] sm:$0xff] }
 0xbac   : > { %v9228_v21 = vadd.f32 %v9227_v38, %v9226_v56  ;;  %5462 = vst.msk [vmem:[#allocation2 + $0x80] sm:$0xff] %vm796_vm0, %v5458_v27  ;;  %v8574_v27 = vld [vmem:[%s15288_s0 + $0x2d0] sm:$0xff] }
 0xbad   : > { %v10315_v51 = vpop.eup %10314  ;;  %10320 = vrcp.f32 %v9188_v10 }
 0xbae   : > { %v5452_v9 = vmul.f32 %v10315_v51, %v9219_v3  ;;  %v8569_v3 = vld [vmem:[%s15288_s0 + $0x2a8] sm:$0xff] }
 0xbaf   : > { %v10317_v5 = vpop.eup %10316  ;;  %v9189_v42 = vpop.f32.mrb[220].mxu1 }
 0xbb0   : > { %v9229_v50 = vpop.f32.mrb[236].mxu0  ;;  %v5453_v44 = vmul.f32 %v10317_v5, %v9222_v55  ;;  %v9190_v8 = vpop.f32.mrb[221].mxu1 }
 0xbb1   : > { %v9230_v30 = vpop.f32.mrb[237].mxu0  ;;  %v9191_v22 = vadd.f32 %v9190_v8, %v9189_v42  ;;  %v9192_v4 = vpop.f32.mrb[222].mxu1 }
 0xbb2   : > { %v9231_v23 = vadd.f32 %v9230_v30, %v9229_v50  ;;  %v9232_v31 = vpop.f32.mrb[238].mxu0  ;;  %v5459_v47 = vpack.c.bf16 %v5453_v44, %v5452_v9  ;;  %v9193_v16 = vpop.f32.mrb[223].mxu1  ;;  %v8578_v50 = vld [vmem:[%s15288_s0 + $0x2f0] sm:$0xff]  ;;  %v8579_v44 = vld [vmem:[%s15288_s0 + $0x2f8] sm:$0xff] }
 0xbb3   : > { %v9233_v49 = vpop.f32.mrb[239].mxu0  ;;  %10322 = vrcp.f32 %v9191_v22  ;;  %v9194_v26 = vadd.f32 %v9193_v16, %v9192_v4  ;;  %v15393_v4 = vld [vmem:[#allocation103_spill] sm:$0xff] }
 0xbb4   : > { %v9234_v12 = vadd.f32 %v9233_v49, %v9232_v31  ;;  %5463 = vst.msk [vmem:[#allocation2 + $0x88] sm:$0xff] %vm796_vm0, %v5459_v47  ;;  %v15394_v47 = vld [vmem:[#allocation107_spill] sm:$0xff]  ;;  %v8573_v49 = vld [vmem:[%s15288_s0 + $0x2c8] sm:$0xff] }
 0xbb5   : > { %v10319_v0 = vpop.eup %10318  ;;  %10324 = vrcp.f32 %v9194_v26  ;;  %v8572_v16 = vld [vmem:[%s15288_s0 + $0x2c0] sm:$0xff] }
 0xbb6   : > { %v5454_v48 = vmul.f32 %v10319_v0, %v9225_v35  ;;  %v8576_v0 = vld [vmem:[%s15288_s0 + $0x2e0] sm:$0xff] }
 0xbb7   : > { %v10321_v39 = vpop.eup %10320  ;;  %v5585_v25 = vpop.f32.mrb[224].mxu1 }
 0xbb8   : > { %v5455_v6 = vmul.f32 %v10321_v39, %v9228_v21  ;;  %v13568_v59 = vadd.f32 %v8564_v19, %v5585_v25  ;;  %v5587_v45 = vpop.f32.mrb[225].mxu1  ;;  %v8577_v19 = vld [vmem:[%s15288_s0 + $0x2e8] sm:$0xff] }
 0xbb9   : > { %v13570_v60 = vadd.f32 %v8565_v41, %v5587_v45  ;;  %v15396_v45 = vld [vmem:[#allocation115_spill] sm:$0xff] }
 0xbba   : > { %v5460_v17 = vpack.c.bf16 %v5455_v6, %v5454_v48  ;;  %v15395_v6 = vld [vmem:[#allocation111_spill] sm:$0xff] }
 0xbbb   : > { %v5591_v13 = vpop.f32.mrb[226].mxu1  ;;  %v5632_v62 = vmax.f32 %v13568_v59, %v13570_v60 }
 0xbbc   : > { %5464 = vst.msk [vmem:[#allocation2 + $0x90] sm:$0xff] %vm796_vm0, %v5460_v17  ;;  %v13581_v53 = vadd.f32 %v8566_v24, %v5591_v13  ;;  %v5593_v46 = vpop.f32.mrb[227].mxu1 }
 0xbbd   : > { %v10323_v61 = vpop.eup %10322  ;;  %v13583_v1 = vadd.f32 %v8567_v37, %v5593_v46  ;;  %5633 = vmax.xlane.f32.xlu1 %v5632_v62 }
 0xbbe   : > { %v5456_v33 = vmul.f32 %v10323_v61, %v9231_v23 }
 0xbbf   : > { %v10325_v40 = vpop.eup %10324  ;;  %v5597_v29 = vpop.f32.mrb[228].mxu1  ;;  %v5635_v11 = vmax.f32 %v13581_v53, %v13583_v1 }
 0xbc0   : > { %v5457_v7 = vmul.f32 %v10325_v40, %v9234_v12  ;;  %v13593_v54 = vadd.f32 %v8568_v20, %v5597_v29  ;;  %v5599_v55 = vpop.f32.mrb[229].mxu1 }
 0xbc1   : > { %v13595_v52 = vadd.f32 %v8569_v3, %v5599_v55  ;;  %5636 = vmax.xlane.f32.xlu0 %v5635_v11 }
 0xbc2   : > { %v5461_v14 = vpack.c.bf16 %v5457_v7, %v5456_v33 }
 0xbc3   : > { %v5603_v18 = vpop.f32.mrb[230].mxu1  ;;  %v5638_v58 = vmax.f32 %v13593_v54, %v13595_v52 }
 0xbc4   : > { %5465 = vst.msk [vmem:[#allocation2 + $0x98] sm:$0xff] %vm796_vm0, %v5461_v14  ;;  %v13606_v57 = vadd.f32 %v8570_v15, %v5603_v18  ;;  %v5605_v43 = vpop.f32.mrb[231].mxu1 }
 0xbc5   : > { %v13608_v36 = vadd.f32 %v8571_v2, %v5605_v43  ;;  %5639 = vmax.xlane.f32.xlu1 %v5638_v58 }
 0xbc7   : > { %v5609_v35 = vpop.f32.mrb[232].mxu1  ;;  %v5641_v34 = vmax.f32 %v13606_v57, %v13608_v36 }
 0xbc8   : > { %v5611_v56 = vpop.f32.mrb[233].mxu1  ;;  %v13646_v26 = vadd.f32 %v8572_v16, %v5609_v35  ;;  %v10653_v16 = vld [vmem:[%s15007_s10 + $0x8] sm:$0xff] }
 0xbc9   : > { %5642 = vmax.xlane.f32.xlu0 %v5641_v34  ;;  %v13648_v12 = vadd.f32 %v8573_v49, %v5611_v56  ;;  %v13687_v34 = vld [vmem:[%s15008_s11 + $0x48] sm:$0xff]  }
 0xbcb   : > { %v5615_v38 = vpop.f32.mrb[234].mxu1  ;;  %v5644_v39 = vmax.f32 %v13646_v26, %v13648_v12 }
 0xbcc   : > { %v13618_v10 = vadd.f32 %v8574_v27, %v5615_v38  ;;  %v5617_v21 = vpop.f32.mrb[235].mxu1 }
 0xbcd   : > { %v13620_v51 = vadd.f32 %v8575_v32, %v5617_v21 }
 0xbcf   : > { %v5621_v9 = vpop.f32.mrb[236].mxu1  ;;  %v5647_v5 = vmax.f32 %v13618_v10, %v13620_v51 }
 0xbd0   : > { %v5623_v42 = vpop.f32.mrb[237].mxu1  ;;  %v13656_v48 = vadd.f32 %v8576_v0, %v5621_v9  ;;  %v13695_v9 = vld [vmem:[%s15008_s11 + $0x8] sm:$0xff]   ;;  %v13717_v0 = vld [vmem:[%s15008_s11 + $0x10] sm:$0xff]  }
 0xbd1   : > { %5648 = vmax.xlane.f32.xlu0 %v5647_v5  ;;  %v13658_v41 = vadd.f32 %v8577_v19, %v5623_v42 }
 0xbd3   : > { %v5627_v8 = vpop.f32.mrb[238].mxu1  ;;  %v5650_v25 = vmax.f32 %v13656_v48, %v13658_v41 }
 0xbd4   : > { %v13630_v30 = vadd.f32 %v8578_v50, %v5627_v8  ;;  %v5629_v22 = vpop.f32.mrb[239].mxu1  ;;  %v13703_v50 = vld [vmem:[%s15008_s11 + $0x50] sm:$0xff]  }
 0xbd5   : > { %v13632_v23 = vadd.f32 %v8579_v44, %v5629_v22  ;;  %v10652_v22 = vld [vmem:[%s15007_s10] sm:$0xff] }
 0xbd6   : > { %5886 = vrot.lane.b32.xlu1 %v15393_v4, %s15304_s5 }
 0xbd7   : > { %v5653_v31 = vmax.f32 %v13630_v30, %v13632_v23 }
 0xbd9   : > { %5654 = vmax.xlane.f32.xlu0 %v5653_v31 }
 0xbef   : > { %5888 = vrot.lane.b32.xlu0 %v15394_v47, %s15304_s5 }
 0xbfa   : > { %5645 = vmax.xlane.f32.xlu1 %v5644_v39 }
 0xbfe   : > { %5651 = vmax.xlane.f32.xlu1 %v5650_v25  ;;  %v10655_v25 = vld [vmem:[%s15007_s10 + $0x10] sm:$0xff] }
 0xc0f   : > { %5890 = vrot.lane.b32.xlu1 %v15395_v6, %s15304_s5 }
 0xc13   : > { %5892 = vrot.lane.b32.xlu1 %v15396_v45, %s15304_s5 }
 0xc4a   : > { %v5634_v24 = vpop.xlane.xlu1 %5633 }
 0xc4b   : > { %v5656_v17 = vsub.f32 %v13568_v59, %v5634_v24  ;;  %v5657_v37 = vsub.f32 %v13570_v60, %v5634_v24 }
 0xc4d   : > { %v5672_v13 = vmul.f32 1.442695, %v5656_v17  ;;  %v5674_v62 = vmul.f32 1.442695, %v5657_v37  ;;  %v10656_v17 = vld [vmem:[%s15007_s10 + $0x18] sm:$0xff] }
 0xc4e   : > { %v5637_v46 = vpop.xlane.xlu0 %5636 }
 0xc4f   : > { %v5658_v61 = vsub.f32 %v13581_v53, %v5637_v46  ;;  %v5659_v20 = vsub.f32 %v13583_v1, %v5637_v46  ;;  %10326 = vpow2.f32 %v5672_v13 }
 0xc50   : > { %10328 = vpow2.f32 %v5674_v62  ;;  %v13737_v62 = vld [vmem:[%s15008_s11 + $0x58] sm:$0xff]  }
 0xc51   : > { %v5676_v33 = vmul.f32 1.442695, %v5658_v61  ;;  %v5678_v3 = vmul.f32 1.442695, %v5659_v20  ;;  %v13745_v20 = vld [vmem:[%s15008_s11 + $0x18] sm:$0xff]  }
 0xc52   : > { %v5640_v40 = vpop.xlane.xlu1 %5639 }
 0xc53   : > { %10330 = vpow2.f32 %v5676_v33  ;;  %v5660_v29 = vsub.f32 %v13593_v54, %v5640_v40  ;;  %v5661_v11 = vsub.f32 %v13595_v52, %v5640_v40  ;;  %v13751_v33 = vld [vmem:[%s15008_s11 + $0x60] sm:$0xff]   ;;  %v13763_v40 = vld [vmem:[%s15008_s11 + $0x68] sm:$0xff]  }
 0xc54   : > { %10332 = vpow2.f32 %v5678_v3  ;;  %v13757_v3 = vld [vmem:[%s15008_s11 + $0x20] sm:$0xff]  }
 0xc55   : > { %v5680_v59 = vmul.f32 1.442695, %v5660_v29  ;;  %v5682_v60 = vmul.f32 1.442695, %v5661_v11  ;;  %v13769_v29 = vld [vmem:[%s15008_s11 + $0x28] sm:$0xff]   ;;  %v13775_v11 = vld [vmem:[%s15008_s11 + $0x70] sm:$0xff]  }
 0xc56   : > { %v5643_v7 = vpop.xlane.xlu0 %5642  ;;  %v5887_v27 = vpop.permute.xlu1 %5886 }
 0xc57   : > { %v5662_v55 = vsub.f32 %v13606_v57, %v5643_v7  ;;  %v5663_v53 = vsub.f32 %v13608_v36, %v5643_v7  ;;  %10334 = vpow2.f32 %v5680_v59  ;;  %v13681_v36 = vld [vmem:[%s15008_s11] sm:$0xff]   ;;  %v5898_v42 = vsel %vm3258_vm1, %v15393_v4, %v5887_v27 }
 0xc58   : > { %10336 = vpow2.f32 %v5682_v60  ;;  %v6314_v44 = vsel %vm3258_vm1, %v5887_v27, %v15393_v4  ;;  %v5902_v31 = vmul.f32 %v10652_v22, %v5898_v42  ;;  %v5903_v49 = vmul.f32 %v10653_v16, %v5898_v42  ;;  %v13781_v60 = vld [vmem:[%s15008_s11 + $0x30] sm:$0xff]   ;;  %v15397_v42 = vld [vmem:[#allocation134_spill] sm:$0xff] }
 0xc59   : > { %v5684_v1 = vmul.f32 1.442695, %v5662_v55  ;;  %v5686_v15 = vmul.f32 1.442695, %v5663_v53  ;;  %v10327_v14 = vpop.eup %10326  ;;  %v13724_v39 = vmul.f32 %v10652_v22, %v6314_v44  ;;  %v6319_v7 = vmul.f32 %v10653_v16, %v6314_v44  ;;  %v13787_v55 = vld [vmem:[%s15008_s11 + $0x78] sm:$0xff]   ;;  %v13817_v44 = vld [vmem:[%s15007_s10 + $0x28] sm:$0xff] }
 0xc5a   : > { %v10329_v2 = vpop.eup %10328  ;;  %v13823_v22 = vld [vmem:[%s15007_s10 + $0x30] sm:$0xff]  ;;  %v13829_v16 = vld [vmem:[%s15007_s10 + $0x38] sm:$0xff] }
 0xc5b   : > { %10338 = vpow2.f32 %v5684_v1 }
 0xc5c   : > { %10340 = vpow2.f32 %v5686_v15 }
 0xc5d   : > { %v10331_v18 = vpop.eup %10330 }
 0xc5e   : > { %v10333_v54 = vpop.eup %10332  ;;  %v5704_v58 = vpack.c.bf16 %v10331_v18, %v10327_v14  ;;  %v13676_v43 = vpop.xlane.xlu0 %5648 }
 0xc5f   : > { %v5705_v52 = vpack.c.bf16 %v10333_v54, %v10329_v2  ;;  %v5666_v1 = vsub.f32 %v13618_v10, %v13676_v43  ;;  %v5667_v15 = vsub.f32 %v13620_v51, %v13676_v43 }
 0xc61   : > { %5744 = vmatprep.mubr.bf16.mxu0 %v5705_v52  ;;  %5825 = vmatprep.mubr.bf16.mxu1 %v5705_v52  ;;  %v10335_v57 = vpop.eup %10334  ;;  %v5692_v14 = vmul.f32 1.442695, %v5666_v1  ;;  %v5694_v2 = vmul.f32 1.442695, %v5667_v15  ;;  %v13842_v15 = vld [vmem:[%s15008_s11 + $0x40] sm:$0xff]  }
 0xc62   : > { %5745 = vmatmul.mubr.bf16.vlgmr.msra.gmra.mrb[240].mxu0 %v5704_v58  ;;  %5826 = vmatmul.mubr.bf16.vlgmr.msra.gmra.mrb[240].mxu1 %v5704_v58  ;;  %v10337_v35 = vpop.eup %10336 }
 0xc63   : > { %9316 = vmatpush3.bf16.msra.mxu1 %v13681_v36  ;;  %10342 = vpow2.f32 %v5692_v14  ;;  %v15399_v14 = vld [vmem:[#allocation79_spill] sm:$0xff] }
 0xc64   : > { %9317 = vmatprep.subr.bf16.mxu1 %v13687_v34  ;;  %10344 = vpow2.f32 %v5694_v2  ;;  %v6217_v2 = vmul.bf16 %v13842_v15, %v15399_v14 }
 0xc65   : > { %v10339_v56 = vpop.eup %10338 }
 0xc66   : > { %v10341_v32 = vpop.eup %10340  ;;  %v13690_v38 = vpop.xlane.xlu0 %5654  ;;  %v5706_v21 = vpack.c.bf16 %v10339_v56, %v10335_v57 }
 0xc67   : > { %9318 = vmatpush3.bf16.msra.mxu1 %v13695_v9  ;;  %v5707_v5 = vpack.c.bf16 %v10341_v32, %v10337_v35  ;;  %v5671_v54 = vsub.f32 %v13632_v23, %v13690_v38  ;;  %v5670_v43 = vsub.f32 %v13630_v30, %v13690_v38 }
 0xc68   : > { %9319 = vmatprep.subr.bf16.mxu1 %v13703_v50 }
 0xc69   : > { %5752 = vmatprep.mubr.bf16.mxu0 %v5707_v5  ;;  %5833 = vmatprep.mubr.bf16.mxu1 %v5707_v5  ;;  %v5702_v27 = vmul.f32 1.442695, %v5671_v54 }
 0xc6a   : > { %5753 = vmatmul.mubr.bf16.gmra.mrb[244].mxu0 %v5706_v21  ;;  %5834 = vmatmul.mubr.bf16.gmra.mrb[244].mxu1 %v5706_v21  ;;  %v5889_v8 = vpop.permute.xlu0 %5888 }
 0xc6b   : > { %9320 = vmatpush3.bf16.msra.mxu1 %v13717_v0  ;;  %v5899_v4 = vsel %vm3258_vm1, %v15394_v47, %v5889_v8  ;;  %v6315_v19 = vsel %vm3258_vm1, %v5889_v8, %v15394_v47 }
 0xc6c   : > { %v5904_v24 = vmul.f32 %v10655_v25, %v5899_v4  ;;  %v5905_v37 = vmul.f32 %v10656_v17, %v5899_v4  ;;  %v13732_v13 = vmul.f32 %v10655_v25, %v6315_v19  ;;  %9321 = vmatprep.subr.bf16.mxu1 %v13737_v62  ;;  %v6321_v59 = vmul.f32 %v10656_v17, %v6315_v19  ;;  %v13835_v19 = vld [vmem:[%s15007_s10 + $0x20] sm:$0xff] }
 0xc6e   : > { %v9889_v47 = vpack.c.bf16 %v5904_v24, %v5902_v31  ;;  %v9897_v46 = vpack.c.bf16 %v13732_v13, %v13724_v39  ;;  %v9887_v61 = vpack.c.bf16 %v5905_v37, %v5903_v49  ;;  %v9895_v53 = vpack.c.bf16 %v6321_v59, %v6319_v7 }
 0xc6f   : > { %9322 = vmatpush3.bf16.msra.mxu1 %v13745_v20 }
 0xc70   : > { %9888 = vmatprep.subr.bf16.mxu0 %v9887_v61  ;;  %9323 = vmatprep.subr.bf16.mxu1 %v13751_v33 }
 0xc71   : > { %9890 = vmatpush1.bf16.msra.mxu0 %v9889_v47  ;;  %v15398_v47 = vld [vmem:[#allocation133_spill] sm:$0xff] }
 0xc72   : > { %v2734_v61 = vmax.f32 %v15398_v47, 1e-24 }
 0xc73   : > { %9324 = vmatpush3.bf16.msra.mxu1 %v13757_v3 }
 0xc74   : > { %9325 = vmatprep.subr.bf16.mxu1 %v13763_v40 }
 0xc77   : > { %9326 = vmatpush3.bf16.msra.mxu1 %v13769_v29 }
 0xc78   : > { %9327 = vmatprep.subr.bf16.mxu1 %v13775_v11 }
 0xc7b   : > { %9328 = vmatpush3.bf16.msra.mxu1 %v13781_v60 }
 0xc7c   : > { %9329 = vmatprep.subr.bf16.mxu1 %v13787_v55 }
 0xc7f   : > { %9330 = vmatpush3.bf16.msra.mxu1 %v13494_v63 }
 0xc80   : > { %9896 = vmatprep.subr.bf16.mxu1 %v9895_v53 }
 0xc87   : > { %v5646_v18 = vpop.xlane.xlu1 %5645 }
 0xc88   : > { %v5664_v58 = vsub.f32 %v13646_v26, %v5646_v18  ;;  %v5665_v52 = vsub.f32 %v13648_v12, %v5646_v18  ;;  %v5700_v12 = vmul.f32 1.442695, %v5670_v43  ;;  %v15400_v18 = vld [vmem:[#allocation136_spill] sm:$0xff] }
 0xc89   : > { %v2735_v54 = vmax.f32 %v15400_v18, 1e-24  ;;  %v15410_v18 = vld [vmem:[#allocation57_spill] sm:$0xff] }
 0xc8a   : > { %v5688_v57 = vmul.f32 1.442695, %v5664_v58  ;;  %v5690_v35 = vmul.f32 1.442695, %v5665_v52 }
 0xc8b   : > { %v5652_v56 = vpop.xlane.xlu1 %5651 }
 0xc8c   : > { %10346 = vpow2.f32 %v5688_v57  ;;  %v5668_v10 = vsub.f32 %v13656_v48, %v5652_v56  ;;  %v5669_v51 = vsub.f32 %v13658_v41, %v5652_v56  ;;  %v10343_v48 = vpop.eup %10342  ;;  %v2733_v41 = vmax.f32 %v15397_v42, 1e-24 }
 0xc8d   : > { %10348 = vpow2.f32 %v5690_v35  ;;  %v10345_v38 = vpop.eup %10344  ;;  %v15401_v35 = vld [vmem:[#allocation135_spill] sm:$0xff] }
 0xc8e   : > { %v5698_v23 = vmul.f32 1.442695, %v5669_v51  ;;  %10350 = vpow2.f32 %v5702_v27  ;;  %v5696_v26 = vmul.f32 1.442695, %v5668_v10  ;;  %v2736_v56 = vmax.f32 %v15401_v35, 1e-24 }
 0xc8f   : > { %v13803_v32 = vpop.permute.xlu1 %5890  ;;  %v15402_v51 = vld [vmem:[#allocation138_spill] sm:$0xff] }
 0xc90   : > { %10352 = vpow2.f32 %v5698_v23  ;;  %v5900_v21 = vsel %vm3258_vm1, %v15395_v6, %v13803_v32  ;;  %v2737_v43 = vmax.f32 %v15402_v51, 1e-24  ;;  %v13853_v23 = vld [vmem:[%s15006_s9] ss:$0 sm:$0xff] }
 0xc91   : > { %10354 = vpow2.f32 %v5696_v26  ;;  %v5907_v8 = vmul.f32 %v13817_v44, %v5900_v21  ;;  %v5906_v25 = vmul.f32 %v13835_v19, %v5900_v21  ;;  %v15403_v21 = vld [vmem:[#allocation137_spill] sm:$0xff] }
 0xc92   : > { %10356 = vpow2.f32 %v5700_v12 }
 0xc93   : > { %v13808_v5 = vpop.permute.xlu1 %5892  ;;  %10358 = vrsqrt.f32 %v2733_v41  ;;  %v15404_v41 = vld [vmem:[#allocation55_spill] sm:$0xff] }
 0xc94   : > { %v5901_v30 = vsel %vm3258_vm1, %v15396_v45, %v13808_v5  ;;  %10360 = vrsqrt.f32 %v2734_v61 }
 0xc95   : > { %v5908_v31 = vmul.f32 %v13823_v22, %v5901_v30  ;;  %v5909_v49 = vmul.f32 %v13829_v16, %v5901_v30  ;;  %10362 = vrsqrt.f32 %v2735_v54 }
 0xc96   : > { %v10347_v4 = vpop.eup %10346  ;;  %10364 = vrsqrt.f32 %v2736_v56  ;;  %v15412_v56 = vld [vmem:[#allocation56_spill] sm:$0xff] }
 0xc97   : > { %v10349_v24 = vpop.eup %10348  ;;  %v9891_v17 = vpack.c.bf16 %v5909_v49, %v5907_v8  ;;  %v5708_v37 = vpack.c.bf16 %v10343_v48, %v10347_v4  ;;  %v9893_v59 = vpack.c.bf16 %v5908_v31, %v5906_v25  ;;  %v2738_v48 = vmax.f32 %v15403_v21, 1e-24  ;;  %v15405_v31 = vld [vmem:[#allocation78_spill] sm:$0xff]  ;;  %v15406_v4 = vld [vmem:[#allocation140_spill] sm:$0xff]  ;;  %v15413_v21 = vld [vmem:[#allocation61_spill] sm:$0xff] }
 0xc98   : > { %v5709_v7 = vpack.c.bf16 %v10345_v38, %v10349_v24  ;;  %v10351_v53 = vpop.eup %10350  ;;  %10366 = vrsqrt.f32 %v2737_v43  ;;  %v6209_v8 = vmul.bf16 %v13681_v36, %v15399_v14  ;;  %v6218_v49 = vmul.bf16 %v13687_v34, %v15405_v31  ;;  %v15407_v24 = vld [vmem:[#allocation53_spill] sm:$0xff] }
 0xc99   : > { %9892 = vmatprep.subr.bf16.mxu0 %v9891_v17  ;;  %10368 = vrsqrt.f32 %v2738_v48  ;;  %v2739_v25 = vmax.f32 %v15406_v4, 1e-24  ;;  %v6210_v61 = vmul.bf16 %v13695_v9, %v15405_v31 }
 0xc9a   : > { %5760 = vmatprep.mubr.bf16.mxu0 %v5709_v7  ;;  %5841 = vmatprep.mubr.bf16.mxu1 %v5709_v7  ;;  %v10353_v1 = vpop.eup %10352 }
 0xc9b   : > { %5761 = vmatmul.mubr.bf16.gmra.mrb[248].mxu0 %v5708_v37  ;;  %5842 = vmatmul.mubr.bf16.gmra.mrb[248].mxu1 %v5708_v37  ;;  %v5711_v58 = vpack.c.bf16 %v10351_v53, %v10353_v1  ;;  %v10355_v52 = vpop.eup %10354  ;;  %v15409_v53 = vld [vmem:[#allocation139_spill] sm:$0xff]  ;;  %10370 = vrsqrt.f32 %v2739_v25  ;;  %v6214_v25 = vmul.bf16 %v13769_v29, %v15405_v31 }
 0xc9c   : > { %9894 = vmatpush1.bf16.msra.mxu0 %v9893_v59  ;;  %v10357_v57 = vpop.eup %10356  ;;  %v15408_v59 = vld [vmem:[#allocation81_spill] sm:$0xff]  ;;  %v2740_v1 = vmax.f32 %v15409_v53, 1e-24 }
 0xc9d   : > { %9355 = vmatprep.subr.bf16.mxu0 %v6217_v2  ;;  %5768 = vmatprep.mubr.bf16.mxu0 %v5711_v58  ;;  %v5710_v27 = vpack.c.bf16 %v10357_v57, %v10355_v52  ;;  %v10359_v10 = vpop.eup %10358  ;;  %v6219_v7 = vmul.bf16 %v13703_v50, %v15408_v59  ;;  %v6211_v52 = vmul.bf16 %v13717_v0, %v15408_v59  ;;  %v15411_v57 = vld [vmem:[#allocation80_spill] sm:$0xff] }
 0xc9e   : > { %5849 = vmatprep.mubr.bf16.mxu1 %v5711_v58  ;;  %v2868_v26 = vmul.f32 %v13853_v23, %v10359_v10  ;;  %v10361_v12 = vpop.eup %10360  ;;  %v6220_v35 = vmul.bf16 %v13737_v62, %v15411_v57  ;;  %10372 = vrsqrt.f32 %v2740_v1  ;;  %v6212_v43 = vmul.bf16 %v13745_v20, %v15411_v57 }
 0xc9f   : > { %v2869_v42 = vmul.f32 %v13853_v23, %v10361_v12  ;;  %v10363_v38 = vpop.eup %10362  ;;  %v6216_v53 = vmul.bf16 %v13494_v63, %v15411_v57 }
 0xca0   : > { %v2932_v30 = vmul.f32 %v2868_v26, %v15404_v41  ;;  %v2870_v37 = vmul.f32 %v13853_v23, %v10363_v38  ;;  %v10365_v47 = vpop.eup %10364  ;;  %v6221_v26 = vmul.bf16 %v13751_v33, %v15399_v14  ;;  %v6213_v41 = vmul.bf16 %v13757_v3, %v15399_v14  ;;  %v15414_v38 = vld [vmem:[#allocation59_spill] sm:$0xff] }
 0xca1   : > { %v2933_v17 = vmul.f32 %v2869_v42, %v15407_v24  ;;  %v2871_v2 = vmul.f32 %v13853_v23, %v10365_v47  ;;  %v6223_v14 = vmul.bf16 %v13775_v11, %v15408_v59  ;;  %v6215_v47 = vmul.bf16 %v13781_v60, %v15408_v59 }
 0xca2   : > { %v2934_v54 = vmul.f32 %v2870_v37, %v15410_v18  ;;  %v10367_v58 = vpop.eup %10366 }
 0xca3   : > { %5769 = vmatmul.mubr.bf16.gmra.mrb[252].mxu0 %v5710_v27  ;;  %5850 = vmatmul.mubr.bf16.gmra.mrb[252].mxu1 %v5710_v27  ;;  %v2935_v27 = vmul.f32 %v2871_v2, %v15412_v56  ;;  %v2872_v10 = vmul.f32 %v13853_v23, %v10367_v58  ;;  %v10369_v51 = vpop.eup %10368 }
 0xca4   : > { %6015 = vmatprep.mubr.f32.mxu0 %v15159_v28  ;;  %v2873_v12 = vmul.f32 %v13853_v23, %v10369_v51 }
 0xca5   : > { %v2936_v48 = vmul.f32 %v2872_v10, %v15413_v21  ;;  %v10371_v42 = vpop.eup %10370 }
 0xca8   : > { %v10373_v4 = vpop.eup %10372 }
 0xca9   : > { %v2875_v24 = vmul.f32 %v13853_v23, %v10373_v4 }
 0xcab   : > { %8604 = vmatmul.mubr.msk.f32.vlgmr.msra.gmra.mrb[0].mxu0 %vm796_vm0, %v2932_v30  ;;  %v6222_v30 = vmul.bf16 %v13763_v40, %v15405_v31  ;;  %v6224_v31 = vmul.bf16 %v13787_v55, %v15411_v57 }
 0xcac   : > { %9356 = vmatpush3.bf16.msra.mxu0 %v6209_v8  ;;  %6021 = vmatprep.mubr.f32.mxu0 %v15159_v28  ;;  %v2937_v8 = vmul.f32 %v2873_v12, %v15414_v38 }
 0xcad   : > { %9357 = vmatprep.subr.bf16.mxu0 %v6218_v49  ;;  %v2874_v49 = vmul.f32 %v13853_v23, %v10371_v42 }
 0xcaf   : > { %8605 = vmatmul.mubr.msk.f32.gmra.mrb[2].mxu0 %vm796_vm0, %v2933_v17  ;;  %v15415_v17 = vld [vmem:[#allocation63_spill] sm:$0xff] }
 0xcb0   : > { %9358 = vmatpush3.bf16.msra.mxu0 %v6210_v61  ;;  %6027 = vmatprep.mubr.f32.mxu0 %v15159_v28  ;;  %v2938_v37 = vmul.f32 %v2874_v49, %v15415_v17  ;;  %v15416_v61 = vld [vmem:[#allocation62_spill] sm:$0xff] }
 0xcb1   : > { %9359 = vmatprep.subr.bf16.mxu0 %v6219_v7  ;;  %v2939_v7 = vmul.f32 %v2875_v24, %v15416_v61 }
 0xcb3   : > { %8606 = vmatmul.mubr.msk.f32.gmra.mrb[4].mxu0 %vm796_vm0, %v2934_v54 }
 0xcb4   : > { %9360 = vmatpush3.bf16.msra.mxu0 %v6211_v52  ;;  %6033 = vmatprep.mubr.f32.mxu0 %v15159_v28 }
 0xcb5   : > { %9361 = vmatprep.subr.bf16.mxu0 %v6220_v35 }
 0xcb7   : > { %8607 = vmatmul.mubr.msk.f32.gmra.mrb[6].mxu0 %vm796_vm0, %v2935_v27 }
 0xcb8   : > { %9362 = vmatpush3.bf16.msra.mxu0 %v6212_v43  ;;  %6039 = vmatprep.mubr.f32.mxu0 %v15159_v28 }
 0xcb9   : > { %9363 = vmatprep.subr.bf16.mxu0 %v6221_v26 }
 0xcbb   : > { %8608 = vmatmul.mubr.msk.f32.gmra.mrb[8].mxu0 %vm796_vm0, %v2936_v48 }
 0xcbc   : > { %9364 = vmatpush3.bf16.msra.mxu0 %v6213_v41  ;;  %6045 = vmatprep.mubr.f32.mxu0 %v15159_v28 }
 0xcbd   : > { %9365 = vmatprep.subr.bf16.mxu0 %v6222_v30 }
 0xcbf   : > { %8609 = vmatmul.mubr.msk.f32.gmra.mrb[10].mxu0 %vm796_vm0, %v2937_v8 }
 0xcc0   : > { %9366 = vmatpush3.bf16.msra.mxu0 %v6214_v25  ;;  %6051 = vmatprep.mubr.f32.mxu0 %v15159_v28 }
 0xcc1   : > { %9367 = vmatprep.subr.bf16.mxu0 %v6223_v14 }
 0xcc3   : > { %8610 = vmatmul.mubr.msk.f32.gmra.mrb[12].mxu0 %vm796_vm0, %v2938_v37 }
 0xcc4   : > { %9368 = vmatpush3.bf16.msra.mxu0 %v6215_v47  ;;  %6057 = vmatprep.mubr.f32.mxu0 %v15159_v28 }
 0xcc5   : > { %9369 = vmatprep.subr.bf16.mxu0 %v6224_v31 }
 0xcc7   : > { %8611 = vmatmul.mubr.msk.f32.gmra.mrb[14].mxu0 %vm796_vm0, %v2939_v7 }
 0xcc8   : > { %9370 = vmatpush3.bf16.msra.mxu0 %v6216_v53 }
 0xcc9   : > { %9395 = vmatprep.subr.bf16.mxu0 %v13842_v15 }
 0xd35   : > { %v9251_v59 = vpop.f32.mrb[240].mxu0  ;;  %v9291_v1 = vpop.f32.mrb[240].mxu1 }
 0xd36   : > { %v9252_v2 = vpop.f32.mrb[241].mxu0  ;;  %v9292_v18 = vpop.f32.mrb[241].mxu1 }
 0xd37   : > { %v9253_v54 = vadd.f32 %v9252_v2, %v9251_v59  ;;  %v9293_v58 = vadd.f32 %v9292_v18, %v9291_v1  ;;  %v9254_v52 = vpop.f32.mrb[242].mxu0  ;;  %v9294_v35 = vpop.f32.mrb[242].mxu1 }
 0xd38   : > { %v9255_v56 = vpop.f32.mrb[243].mxu0  ;;  %v9295_v27 = vpop.f32.mrb[243].mxu1 }
 0xd39   : > { %10374 = vrcp.f32 %v9253_v54  ;;  %v9256_v10 = vadd.f32 %v9255_v56, %v9254_v52  ;;  %v9296_v51 = vadd.f32 %v9295_v27, %v9294_v35 }
 0xd3b   : > { %10376 = vrcp.f32 %v9256_v10 }
 0xd3d   : > { %v9257_v63 = vpop.f32.mrb[244].mxu0  ;;  %v9297_v57 = vpop.f32.mrb[244].mxu1 }
 0xd3e   : > { %v9258_v43 = vpop.f32.mrb[245].mxu0  ;;  %v9298_v26 = vpop.f32.mrb[245].mxu1 }
 0xd3f   : > { %v9259_v12 = vadd.f32 %v9258_v43, %v9257_v63  ;;  %v9299_v21 = vadd.f32 %v9298_v26, %v9297_v57  ;;  %v9260_v48 = vpop.f32.mrb[246].mxu0  ;;  %v9300_v42 = vpop.f32.mrb[246].mxu1 }
 0xd40   : > { %v9261_v41 = vpop.f32.mrb[247].mxu0  ;;  %v9301_v30 = vpop.f32.mrb[247].mxu1 }
 0xd41   : > { %10378 = vrcp.f32 %v9259_v12  ;;  %v9262_v38 = vadd.f32 %v9261_v41, %v9260_v48  ;;  %v9302_v8 = vadd.f32 %v9301_v30, %v9300_v42 }
 0xd43   : > { %v10375_v49 = vpop.eup %10374  ;;  %10380 = vrcp.f32 %v9262_v38 }
 0xd44   : > { %v5866_v4 = vmul.f32 %v10375_v49, %v9293_v58 }
 0xd45   : > { %v10377_v25 = vpop.eup %10376 }
 0xd46   : > { %v5867_v14 = vmul.f32 %v10377_v25, %v9296_v51 }
 0xd48   : > { %v5874_v24 = vpack.c.bf16 %v5867_v14, %v5866_v4  ;;  %v8589_v4 = vld [vmem:[%s15288_s0 + $0x308] sm:$0xff] }
 0xd4a   : > { %5878 = vst.msk [vmem:[#allocation2 + $0xa0] sm:$0xff] %vm796_vm0, %v5874_v24 }
 0xd4b   : > { %v10379_v17 = vpop.eup %10378 }
 0xd4c   : > { %v5868_v37 = vmul.f32 %v10379_v17, %v9299_v21 }
 0xd4d   : > { %v10381_v47 = vpop.eup %10380 }
 0xd4e   : > { %v5869_v31 = vmul.f32 %v10381_v47, %v9302_v8  ;;  %v8588_v8 = vld [vmem:[%s15288_s0 + $0x300] sm:$0xff] }
 0xd50   : > { %v5875_v61 = vpack.c.bf16 %v5869_v31, %v5868_v37  ;;  %v8590_v31 = vld [vmem:[%s15288_s0 + $0x310] sm:$0xff] }
 0xd52   : > { %5879 = vst.msk [vmem:[#allocation2 + $0xa8] sm:$0xff] %vm796_vm0, %v5875_v61 }
 0xd6e   : > { %v9263_v7 = vpop.f32.mrb[248].mxu0  ;;  %v9303_v53 = vpop.f32.mrb[248].mxu1 }
 0xd6f   : > { %v9264_v59 = vpop.f32.mrb[249].mxu0  ;;  %v9304_v1 = vpop.f32.mrb[249].mxu1 }
 0xd70   : > { %v9265_v2 = vadd.f32 %v9264_v59, %v9263_v7  ;;  %v9305_v18 = vadd.f32 %v9304_v1, %v9303_v53  ;;  %v9266_v54 = vpop.f32.mrb[250].mxu0  ;;  %v9306_v58 = vpop.f32.mrb[250].mxu1  ;;  %v8591_v7 = vld [vmem:[%s15288_s0 + $0x318] sm:$0xff] }
 0xd71   : > { %v9267_v52 = vpop.f32.mrb[251].mxu0  ;;  %v9307_v35 = vpop.f32.mrb[251].mxu1 }
 0xd72   : > { %10382 = vrcp.f32 %v9265_v2  ;;  %v9268_v56 = vadd.f32 %v9267_v52, %v9266_v54  ;;  %v9308_v27 = vadd.f32 %v9307_v35, %v9306_v58  ;;  %v8592_v58 = vld [vmem:[%s15288_s0 + $0x320] sm:$0xff]  ;;  %v8593_v35 = vld [vmem:[%s15288_s0 + $0x328] sm:$0xff] }
 0xd74   : > { %10384 = vrcp.f32 %v9268_v56 }
 0xd76   : > { %v9269_v10 = vpop.f32.mrb[252].mxu0  ;;  %v9309_v51 = vpop.f32.mrb[252].mxu1 }
 0xd77   : > { %v9270_v63 = vpop.f32.mrb[253].mxu0  ;;  %v9310_v57 = vpop.f32.mrb[253].mxu1 }
 0xd78   : > { %v9271_v43 = vadd.f32 %v9270_v63, %v9269_v10  ;;  %v9311_v26 = vadd.f32 %v9310_v57, %v9309_v51  ;;  %v9272_v12 = vpop.f32.mrb[254].mxu0  ;;  %v9312_v21 = vpop.f32.mrb[254].mxu1 }
 0xd79   : > { %v9273_v48 = vpop.f32.mrb[255].mxu0  ;;  %v9313_v42 = vpop.f32.mrb[255].mxu1 }
 0xd7a   : > { %10386 = vrcp.f32 %v9271_v43  ;;  %v9274_v41 = vadd.f32 %v9273_v48, %v9272_v12  ;;  %v9314_v30 = vadd.f32 %v9313_v42, %v9312_v21  ;;  %v8595_v21 = vld [vmem:[%s15288_s0 + $0x338] sm:$0xff] }
 0xd7c   : > { %v10383_v38 = vpop.eup %10382  ;;  %10388 = vrcp.f32 %v9274_v41 }
 0xd7d   : > { %v5870_v49 = vmul.f32 %v10383_v38, %v9305_v18 }
 0xd7e   : > { %v10385_v25 = vpop.eup %10384  ;;  %v6017_v14 = vpop.f32.mrb[0].mxu0 }
 0xd7f   : > { %v5871_v24 = vmul.f32 %v10385_v25, %v9308_v27  ;;  %v13928_v17 = vadd.f32 %v8588_v8, %v6017_v14  ;;  %v6019_v37 = vpop.f32.mrb[1].mxu0  ;;  %v8596_v8 = vld [vmem:[%s15288_s0 + $0x340] sm:$0xff] }
 0xd80   : > { %v13930_v47 = vadd.f32 %v8589_v4, %v6019_v37 }
 0xd81   : > { %v5876_v61 = vpack.c.bf16 %v5871_v24, %v5870_v49  ;;  %v8597_v49 = vld [vmem:[%s15288_s0 + $0x348] sm:$0xff] }
 0xd82   : > { %v6023_v53 = vpop.f32.mrb[2].mxu0  ;;  %v6064_v59 = vmax.f32 %v13928_v17, %v13930_v47 }
 0xd83   : > { %5880 = vst.msk [vmem:[#allocation2 + $0xb0] sm:$0xff] %vm796_vm0, %v5876_v61  ;;  %v13941_v1 = vadd.f32 %v8590_v31, %v6023_v53  ;;  %v6025_v2 = vpop.f32.mrb[3].mxu0  ;;  %v8598_v31 = vld [vmem:[%s15288_s0 + $0x350] sm:$0xff]  ;;  %v8599_v61 = vld [vmem:[%s15288_s0 + $0x358] sm:$0xff] }
 0xd84   : > { %v10387_v18 = vpop.eup %10386  ;;  %v13943_v54 = vadd.f32 %v8591_v7, %v6025_v2  ;;  %6065 = vmax.xlane.f32.xlu0 %v6064_v59 }
 0xd85   : > { %v5872_v52 = vmul.f32 %v10387_v18, %v9311_v26  ;;  %v8594_v26 = vld [vmem:[%s15288_s0 + $0x330] sm:$0xff] }
 0xd86   : > { %v10389_v56 = vpop.eup %10388  ;;  %v6029_v27 = vpop.f32.mrb[4].mxu0  ;;  %v6067_v10 = vmax.f32 %v13941_v1, %v13943_v54 }
 0xd87   : > { %v5873_v51 = vmul.f32 %v10389_v56, %v9314_v30  ;;  %v13953_v63 = vadd.f32 %v8592_v58, %v6029_v27  ;;  %v6031_v57 = vpop.f32.mrb[5].mxu0  ;;  %v8600_v58 = vld [vmem:[%s15288_s0 + $0x360] sm:$0xff] }
 0xd88   : > { %v13955_v43 = vadd.f32 %v8593_v35, %v6031_v57  ;;  %6068 = vmax.xlane.f32.xlu1 %v6067_v10  ;;  %v8602_v57 = vld [vmem:[%s15288_s0 + $0x370] sm:$0xff] }
 0xd89   : > { %v5877_v12 = vpack.c.bf16 %v5873_v51, %v5872_v52  ;;  %v8601_v52 = vld [vmem:[%s15288_s0 + $0x368] sm:$0xff] }
 0xd8a   : > { %v6035_v48 = vpop.f32.mrb[6].mxu0  ;;  %v6070_v42 = vmax.f32 %v13953_v63, %v13955_v43 }
 0xd8b   : > { %5881 = vst.msk [vmem:[#allocation2 + $0xb8] sm:$0xff] %vm796_vm0, %v5877_v12  ;;  %v6036_v41 = vadd.f32 %v8594_v26, %v6035_v48  ;;  %v6037_v30 = vpop.f32.mrb[7].mxu0  ;;  %v8603_v26 = vld [vmem:[%s15288_s0 + $0x378] sm:$0xff] }
 0xd8c   : > { %v6038_v38 = vadd.f32 %v8595_v21, %v6037_v30  ;;  %6071 = vmax.xlane.f32.xlu0 %v6070_v42 }
 0xd8e   : > { %v6041_v4 = vpop.f32.mrb[8].mxu0  ;;  %v6073_v25 = vmax.f32 %v6036_v41, %v6038_v38 }
 0xd8f   : > { %v13972_v14 = vadd.f32 %v8596_v8, %v6041_v4  ;;  %v6043_v24 = vpop.f32.mrb[9].mxu0 }
 0xd90   : > { %v13974_v37 = vadd.f32 %v8597_v49, %v6043_v24  ;;  %6074 = vmax.xlane.f32.xlu0 %v6073_v25 }
 0xd92   : > { %v6047_v7 = vpop.f32.mrb[10].mxu0  ;;  %v6076_v53 = vmax.f32 %v13972_v14, %v13974_v37 }
 0xd93   : > { %v13984_v59 = vadd.f32 %v8598_v31, %v6047_v7  ;;  %v6049_v2 = vpop.f32.mrb[11].mxu0 }
 0xd94   : > { %v13986_v18 = vadd.f32 %v8599_v61, %v6049_v2  ;;  %6077 = vmax.xlane.f32.xlu1 %v6076_v53 }
 0xd96   : > { %v6053_v35 = vpop.f32.mrb[12].mxu0  ;;  %v6079_v56 = vmax.f32 %v13984_v59, %v13986_v18 }
 0xd97   : > { %v13996_v27 = vadd.f32 %v8600_v58, %v6053_v35  ;;  %v6055_v10 = vpop.f32.mrb[13].mxu0 }
 0xd98   : > { %v13998_v51 = vadd.f32 %v8601_v52, %v6055_v10  ;;  %6080 = vmax.xlane.f32.xlu0 %v6079_v56 }
 0xd9a   : > { %v6059_v12 = vpop.f32.mrb[14].mxu0  ;;  %v6082_v21 = vmax.f32 %v13996_v27, %v13998_v51 }
 0xd9b   : > { %v14008_v48 = vadd.f32 %v8602_v57, %v6059_v12  ;;  %v6061_v42 = vpop.f32.mrb[15].mxu0 }
 0xd9c   : > { %v14010_v30 = vadd.f32 %v8603_v26, %v6061_v42  ;;  %6083 = vmax.xlane.f32.xlu1 %v6082_v21  ;;  %v6317_v42 = vsel %vm3258_vm1, %v13808_v5, %v15396_v45 }
 0xd9e   : > { %v6085_v8 = vmax.f32 %v14008_v48, %v14010_v30 }
 0xda0   : > { %6086 = vmax.xlane.f32.xlu0 %v6085_v8 }
 0xe11   : > { %v6066_v49 = vpop.xlane.xlu0 %6065 }
 0xe12   : > { %v6088_v4 = vsub.f32 %v13928_v17, %v6066_v49  ;;  %v6089_v25 = vsub.f32 %v13930_v47, %v6066_v49 }
 0xe14   : > { %v6104_v24 = vmul.f32 1.442695, %v6088_v4  ;;  %v6106_v31 = vmul.f32 1.442695, %v6089_v25  ;;  %v6325_v25 = vmul.f32 %v13829_v16, %v6317_v42 }
 0xe15   : > { %v6069_v61 = vpop.xlane.xlu1 %6068 }
 0xe16   : > { %v6090_v7 = vsub.f32 %v13941_v1, %v6069_v61  ;;  %v6091_v53 = vsub.f32 %v13943_v54, %v6069_v61  ;;  %10390 = vpow2.f32 %v6104_v24 }
 0xe17   : > { %10392 = vpow2.f32 %v6106_v31 }
 0xe18   : > { %v6108_v2 = vmul.f32 1.442695, %v6090_v7  ;;  %v6110_v58 = vmul.f32 1.442695, %v6091_v53  ;;  %v6324_v7 = vmul.f32 %v13823_v22, %v6317_v42 }
 0xe19   : > { %v6072_v52 = vpop.xlane.xlu0 %6071 }
 0xe1a   : > { %10394 = vpow2.f32 %v6108_v2  ;;  %v6092_v35 = vsub.f32 %v13953_v63, %v6072_v52  ;;  %v6093_v56 = vsub.f32 %v13955_v43, %v6072_v52 }
 0xe1b   : > { %10396 = vpow2.f32 %v6110_v58 }
 0xe1c   : > { %v6112_v17 = vmul.f32 1.442695, %v6092_v35  ;;  %v6114_v47 = vmul.f32 1.442695, %v6093_v56 }
 0xe1d   : > { %v6075_v10 = vpop.xlane.xlu0 %6074 }
 0xe1e   : > { %v6094_v57 = vsub.f32 %v6036_v41, %v6075_v10  ;;  %v6095_v26 = vsub.f32 %v6038_v38, %v6075_v10  ;;  %10398 = vpow2.f32 %v6112_v17  ;;  %v6316_v41 = vsel %vm3258_vm1, %v13803_v32, %v15395_v6 }
 0xe1f   : > { %10400 = vpow2.f32 %v6114_v47  ;;  %v15417_v47 = vld [vmem:[#allocation83_spill] sm:$0xff] }
 0xe20   : > { %v6116_v1 = vmul.f32 1.442695, %v6094_v57  ;;  %v6118_v12 = vmul.f32 1.442695, %v6095_v26  ;;  %v10391_v21 = vpop.eup %10390  ;;  %v6633_v39 = vmul.bf16 %v13842_v15, %v15417_v47  ;;  %v15418_v26 = vld [vmem:[#allocation142_spill] sm:$0xff] }
 0xe21   : > { %v6078_v54 = vpop.xlane.xlu1 %6077  ;;  %v10393_v8 = vpop.eup %10392 }
 0xe22   : > { %10402 = vpow2.f32 %v6116_v1  ;;  %v6096_v63 = vsub.f32 %v13972_v14, %v6078_v54  ;;  %v6097_v43 = vsub.f32 %v13974_v37, %v6078_v54  ;;  %v6323_v37 = vmul.f32 %v13817_v44, %v6316_v41 }
 0xe23   : > { %10404 = vpow2.f32 %v6118_v12  ;;  %v2741_v1 = vmax.f32 %v15418_v26, 1e-24 }
 0xe24   : > { %v10395_v49 = vpop.eup %10394  ;;  %v6120_v38 = vmul.f32 1.442695, %v6096_v63  ;;  %v6122_v31 = vmul.f32 1.442695, %v6097_v43  ;;  %v9899_v32 = vpack.c.bf16 %v6325_v25, %v6323_v37 }
 0xe25   : > { %v10397_v4 = vpop.eup %10396  ;;  %v6136_v24 = vpack.c.bf16 %v10395_v49, %v10391_v21  ;;  %v6081_v61 = vpop.xlane.xlu0 %6080  ;;  %v15419_v21 = vld [vmem:[#allocation141_spill] sm:$0xff] }
 0xe26   : > { %v6098_v45 = vsub.f32 %v13984_v59, %v6081_v61  ;;  %v6099_v5 = vsub.f32 %v13986_v18, %v6081_v61  ;;  %v6137_v14 = vpack.c.bf16 %v10397_v4, %v10393_v8  ;;  %10406 = vpow2.f32 %v6120_v38  ;;  %v15420_v8 = vld [vmem:[#allocation144_spill] sm:$0xff] }
 0xe27   : > { %10408 = vpow2.f32 %v6122_v31  ;;  %v6322_v59 = vmul.f32 %v13835_v19, %v6316_v41  ;;  %v2742_v42 = vmax.f32 %v15419_v21, 1e-24  ;;  %v2743_v49 = vmax.f32 %v15420_v8, 1e-24 }
 0xe28   : > { %v6124_v53 = vmul.f32 1.442695, %v6098_v45  ;;  %v6126_v2 = vmul.f32 1.442695, %v6099_v5  ;;  %6176 = vmatprep.mubr.bf16.mxu1 %v6137_v14  ;;  %6257 = vmatprep.mubr.bf16.mxu0 %v6137_v14  ;;  %v10399_v16 = vpop.eup %10398  ;;  %v15422_v5 = vld [vmem:[#allocation146_spill] sm:$0xff]  ;;  %v6629_v8 = vmul.bf16 %v13757_v3, %v15417_v47 }
 0xe29   : > { %6177 = vmatmul.mubr.bf16.vlgmr.msra.gmra.mrb[0].mxu1 %v6136_v24  ;;  %6258 = vmatmul.mubr.bf16.vlgmr.msra.gmra.mrb[16].mxu0 %v6136_v24  ;;  %v6084_v6 = vpop.xlane.xlu1 %6083  ;;  %v10401_v18 = vpop.eup %10400  ;;  %v9901_v52 = vpack.c.bf16 %v6324_v7, %v6322_v59  ;;  %v15421_v24 = vld [vmem:[#allocation143_spill] sm:$0xff]  ;;  %v2745_v14 = vmax.f32 %v15422_v5, 1e-24 }
 0xe2a   : > { %10410 = vpow2.f32 %v6124_v53  ;;  %9898 = vmatpush1.bf16.msra.mxu1 %v9897_v46  ;;  %9396 = vmatpush3.bf16.msra.mxu0 %v13681_v36  ;;  %v6100_v44 = vsub.f32 %v13996_v27, %v6084_v6  ;;  %v6101_v22 = vsub.f32 %v13998_v51, %v6084_v6  ;;  %v2744_v31 = vmax.f32 %v15421_v24, 1e-24  ;;  %v15423_v53 = vld [vmem:[#allocation145_spill] sm:$0xff]  ;;  %v14068_v6 = vld [vmem:[%s15008_s11 + $0x38] sm:$0xff]   ;;  %v15424_v59 = vld [vmem:[#allocation67_spill] sm:$0xff] }
 0xe2b   : > { %10412 = vpow2.f32 %v6126_v2  ;;  %9900 = vmatprep.subr.bf16.mxu1 %v9899_v32  ;;  %9397 = vmatprep.subr.bf16.mxu0 %v13687_v34  ;;  %v2746_v2 = vmax.f32 %v15423_v53, 1e-24  ;;  %v6738_v32 = vld [vmem:[#allocation2 + $0x40] sm:$0xff] }
 0xe2c   : > { %v10403_v58 = vpop.eup %10402  ;;  %v6128_v35 = vmul.f32 1.442695, %v6100_v44  ;;  %v6130_v17 = vmul.f32 1.442695, %v6101_v22 }
 0xe2d   : > { %v10405_v19 = vpop.eup %10404  ;;  %v6138_v56 = vpack.c.bf16 %v10403_v58, %v10399_v16  ;;  %v6087_v13 = vpop.xlane.xlu0 %6086  ;;  %v15425_v58 = vld [vmem:[#allocation82_spill] sm:$0xff] }
 0xe2e   : > { %9902 = vmatpush1.bf16.msra.mxu1 %v9901_v52  ;;  %9398 = vmatpush3.bf16.msra.mxu0 %v13695_v9  ;;  %v6102_v46 = vsub.f32 %v14008_v48, %v6087_v13  ;;  %v6103_v27 = vsub.f32 %v14010_v30, %v6087_v13  ;;  %v6139_v51 = vpack.c.bf16 %v10405_v19, %v10401_v18  ;;  %10414 = vpow2.f32 %v6128_v35  ;;  %v15426_v35 = vld [vmem:[#allocation148_spill] sm:$0xff] }
 0xe2f   : > { %9435 = vmatprep.subr.bf16.mxu1 %v6633_v39  ;;  %9399 = vmatprep.subr.bf16.mxu0 %v13703_v50  ;;  %10416 = vpow2.f32 %v6130_v17  ;;  %v6625_v18 = vmul.bf16 %v13681_v36, %v15417_v47  ;;  %v6634_v52 = vmul.bf16 %v13687_v34, %v15425_v58  ;;  %v2747_v19 = vmax.f32 %v15426_v35, 1e-24 }
 0xe30   : > { %v6132_v10 = vmul.f32 1.442695, %v6102_v46  ;;  %v6134_v57 = vmul.f32 1.442695, %v6103_v27  ;;  %6184 = vmatprep.mubr.bf16.mxu1 %v6139_v51  ;;  %6265 = vmatprep.mubr.bf16.mxu0 %v6139_v51  ;;  %v10407_v15 = vpop.eup %10406  ;;  %v6626_v36 = vmul.bf16 %v13695_v9, %v15425_v58  ;;  %v15428_v46 = vld [vmem:[#allocation85_spill] sm:$0xff]  ;;  %v15429_v27 = vld [vmem:[#allocation147_spill] sm:$0xff] }
 0xe31   : > { %6185 = vmatmul.mubr.bf16.gmra.mrb[4].mxu1 %v6138_v56  ;;  %6266 = vmatmul.mubr.bf16.gmra.mrb[20].mxu0 %v6138_v56  ;;  %v10409_v48 = vpop.eup %10408  ;;  %v15427_v56 = vld [vmem:[#allocation65_spill] sm:$0xff]  ;;  %v6635_v34 = vmul.bf16 %v13703_v50, %v15428_v46  ;;  %v2748_v51 = vmax.f32 %v15429_v27, 1e-24  ;;  %v6627_v9 = vmul.bf16 %v13717_v0, %v15428_v46  ;;  %v6631_v24 = vmul.bf16 %v13781_v60, %v15428_v46 }
 0xe32   : > { %10418 = vpow2.f32 %v6132_v10  ;;  %9400 = vmatpush3.bf16.msra.mxu0 %v13717_v0  ;;  %v6637_v0 = vmul.bf16 %v13751_v33, %v15417_v47  ;;  %v15435_v47 = vld [vmem:[#allocation75_spill] sm:$0xff] }
 0xe33   : > { %10420 = vpow2.f32 %v6134_v57  ;;  %9401 = vmatprep.subr.bf16.mxu0 %v13737_v62  ;;  %v15430_v57 = vld [vmem:[#allocation69_spill] sm:$0xff] }
 0xe34   : > { %v10411_v30 = vpop.eup %10410  ;;  %10422 = vrsqrt.f32 %v2741_v1  ;;  %v15431_v1 = vld [vmem:[#allocation84_spill] sm:$0xff] }
 0xe35   : > { %v10413_v12 = vpop.eup %10412  ;;  %v6140_v54 = vpack.c.bf16 %v10411_v30, %v10407_v15  ;;  %10424 = vrsqrt.f32 %v2742_v42  ;;  %v6636_v50 = vmul.bf16 %v13737_v62, %v15431_v1  ;;  %v6628_v21 = vmul.bf16 %v13745_v20, %v15431_v1  ;;  %v15433_v42 = vld [vmem:[#allocation73_spill] sm:$0xff] }
 0xe36   : > { %9402 = vmatpush3.bf16.msra.mxu0 %v13745_v20  ;;  %v6141_v63 = vpack.c.bf16 %v10413_v12, %v10409_v48  ;;  %10426 = vrsqrt.f32 %v2743_v49  ;;  %v15432_v48 = vld [vmem:[#allocation68_spill] sm:$0xff]  ;;  %v6638_v20 = vmul.bf16 %v13763_v40, %v15425_v58 }
 0xe37   : > { %9403 = vmatprep.subr.bf16.mxu0 %v13751_v33  ;;  %10428 = vrsqrt.f32 %v2744_v31  ;;  %v15434_v33 = vld [vmem:[#allocation71_spill] sm:$0xff] }
 0xe38   : > { %6192 = vmatprep.mubr.bf16.mxu1 %v6141_v63  ;;  %6273 = vmatprep.mubr.bf16.mxu0 %v6141_v63  ;;  %v10415_v43 = vpop.eup %10414  ;;  %10430 = vrsqrt.f32 %v2745_v14 }
 0xe39   : > { %6193 = vmatmul.mubr.bf16.gmra.mrb[8].mxu1 %v6140_v54  ;;  %6274 = vmatmul.mubr.bf16.gmra.mrb[24].mxu0 %v6140_v54  ;;  %v10417_v41 = vpop.eup %10416  ;;  %10432 = vrsqrt.f32 %v2746_v2 }
 0xe3a   : > { %9404 = vmatpush3.bf16.msra.mxu0 %v13757_v3  ;;  %10434 = vrsqrt.f32 %v2747_v19  ;;  %v6639_v3 = vmul.bf16 %v13775_v11, %v15428_v46 }
 0xe3b   : > { %9405 = vmatprep.subr.bf16.mxu0 %v13763_v40  ;;  %10436 = vrsqrt.f32 %v2748_v51 }
 0xe3c   : > { %v10419_v38 = vpop.eup %10418 }
 0xe3d   : > { %v10421_v4 = vpop.eup %10420  ;;  %v6142_v25 = vpack.c.bf16 %v10419_v38, %v10415_v43 }
 0xe3e   : > { %9406 = vmatpush3.bf16.msra.mxu0 %v13769_v29  ;;  %v6143_v61 = vpack.c.bf16 %v10421_v4, %v10417_v41  ;;  %v10423_v45 = vpop.eup %10422  ;;  %v6630_v4 = vmul.bf16 %v13769_v29, %v15425_v58  ;;  %v6640_v29 = vmul.bf16 %v13787_v55, %v15431_v1 }
 0xe3f   : > { %9407 = vmatprep.subr.bf16.mxu0 %v13775_v11  ;;  %v2876_v37 = vmul.f32 %v13853_v23, %v10423_v45  ;;  %v10425_v7 = vpop.eup %10424  ;;  %v15436_v11 = vld [vmem:[#allocation74_spill] sm:$0xff] }
 0xe40   : > { %6200 = vmatprep.mubr.bf16.mxu1 %v6143_v61  ;;  %6281 = vmatprep.mubr.bf16.mxu0 %v6143_v61  ;;  %v2877_v16 = vmul.f32 %v13853_v23, %v10425_v7  ;;  %v10427_v22 = vpop.eup %10426 }
 0xe41   : > { %6201 = vmatmul.mubr.bf16.gmra.mrb[12].mxu1 %v6142_v25  ;;  %6282 = vmatmul.mubr.bf16.gmra.mrb[28].mxu0 %v6142_v25  ;;  %v2940_v44 = vmul.f32 %v2876_v37, %v15424_v59  ;;  %v2878_v39 = vmul.f32 %v13853_v23, %v10427_v22  ;;  %v10429_v13 = vpop.eup %10428 }
 0xe42   : > { %9408 = vmatpush3.bf16.msra.mxu0 %v13781_v60  ;;  %6431 = vmatprep.mubr.f32.mxu1 %v15159_v28  ;;  %v2941_v17 = vmul.f32 %v2877_v16, %v15427_v56  ;;  %v2879_v10 = vmul.f32 %v13853_v23, %v10429_v13  ;;  %v10431_v26 = vpop.eup %10430 }
 0xe43   : > { %9409 = vmatprep.subr.bf16.mxu0 %v13787_v55  ;;  %v2942_v15 = vmul.f32 %v2878_v39, %v15430_v57  ;;  %v2880_v12 = vmul.f32 %v13853_v23, %v10431_v26  ;;  %v10433_v54 = vpop.eup %10432 }
 0xe44   : > { %v2943_v30 = vmul.f32 %v2879_v10, %v15432_v48  ;;  %v2881_v62 = vmul.f32 %v13853_v23, %v10433_v54  ;;  %v10435_v43 = vpop.eup %10434 }
 0xe45   : > { %v2944_v63 = vmul.f32 %v2880_v12, %v15433_v42  ;;  %v2882_v41 = vmul.f32 %v13853_v23, %v10435_v43  ;;  %v10437_v38 = vpop.eup %10436 }
 0xe46   : > { %9410 = vmatpush3.bf16.msra.mxu0 %v14068_v6  ;;  %v2945_v49 = vmul.f32 %v2881_v62, %v15434_v33  ;;  %v2883_v40 = vmul.f32 %v13853_v23, %v10437_v38  ;;  %v6632_v23 = vmul.bf16 %v14068_v6, %v15431_v1 }
 0xe47   : > { %9903 = vmatprep.subr.msk.bf16.mxu0 %vm796_vm0, %v6738_v32  ;;  %v2946_v25 = vmul.f32 %v2882_v41, %v15435_v47 }
 0xe48   : > { %v2947_v31 = vmul.f32 %v2883_v40, %v15436_v11 }
 0xe49   : > { %8628 = vmatmul.mubr.msk.f32.vlgmr.msra.gmra.mrb[16].mxu1 %vm796_vm0, %v2940_v44 }
 0xe4a   : > { %9436 = vmatpush3.bf16.msra.mxu1 %v6625_v18  ;;  %6437 = vmatprep.mubr.f32.mxu1 %v15159_v28 }
 0xe4b   : > { %9437 = vmatprep.subr.bf16.mxu1 %v6634_v52 }
 0xe4d   : > { %8629 = vmatmul.mubr.msk.f32.gmra.mrb[18].mxu1 %vm796_vm0, %v2941_v17 }
 0xe4e   : > { %9438 = vmatpush3.bf16.msra.mxu1 %v6626_v36  ;;  %6443 = vmatprep.mubr.f32.mxu1 %v15159_v28 }
 0xe4f   : > { %9439 = vmatprep.subr.bf16.mxu1 %v6635_v34 }
 0xe51   : > { %8630 = vmatmul.mubr.msk.f32.gmra.mrb[20].mxu1 %vm796_vm0, %v2942_v15 }
 0xe52   : > { %9440 = vmatpush3.bf16.msra.mxu1 %v6627_v9  ;;  %6449 = vmatprep.mubr.f32.mxu1 %v15159_v28 }
 0xe53   : > { %9441 = vmatprep.subr.bf16.mxu1 %v6636_v50 }
 0xe55   : > { %8631 = vmatmul.mubr.msk.f32.gmra.mrb[22].mxu1 %vm796_vm0, %v2943_v30 }
 0xe56   : > { %9442 = vmatpush3.bf16.msra.mxu1 %v6628_v21  ;;  %6455 = vmatprep.mubr.f32.mxu1 %v15159_v28 }
 0xe57   : > { %9443 = vmatprep.subr.bf16.mxu1 %v6637_v0 }
 0xe59   : > { %8632 = vmatmul.mubr.msk.f32.gmra.mrb[24].mxu1 %vm796_vm0, %v2944_v63 }
 0xe5a   : > { %9444 = vmatpush3.bf16.msra.mxu1 %v6629_v8  ;;  %6461 = vmatprep.mubr.f32.mxu1 %v15159_v28 }
 0xe5b   : > { %9445 = vmatprep.subr.bf16.mxu1 %v6638_v20 }
 0xe5d   : > { %8633 = vmatmul.mubr.msk.f32.gmra.mrb[26].mxu1 %vm796_vm0, %v2945_v49 }
 0xe5e   : > { %9446 = vmatpush3.bf16.msra.mxu1 %v6630_v4  ;;  %6467 = vmatprep.mubr.f32.mxu1 %v15159_v28 }
 0xe5f   : > { %9447 = vmatprep.subr.bf16.mxu1 %v6639_v3 }
 0xe61   : > { %8634 = vmatmul.mubr.msk.f32.gmra.mrb[28].mxu1 %vm796_vm0, %v2946_v25 }
 0xe62   : > { %9448 = vmatpush3.bf16.msra.mxu1 %v6631_v24  ;;  %6473 = vmatprep.mubr.f32.mxu1 %v15159_v28 }
 0xe63   : > { %9449 = vmatprep.subr.bf16.mxu1 %v6640_v29  ;;  %v8612_v29 = vld [vmem:[%s15288_s0 + $0x380] sm:$0xff] }
 0xe65   : > { %8635 = vmatmul.mubr.msk.f32.gmra.mrb[30].mxu1 %vm796_vm0, %v2947_v31  ;;  %v8613_v31 = vld [vmem:[%s15288_s0 + $0x388] sm:$0xff] }
 0xe66   : > { %9450 = vmatpush3.bf16.msra.mxu1 %v6632_v23 }
 0xefc   : > { %v9331_v61 = vpop.f32.mrb[0].mxu1  ;;  %v9371_v45 = vpop.f32.mrb[16].mxu0 }
 0xefd   : > { %v9332_v60 = vpop.f32.mrb[1].mxu1  ;;  %v9372_v5 = vpop.f32.mrb[17].mxu0 }
 0xefe   : > { %v9333_v14 = vadd.f32 %v9332_v60, %v9331_v61  ;;  %v9373_v37 = vadd.f32 %v9372_v5, %v9371_v45  ;;  %v9334_v7 = vpop.f32.mrb[2].mxu1  ;;  %v9374_v55 = vpop.f32.mrb[18].mxu0 }
 0xeff   : > { %v9335_v53 = vpop.f32.mrb[3].mxu1  ;;  %v9375_v2 = vpop.f32.mrb[19].mxu0 }
 0xf00   : > { %10438 = vrcp.f32 %v9333_v14  ;;  %v9336_v28 = vadd.f32 %v9335_v53, %v9334_v7  ;;  %v9376_v32 = vadd.f32 %v9375_v2, %v9374_v55  ;;  %v8615_v55 = vld [vmem:[%s15288_s0 + $0x398] sm:$0xff] }
 0xf02   : > { %10440 = vrcp.f32 %v9336_v28 }
 0xf04   : > { %v9337_v16 = vpop.f32.mrb[4].mxu1  ;;  %v9377_v59 = vpop.f32.mrb[20].mxu0 }
 0xf05   : > { %v9338_v6 = vpop.f32.mrb[5].mxu1  ;;  %v9378_v44 = vpop.f32.mrb[21].mxu0 }
 0xf06   : > { %v9339_v22 = vadd.f32 %v9338_v6, %v9337_v16  ;;  %v9379_v18 = vadd.f32 %v9378_v44, %v9377_v59  ;;  %v9340_v58 = vpop.f32.mrb[6].mxu1  ;;  %v9380_v52 = vpop.f32.mrb[22].mxu0  ;;  %v8616_v6 = vld [vmem:[%s15288_s0 + $0x3a0] sm:$0xff] }
 0xf07   : > { %v9341_v35 = vpop.f32.mrb[7].mxu1  ;;  %v9381_v19 = vpop.f32.mrb[23].mxu0 }
 0xf08   : > { %10442 = vrcp.f32 %v9339_v22  ;;  %v9342_v56 = vadd.f32 %v9341_v35, %v9340_v58  ;;  %v9382_v17 = vadd.f32 %v9381_v19, %v9380_v52  ;;  %v8617_v22 = vld [vmem:[%s15288_s0 + $0x3a8] sm:$0xff] }
 0xf0a   : > { %v10439_v39 = vpop.eup %10438  ;;  %10444 = vrcp.f32 %v9342_v56 }
 0xf0b   : > { %v6298_v13 = vmul.f32 %v10439_v39, %v9373_v37  ;;  %v8614_v37 = vld [vmem:[%s15288_s0 + $0x390] sm:$0xff] }
 0xf0c   : > { %v10441_v36 = vpop.eup %10440  ;;  %v9343_v46 = vpop.f32.mrb[8].mxu1  ;;  %v8618_v39 = vld [vmem:[%s15288_s0 + $0x3b0] sm:$0xff] }
 0xf0d   : > { %v9383_v34 = vpop.f32.mrb[24].mxu0  ;;  %v6299_v27 = vmul.f32 %v10441_v36, %v9376_v32  ;;  %v9344_v51 = vpop.f32.mrb[9].mxu1  ;;  %v8619_v36 = vld [vmem:[%s15288_s0 + $0x3b8] sm:$0xff] }
 0xf0e   : > { %v9384_v10 = vpop.f32.mrb[25].mxu0  ;;  %v9345_v57 = vadd.f32 %v9344_v51, %v9343_v46  ;;  %v9346_v26 = vpop.f32.mrb[10].mxu1 }
 0xf0f   : > { %v9385_v15 = vadd.f32 %v9384_v10, %v9383_v34  ;;  %v9386_v9 = vpop.f32.mrb[26].mxu0  ;;  %v6306_v1 = vpack.c.bf16 %v6299_v27, %v6298_v13  ;;  %v9347_v50 = vpop.f32.mrb[11].mxu1 }
 0xf10   : > { %v9387_v48 = vpop.f32.mrb[27].mxu0  ;;  %10446 = vrcp.f32 %v9345_v57  ;;  %v9348_v30 = vadd.f32 %v9347_v50, %v9346_v26  ;;  %v8620_v57 = vld [vmem:[%s15288_s0 + $0x3c0] sm:$0xff] }
 0xf11   : > { %v9388_v12 = vadd.f32 %v9387_v48, %v9386_v9  ;;  %6310 = vst.msk [vmem:[#allocation2 + $0xc0] sm:$0xff] %vm796_vm0, %v6306_v1 }
 0xf12   : > { %v10443_v54 = vpop.eup %10442  ;;  %10448 = vrcp.f32 %v9348_v30  ;;  %v8622_v30 = vld [vmem:[%s15288_s0 + $0x3d0] sm:$0xff] }
 0xf13   : > { %v6300_v21 = vmul.f32 %v10443_v54, %v9379_v18 }
 0xf14   : > { %v10445_v0 = vpop.eup %10444  ;;  %v9349_v62 = vpop.f32.mrb[12].mxu1 }
 0xf15   : > { %v9389_v42 = vpop.f32.mrb[28].mxu0  ;;  %v6301_v63 = vmul.f32 %v10445_v0, %v9382_v17  ;;  %v9350_v43 = vpop.f32.mrb[13].mxu1 }
 0xf16   : > { %v9390_v8 = vpop.f32.mrb[29].mxu0  ;;  %v9351_v20 = vadd.f32 %v9350_v43, %v9349_v62  ;;  %v9352_v49 = vpop.f32.mrb[14].mxu1  ;;  %v8625_v43 = vld [vmem:[%s15288_s0 + $0x3e8] sm:$0xff] }
 0xf17   : > { %v9391_v33 = vadd.f32 %v9390_v8, %v9389_v42  ;;  %v9392_v41 = vpop.f32.mrb[30].mxu0  ;;  %v6307_v38 = vpack.c.bf16 %v6301_v63, %v6300_v21  ;;  %v9353_v4 = vpop.f32.mrb[15].mxu1  ;;  %v8624_v63 = vld [vmem:[%s15288_s0 + $0x3e0] sm:$0xff] }
 0xf18   : > { %v9393_v3 = vpop.f32.mrb[31].mxu0  ;;  %10450 = vrcp.f32 %v9351_v20  ;;  %v9354_v40 = vadd.f32 %v9353_v4, %v9352_v49  ;;  %v6754_v25 = vld [vmem:[#allocation2 + $0xc0] sm:$0xff]  ;;  %v8627_v4 = vld [vmem:[%s15288_s0 + $0x3f8] sm:$0xff] }
 0xf19   : > { %v9394_v47 = vadd.f32 %v9393_v3, %v9392_v41  ;;  %6311 = vst.msk [vmem:[#allocation2 + $0xc8] sm:$0xff] %vm796_vm0, %v6307_v38  ;;  %9911 = vmatprep.subr.msk.bf16.mxu1 %vm796_vm0, %v6754_v25  ;;  %v8626_v38 = vld [vmem:[%s15288_s0 + $0x3f0] sm:$0xff] }
 0xf1a   : > { %v10447_v24 = vpop.eup %10446  ;;  %10452 = vrcp.f32 %v9354_v40 }
 0xf1b   : > { %v6302_v11 = vmul.f32 %v10447_v24, %v9385_v15  ;;  %v8621_v15 = vld [vmem:[%s15288_s0 + $0x3c8] sm:$0xff] }
 0xf1c   : > { %v10449_v23 = vpop.eup %10448  ;;  %v6433_v61 = vpop.f32.mrb[16].mxu1 }
 0xf1d   : > { %v6303_v45 = vmul.f32 %v10449_v23, %v9388_v12  ;;  %v14143_v60 = vadd.f32 %v8612_v29, %v6433_v61  ;;  %v6435_v5 = vpop.f32.mrb[17].mxu1  ;;  %v8623_v12 = vld [vmem:[%s15288_s0 + $0x3d8] sm:$0xff]  ;;  %v15126_v23 = vmov 0   ;;  %v6768_v61 = vld [vmem:[%s15010_s13 + $0x10] sm:$0xff] }
 0xf1e   : > { %v14145_v14 = vadd.f32 %v8613_v31, %v6435_v5  ;;  %v6767_v31 = vld [vmem:[%s15010_s13 + $0x8] sm:$0xff]  ;;  %9930 = vset.pattern.permute.xlu1 %v15126_v23  ;;  %9931 = vset.pattern.permute.xlu0 %v15126_v23  ;;  %v7008_v5 = vld [vmem:[%s15011_s14] sm:$0xff] }
 0xf1f   : > { %v6308_v7 = vpack.c.bf16 %v6303_v45, %v6302_v11  ;;  %v6766_v11 = vld [vmem:[%s15010_s13] sm:$0xff]  ;;  %v6769_v45 = vld [vmem:[%s15010_s13 + $0x18] sm:$0xff] }
 0xf20   : > { %v6439_v53 = vpop.f32.mrb[18].mxu1  ;;  %v6480_v2 = vmax.f32 %v14143_v60, %v14145_v14 }
 0xf21   : > { %6312 = vst.msk [vmem:[#allocation2 + $0xd0] sm:$0xff] %vm796_vm0, %v6308_v7  ;;  %v14156_v28 = vadd.f32 %v8614_v37, %v6439_v53  ;;  %v6441_v32 = vpop.f32.mrb[19].mxu1  ;;  %v7009_v37 = vld [vmem:[%s15011_s14 + $0x8] sm:$0xff]  ;;  %v7012_v7 = vld [vmem:[%s15012_s15] sm:$0xff] }
 0xf22   : > { %v10451_v16 = vpop.eup %10450  ;;  %v14158_v59 = vadd.f32 %v8615_v55, %v6441_v32  ;;  %6481 = vmax.xlane.f32.xlu1 %v6480_v2  ;;  %v7013_v55 = vld [vmem:[%s15012_s15 + $0x8] sm:$0xff] }
 0xf23   : > { %v6304_v44 = vmul.f32 %v10451_v16, %v9391_v33 }
 0xf24   : > { %v10453_v18 = vpop.eup %10452  ;;  %v6445_v58 = vpop.f32.mrb[20].mxu1  ;;  %v6483_v52 = vmax.f32 %v14156_v28, %v14158_v59 }
 0xf25   : > { %v6305_v35 = vmul.f32 %v10453_v18, %v9394_v47  ;;  %v14168_v19 = vadd.f32 %v8616_v6, %v6445_v58  ;;  %v6447_v56 = vpop.f32.mrb[21].mxu1 }
 0xf26   : > { %v14170_v17 = vadd.f32 %v8617_v22, %v6447_v56  ;;  %6484 = vmax.xlane.f32.xlu0 %v6483_v52 }
 0xf27   : > { %v6309_v13 = vpack.c.bf16 %v6305_v35, %v6304_v44 }
 0xf28   : > { %v6451_v46 = vpop.f32.mrb[22].mxu1  ;;  %v6486_v34 = vmax.f32 %v14168_v19, %v14170_v17 }
 0xf29   : > { %6313 = vst.msk [vmem:[#allocation2 + $0xd8] sm:$0xff] %vm796_vm0, %v6309_v13  ;;  %v14181_v27 = vadd.f32 %v8618_v39, %v6451_v46  ;;  %v6453_v51 = vpop.f32.mrb[23].mxu1 }
 0xf2a   : > { %v14183_v10 = vadd.f32 %v8619_v36, %v6453_v51  ;;  %6487 = vmax.xlane.f32.xlu1 %v6486_v34 }
 0xf2c   : > { %v6457_v26 = vpop.f32.mrb[24].mxu1  ;;  %v6489_v9 = vmax.f32 %v14181_v27, %v14183_v10 }
 0xf2d   : > { %v14193_v1 = vadd.f32 %v8620_v57, %v6457_v26  ;;  %v6459_v50 = vpop.f32.mrb[25].mxu1 }
 0xf2e   : > { %v14195_v48 = vadd.f32 %v8621_v15, %v6459_v50  ;;  %6490 = vmax.xlane.f32.xlu0 %v6489_v9 }
 0xf30   : > { %v6463_v54 = vpop.f32.mrb[26].mxu1  ;;  %v6492_v21 = vmax.f32 %v14193_v1, %v14195_v48 }
 0xf31   : > { %v14205_v0 = vadd.f32 %v8622_v30, %v6463_v54  ;;  %v6465_v62 = vpop.f32.mrb[27].mxu1 }
 0xf32   : > { %v14207_v42 = vadd.f32 %v8623_v12, %v6465_v62  ;;  %6493 = vmax.xlane.f32.xlu1 %v6492_v21  ;;  %v6730_v21 = vld [vmem:[#allocation2] sm:$0xff] }
 0xf33   : > { %v6746_v62 = vld [vmem:[#allocation2 + $0x80] sm:$0xff] }
 0xf34   : > { %v6469_v8 = vpop.f32.mrb[28].mxu1  ;;  %v6495_v20 = vmax.f32 %v14205_v0, %v14207_v42 }
 0xf35   : > { %v14217_v33 = vadd.f32 %v8624_v63, %v6469_v8  ;;  %v6471_v49 = vpop.f32.mrb[29].mxu1 }
 0xf36   : > { %v14219_v41 = vadd.f32 %v8625_v43, %v6471_v49  ;;  %6496 = vmax.xlane.f32.xlu0 %v6495_v20  ;;  %v6855_v43 = vsel %vm796_vm0, %v6746_v62, 0 }
 0xf38   : > { %v6475_v3 = vpop.f32.mrb[30].mxu1  ;;  %v6498_v40 = vmax.f32 %v14217_v33, %v14219_v41 }
 0xf39   : > { %v14229_v47 = vadd.f32 %v8626_v38, %v6475_v3  ;;  %v6477_v25 = vpop.f32.mrb[31].mxu1 }
 0xf3a   : > { %v14231_v24 = vadd.f32 %v8627_v4, %v6477_v25  ;;  %6499 = vmax.xlane.f32.xlu1 %v6498_v40 }
 0xf3c   : > { %v6501_v29 = vmax.f32 %v14229_v47, %v14231_v24 }
 0xf3e   : > { %6502 = vmax.xlane.f32.xlu0 %v6501_v29 }
 0xf4b   : > { %6772 = vperm.xlu1 %9930, %v6766_v11  }
 0xf4f   : > { %6782 = vperm.xlu1 %9930, %v6768_v61  }
 0xf53   : > { %6787 = vperm.xlu1 %9930, %v6769_v45  }
 0xf54   : > { %6777 = vperm.xlu0 %9931, %v6767_v31  }
 0xf57   : > { %7155 = vperm.xlu1 %9930, %v7008_v5  }
 0xf5b   : > { %7160 = vperm.xlu1 %9930, %v7009_v37   ;;  %v6747_v37 = vld [vmem:[#allocation2 + $0x88] sm:$0xff] }
 0xf5f   : > { %7191 = vperm.xlu1 %9930, %v7012_v7  }
 0xf63   : > { %7196 = vperm.xlu1 %9930, %v7013_v55  }
 0xfaf   : > { %v6482_v53 = vpop.xlane.xlu1 %6481 }
 0xfb0   : > { %v6504_v2 = vsub.f32 %v14143_v60, %v6482_v53  ;;  %v6505_v32 = vsub.f32 %v14145_v14, %v6482_v53  ;;  %v6858_v53 = vsel %vm796_vm0, %v6747_v37, 0 }
 0xfb2   : > { %v6520_v16 = vmul.f32 1.442695, %v6504_v2  ;;  %v6522_v6 = vmul.f32 1.442695, %v6505_v32 }
 0xfb3   : > { %v6485_v44 = vpop.xlane.xlu0 %6484 }
 0xfb4   : > { %v6506_v22 = vsub.f32 %v14156_v28, %v6485_v44  ;;  %v6507_v18 = vsub.f32 %v14158_v59, %v6485_v44  ;;  %10454 = vpow2.f32 %v6520_v16 }
 0xfb5   : > { %10456 = vpow2.f32 %v6522_v6 }
 0xfb6   : > { %v6524_v58 = vmul.f32 1.442695, %v6506_v22  ;;  %v6526_v52 = vmul.f32 1.442695, %v6507_v18  ;;  %v6732_v18 = vld [vmem:[#allocation2 + $0x10] sm:$0xff] }
 0xfb7   : > { %v6488_v35 = vpop.xlane.xlu1 %6487 }
 0xfb8   : > { %10458 = vpow2.f32 %v6524_v58  ;;  %v6508_v56 = vsub.f32 %v14168_v19, %v6488_v35  ;;  %v6509_v39 = vsub.f32 %v14170_v17, %v6488_v35  ;;  %v6748_v58 = vld [vmem:[#allocation2 + $0x90] sm:$0xff] }
 0xfb9   : > { %10460 = vpow2.f32 %v6526_v52  ;;  %v6813_v52 = vsel %vm796_vm0, %v6732_v18, 0  ;;  %v6861_v35 = vsel %vm796_vm0, %v6748_v58, 0 }
 0xfba   : > { %v6528_v60 = vmul.f32 1.442695, %v6508_v56  ;;  %v6530_v14 = vmul.f32 1.442695, %v6509_v39  ;;  %v6741_v39 = vld [vmem:[#allocation2 + $0x58] sm:$0xff] }
 0xfbb   : > { %v6491_v13 = vpop.xlane.xlu0 %6490 }
 0xfbc   : > { %v6510_v36 = vsub.f32 %v14181_v27, %v6491_v13  ;;  %v6511_v28 = vsub.f32 %v14183_v10, %v6491_v13  ;;  %10462 = vpow2.f32 %v6528_v60  ;;  %v6757_v60 = vld [vmem:[#allocation2 + $0xd8] sm:$0xff] }
 0xfbd   : > { %10464 = vpow2.f32 %v6530_v14 }
 0xfbe   : > { %v6532_v59 = vmul.f32 1.442695, %v6510_v36  ;;  %v6534_v46 = vmul.f32 1.442695, %v6511_v28  ;;  %v10455_v51 = vpop.eup %10454 }
 0xfbf   : > { %v6494_v34 = vpop.xlane.xlu1 %6493  ;;  %v10457_v17 = vpop.eup %10456 }
 0xfc0   : > { %10466 = vpow2.f32 %v6532_v59  ;;  %v6512_v57 = vsub.f32 %v14193_v1, %v6494_v34  ;;  %v6513_v19 = vsub.f32 %v14195_v48, %v6494_v34  ;;  %v6807_v48 = vsel %vm796_vm0, %v6730_v21, 0  ;;  %v6749_v34 = vld [vmem:[#allocation2 + $0x98] sm:$0xff] }
 0xfc1   : > { %10468 = vpow2.f32 %v6534_v46  ;;  %v6733_v46 = vld [vmem:[#allocation2 + $0x18] sm:$0xff] }
 0xfc2   : > { %v10459_v15 = vpop.eup %10458  ;;  %v6536_v26 = vmul.f32 1.442695, %v6512_v57  ;;  %v6538_v27 = vmul.f32 1.442695, %v6513_v19  ;;  %v6816_v57 = vsel %vm796_vm0, %v6733_v46, 0  ;;  %v6864_v19 = vsel %vm796_vm0, %v6749_v34, 0 }
 0xfc3   : > { %v10461_v9 = vpop.eup %10460  ;;  %v6552_v50 = vpack.c.bf16 %v10459_v15, %v10455_v51  ;;  %v6497_v30 = vpop.xlane.xlu0 %6496  ;;  %v14292_v51 = vld [vmem:[%s15009_s12] sm:$0xff]   ;;  %v6737_v21 = vld [vmem:[#allocation2 + $0x38] sm:$0xff] }
 0xfc4   : > { %v6514_v10 = vsub.f32 %v14205_v0, %v6497_v30  ;;  %v6515_v12 = vsub.f32 %v14207_v42, %v6497_v30  ;;  %v6553_v54 = vpack.c.bf16 %v10461_v9, %v10457_v17  ;;  %10470 = vpow2.f32 %v6536_v26  ;;  %v6739_v0 = vld [vmem:[#allocation2 + $0x48] sm:$0xff]  ;;  %v6742_v17 = vld [vmem:[#allocation2 + $0x60] sm:$0xff]  ;;  %v6744_v30 = vld [vmem:[#allocation2 + $0x70] sm:$0xff] }
 0xfc5   : > { %10472 = vpow2.f32 %v6538_v27  ;;  %v6755_v42 = vld [vmem:[#allocation2 + $0xc8] sm:$0xff]  ;;  %v6734_v15 = vld [vmem:[#allocation2 + $0x20] sm:$0xff]  ;;  %v6828_v62 = vsel %vm796_vm0, %v6737_v21, 0 }
 0xfc6   : > { %v6540_v63 = vmul.f32 1.442695, %v6514_v10  ;;  %v6542_v1 = vmul.f32 1.442695, %v6515_v12  ;;  %6592 = vmatprep.mubr.bf16.mxu0 %v6553_v54  ;;  %6673 = vmatprep.mubr.bf16.mxu1 %v6553_v54  ;;  %v10463_v20 = vpop.eup %10462  ;;  %v6819_v26 = vsel %vm796_vm0, %v6734_v15, 0  ;;  %v6743_v9 = vld [vmem:[#allocation2 + $0x68] sm:$0xff] }
 0xfc7   : > { %6593 = vmatmul.mubr.bf16.vlgmr.msra.gmra.mrb[32].mxu0 %v6552_v50  ;;  %6674 = vmatmul.mubr.bf16.vlgmr.msra.gmra.mrb[32].mxu1 %v6552_v50  ;;  %v6500_v8 = vpop.xlane.xlu1 %6499  ;;  %v10465_v4 = vpop.eup %10464  ;;  %v6735_v50 = vld [vmem:[#allocation2 + $0x28] sm:$0xff]  ;;  %v6736_v10 = vld [vmem:[#allocation2 + $0x30] sm:$0xff]  ;;  %v6745_v54 = vld [vmem:[#allocation2 + $0x78] sm:$0xff] }
 0xfc8   : > { %10474 = vpow2.f32 %v6540_v63  ;;  %9476 = vmatpush3.bf16.xpose.msra.mxu0 %v6807_v48  ;;  %9496 = vmatpush3.bf16.xpose.msra.mxu1 %v6855_v43  ;;  %v6516_v49 = vsub.f32 %v14217_v33, %v6500_v8  ;;  %v6517_v38 = vsub.f32 %v14219_v41, %v6500_v8  ;;  %v6731_v33 = vld [vmem:[#allocation2 + $0x8] sm:$0xff]  ;;  %v6822_v27 = vsel %vm796_vm0, %v6735_v50, 0  ;;  %v7011_v48 = vld [vmem:[%s15011_s14 + $0x18] sm:$0xff]  ;;  %v7014_v43 = vld [vmem:[%s15012_s15 + $0x10] sm:$0xff] }
 0xfc9   : > { %10476 = vpow2.f32 %v6542_v1  ;;  %9904 = vmatprep.subr.msk.bf16.mxu0 %vm796_vm0, %v6739_v0  ;;  %9912 = vmatprep.subr.msk.bf16.mxu1 %vm796_vm0, %v6755_v42  ;;  %v6810_v55 = vsel %vm796_vm0, %v6731_v33, 0  ;;  %v6825_v12 = vsel %vm796_vm0, %v6736_v10, 0  ;;  %v14311_v63 = vld [vmem:[%s15009_s12 + $0x8] sm:$0xff]   ;;  %v7010_v1 = vld [vmem:[%s15011_s14 + $0x10] sm:$0xff]  ;;  %v7015_v8 = vld [vmem:[%s15012_s15 + $0x18] sm:$0xff] }
 0xfca   : > { %v10467_v3 = vpop.eup %10466  ;;  %v6544_v40 = vmul.f32 1.442695, %v6516_v49  ;;  %v6546_v11 = vmul.f32 1.442695, %v6517_v38  ;;  %7165 = vperm.xlu1 %9930, %v7010_v1   ;;  %7201 = vperm.xlu0 %9931, %v7014_v43   ;;  %v7257_v0 = vld [vmem:[%s15014_s17] sm:$0xff]  ;;  %v7260_v42 = vld [vmem:[%s15014_s17 + $0x18] sm:$0xff] }
 0xfcb   : > { %v10469_v25 = vpop.eup %10468  ;;  %v6554_v29 = vpack.c.bf16 %v10467_v3, %v10463_v20  ;;  %v6503_v31 = vpop.xlane.xlu0 %6502  ;;  %v7258_v20 = vld [vmem:[%s15014_s17 + $0x8] sm:$0xff]  ;;  %v7259_v49 = vld [vmem:[%s15014_s17 + $0x10] sm:$0xff]  ;;  %v7264_v3 = vld [vmem:[%s15014_s17 + $0x38] sm:$0xff] }
 0xfcc   : > { %v6518_v61 = vsub.f32 %v14229_v47, %v6503_v31  ;;  %v6519_v45 = vsub.f32 %v14231_v24, %v6503_v31  ;;  %v6555_v5 = vpack.c.bf16 %v10469_v25, %v10465_v4  ;;  %10478 = vpow2.f32 %v6544_v40  ;;  %v6740_v47 = vld [vmem:[#allocation2 + $0x50] sm:$0xff]  ;;  %v7262_v38 = vld [vmem:[%s15014_s17 + $0x28] sm:$0xff]  ;;  %v7261_v4 = vld [vmem:[%s15014_s17 + $0x20] sm:$0xff] }
 0xfcd   : > { %10480 = vpow2.f32 %v6546_v11  ;;  %v6756_v24 = vld [vmem:[#allocation2 + $0xd0] sm:$0xff]  ;;  %v7792_v11 = vld [vmem:[%s15016_s19 + $0x8] sm:$0xff]  ;;  %v7944_v43 = vld [vmem:[%s15018_s21 + $0x18] sm:$0xff] }
 0xfce   : > { %v6548_v41 = vmul.f32 1.442695, %v6518_v61  ;;  %v6550_v7 = vmul.f32 1.442695, %v6519_v45  ;;  %6600 = vmatprep.mubr.bf16.mxu0 %v6555_v5  ;;  %6681 = vmatprep.mubr.bf16.mxu1 %v6555_v5  ;;  %v10471_v2 = vpop.eup %10470 }
 0xfcf   : > { %6601 = vmatmul.mubr.bf16.gmra.mrb[36].mxu0 %v6554_v29  ;;  %6682 = vmatmul.mubr.bf16.gmra.mrb[36].mxu1 %v6554_v29  ;;  %v10473_v32 = vpop.eup %10472  ;;  %v7263_v29 = vld [vmem:[%s15014_s17 + $0x30] sm:$0xff] }
 0xfd0   : > { %10482 = vpow2.f32 %v6548_v41  ;;  %9478 = vmatpush3.bf16.xpose.msra.mxu0 %v6810_v55  ;;  %9498 = vmatpush3.bf16.xpose.msra.mxu1 %v6858_v53 }
 0xfd1   : > { %10484 = vpow2.f32 %v6550_v7  ;;  %9905 = vmatprep.subr.msk.bf16.mxu0 %vm796_vm0, %v6740_v47  ;;  %9913 = vmatprep.subr.msk.bf16.mxu1 %vm796_vm0, %v6756_v24  ;;  %v7794_v47 = vld [vmem:[%s15016_s19 + $0x18] sm:$0xff] }
 0xfd2   : > { %v10475_v16 = vpop.eup %10474  ;;  %7170 = vperm.xlu1 %9930, %v7011_v48   ;;  %7267 = vperm.xlu0 %9931, %v7257_v0   ;;  %v7941_v48 = vld [vmem:[%s15018_s21] sm:$0xff] }
 0xfd3   : > { %v10477_v6 = vpop.eup %10476  ;;  %v6556_v44 = vpack.c.bf16 %v10475_v16, %v10471_v2  ;;  %v7791_v2 = vld [vmem:[%s15016_s19] sm:$0xff]  ;;  %v7793_v16 = vld [vmem:[%s15016_s19 + $0x10] sm:$0xff] }
 0xfd4   : > { %v6557_v22 = vpack.c.bf16 %v10477_v6, %v10473_v32  ;;  %v7938_v6 = vld [vmem:[%s15017_s20 + $0x8] sm:$0xff] }
 0xfd6   : > { %6608 = vmatprep.mubr.bf16.mxu0 %v6557_v22  ;;  %6689 = vmatprep.mubr.bf16.mxu1 %v6557_v22  ;;  %v10479_v56 = vpop.eup %10478 }
 0xfd7   : > { %6609 = vmatmul.mubr.bf16.gmra.mrb[40].mxu0 %v6556_v44  ;;  %6690 = vmatmul.mubr.bf16.gmra.mrb[40].mxu1 %v6556_v44  ;;  %v10481_v14 = vpop.eup %10480 }
 0xfd8   : > { %9480 = vmatpush3.bf16.xpose.msra.mxu0 %v6813_v52  ;;  %9500 = vmatpush3.bf16.xpose.msra.mxu1 %v6861_v35 }
 0xfd9   : > { %9906 = vmatprep.subr.msk.bf16.mxu0 %vm796_vm0, %v6741_v39  ;;  %9914 = vmatprep.subr.msk.bf16.mxu1 %vm796_vm0, %v6757_v60 }
 0xfda   : > { %v10483_v13 = vpop.eup %10482  ;;  %7206 = vperm.xlu1 %9930, %v7015_v8   ;;  %7277 = vperm.xlu0 %9931, %v7259_v49  }
 0xfdb   : > { %v10485_v36 = vpop.eup %10484  ;;  %v6558_v28 = vpack.c.bf16 %v10483_v13, %v10479_v56  ;;  %v7937_v13 = vld [vmem:[%s15017_s20] sm:$0xff] }
 0xfdc   : > { %v6559_v59 = vpack.c.bf16 %v10485_v36, %v10481_v14  ;;  %v7940_v36 = vld [vmem:[%s15017_s20 + $0x18] sm:$0xff] }
 0xfde   : > { %6616 = vmatprep.mubr.bf16.mxu0 %v6559_v59  ;;  %6697 = vmatprep.mubr.bf16.mxu1 %v6559_v59 }
 0xfdf   : > { %6617 = vmatmul.mubr.bf16.gmra.mrb[44].mxu0 %v6558_v28  ;;  %6698 = vmatmul.mubr.bf16.gmra.mrb[44].mxu1 %v6558_v28 }
 0xfe0   : > { %9482 = vmatpush3.bf16.xpose.msra.mxu0 %v6816_v57  ;;  %9502 = vmatpush3.bf16.xpose.msra.mxu1 %v6864_v19  ;;  %v7939_v19 = vld [vmem:[%s15017_s20 + $0x10] sm:$0xff] }
 0xfe1   : > { %9907 = vmatprep.subr.msk.bf16.mxu0 %vm796_vm0, %v6742_v17  ;;  %9491 = vmatprep.mubr.msk.bf16.mxu0 %vm796_vm0, %v14292_v51  ;;  %v7942_v17 = vld [vmem:[%s15018_s21 + $0x8] sm:$0xff] }
 0xfe2   : > { %9511 = vmatprep.mubr.msk.bf16.mxu1 %vm796_vm0, %v14292_v51  ;;  %7272 = vperm.xlu1 %9930, %v7258_v20  }
 0xfe3   : > { %7287 = vperm.xlu0 %9931, %v7261_v4  }
 0xfe6   : > { %7282 = vperm.xlu1 %9930, %v7260_v42  }
 0xfe7   : > { %7297 = vperm.xlu0 %9931, %v7263_v29  }
 0xfe8   : > { %9484 = vmatpush3.bf16.xpose.msra.mxu0 %v6819_v26 }
 0xfe9   : > { %9908 = vmatprep.subr.msk.bf16.mxu0 %vm796_vm0, %v6743_v9 }
 0xfea   : > { %7292 = vperm.xlu1 %9930, %v7262_v38   ;;  %v7943_v38 = vld [vmem:[%s15018_s21 + $0x10] sm:$0xff] }
 0xfeb   : > { %7797 = vperm.xlu0 %9931, %v7791_v2  }
 0xfee   : > { %7302 = vperm.xlu1 %9930, %v7264_v3  }
 0xfef   : > { %7807 = vperm.xlu0 %9931, %v7793_v16  }
 0xff0   : > { %9486 = vmatpush3.bf16.xpose.msra.mxu0 %v6822_v27 }
 0xff1   : > { %9909 = vmatprep.subr.msk.bf16.mxu0 %vm796_vm0, %v6744_v30 }
 0xff2   : > { %7802 = vperm.xlu1 %9930, %v7792_v11  }
 0xff3   : > { %8083 = vperm.xlu0 %9931, %v7937_v13  }
 0xff6   : > { %7812 = vperm.xlu1 %9930, %v7794_v47  }
 0xff7   : > { %8093 = vperm.xlu0 %9931, %v7939_v19  }
 0xff8   : > { %9488 = vmatpush3.bf16.xpose.msra.mxu0 %v6825_v12 }
 0xff9   : > { %9910 = vmatprep.subr.msk.bf16.mxu0 %vm796_vm0, %v6745_v54 }
 0xffa   : > { %8088 = vperm.xlu1 %9930, %v7938_v6  }
 0xffb   : > { %8119 = vperm.xlu0 %9931, %v7941_v48  }
 0xffe   : > { %8098 = vperm.xlu1 %9930, %v7940_v36  }
 0xfff   : > { %8129 = vperm.xlu0 %9931, %v7943_v38  }
0x1000   : > { %9490 = vmatpush3.bf16.xpose.msra.mxu0 %v6828_v62 }
0x1002   : > { %8124 = vperm.xlu1 %9930, %v7942_v17  }
0x1006   : > { %8134 = vperm.xlu1 %9930, %v7944_v43  }
0x1007   : > { %9492 = vmatmul.mubr.msk.bf16.vlgmr.msra.gmra.mrb[48].mxu0 %vm796_vm0, %v14292_v51 }
0x1008   : > { %9493 = vmatprep.mubr.msk.bf16.mxu0 %vm796_vm0, %v14311_v63 }
0x100f   : > { %9494 = vmatmul.mubr.msk.bf16.gmra.mrb[52].mxu0 %vm796_vm0, %v14311_v63 }
0x1010   : > { %7369 = vmatprep.mubr.bf16.mxu0 %v15126_v23 }
0x109a   : > { %v9411_v40 = vpop.f32.mrb[32].mxu0  ;;  %v9451_v25 = vpop.f32.mrb[32].mxu1 }
0x109b   : > { %v9412_v31 = vpop.f32.mrb[33].mxu0  ;;  %v9452_v61 = vpop.f32.mrb[33].mxu1 }
0x109c   : > { %v9413_v45 = vadd.f32 %v9412_v31, %v9411_v40  ;;  %v9453_v5 = vadd.f32 %v9452_v61, %v9451_v25  ;;  %v9414_v33 = vpop.f32.mrb[34].mxu0  ;;  %v9454_v37 = vpop.f32.mrb[34].mxu1  ;;  %v6750_v61 = vld [vmem:[#allocation2 + $0xa0] sm:$0xff] }
0x109d   : > { %v9415_v41 = vpop.f32.mrb[35].mxu0  ;;  %v9455_v7 = vpop.f32.mrb[35].mxu1 }
0x109e   : > { %10486 = vrcp.f32 %v9413_v45  ;;  %v9416_v55 = vadd.f32 %v9415_v41, %v9414_v33  ;;  %v9456_v53 = vadd.f32 %v9455_v7, %v9454_v37 }
0x10a0   : > { %10488 = vrcp.f32 %v9416_v55  ;;  %v6867_v55 = vsel %vm796_vm0, %v6750_v61, 0 }
0x10a2   : > { %v9417_v24 = vpop.f32.mrb[36].mxu0  ;;  %v9457_v32 = vpop.f32.mrb[36].mxu1 }
0x10a3   : > { %v9418_v44 = vpop.f32.mrb[37].mxu0  ;;  %v9458_v22 = vpop.f32.mrb[37].mxu1 }
0x10a4   : > { %v9419_v18 = vadd.f32 %v9418_v44, %v9417_v24  ;;  %v9459_v58 = vadd.f32 %v9458_v22, %v9457_v32  ;;  %v9420_v52 = vpop.f32.mrb[38].mxu0  ;;  %v9460_v35 = vpop.f32.mrb[38].mxu1  ;;  %v6751_v32 = vld [vmem:[#allocation2 + $0xa8] sm:$0xff] }
0x10a5   : > { %v9421_v56 = vpop.f32.mrb[39].mxu0  ;;  %v9461_v39 = vpop.f32.mrb[39].mxu1  ;;  %v6870_v44 = vsel %vm796_vm0, %v6751_v32, 0 }
0x10a6   : > { %10490 = vrcp.f32 %v9419_v18  ;;  %v9422_v60 = vadd.f32 %v9421_v56, %v9420_v52  ;;  %v9462_v14 = vadd.f32 %v9461_v39, %v9460_v35  ;;  %v6752_v35 = vld [vmem:[#allocation2 + $0xb0] sm:$0xff] }
0x10a8   : > { %v10487_v28 = vpop.eup %10486  ;;  %10492 = vrcp.f32 %v9422_v60  ;;  %v6873_v60 = vsel %vm796_vm0, %v6752_v35, 0 }
0x10a9   : > { %v6714_v59 = vmul.f32 %v10487_v28, %v9453_v5  ;;  %v14404_v28 = vpop.permute.xlu1 %6772 }
0x10aa   : > { %v10489_v46 = vpop.eup %10488  ;;  %v9423_v34 = vpop.f32.mrb[40].mxu0 }
0x10ab   : > { %v9463_v57 = vpop.f32.mrb[40].mxu1  ;;  %v6715_v15 = vmul.f32 %v10489_v46, %v9456_v53  ;;  %v9424_v26 = vpop.f32.mrb[41].mxu0 }
0x10ac   : > { %v9464_v9 = vpop.f32.mrb[41].mxu1  ;;  %v9425_v50 = vadd.f32 %v9424_v26, %v9423_v34  ;;  %v9426_v30 = vpop.f32.mrb[42].mxu0 }
0x10ad   : > { %v9465_v27 = vadd.f32 %v9464_v9, %v9463_v57  ;;  %v9466_v10 = vpop.f32.mrb[42].mxu1  ;;  %v6722_v12 = vpack.c.bf16 %v6715_v15, %v6714_v59  ;;  %v9427_v54 = vpop.f32.mrb[43].mxu0 }
0x10ae   : > { %v9467_v21 = vpop.f32.mrb[43].mxu1  ;;  %10494 = vrcp.f32 %v9425_v50  ;;  %v9428_v62 = vadd.f32 %v9427_v54, %v9426_v30  ;;  %v14410_v46 = vpop.permute.xlu0 %6777 }
0x10af   : > { %v9468_v1 = vadd.f32 %v9467_v21, %v9466_v10  ;;  %6726 = vst.msk [vmem:[#allocation2 + $0xe0] sm:$0xff] %vm796_vm0, %v6722_v12  ;;  %v14414_v15 = vpop.permute.xlu1 %6782 }
0x10b0   : > { %v10491_v8 = vpop.eup %10490  ;;  %10496 = vrcp.f32 %v9428_v62 }
0x10b1   : > { %v6716_v20 = vmul.f32 %v10491_v8, %v9459_v58 }
0x10b2   : > { %v10493_v0 = vpop.eup %10492  ;;  %v9429_v42 = vpop.f32.mrb[44].mxu0 }
0x10b3   : > { %v9469_v49 = vpop.f32.mrb[44].mxu1  ;;  %v6717_v4 = vmul.f32 %v10493_v0, %v9462_v14  ;;  %v9430_v3 = vpop.f32.mrb[45].mxu0  ;;  %v6753_v14 = vld [vmem:[#allocation2 + $0xb8] sm:$0xff] }
0x10b4   : > { %v9470_v40 = vpop.f32.mrb[45].mxu1  ;;  %v9431_v25 = vadd.f32 %v9430_v3, %v9429_v42  ;;  %v9432_v11 = vpop.f32.mrb[46].mxu0  ;;  %v6876_v36 = vsel %vm796_vm0, %v6753_v14, 0 }
0x10b5   : > { %v9471_v29 = vadd.f32 %v9470_v40, %v9469_v49  ;;  %v9472_v31 = vpop.f32.mrb[46].mxu1  ;;  %v6723_v45 = vpack.c.bf16 %v6717_v4, %v6716_v20  ;;  %v9433_v5 = vpop.f32.mrb[47].mxu0 }
0x10b6   : > { %v9473_v33 = vpop.f32.mrb[47].mxu1  ;;  %10498 = vrcp.f32 %v9431_v25  ;;  %v9434_v37 = vadd.f32 %v9433_v5, %v9432_v11  ;;  %v6758_v7 = vld [vmem:[#allocation2 + $0xe0] sm:$0xff]  ;;  %v14421_v10 = vpop.permute.xlu1 %6787 }
0x10b7   : > { %v9474_v41 = vadd.f32 %v9473_v33, %v9472_v31  ;;  %6727 = vst.msk [vmem:[#allocation2 + $0xe8] sm:$0xff] %vm796_vm0, %v6723_v45  ;;  %9915 = vmatprep.subr.msk.bf16.mxu1 %vm796_vm0, %v6758_v7 }
0x10b8   : > { %v10495_v53 = vpop.eup %10494  ;;  %10500 = vrcp.f32 %v9434_v37  ;;  %9504 = vmatpush3.bf16.xpose.msra.mxu1 %v6867_v55 }
0x10b9   : > { %v6718_v2 = vmul.f32 %v10495_v53, %v9465_v27 }
0x10ba   : > { %v10497_v47 = vpop.eup %10496 }
0x10bb   : > { %v6719_v24 = vmul.f32 %v10497_v47, %v9468_v1 }
0x10bd   : > { %v6724_v16 = vpack.c.bf16 %v6719_v24, %v6718_v2 }
0x10be   : > { %v6759_v6 = vld [vmem:[#allocation2 + $0xe8] sm:$0xff] }
0x10bf   : > { %6728 = vst.msk [vmem:[#allocation2 + $0xf0] sm:$0xff] %vm796_vm0, %v6724_v16  ;;  %9916 = vmatprep.subr.msk.bf16.mxu1 %vm796_vm0, %v6759_v6 }
0x10c0   : > { %v10499_v22 = vpop.eup %10498  ;;  %9506 = vmatpush3.bf16.xpose.msra.mxu1 %v6870_v44  ;;  %v14427_v44 = vpop.permute.xlu1 %7155 }
0x10c1   : > { %v6720_v18 = vmul.f32 %v10499_v22, %v9471_v29 }
0x10c2   : > { %v10501_v58 = vpop.eup %10500 }
0x10c3   : > { %v6721_v52 = vmul.f32 %v10501_v58, %v9474_v41 }
0x10c5   : > { %v6725_v56 = vpack.c.bf16 %v6721_v52, %v6720_v18 }
0x10c6   : > { %v6760_v39 = vld [vmem:[#allocation2 + $0xf0] sm:$0xff] }
0x10c7   : > { %6729 = vst.msk [vmem:[#allocation2 + $0xf8] sm:$0xff] %vm796_vm0, %v6725_v56  ;;  %9917 = vmatprep.subr.msk.bf16.mxu1 %vm796_vm0, %v6760_v39 }
0x10c8   : > { %9508 = vmatpush3.bf16.xpose.msra.mxu1 %v6873_v60 }
0x10ce   : > { %v6761_v13 = vld [vmem:[#allocation2 + $0xf8] sm:$0xff] }
0x10cf   : > { %9918 = vmatprep.subr.msk.bf16.mxu1 %vm796_vm0, %v6761_v13 }
0x10d0   : > { %9510 = vmatpush3.bf16.xpose.msra.mxu1 %v6876_v36  ;;  %v14429_v36 = vpop.permute.xlu1 %7160 }
0x10d7   : > { %9512 = vmatmul.mubr.msk.bf16.vlgmr.msra.gmra.mrb[48].mxu1 %vm796_vm0, %v14292_v51 }
0x10d8   : > { %9513 = vmatprep.mubr.msk.bf16.mxu1 %vm796_vm0, %v14311_v63 }
0x10da   : > { %v6936_v59 = vpop.f32.mrb[48].mxu0 }
0x10db   : > { %v6937_v34 = vadd.f32 %v6936_v59, %v14404_v28  ;;  %v6938_v57 = vpop.f32.mrb[49].mxu0 }
0x10dc   : > { %v6939_v19 = vadd.f32 %v6938_v57, %v14404_v28  ;;  %v6940_v17 = vpop.f32.mrb[50].mxu0 }
0x10dd   : > { %v6941_v26 = vadd.f32 %v6940_v17, %v14410_v46  ;;  %v6942_v9 = vpop.f32.mrb[51].mxu0 }
0x10de   : > { %v6943_v50 = vadd.f32 %v6942_v9, %v14410_v46  ;;  %v14431_v9 = vpop.permute.xlu1 %7191 }
0x10df   : > { %9514 = vmatmul.mubr.msk.bf16.gmra.mrb[52].mxu1 %vm796_vm0, %v14311_v63  ;;  %v7016_v51 = vadd.f32 %v6941_v26, %v6937_v34 }
0x10e0   : > { %v7025_v27 = vadd.f32 %v6943_v50, %v6939_v19  ;;  %7442 = vmatprep.mubr.bf16.mxu1 %v15126_v23 }
0x10e2   : > { %v6946_v30 = vpop.f32.mrb[52].mxu0 }
0x10e3   : > { %v6947_v12 = vadd.f32 %v6946_v30, %v14414_v15  ;;  %v6948_v54 = vpop.f32.mrb[53].mxu0 }
0x10e4   : > { %v6949_v21 = vadd.f32 %v6948_v54, %v14414_v15  ;;  %v6950_v62 = vpop.f32.mrb[54].mxu0 }
0x10e5   : > { %v7017_v1 = vadd.f32 %v7016_v51, %v6947_v12  ;;  %v6952_v48 = vpop.f32.mrb[55].mxu0  ;;  %v6951_v43 = vadd.f32 %v6950_v62, %v14421_v10 }
0x10e6   : > { %v7026_v8 = vadd.f32 %v7025_v27, %v6949_v21  ;;  %v6953_v63 = vadd.f32 %v6952_v48, %v14421_v10 }
0x10e7   : > { %v7018_v20 = vadd.f32 %v7017_v1, %v6951_v43 }
0x10e8   : > { %v7027_v0 = vadd.f32 %v7026_v8, %v6953_v63 }
0x10e9   : > { %v7019_v42 = vrot.slane %v7018_v20, 4 }
0x10ea   : > { %v7028_v49 = vrot.slane %v7027_v0, 4 }
0x10eb   : > { %v7020_v38 = vadd.f32 %v7019_v42, %v7018_v20 }
0x10ec   : > { %v7029_v4 = vadd.f32 %v7028_v49, %v7027_v0 }
0x10ed   : > { %v7021_v3 = vrot.slane %v7020_v38, 2 }
0x10ee   : > { %v7030_v40 = vrot.slane %v7029_v4, 2 }
0x10ef   : > { %v7022_v25 = vadd.f32 %v7021_v3, %v7020_v38 }
0x10f0   : > { %v7031_v29 = vadd.f32 %v7030_v40, %v7029_v4 }
0x10f1   : > { %v7023_v11 = vrot.slane %v7022_v25, 1 }
0x10f2   : > { %v7032_v31 = vrot.slane %v7031_v29, 1 }
0x10f3   : > { %v7024_v61 = vadd.f32 %v7023_v11, %v7022_v25 }
0x10f4   : > { %v7033_v45 = vadd.f32 %v7032_v31, %v7031_v29  ;;  %v14439_v31 = vpop.permute.xlu0 %7201 }
0x10f5   : > { %v7053_v5 = vmul.f32 0.03125, %v7024_v61 }
0x10f6   : > { %v7054_v33 = vmul.f32 0.03125, %v7033_v45 }
0x10f7   : > { %v7061_v37 = vsub.f32 %v6941_v26, %v7053_v5  ;;  %v7065_v41 = vsub.f32 %v6947_v12, %v7053_v5  ;;  %v7069_v7 = vsub.f32 %v6951_v43, %v7053_v5  ;;  %v7057_v55 = vsub.f32 %v6937_v34, %v7053_v5 }
0x10f8   : > { %v7062_v53 = vsub.f32 %v6943_v50, %v7054_v33  ;;  %v7066_v2 = vsub.f32 %v6949_v21, %v7054_v33  ;;  %v7070_v47 = vsub.f32 %v6953_v63, %v7054_v33  ;;  %v7058_v24 = vsub.f32 %v6939_v19, %v7054_v33  ;;  %v14433_v21 = vpop.permute.xlu1 %7196 }
0x10f9   : > { %v7073_v32 = vmul.f32 %v7057_v55, %v7057_v55  ;;  %v7077_v16 = vmul.f32 %v7061_v37, %v7061_v37  ;;  %v7081_v6 = vmul.f32 %v7065_v41, %v7065_v41  ;;  %v7085_v52 = vmul.f32 %v7069_v7, %v7069_v7 }
0x10fa   : > { %v7074_v22 = vmul.f32 %v7058_v24, %v7058_v24  ;;  %v7078_v18 = vmul.f32 %v7062_v53, %v7062_v53  ;;  %v7082_v58 = vmul.f32 %v7066_v2, %v7066_v2  ;;  %v7086_v56 = vmul.f32 %v7070_v47, %v7070_v47 }
0x10fb   : > { %v7089_v35 = vadd.f32 %v7077_v16, %v7073_v32 }
0x10fc   : > { %v7098_v39 = vadd.f32 %v7078_v18, %v7074_v22  ;;  %v14435_v63 = vpop.permute.xlu1 %7165 }
0x10fd   : > { %v7090_v60 = vadd.f32 %v7089_v35, %v7081_v6  ;;  %v10674_v35 = vld [vmem:[%s10845_s30 + $0x20] sm:$0xff] }
0x10fe   : > { %v7099_v14 = vadd.f32 %v7098_v39, %v7082_v58  ;;  %v10673_v58 = vld [vmem:[%s10845_s30] sm:$0xff]  ;;  %v10675_v39 = vld [vmem:[%s10845_s30 + $0x8] sm:$0xff] }
0x10ff   : > { %v7091_v13 = vadd.f32 %v7090_v60, %v7085_v52 }
0x1100   : > { %v7100_v59 = vadd.f32 %v7099_v14, %v7086_v56  ;;  %v14437_v20 = vpop.permute.xlu1 %7170  ;;  %v10676_v14 = vld [vmem:[%s10845_s30 + $0x28] sm:$0xff] }
0x1101   : > { %v7092_v34 = vrot.slane %v7091_v13, 4 }
0x1102   : > { %v7101_v57 = vrot.slane %v7100_v59, 4 }
0x1103   : > { %v7093_v19 = vadd.f32 %v7092_v34, %v7091_v13 }
0x1104   : > { %v7102_v17 = vadd.f32 %v7101_v57, %v7100_v59  ;;  %v14441_v61 = vpop.permute.xlu1 %7206  ;;  %v10677_v59 = vld [vmem:[%s10845_s30 + $0x48] sm:$0xff] }
0x1105   : > { %v7094_v26 = vrot.slane %v7093_v19, 2  ;;  %v10678_v57 = vld [vmem:[%s10845_s30 + $0x68] sm:$0xff] }
0x1106   : > { %v7103_v50 = vrot.slane %v7102_v17, 2 }
0x1107   : > { %v7095_v51 = vadd.f32 %v7094_v26, %v7093_v19 }
0x1108   : > { %v7104_v27 = vadd.f32 %v7103_v50, %v7102_v17  ;;  %v10679_v17 = vld [vmem:[%s10845_s30 + $0x40] sm:$0xff] }
0x1109   : > { %v7096_v30 = vrot.slane %v7095_v51, 1  ;;  %v10680_v50 = vld [vmem:[%s10845_s30 + $0x60] sm:$0xff] }
0x110a   : > { %v7105_v12 = vrot.slane %v7104_v27, 1 }
0x110b   : > { %v7097_v54 = vadd.f32 %v7096_v30, %v7095_v51 }
0x110c   : > { %v7106_v62 = vadd.f32 %v7105_v12, %v7104_v27 }
0x110d   : > { %v7125_v1 = vmul.f32 0.03125, %v7097_v54 }
0x110e   : > { %v7126_v48 = vmul.f32 0.03125, %v7106_v62  ;;  %v14494_v62 = vld [vmem:[%s15013_s16] sm:$0xff]  }
0x110f   : > { %v7129_v43 = vadd.f32 1e-05, %v7125_v1  ;;  %v14502_v1 = vld [vmem:[%s15013_s16 + $0x8] sm:$0xff]  }
0x1110   : > { %v7130_v8 = vadd.f32 1e-05, %v7126_v48  ;;  %v14510_v48 = vld [vmem:[%s15013_s16 + $0x10] sm:$0xff]  }
0x1111   : > { %10502 = vrsqrt.f32 %v7129_v43  ;;  %v14518_v43 = vld [vmem:[%s15013_s16 + $0x18] sm:$0xff]  }
0x1112   : > { %10504 = vrsqrt.f32 %v7130_v8 }
0x111b   : > { %v10503_v0 = vpop.eup %10502 }
0x111c   : > { %v10505_v42 = vpop.eup %10504  ;;  %v7137_v49 = vmul.f32 %v10503_v0, %v7057_v55  ;;  %v7141_v38 = vmul.f32 %v10503_v0, %v7061_v37  ;;  %v7145_v4 = vmul.f32 %v10503_v0, %v7065_v41  ;;  %v7149_v3 = vmul.f32 %v10503_v0, %v7069_v7 }
0x111d   : > { %v7138_v40 = vmul.f32 %v10505_v42, %v7058_v24  ;;  %v7142_v25 = vmul.f32 %v10505_v42, %v7062_v53  ;;  %v7146_v29 = vmul.f32 %v10505_v42, %v7066_v2  ;;  %v7150_v11 = vmul.f32 %v10505_v42, %v7070_v47 }
0x111e   : > { %v7173_v45 = vmul.f32 %v14427_v44, %v7137_v49  ;;  %v7177_v5 = vmul.f32 %v14429_v36, %v7141_v38  ;;  %v7181_v33 = vmul.f32 %v14435_v63, %v7145_v4  ;;  %v7185_v37 = vmul.f32 %v14437_v20, %v7149_v3 }
0x111f   : > { %v7174_v41 = vmul.f32 %v14427_v44, %v7138_v40  ;;  %v7178_v7 = vmul.f32 %v14429_v36, %v7142_v25  ;;  %v7182_v55 = vmul.f32 %v14435_v63, %v7146_v29  ;;  %v7186_v53 = vmul.f32 %v14437_v20, %v7150_v11 }
0x1120   : > { %v7209_v2 = vadd.f32 %v14431_v9, %v7173_v45  ;;  %v7213_v47 = vadd.f32 %v14433_v21, %v7177_v5  ;;  %v7217_v24 = vadd.f32 %v14439_v31, %v7181_v33  ;;  %v7221_v32 = vadd.f32 %v14441_v61, %v7185_v37 }
0x1121   : > { %v7210_v16 = vadd.f32 %v14431_v9, %v7174_v41  ;;  %v7214_v6 = vadd.f32 %v14433_v21, %v7178_v7  ;;  %v7218_v22 = vadd.f32 %v14439_v31, %v7182_v55  ;;  %v7222_v18 = vadd.f32 %v14441_v61, %v7186_v53 }
0x1122   : > { %v14460_v52 = vadd.f32 %v10673_v58, %v7209_v2  ;;  %v14463_v56 = vadd.f32 %v10674_v35, %v7213_v47  ;;  %v14478_v26 = vadd.f32 %v10679_v17, %v7217_v24  ;;  %v14481_v51 = vadd.f32 %v10680_v50, %v7221_v32 }
0x1123   : > { %v14466_v60 = vadd.f32 %v10675_v39, %v7210_v16  ;;  %v14469_v13 = vadd.f32 %v10676_v14, %v7214_v6  ;;  %v14472_v34 = vadd.f32 %v10677_v59, %v7218_v22  ;;  %v14475_v19 = vadd.f32 %v10678_v57, %v7222_v18 }
0x1124   : > { %v7249_v27 = vpack.c.bf16 %v14463_v56, %v14460_v52  ;;  %v7253_v54 = vpack.c.bf16 %v14481_v51, %v14478_v26 }
0x1125   : > { %v7250_v30 = vpack.c.bf16 %v14469_v13, %v14466_v60  ;;  %v7254_v12 = vpack.c.bf16 %v14475_v19, %v14472_v34 }
0x1127   : > { %7337 = vmatprep.subr.bf16.mxu0 %v7250_v30 }
0x1128   : > { %7338 = vmatpush1.bf16.msra.mxu0 %v7249_v27 }
0x1129   : > { %7339 = vmatprep.subr.bf16.mxu0 %v7254_v12 }
0x112c   : > { %7340 = vmatpush1.bf16.msra.mxu0 %v7253_v54 }
0x112f   : > { %8646 = vmatmul.mubr.msk.bf16.vlgmr.msra.gmra.mrb[56].mxu0 %vm796_vm0, %v14494_v62 }
0x1130   : > { %7379 = vmatprep.mubr.bf16.mxu0 %v15126_v23 }
0x1137   : > { %8647 = vmatmul.mubr.msk.bf16.gmra.mrb[60].mxu0 %vm796_vm0, %v14502_v1 }
0x1138   : > { %7389 = vmatprep.mubr.bf16.mxu0 %v15126_v23 }
0x113f   : > { %8648 = vmatmul.mubr.msk.bf16.gmra.mrb[64].mxu0 %vm796_vm0, %v14510_v48 }
0x1140   : > { %7399 = vmatprep.mubr.bf16.mxu0 %v15126_v23 }
0x1147   : > { %8649 = vmatmul.mubr.msk.bf16.gmra.mrb[68].mxu0 %vm796_vm0, %v14518_v43 }
0x1148   : > { %7863 = vmatprep.mubr.bf16.mxu0 %v15126_v23 }
0x11aa   : > { %v6989_v8 = vpop.f32.mrb[48].mxu1 }
0x11ab   : > { %v6991_v0 = vpop.f32.mrb[49].mxu1  ;;  %v6990_v49 = vadd.f32 %v6989_v8, %v14404_v28 }
0x11ac   : > { %v6993_v42 = vpop.f32.mrb[50].mxu1  ;;  %v6992_v3 = vadd.f32 %v6991_v0, %v14404_v28 }
0x11ad   : > { %v6994_v38 = vadd.f32 %v6993_v42, %v14410_v46  ;;  %v6995_v4 = vpop.f32.mrb[51].mxu1 }
0x11ae   : > { %v6996_v40 = vadd.f32 %v6995_v4, %v14410_v46 }
0x11af   : > { %v7034_v25 = vadd.f32 %v6994_v38, %v6990_v49 }
0x11b0   : > { %v7043_v29 = vadd.f32 %v6996_v40, %v6992_v3 }
0x11b2   : > { %v6999_v11 = vpop.f32.mrb[52].mxu1 }
0x11b3   : > { %v7000_v45 = vadd.f32 %v6999_v11, %v14414_v15  ;;  %v7001_v5 = vpop.f32.mrb[53].mxu1 }
0x11b4   : > { %v7002_v33 = vadd.f32 %v7001_v5, %v14414_v15  ;;  %v7003_v37 = vpop.f32.mrb[54].mxu1 }
0x11b5   : > { %v7035_v41 = vadd.f32 %v7034_v25, %v7000_v45  ;;  %v7004_v7 = vadd.f32 %v7003_v37, %v14421_v10  ;;  %v7005_v55 = vpop.f32.mrb[55].mxu1 }
0x11b6   : > { %v7044_v53 = vadd.f32 %v7043_v29, %v7002_v33  ;;  %v7006_v2 = vadd.f32 %v7005_v55, %v14421_v10 }
0x11b7   : > { %v7036_v47 = vadd.f32 %v7035_v41, %v7004_v7 }
0x11b8   : > { %v7045_v28 = vadd.f32 %v7044_v53, %v7006_v2 }
0x11b9   : > { %v7037_v24 = vrot.slane %v7036_v47, 4 }
0x11ba   : > { %v7046_v46 = vrot.slane %v7045_v28, 4 }
0x11bb   : > { %v7038_v32 = vadd.f32 %v7037_v24, %v7036_v47 }
0x11bc   : > { %v7047_v16 = vadd.f32 %v7046_v46, %v7045_v28 }
0x11bd   : > { %v7039_v6 = vrot.slane %v7038_v32, 2 }
0x11be   : > { %v7048_v22 = vrot.slane %v7047_v16, 2 }
0x11bf   : > { %v7040_v18 = vadd.f32 %v7039_v6, %v7038_v32 }
0x11c0   : > { %v7049_v58 = vadd.f32 %v7048_v22, %v7047_v16 }
0x11c1   : > { %v7041_v35 = vrot.slane %v7040_v18, 1 }
0x11c2   : > { %v7050_v15 = vrot.slane %v7049_v58, 1 }
0x11c3   : > { %v7042_v39 = vadd.f32 %v7041_v35, %v7040_v18 }
0x11c4   : > { %v7051_v14 = vadd.f32 %v7050_v15, %v7049_v58 }
0x11c5   : > { %v7055_v59 = vmul.f32 0.03125, %v7042_v39 }
0x11c6   : > { %v7056_v57 = vmul.f32 0.03125, %v7051_v14 }
0x11c7   : > { %v7059_v17 = vsub.f32 %v6990_v49, %v7055_v59  ;;  %v7063_v50 = vsub.f32 %v6994_v38, %v7055_v59  ;;  %v7067_v27 = vsub.f32 %v7000_v45, %v7055_v59  ;;  %v7071_v10 = vsub.f32 %v7004_v7, %v7055_v59 }
0x11c8   : > { %v7060_v30 = vsub.f32 %v6992_v3, %v7056_v57  ;;  %v7064_v12 = vsub.f32 %v6996_v40, %v7056_v57  ;;  %v7068_v54 = vsub.f32 %v7002_v33, %v7056_v57  ;;  %v7072_v8 = vsub.f32 %v7006_v2, %v7056_v57 }
0x11c9   : > { %v7075_v0 = vmul.f32 %v7059_v17, %v7059_v17  ;;  %v7079_v42 = vmul.f32 %v7063_v50, %v7063_v50  ;;  %v7083_v29 = vmul.f32 %v7067_v27, %v7067_v27  ;;  %v7087_v41 = vmul.f32 %v7071_v10, %v7071_v10 }
0x11ca   : > { %v7076_v4 = vmul.f32 %v7060_v30, %v7060_v30  ;;  %v7080_v25 = vmul.f32 %v7064_v12, %v7064_v12  ;;  %v7084_v5 = vmul.f32 %v7068_v54, %v7068_v54  ;;  %v7088_v53 = vmul.f32 %v7072_v8, %v7072_v8 }
0x11cb   : > { %v7107_v11 = vadd.f32 %v7079_v42, %v7075_v0 }
0x11cc   : > { %v7116_v37 = vadd.f32 %v7080_v25, %v7076_v4 }
0x11cd   : > { %v7108_v55 = vadd.f32 %v7107_v11, %v7083_v29 }
0x11ce   : > { %v7117_v47 = vadd.f32 %v7116_v37, %v7084_v5 }
0x11cf   : > { %v7109_v49 = vadd.f32 %v7108_v55, %v7087_v41 }
0x11d0   : > { %v7118_v38 = vadd.f32 %v7117_v47, %v7088_v53 }
0x11d1   : > { %v7110_v45 = vrot.slane %v7109_v49, 4 }
0x11d2   : > { %v7119_v7 = vrot.slane %v7118_v38, 4 }
0x11d3   : > { %v7111_v3 = vadd.f32 %v7110_v45, %v7109_v49 }
0x11d4   : > { %v7120_v40 = vadd.f32 %v7119_v7, %v7118_v38  ;;  %v10685_v7 = vld [vmem:[%s10845_s30 + $0x58] sm:$0xff] }
0x11d5   : > { %v7112_v33 = vrot.slane %v7111_v3, 2 }
0x11d6   : > { %v7121_v2 = vrot.slane %v7120_v40, 2 }
0x11d7   : > { %v7113_v28 = vadd.f32 %v7112_v33, %v7111_v3 }
0x11d8   : > { %v7122_v24 = vadd.f32 %v7121_v2, %v7120_v40 }
0x11d9   : > { %v7114_v46 = vrot.slane %v7113_v28, 1 }
0x11da   : > { %v7123_v32 = vrot.slane %v7122_v24, 1 }
0x11db   : > { %v7115_v16 = vadd.f32 %v7114_v46, %v7113_v28  ;;  %v10687_v28 = vld [vmem:[%s10845_s30 + $0x50] sm:$0xff] }
0x11dc   : > { %v7124_v6 = vadd.f32 %v7123_v32, %v7122_v24  ;;  %v10688_v24 = vld [vmem:[%s10845_s30 + $0x70] sm:$0xff] }
0x11dd   : > { %v7127_v22 = vmul.f32 0.03125, %v7115_v16 }
0x11de   : > { %v7128_v18 = vmul.f32 0.03125, %v7124_v6  ;;  %v14582_v6 = vpop.permute.xlu0 %7267 }
0x11df   : > { %v7131_v58 = vadd.f32 1e-05, %v7127_v22 }
0x11e0   : > { %v7132_v35 = vadd.f32 1e-05, %v7128_v18 }
0x11e1   : > { %10506 = vrsqrt.f32 %v7131_v58 }
0x11e2   : > { %10508 = vrsqrt.f32 %v7132_v35  ;;  %v14587_v35 = vpop.permute.xlu1 %7272 }
0x11eb   : > { %v10507_v15 = vpop.eup %10506 }
0x11ec   : > { %v10509_v39 = vpop.eup %10508  ;;  %v7147_v14 = vmul.f32 %v10507_v15, %v7067_v27  ;;  %v7151_v59 = vmul.f32 %v10507_v15, %v7071_v10  ;;  %v7139_v57 = vmul.f32 %v10507_v15, %v7059_v17  ;;  %v7143_v0 = vmul.f32 %v10507_v15, %v7063_v50 }
0x11ed   : > { %v7152_v42 = vmul.f32 %v10509_v39, %v7072_v8  ;;  %v7140_v4 = vmul.f32 %v10509_v39, %v7060_v30  ;;  %v7144_v25 = vmul.f32 %v10509_v39, %v7064_v12  ;;  %v7148_v29 = vmul.f32 %v10509_v39, %v7068_v54 }
0x11ee   : > { %v7187_v11 = vmul.f32 %v14437_v20, %v7151_v59  ;;  %v7175_v5 = vmul.f32 %v14427_v44, %v7139_v57  ;;  %v7179_v37 = vmul.f32 %v14429_v36, %v7143_v0  ;;  %v7183_v41 = vmul.f32 %v14435_v63, %v7147_v14 }
0x11ef   : > { %v7188_v55 = vmul.f32 %v14437_v20, %v7152_v42  ;;  %v7176_v17 = vmul.f32 %v14427_v44, %v7140_v4  ;;  %v7180_v50 = vmul.f32 %v14429_v36, %v7144_v25  ;;  %v7184_v27 = vmul.f32 %v14435_v63, %v7148_v29  ;;  %v10681_v36 = vld [vmem:[%s10845_s30 + $0x10] sm:$0xff] }
0x11f0   : > { %v7211_v10 = vadd.f32 %v14431_v9, %v7175_v5  ;;  %v7215_v30 = vadd.f32 %v14433_v21, %v7179_v37  ;;  %v7223_v44 = vadd.f32 %v14441_v61, %v7187_v11  ;;  %v10682_v63 = vld [vmem:[%s10845_s30 + $0x30] sm:$0xff]  ;;  %v7219_v49 = vadd.f32 %v14439_v31, %v7183_v41  ;;  %v14612_v37 = vpop.permute.xlu0 %7277 }
0x11f1   : > { %v7212_v12 = vadd.f32 %v14431_v9, %v7176_v17  ;;  %v7216_v54 = vadd.f32 %v14433_v21, %v7180_v50  ;;  %v7220_v20 = vadd.f32 %v14439_v31, %v7184_v27  ;;  %v7224_v8 = vadd.f32 %v14441_v61, %v7188_v55  ;;  %v10683_v9 = vld [vmem:[%s10845_s30 + $0x18] sm:$0xff] }
0x11f2   : > { %v14547_v53 = vadd.f32 %v10681_v36, %v7211_v10  ;;  %v14550_v47 = vadd.f32 %v10682_v63, %v7215_v30  ;;  %v10684_v21 = vld [vmem:[%s10845_s30 + $0x38] sm:$0xff]  ;;  %v14570_v31 = vadd.f32 %v10687_v28, %v7219_v49  ;;  %v14573_v46 = vadd.f32 %v10688_v24, %v7223_v44  ;;  %v14619_v30 = vpop.permute.xlu1 %7282 }
0x11f3   : > { %v14554_v38 = vadd.f32 %v10683_v9, %v7212_v12  ;;  %v14557_v45 = vadd.f32 %v10684_v21, %v7216_v54  ;;  %v14560_v3 = vadd.f32 %v10685_v7, %v7220_v20  ;;  %v10686_v61 = vld [vmem:[%s10845_s30 + $0x78] sm:$0xff] }
0x11f4   : > { %v14563_v40 = vadd.f32 %v10686_v61, %v7224_v8  ;;  %v7251_v2 = vpack.c.bf16 %v14550_v47, %v14547_v53  ;;  %v7255_v16 = vpack.c.bf16 %v14573_v46, %v14570_v31 }
0x11f5   : > { %v7252_v33 = vpack.c.bf16 %v14557_v45, %v14554_v38 }
0x11f6   : > { %v7256_v32 = vpack.c.bf16 %v14563_v40, %v14560_v3 }
0x11f7   : > { %7410 = vmatprep.subr.bf16.mxu1 %v7252_v33 }
0x11f8   : > { %7411 = vmatpush1.bf16.msra.mxu1 %v7251_v2 }
0x11f9   : > { %7412 = vmatprep.subr.bf16.mxu1 %v7256_v32 }
0x11fc   : > { %7413 = vmatpush1.bf16.msra.mxu1 %v7255_v16 }
0x11ff   : > { %8650 = vmatmul.mubr.msk.bf16.vlgmr.msra.gmra.mrb[56].mxu1 %vm796_vm0, %v14494_v62 }
0x1200   : > { %7452 = vmatprep.mubr.bf16.mxu1 %v15126_v23 }
0x1202   : > { %v7371_v22 = vpop.f32.mrb[56].mxu0 }
0x1203   : > { %v14585_v18 = vadd.f32 %v7371_v22, %v14582_v6  ;;  %v7373_v58 = vpop.f32.mrb[57].mxu0 }
0x1204   : > { %v14590_v15 = vadd.f32 %v7373_v58, %v14582_v6  ;;  %v7375_v39 = vpop.f32.mrb[58].mxu0 }
0x1205   : > { %v7483_v14 = vmul.f32 %v14585_v18, %v14585_v18  ;;  %v14595_v62 = vadd.f32 %v7375_v39, %v14587_v35  ;;  %v7377_v59 = vpop.f32.mrb[59].mxu0 }
0x1206   : > { %v7484_v57 = vmul.f32 %v14590_v15, %v14590_v15  ;;  %v14600_v0 = vadd.f32 %v7377_v59, %v14587_v35 }
0x1207   : > { %v7515_v42 = vmul.f32 %v7483_v14, %v14585_v18  ;;  %v7487_v4 = vmul.f32 %v14595_v62, %v14595_v62  ;;  %8651 = vmatmul.mubr.msk.bf16.gmra.mrb[60].mxu1 %vm796_vm0, %v14502_v1  ;;  %v14647_v14 = vpop.permute.xlu0 %7287 }
0x1208   : > { %v7516_v25 = vmul.f32 %v7484_v57, %v14590_v15  ;;  %v7488_v29 = vmul.f32 %v14600_v0, %v14600_v0  ;;  %7462 = vmatprep.mubr.bf16.mxu1 %v15126_v23 }
0x1209   : > { %v7547_v11 = vmul.f32 0.044715, %v7515_v42  ;;  %v7519_v5 = vmul.f32 %v7487_v4, %v14595_v62 }
0x120a   : > { %v7548_v41 = vmul.f32 0.044715, %v7516_v25  ;;  %v7520_v55 = vmul.f32 %v7488_v29, %v14600_v0  ;;  %v7381_v17 = vpop.f32.mrb[60].mxu0 }
0x120b   : > { %v7579_v50 = vadd.f32 %v7547_v11, %v14585_v18  ;;  %v7551_v27 = vmul.f32 0.044715, %v7519_v5  ;;  %v14617_v1 = vadd.f32 %v7381_v17, %v14612_v37  ;;  %v7383_v10 = vpop.f32.mrb[61].mxu0  ;;  %v14654_v11 = vpop.permute.xlu1 %7292 }
0x120c   : > { %v7580_v12 = vadd.f32 %v7548_v41, %v14590_v15  ;;  %v7552_v54 = vmul.f32 0.044715, %v7520_v55  ;;  %v14623_v20 = vadd.f32 %v7383_v10, %v14612_v37  ;;  %v7385_v8 = vpop.f32.mrb[62].mxu0 }
0x120d   : > { %v7611_v44 = vmul.f32 0.7978846, %v7579_v50  ;;  %v7583_v36 = vadd.f32 %v7551_v27, %v14595_v62  ;;  %v7491_v63 = vmul.f32 %v14617_v1, %v14617_v1  ;;  %v14629_v49 = vadd.f32 %v7385_v8, %v14619_v30  ;;  %v7387_v9 = vpop.f32.mrb[63].mxu0 }
0x120e   : > { %v7612_v21 = vmul.f32 0.7978846, %v7580_v12  ;;  %v7584_v7 = vadd.f32 %v7552_v54, %v14600_v0  ;;  %v7492_v61 = vmul.f32 %v14623_v20, %v14623_v20  ;;  %v14635_v33 = vadd.f32 %v7387_v9, %v14619_v30 }
0x120f   : > { %10510 = vtanh.f32 %v7611_v44  ;;  %v7615_v2 = vmul.f32 0.7978846, %v7583_v36  ;;  %v7523_v28 = vmul.f32 %v7491_v63, %v14617_v1  ;;  %v7495_v24 = vmul.f32 %v14629_v49, %v14629_v49  ;;  %8652 = vmatmul.mubr.msk.bf16.gmra.mrb[64].mxu1 %vm796_vm0, %v14510_v48 }
0x1210   : > { %10512 = vtanh.f32 %v7612_v21  ;;  %v7616_v32 = vmul.f32 0.7978846, %v7584_v7  ;;  %v7524_v16 = vmul.f32 %v7492_v61, %v14623_v20  ;;  %v7496_v22 = vmul.f32 %v14635_v33, %v14635_v33  ;;  %7472 = vmatprep.mubr.bf16.mxu1 %v15126_v23 }
0x1211   : > { %10514 = vtanh.f32 %v7615_v2  ;;  %v7555_v58 = vmul.f32 0.044715, %v7523_v28  ;;  %v7527_v39 = vmul.f32 %v7495_v24, %v14629_v49 }
0x1212   : > { %v7556_v59 = vmul.f32 0.044715, %v7524_v16  ;;  %v7528_v57 = vmul.f32 %v7496_v22, %v14635_v33  ;;  %v7391_v42 = vpop.f32.mrb[64].mxu0  ;;  %10516 = vtanh.f32 %v7616_v32 }
0x1213   : > { %v7587_v48 = vadd.f32 %v7555_v58, %v14617_v1  ;;  %v7559_v4 = vmul.f32 0.044715, %v7527_v39  ;;  %v14652_v25 = vadd.f32 %v7391_v42, %v14647_v14  ;;  %v7393_v29 = vpop.f32.mrb[65].mxu0  ;;  %v14682_v39 = vpop.permute.xlu0 %7297 }
0x1214   : > { %v7588_v5 = vadd.f32 %v7556_v59, %v14623_v20  ;;  %v7560_v41 = vmul.f32 0.044715, %v7528_v57  ;;  %v14658_v55 = vadd.f32 %v7393_v29, %v14647_v14  ;;  %v7395_v17 = vpop.f32.mrb[66].mxu0 }
0x1215   : > { %v7619_v50 = vmul.f32 0.7978846, %v7587_v48  ;;  %v7591_v27 = vadd.f32 %v7559_v4, %v14629_v49  ;;  %v7499_v10 = vmul.f32 %v14652_v25, %v14652_v25  ;;  %v14664_v12 = vadd.f32 %v7395_v17, %v14654_v11  ;;  %v7397_v54 = vpop.f32.mrb[67].mxu0 }
0x1216   : > { %v7620_v8 = vmul.f32 0.7978846, %v7588_v5  ;;  %v7592_v44 = vadd.f32 %v7560_v41, %v14635_v33  ;;  %v7500_v36 = vmul.f32 %v14658_v55, %v14658_v55  ;;  %v14670_v63 = vadd.f32 %v7397_v54, %v14654_v11 }
0x1217   : > { %10518 = vtanh.f32 %v7619_v50  ;;  %v7623_v9 = vmul.f32 0.7978846, %v7591_v27  ;;  %v7531_v21 = vmul.f32 %v7499_v10, %v14652_v25  ;;  %v7503_v7 = vmul.f32 %v14664_v12, %v14664_v12  ;;  %8653 = vmatmul.mubr.msk.bf16.gmra.mrb[68].mxu1 %vm796_vm0, %v14518_v43 }
0x1218   : > { %10520 = vtanh.f32 %v7620_v8  ;;  %v7624_v61 = vmul.f32 0.7978846, %v7592_v44  ;;  %v7532_v2 = vmul.f32 %v7500_v36, %v14658_v55  ;;  %v7504_v28 = vmul.f32 %v14670_v63, %v14670_v63  ;;  %7916 = vmatprep.mubr.bf16.mxu1 %v15126_v23 }
0x1219   : > { %v10511_v24 = vpop.eup %10510  ;;  %10522 = vtanh.f32 %v7623_v9  ;;  %v7563_v32 = vmul.f32 0.044715, %v7531_v21  ;;  %v7535_v16 = vmul.f32 %v7503_v7, %v14664_v12 }
0x121a   : > { %v10513_v22 = vpop.eup %10512  ;;  %v7675_v58 = vadd.f32 1.0, %v10511_v24  ;;  %10524 = vtanh.f32 %v7624_v61  ;;  %v7564_v43 = vmul.f32 0.044715, %v7532_v2  ;;  %v7536_v59 = vmul.f32 %v7504_v28, %v14670_v63  ;;  %v7401_v57 = vpop.f32.mrb[68].mxu0 }
0x121b   : > { %v10515_v42 = vpop.eup %10514  ;;  %v7595_v48 = vadd.f32 %v7563_v32, %v14652_v25  ;;  %v7567_v4 = vmul.f32 0.044715, %v7535_v16  ;;  %v14687_v29 = vadd.f32 %v7401_v57, %v14682_v39  ;;  %v7403_v5 = vpop.f32.mrb[69].mxu0  ;;  %v7676_v41 = vadd.f32 1.0, %v10513_v22 }
0x121c   : > { %v7707_v17 = vmul.f32 0.5, %v7675_v58  ;;  %v7679_v50 = vadd.f32 1.0, %v10515_v42  ;;  %v7596_v27 = vadd.f32 %v7564_v43, %v14658_v55  ;;  %v7568_v10 = vmul.f32 0.044715, %v7536_v59  ;;  %v7405_v54 = vpop.f32.mrb[70].mxu0  ;;  %v10517_v7 = vpop.eup %10516 }
0x121d   : > { %v7627_v8 = vmul.f32 0.7978846, %v7595_v48  ;;  %v7599_v44 = vadd.f32 %v7567_v4, %v14664_v12  ;;  %v7507_v36 = vmul.f32 %v14687_v29, %v14687_v29  ;;  %v14694_v9 = vadd.f32 %v7403_v5, %v14682_v39  ;;  %v7407_v21 = vpop.f32.mrb[71].mxu0  ;;  %v14698_v32 = vpop.permute.xlu1 %7302 }
0x121e   : > { %v7739_v61 = vmul.f32 %v7707_v17, %v14585_v18  ;;  %v7711_v2 = vmul.f32 0.5, %v7679_v50  ;;  %v7628_v28 = vmul.f32 0.7978846, %v7596_v27  ;;  %v7600_v24 = vadd.f32 %v7568_v10, %v14670_v63 }
0x121f   : > { %10526 = vtanh.f32 %v7627_v8  ;;  %v7631_v16 = vmul.f32 0.7978846, %v7599_v44  ;;  %v7539_v22 = vmul.f32 %v7507_v36, %v14687_v29  ;;  %v7508_v58 = vmul.f32 %v14694_v9, %v14694_v9 }
0x1220   : > { %v7743_v43 = vmul.f32 %v7711_v2, %v14595_v62  ;;  %10528 = vtanh.f32 %v7628_v28  ;;  %v7632_v59 = vmul.f32 0.7978846, %v7600_v24  ;;  %v14705_v57 = vadd.f32 %v7405_v54, %v14698_v32 }
0x1221   : > { %v10519_v18 = vpop.eup %10518  ;;  %10530 = vtanh.f32 %v7631_v16  ;;  %v7571_v42 = vmul.f32 0.044715, %v7539_v22  ;;  %v7540_v48 = vmul.f32 %v7508_v58, %v14694_v9  ;;  %v14709_v4 = vadd.f32 %v7407_v21, %v14698_v32 }
0x1222   : > { %v10521_v5 = vpop.eup %10520  ;;  %v7683_v17 = vadd.f32 1.0, %v10519_v18  ;;  %10532 = vtanh.f32 %v7632_v59  ;;  %v7511_v50 = vmul.f32 %v14705_v57, %v14705_v57  ;;  %v7680_v62 = vadd.f32 1.0, %v10517_v7 }
0x1223   : > { %v10523_v27 = vpop.eup %10522  ;;  %v7603_v10 = vadd.f32 %v7571_v42, %v14687_v29  ;;  %v7572_v54 = vmul.f32 0.044715, %v7540_v48  ;;  %v7512_v8 = vmul.f32 %v14709_v4, %v14709_v4  ;;  %v7708_v44 = vmul.f32 0.5, %v7676_v41 }
0x1224   : > { %v10525_v36 = vpop.eup %10524  ;;  %v7715_v2 = vmul.f32 0.5, %v7683_v17  ;;  %v7687_v28 = vadd.f32 1.0, %v10523_v27  ;;  %v7543_v21 = vmul.f32 %v7511_v50, %v14705_v57  ;;  %v7712_v24 = vmul.f32 0.5, %v7680_v62 }
0x1225   : > { %v7635_v16 = vmul.f32 0.7978846, %v7603_v10  ;;  %v7604_v22 = vadd.f32 %v7572_v54, %v14694_v9  ;;  %v7544_v58 = vmul.f32 %v7512_v8, %v14709_v4  ;;  %v7740_v7 = vmul.f32 %v7708_v44, %v14590_v15 }
0x1226   : > { %v7747_v59 = vmul.f32 %v7715_v2, %v14617_v1  ;;  %v7719_v18 = vmul.f32 0.5, %v7687_v28  ;;  %v7575_v42 = vmul.f32 0.044715, %v7543_v21  ;;  %v7744_v48 = vmul.f32 %v7712_v24, %v14600_v0 }
0x1227   : > { %10534 = vtanh.f32 %v7635_v16  ;;  %v7636_v41 = vmul.f32 0.7978846, %v7604_v22  ;;  %v7576_v17 = vmul.f32 0.044715, %v7544_v58  ;;  %v7775_v27 = vpack.c.bf16 %v7743_v43, %v7739_v61 }
0x1228   : > { %v7751_v50 = vmul.f32 %v7719_v18, %v14629_v49  ;;  %v7607_v62 = vadd.f32 %v7575_v42, %v14705_v57  ;;  %v7776_v10 = vpack.c.bf16 %v7744_v48, %v7740_v7  ;;  %v7684_v54 = vadd.f32 1.0, %v10521_v5 }
0x1229   : > { %v10527_v23 = vpop.eup %10526  ;;  %10536 = vtanh.f32 %v7636_v41  ;;  %v7608_v15 = vadd.f32 %v7576_v17, %v14709_v4  ;;  %v7688_v8 = vadd.f32 1.0, %v10525_v36 }
0x122a   : > { %v10529_v1 = vpop.eup %10528  ;;  %v7691_v44 = vadd.f32 1.0, %v10527_v23  ;;  %v7639_v2 = vmul.f32 0.7978846, %v7607_v62  ;;  %7831 = vmatprep.subr.bf16.mxu0 %v7776_v10  ;;  %v7716_v0 = vmul.f32 0.5, %v7684_v54  ;;  %v7779_v28 = vpack.c.bf16 %v7751_v50, %v7747_v59 }
0x122b   : > { %v10531_v21 = vpop.eup %10530  ;;  %v7640_v24 = vmul.f32 0.7978846, %v7608_v15  ;;  %7832 = vmatpush1.bf16.msra.mxu0 %v7775_v27  ;;  %v7720_v61 = vmul.f32 0.5, %v7688_v8  ;;  %v7692_v49 = vadd.f32 1.0, %v10529_v1 }
0x122c   : > { %v10533_v43 = vpop.eup %10532  ;;  %v7723_v16 = vmul.f32 0.5, %v7691_v44  ;;  %v7695_v22 = vadd.f32 1.0, %v10531_v21  ;;  %10538 = vtanh.f32 %v7639_v2  ;;  %v7748_v5 = vmul.f32 %v7716_v0, %v14623_v20 }
0x122d   : > { %10540 = vtanh.f32 %v7640_v24  ;;  %v7752_v36 = vmul.f32 %v7720_v61, %v14635_v33  ;;  %v7696_v58 = vadd.f32 1.0, %v10533_v43  ;;  %v7724_v23 = vmul.f32 0.5, %v7692_v49  ;;  %v14738_v61 = vld [vmem:[%s15015_s18] sm:$0xff]  }
0x122e   : > { %v7727_v7 = vmul.f32 0.5, %v7695_v22  ;;  %v7755_v59 = vmul.f32 %v7723_v16, %v14652_v25  ;;  %v15437_v49 = vmov 0  }
0x122f   : > { %v7780_v18 = vpack.c.bf16 %v7752_v36, %v7748_v5  ;;  %v7728_v42 = vmul.f32 0.5, %v7696_v58  ;;  %v7756_v17 = vmul.f32 %v7724_v23, %v14658_v55 }
0x1230   : > { %v7759_v48 = vmul.f32 %v7727_v7, %v14664_v12 }
0x1231   : > { %v10535_v41 = vpop.eup %10534  ;;  %7833 = vmatprep.subr.bf16.mxu0 %v7780_v18  ;;  %v7760_v27 = vmul.f32 %v7728_v42, %v14670_v63 }
0x1232   : > { %7834 = vmatpush1.bf16.msra.mxu0 %v7779_v28  ;;  %v7783_v20 = vpack.c.bf16 %v7759_v48, %v7755_v59  ;;  %v7699_v62 = vadd.f32 1.0, %v10535_v41 }
0x1233   : > { %v10537_v50 = vpop.eup %10536  ;;  %v7784_v33 = vpack.c.bf16 %v7760_v27, %v7756_v17 }
0x1234   : > { %v7700_v10 = vadd.f32 1.0, %v10537_v50  ;;  %v7731_v8 = vmul.f32 0.5, %v7699_v62 }
0x1235   : > { %7835 = vmatprep.subr.bf16.mxu0 %v7784_v33 }
0x1236   : > { %v10539_v54 = vpop.eup %10538  ;;  %7836 = vmatpush1.bf16.msra.mxu0 %v7783_v20  ;;  %v7732_v12 = vmul.f32 0.5, %v7700_v10  ;;  %v7763_v55 = vmul.f32 %v7731_v8, %v14687_v29  ;;  %v14746_v29 = vld [vmem:[%s15015_s18 + $0x8] sm:$0xff]  }
0x1237   : > { %v10541_v15 = vpop.eup %10540  ;;  %v7703_v25 = vadd.f32 1.0, %v10539_v54 }
0x1238   : > { %v7704_v1 = vadd.f32 1.0, %v10541_v15  ;;  %v7764_v0 = vmul.f32 %v7732_v12, %v14694_v9 }
0x1239   : > { %v7735_v44 = vmul.f32 0.5, %v7703_v25 }
0x123a   : > { %v7736_v2 = vmul.f32 0.5, %v7704_v1 }
0x123b   : > { %v7767_v63 = vmul.f32 %v7735_v44, %v14705_v57 }
0x123c   : > { %v7768_v28 = vmul.f32 %v7736_v2, %v14709_v4 }
0x123d   : > { %v7787_v21 = vpack.c.bf16 %v7767_v63, %v7763_v55 }
0x123e   : > { %v7788_v24 = vpack.c.bf16 %v7768_v28, %v7764_v0 }
0x1240   : > { %7837 = vmatprep.subr.bf16.mxu0 %v7788_v24 }
0x1241   : > { %7838 = vmatpush1.bf16.msra.mxu0 %v7787_v21 }
0x1244   : > { %8656 = vmatmul.mubr.msk.bf16.vlgmr.msra.gmra.mrb[72].mxu0 %vm3258_vm1, %v14738_v61 }
0x1245   : > { %7873 = vmatprep.mubr.bf16.mxu0 %v15437_v49 }
0x124c   : > { %8657 = vmatmul.mubr.msk.bf16.gmra.mrb[76].mxu0 %vm3258_vm1, %v14746_v29 }
0x12d2   : > { %v7444_v9 = vpop.f32.mrb[56].mxu1 }
0x12d3   : > { %v14751_v57 = vadd.f32 %v7444_v9, %v14582_v6  ;;  %v7446_v4 = vpop.f32.mrb[57].mxu1 }
0x12d4   : > { %v14754_v43 = vadd.f32 %v7446_v4, %v14582_v6  ;;  %v7448_v16 = vpop.f32.mrb[58].mxu1 }
0x12d5   : > { %v7485_v22 = vmul.f32 %v14751_v57, %v14751_v57  ;;  %v14759_v5 = vadd.f32 %v7448_v16, %v14587_v35  ;;  %v7450_v36 = vpop.f32.mrb[59].mxu1 }
0x12d6   : > { %v7486_v58 = vmul.f32 %v14754_v43, %v14754_v43  ;;  %v14764_v23 = vadd.f32 %v7450_v36, %v14587_v35 }
0x12d7   : > { %v7517_v7 = vmul.f32 %v7485_v22, %v14751_v57  ;;  %v7489_v6 = vmul.f32 %v14759_v5, %v14759_v5 }
0x12d8   : > { %v7518_v18 = vmul.f32 %v7486_v58, %v14754_v43  ;;  %v7490_v42 = vmul.f32 %v14764_v23, %v14764_v23 }
0x12d9   : > { %v7549_v59 = vmul.f32 0.044715, %v7517_v7  ;;  %v7521_v48 = vmul.f32 %v7489_v6, %v14759_v5 }
0x12da   : > { %v7550_v41 = vmul.f32 0.044715, %v7518_v18  ;;  %v7522_v17 = vmul.f32 %v7490_v42, %v14764_v23  ;;  %v7454_v27 = vpop.f32.mrb[60].mxu1 }
0x12db   : > { %v7581_v35 = vadd.f32 %v7549_v59, %v14751_v57  ;;  %v7553_v20 = vmul.f32 0.044715, %v7521_v48  ;;  %v14776_v50 = vadd.f32 %v7454_v27, %v14612_v37  ;;  %v7456_v62 = vpop.f32.mrb[61].mxu1 }
0x12dc   : > { %v7582_v33 = vadd.f32 %v7550_v41, %v14754_v43  ;;  %v7554_v10 = vmul.f32 0.044715, %v7522_v17  ;;  %v14780_v54 = vadd.f32 %v7456_v62, %v14612_v37  ;;  %v7458_v15 = vpop.f32.mrb[62].mxu1 }
0x12dd   : > { %v7613_v8 = vmul.f32 0.7978846, %v7581_v35  ;;  %v7585_v25 = vadd.f32 %v7553_v20, %v14759_v5  ;;  %v7493_v1 = vmul.f32 %v14776_v50, %v14776_v50  ;;  %v14786_v12 = vadd.f32 %v7458_v15, %v14619_v30  ;;  %v7460_v44 = vpop.f32.mrb[63].mxu1 }
0x12de   : > { %v7614_v2 = vmul.f32 0.7978846, %v7582_v33  ;;  %v7586_v55 = vadd.f32 %v7554_v10, %v14764_v23  ;;  %v7494_v63 = vmul.f32 %v14780_v54, %v14780_v54  ;;  %v14792_v37 = vadd.f32 %v7460_v44, %v14619_v30 }
0x12df   : > { %10542 = vtanh.f32 %v7613_v8  ;;  %v7617_v0 = vmul.f32 0.7978846, %v7585_v25  ;;  %v7525_v28 = vmul.f32 %v7493_v1, %v14776_v50  ;;  %v7497_v21 = vmul.f32 %v14786_v12, %v14786_v12 }
0x12e0   : > { %10544 = vtanh.f32 %v7614_v2  ;;  %v7618_v24 = vmul.f32 0.7978846, %v7586_v55  ;;  %v7526_v9 = vmul.f32 %v7494_v63, %v14780_v54  ;;  %v7498_v4 = vmul.f32 %v14792_v37, %v14792_v37 }
0x12e1   : > { %10546 = vtanh.f32 %v7617_v0  ;;  %v7557_v16 = vmul.f32 0.044715, %v7525_v28  ;;  %v7529_v22 = vmul.f32 %v7497_v21, %v14786_v12 }
0x12e2   : > { %v7558_v30 = vmul.f32 0.044715, %v7526_v9  ;;  %v7530_v36 = vmul.f32 %v7498_v4, %v14792_v37  ;;  %v7464_v58 = vpop.f32.mrb[64].mxu1  ;;  %10548 = vtanh.f32 %v7618_v24 }
0x12e3   : > { %v7589_v7 = vadd.f32 %v7557_v16, %v14776_v50  ;;  %v7561_v6 = vmul.f32 0.044715, %v7529_v22  ;;  %v14804_v18 = vadd.f32 %v7464_v58, %v14647_v14  ;;  %v7466_v42 = vpop.f32.mrb[65].mxu1 }
0x12e4   : > { %v7590_v59 = vadd.f32 %v7558_v30, %v14780_v54  ;;  %v7562_v48 = vmul.f32 0.044715, %v7530_v36  ;;  %v14808_v41 = vadd.f32 %v7466_v42, %v14647_v14  ;;  %v7468_v17 = vpop.f32.mrb[66].mxu1 }
0x12e5   : > { %v7621_v27 = vmul.f32 0.7978846, %v7589_v7  ;;  %v7593_v35 = vadd.f32 %v7561_v6, %v14786_v12  ;;  %v7501_v20 = vmul.f32 %v14804_v18, %v14804_v18  ;;  %v14814_v62 = vadd.f32 %v7468_v17, %v14654_v11  ;;  %v7470_v33 = vpop.f32.mrb[67].mxu1 }
0x12e6   : > { %v7622_v10 = vmul.f32 0.7978846, %v7590_v59  ;;  %v7594_v15 = vadd.f32 %v7562_v48, %v14792_v37  ;;  %v7502_v8 = vmul.f32 %v14808_v41, %v14808_v41  ;;  %v14820_v14 = vadd.f32 %v7470_v33, %v14654_v11 }
0x12e7   : > { %10550 = vtanh.f32 %v7621_v27  ;;  %v7625_v25 = vmul.f32 0.7978846, %v7593_v35  ;;  %v7533_v1 = vmul.f32 %v7501_v20, %v14804_v18  ;;  %v7505_v44 = vmul.f32 %v14814_v62, %v14814_v62 }
0x12e8   : > { %10552 = vtanh.f32 %v7622_v10  ;;  %v7626_v2 = vmul.f32 0.7978846, %v7594_v15  ;;  %v7534_v55 = vmul.f32 %v7502_v8, %v14808_v41  ;;  %v7506_v63 = vmul.f32 %v14820_v14, %v14820_v14 }
0x12e9   : > { %v10543_v0 = vpop.eup %10542  ;;  %10554 = vtanh.f32 %v7625_v25  ;;  %v7565_v28 = vmul.f32 0.044715, %v7533_v1  ;;  %v7537_v11 = vmul.f32 %v7505_v44, %v14814_v62 }
0x12ea   : > { %v10545_v21 = vpop.eup %10544  ;;  %v7677_v24 = vadd.f32 1.0, %v10543_v0  ;;  %10556 = vtanh.f32 %v7626_v2  ;;  %v7566_v9 = vmul.f32 0.044715, %v7534_v55  ;;  %v7538_v4 = vmul.f32 %v7506_v63, %v14820_v14  ;;  %v7474_v16 = vpop.f32.mrb[68].mxu1 }
0x12eb   : > { %v10547_v22 = vpop.eup %10546  ;;  %v7597_v30 = vadd.f32 %v7565_v28, %v14804_v18  ;;  %v7569_v36 = vmul.f32 0.044715, %v7537_v11  ;;  %v14832_v58 = vadd.f32 %v7474_v16, %v14682_v39  ;;  %v7476_v7 = vpop.f32.mrb[69].mxu1  ;;  %v7678_v6 = vadd.f32 1.0, %v10545_v21 }
0x12ec   : > { %v7709_v42 = vmul.f32 0.5, %v7677_v24  ;;  %v7681_v59 = vadd.f32 1.0, %v10547_v22  ;;  %v7598_v48 = vadd.f32 %v7566_v9, %v14808_v41  ;;  %v7570_v17 = vmul.f32 0.044715, %v7538_v4  ;;  %v7478_v27 = vpop.f32.mrb[70].mxu1  ;;  %v10549_v8 = vpop.eup %10548 }
0x12ed   : > { %v7629_v35 = vmul.f32 0.7978846, %v7597_v30  ;;  %v7601_v20 = vadd.f32 %v7569_v36, %v14814_v62  ;;  %v7509_v33 = vmul.f32 %v14832_v58, %v14832_v58  ;;  %v14839_v10 = vadd.f32 %v7476_v7, %v14682_v39  ;;  %v7480_v15 = vpop.f32.mrb[71].mxu1 }
0x12ee   : > { %v7741_v25 = vmul.f32 %v7709_v42, %v14751_v57  ;;  %v7713_v1 = vmul.f32 0.5, %v7681_v59  ;;  %v7630_v44 = vmul.f32 0.7978846, %v7598_v48  ;;  %v7602_v2 = vadd.f32 %v7570_v17, %v14820_v14 }
0x12ef   : > { %10558 = vtanh.f32 %v7629_v35  ;;  %v7633_v55 = vmul.f32 0.7978846, %v7601_v20  ;;  %v7541_v63 = vmul.f32 %v7509_v33, %v14832_v58  ;;  %v7510_v0 = vmul.f32 %v14839_v10, %v14839_v10 }
0x12f0   : > { %v7745_v28 = vmul.f32 %v7713_v1, %v14759_v5  ;;  %10560 = vtanh.f32 %v7630_v44  ;;  %v7634_v39 = vmul.f32 0.7978846, %v7602_v2  ;;  %v14848_v11 = vadd.f32 %v7478_v27, %v14698_v32 }
0x12f1   : > { %v10551_v21 = vpop.eup %10550  ;;  %10562 = vtanh.f32 %v7633_v55  ;;  %v7573_v57 = vmul.f32 0.044715, %v7541_v63  ;;  %v7542_v24 = vmul.f32 %v7510_v0, %v14839_v10  ;;  %v14852_v9 = vadd.f32 %v7480_v15, %v14698_v32 }
0x12f2   : > { %v10553_v4 = vpop.eup %10552  ;;  %v7685_v16 = vadd.f32 1.0, %v10551_v21  ;;  %10564 = vtanh.f32 %v7634_v39  ;;  %v7513_v22 = vmul.f32 %v14848_v11, %v14848_v11  ;;  %v7682_v5 = vadd.f32 1.0, %v10549_v8 }
0x12f3   : > { %v10555_v30 = vpop.eup %10554  ;;  %v7605_v36 = vadd.f32 %v7573_v57, %v14832_v58  ;;  %v7574_v7 = vmul.f32 0.044715, %v7542_v24  ;;  %v7514_v42 = vmul.f32 %v14852_v9, %v14852_v9  ;;  %v7710_v59 = vmul.f32 0.5, %v7678_v6 }
0x12f4   : > { %v10557_v48 = vpop.eup %10556  ;;  %v7717_v17 = vmul.f32 0.5, %v7685_v16  ;;  %v7689_v27 = vadd.f32 1.0, %v10555_v30  ;;  %v7545_v32 = vmul.f32 %v7513_v22, %v14848_v11  ;;  %v7714_v35 = vmul.f32 0.5, %v7682_v5 }
0x12f5   : > { %v7637_v20 = vmul.f32 0.7978846, %v7605_v36  ;;  %v7606_v33 = vadd.f32 %v7574_v7, %v14839_v10  ;;  %v7546_v15 = vmul.f32 %v7514_v42, %v14852_v9  ;;  %v7742_v8 = vmul.f32 %v7710_v59, %v14754_v43 }
0x12f6   : > { %v7749_v1 = vmul.f32 %v7717_v17, %v14776_v50  ;;  %v7721_v44 = vmul.f32 0.5, %v7689_v27  ;;  %v7577_v2 = vmul.f32 0.044715, %v7545_v32  ;;  %v7746_v55 = vmul.f32 %v7714_v35, %v14764_v23 }
0x12f7   : > { %10566 = vtanh.f32 %v7637_v20  ;;  %v7638_v6 = vmul.f32 0.7978846, %v7606_v33  ;;  %v7578_v63 = vmul.f32 0.044715, %v7546_v15  ;;  %v7777_v0 = vpack.c.bf16 %v7745_v28, %v7741_v25 }
0x12f8   : > { %v7753_v39 = vmul.f32 %v7721_v44, %v14786_v12  ;;  %v7609_v21 = vadd.f32 %v7577_v2, %v14848_v11  ;;  %v7778_v57 = vpack.c.bf16 %v7746_v55, %v7742_v8  ;;  %v7686_v24 = vadd.f32 1.0, %v10553_v4 }
0x12f9   : > { %v10559_v16 = vpop.eup %10558  ;;  %10568 = vtanh.f32 %v7638_v6  ;;  %v7610_v43 = vadd.f32 %v7578_v63, %v14852_v9  ;;  %v7690_v22 = vadd.f32 1.0, %v10557_v48 }
0x12fa   : > { %v10561_v50 = vpop.eup %10560  ;;  %v7693_v5 = vadd.f32 1.0, %v10559_v16  ;;  %v7641_v30 = vmul.f32 0.7978846, %v7609_v21  ;;  %7884 = vmatprep.subr.bf16.mxu1 %v7778_v57  ;;  %v7718_v23 = vmul.f32 0.5, %v7686_v24  ;;  %v7781_v36 = vpack.c.bf16 %v7753_v39, %v7749_v1 }
0x12fb   : > { %v10563_v7 = vpop.eup %10562  ;;  %v7642_v42 = vmul.f32 0.7978846, %v7610_v43  ;;  %7885 = vmatpush1.bf16.msra.mxu1 %v7777_v0  ;;  %v7722_v25 = vmul.f32 0.5, %v7690_v22  ;;  %v7694_v12 = vadd.f32 1.0, %v10561_v50 }
0x12fc   : > { %v10565_v28 = vpop.eup %10564  ;;  %v7725_v59 = vmul.f32 0.5, %v7693_v5  ;;  %v7697_v17 = vadd.f32 1.0, %v10563_v7  ;;  %10570 = vtanh.f32 %v7641_v30  ;;  %v7750_v4 = vmul.f32 %v7718_v23, %v14780_v54  ;;  %v14881_v23 = vpop.permute.xlu1 %7802 }
0x12fd   : > { %10572 = vtanh.f32 %v7642_v42  ;;  %v7754_v48 = vmul.f32 %v7722_v25, %v14792_v37  ;;  %v7698_v27 = vadd.f32 1.0, %v10565_v28  ;;  %v7726_v32 = vmul.f32 0.5, %v7694_v12 }
0x12fe   : > { %v7729_v35 = vmul.f32 0.5, %v7697_v17  ;;  %v7757_v15 = vmul.f32 %v7725_v59, %v14804_v18 }
0x12ff   : > { %v7782_v20 = vpack.c.bf16 %v7754_v48, %v7750_v4  ;;  %v7730_v33 = vmul.f32 0.5, %v7698_v27  ;;  %v7758_v44 = vmul.f32 %v7726_v32, %v14808_v41 }
0x1300   : > { %v7761_v8 = vmul.f32 %v7729_v35, %v14814_v62  ;;  %v14894_v4 = vpop.permute.xlu1 %7812 }
0x1301   : > { %v10567_v1 = vpop.eup %10566  ;;  %7886 = vmatprep.subr.bf16.mxu1 %v7782_v20  ;;  %v7762_v2 = vmul.f32 %v7730_v33, %v14820_v14 }
0x1302   : > { %7887 = vmatpush1.bf16.msra.mxu1 %v7781_v36  ;;  %v7785_v54 = vpack.c.bf16 %v7761_v8, %v7757_v15  ;;  %v7701_v6 = vadd.f32 1.0, %v10567_v1 }
0x1303   : > { %v10569_v55 = vpop.eup %10568  ;;  %v7786_v37 = vpack.c.bf16 %v7762_v2, %v7758_v44 }
0x1304   : > { %v7702_v63 = vadd.f32 1.0, %v10569_v55  ;;  %v7733_v21 = vmul.f32 0.5, %v7701_v6 }
0x1305   : > { %7888 = vmatprep.subr.bf16.mxu1 %v7786_v37 }
0x1306   : > { %v10571_v0 = vpop.eup %10570  ;;  %7889 = vmatpush1.bf16.msra.mxu1 %v7785_v54  ;;  %v7734_v62 = vmul.f32 0.5, %v7702_v63  ;;  %v7765_v41 = vmul.f32 %v7733_v21, %v14832_v58  ;;  %v14883_v58 = vpop.permute.xlu0 %7797 }
0x1307   : > { %v10573_v39 = vpop.eup %10572  ;;  %v7705_v18 = vadd.f32 1.0, %v10571_v0 }
0x1308   : > { %v7706_v57 = vadd.f32 1.0, %v10573_v39  ;;  %v7766_v43 = vmul.f32 %v7734_v62, %v14839_v10 }
0x1309   : > { %v7737_v24 = vmul.f32 0.5, %v7705_v18 }
0x130a   : > { %v7738_v16 = vmul.f32 0.5, %v7706_v57 }
0x130b   : > { %v7769_v14 = vmul.f32 %v7737_v24, %v14848_v11 }
0x130c   : > { %v7770_v22 = vmul.f32 %v7738_v16, %v14852_v9 }
0x130d   : > { %v7789_v50 = vpack.c.bf16 %v7769_v14, %v7765_v41 }
0x130e   : > { %v7790_v5 = vpack.c.bf16 %v7770_v22, %v7766_v43 }
0x1310   : > { %7890 = vmatprep.subr.bf16.mxu1 %v7790_v5 }
0x1311   : > { %7891 = vmatpush1.bf16.msra.mxu1 %v7789_v50 }
0x1314   : > { %8658 = vmatmul.mubr.msk.bf16.vlgmr.msra.gmra.mrb[72].mxu1 %vm3258_vm1, %v14738_v61 }
0x1315   : > { %7926 = vmatprep.mubr.bf16.mxu1 %v15437_v49  ;;  %v14891_v49 = vpop.permute.xlu0 %7807 }
0x1317   : > { %v7865_v30 = vpop.f32.mrb[72].mxu0 }
0x1318   : > { %v7867_v36 = vpop.f32.mrb[73].mxu0  ;;  %v7866_v10 = vadd.f32 %v7865_v30, %v14883_v58 }
0x1319   : > { %v7869_v11 = vpop.f32.mrb[74].mxu0  ;;  %v7868_v42 = vadd.f32 %v7867_v36, %v14883_v58 }
0x131a   : > { %v7870_v9 = vadd.f32 %v7869_v11, %v14881_v23  ;;  %v7871_v7 = vpop.f32.mrb[75].mxu0 }
0x131b   : > { %v7872_v25 = vadd.f32 %v7871_v7, %v14881_v23 }
0x131c   : > { %v7945_v12 = vadd.f32 %v7870_v9, %v7866_v10  ;;  %8659 = vmatmul.mubr.msk.bf16.gmra.mrb[76].mxu1 %vm3258_vm1, %v14746_v29 }
0x131d   : > { %v7954_v61 = vadd.f32 %v7872_v25, %v7868_v42 }
0x131f   : > { %v7875_v28 = vpop.f32.mrb[76].mxu0 }
0x1320   : > { %v7876_v59 = vadd.f32 %v7875_v28, %v14891_v49  ;;  %v7877_v17 = vpop.f32.mrb[77].mxu0 }
0x1321   : > { %v7878_v48 = vadd.f32 %v7877_v17, %v14891_v49  ;;  %v7879_v27 = vpop.f32.mrb[78].mxu0 }
0x1322   : > { %v7946_v32 = vadd.f32 %v7945_v12, %v7876_v59  ;;  %v7880_v35 = vadd.f32 %v7879_v27, %v14894_v4  ;;  %v7881_v20 = vpop.f32.mrb[79].mxu0 }
0x1323   : > { %v7955_v33 = vadd.f32 %v7954_v61, %v7878_v48  ;;  %v7882_v15 = vadd.f32 %v7881_v20, %v14894_v4 }
0x1324   : > { %v7947_v29 = vadd.f32 %v7946_v32, %v7880_v35 }
0x1325   : > { %v7956_v8 = vadd.f32 %v7955_v33, %v7882_v15 }
0x1326   : > { %v7948_v1 = vrot.slane %v7947_v29, 4 }
0x1327   : > { %v7957_v44 = vrot.slane %v7956_v8, 4 }
0x1328   : > { %v7949_v2 = vadd.f32 %v7948_v1, %v7947_v29 }
0x1329   : > { %v7958_v54 = vadd.f32 %v7957_v44, %v7956_v8 }
0x132a   : > { %v7950_v55 = vrot.slane %v7949_v2, 2 }
0x132b   : > { %v7959_v6 = vrot.slane %v7958_v54, 2 }
0x132c   : > { %v7951_v37 = vadd.f32 %v7950_v55, %v7949_v2  ;;  %v14899_v55 = vpop.permute.xlu1 %8088 }
0x132d   : > { %v7960_v63 = vadd.f32 %v7959_v6, %v7958_v54  ;;  %v14901_v6 = vpop.permute.xlu0 %8083 }
0x132e   : > { %v7952_v0 = vrot.slane %v7951_v37, 1 }
0x132f   : > { %v7961_v39 = vrot.slane %v7960_v63, 1 }
0x1330   : > { %v7953_v21 = vadd.f32 %v7952_v0, %v7951_v37 }
0x1331   : > { %v7962_v18 = vadd.f32 %v7961_v39, %v7960_v63 }
0x1332   : > { %v7981_v57 = vmul.f32 0.03125, %v7953_v21  ;;  %v14903_v21 = vpop.permute.xlu1 %8098 }
0x1333   : > { %v7982_v62 = vmul.f32 0.03125, %v7962_v18  ;;  %v14905_v18 = vpop.permute.xlu0 %8093 }
0x1334   : > { %v7985_v24 = vsub.f32 %v7866_v10, %v7981_v57  ;;  %v7989_v16 = vsub.f32 %v7870_v9, %v7981_v57  ;;  %v7993_v41 = vsub.f32 %v7876_v59, %v7981_v57  ;;  %v7997_v14 = vsub.f32 %v7880_v35, %v7981_v57 }
0x1335   : > { %v7986_v43 = vsub.f32 %v7868_v42, %v7982_v62  ;;  %v7990_v22 = vsub.f32 %v7872_v25, %v7982_v62  ;;  %v7994_v50 = vsub.f32 %v7878_v48, %v7982_v62  ;;  %v7998_v5 = vsub.f32 %v7882_v15, %v7982_v62 }
0x1336   : > { %v8001_v30 = vmul.f32 %v7985_v24, %v7985_v24  ;;  %v8005_v36 = vmul.f32 %v7989_v16, %v7989_v16  ;;  %v8009_v12 = vmul.f32 %v7993_v41, %v7993_v41  ;;  %v8013_v27 = vmul.f32 %v7997_v14, %v7997_v14  ;;  %v14907_v57 = vpop.permute.xlu1 %8124 }
0x1337   : > { %v8002_v11 = vmul.f32 %v7986_v43, %v7986_v43  ;;  %v8006_v7 = vmul.f32 %v7990_v22, %v7990_v22  ;;  %v8010_v28 = vmul.f32 %v7994_v50, %v7994_v50  ;;  %v8014_v20 = vmul.f32 %v7998_v5, %v7998_v5  ;;  %v14909_v62 = vpop.permute.xlu0 %8119 }
0x1338   : > { %v8017_v61 = vadd.f32 %v8005_v36, %v8001_v30 }
0x1339   : > { %v8026_v17 = vadd.f32 %v8006_v7, %v8002_v11 }
0x133a   : > { %v8018_v32 = vadd.f32 %v8017_v61, %v8009_v12 }
0x133b   : > { %v8027_v33 = vadd.f32 %v8026_v17, %v8010_v28 }
0x133c   : > { %v8019_v10 = vadd.f32 %v8018_v32, %v8013_v27 }
0x133d   : > { %v8028_v9 = vadd.f32 %v8027_v33, %v8014_v20 }
0x133e   : > { %v8020_v59 = vrot.slane %v8019_v10, 4 }
0x133f   : > { %v8029_v35 = vrot.slane %v8028_v9, 4 }
0x1340   : > { %v8021_v42 = vadd.f32 %v8020_v59, %v8019_v10  ;;  %v14915_v59 = vpop.permute.xlu1 %8134 }
0x1341   : > { %v8030_v25 = vadd.f32 %v8029_v35, %v8028_v9  ;;  %v14917_v35 = vpop.permute.xlu0 %8129 }
0x1342   : > { %v8022_v48 = vrot.slane %v8021_v42, 2 }
0x1343   : > { %v8031_v15 = vrot.slane %v8030_v25, 2 }
0x1344   : > { %v8023_v29 = vadd.f32 %v8022_v48, %v8021_v42 }
0x1345   : > { %v8032_v8 = vadd.f32 %v8031_v15, %v8030_v25 }
0x1346   : > { %v8024_v1 = vrot.slane %v8023_v29, 1 }
0x1347   : > { %v8033_v44 = vrot.slane %v8032_v8, 1 }
0x1348   : > { %v8025_v2 = vadd.f32 %v8024_v1, %v8023_v29 }
0x1349   : > { %v8034_v54 = vadd.f32 %v8033_v44, %v8032_v8 }
0x134a   : > { %v8053_v37 = vmul.f32 0.03125, %v8025_v2 }
0x134b   : > { %v8054_v63 = vmul.f32 0.03125, %v8034_v54 }
0x134c   : > { %v8057_v0 = vadd.f32 1e-05, %v8053_v37 }
0x134d   : > { %v8058_v39 = vadd.f32 1e-05, %v8054_v63 }
0x134e   : > { %10574 = vrsqrt.f32 %v8057_v0 }
0x134f   : > { %10576 = vrsqrt.f32 %v8058_v39 }
0x1358   : > { %v10575_v30 = vpop.eup %10574 }
0x1359   : > { %v10577_v36 = vpop.eup %10576  ;;  %v8065_v11 = vmul.f32 %v10575_v30, %v7985_v24  ;;  %v8069_v7 = vmul.f32 %v10575_v30, %v7989_v16  ;;  %v8073_v12 = vmul.f32 %v10575_v30, %v7993_v41  ;;  %v8077_v61 = vmul.f32 %v10575_v30, %v7997_v14 }
0x135a   : > { %v8066_v28 = vmul.f32 %v10577_v36, %v7986_v43  ;;  %v8070_v17 = vmul.f32 %v10577_v36, %v7990_v22  ;;  %v8074_v27 = vmul.f32 %v10577_v36, %v7994_v50  ;;  %v8078_v32 = vmul.f32 %v10577_v36, %v7998_v5 }
0x135b   : > { %v8101_v20 = vmul.f32 %v14901_v6, %v8065_v11  ;;  %v8105_v33 = vmul.f32 %v14899_v55, %v8069_v7  ;;  %v8109_v10 = vmul.f32 %v14905_v18, %v8073_v12  ;;  %v8113_v9 = vmul.f32 %v14903_v21, %v8077_v61 }
0x135c   : > { %v8102_v24 = vmul.f32 %v14901_v6, %v8066_v28  ;;  %v8106_v16 = vmul.f32 %v14899_v55, %v8070_v17  ;;  %v8110_v41 = vmul.f32 %v14905_v18, %v8074_v27  ;;  %v8114_v14 = vmul.f32 %v14903_v21, %v8078_v32 }
0x135d   : > { %v8137_v43 = vadd.f32 %v14909_v62, %v8101_v20  ;;  %v8141_v22 = vadd.f32 %v14907_v57, %v8105_v33  ;;  %v8145_v50 = vadd.f32 %v14917_v35, %v8109_v10  ;;  %v8149_v5 = vadd.f32 %v14915_v59, %v8113_v9 }
0x135e   : > { %v8138_v42 = vadd.f32 %v14909_v62, %v8102_v24  ;;  %v8142_v25 = vadd.f32 %v14907_v57, %v8106_v16  ;;  %v8146_v48 = vadd.f32 %v14917_v35, %v8110_v41  ;;  %v8150_v15 = vadd.f32 %v14915_v59, %v8114_v14 }
0x135f   : > { %v8153_v29 = vadd.f32 %v8137_v43, %v14460_v52  ;;  %v8157_v8 = vadd.f32 %v8141_v22, %v14463_v56  ;;  %v8161_v1 = vadd.f32 %v8145_v50, %v14478_v26  ;;  %v8165_v44 = vadd.f32 %v8149_v5, %v14481_v51 }
0x1360   : > { %v8154_v2 = vadd.f32 %v8138_v42, %v14466_v60  ;;  %v8158_v54 = vadd.f32 %v8142_v25, %v14469_v13  ;;  %v8162_v37 = vadd.f32 %v8146_v48, %v14472_v34  ;;  %v8166_v63 = vadd.f32 %v8150_v15, %v14475_v19 }
0x1361   : > { %8169 = vst [vmem:[%s14932_s27] sm:$0xff] %v8153_v29  ;;  %8173 = vst [vmem:[%s14932_s27 + $0x20] sm:$0xff] %v8157_v8 }
0x1362   : > { %8177 = vst [vmem:[%s14932_s27 + $0x40] sm:$0xff] %v8161_v1  ;;  %8181 = vst [vmem:[%s14932_s27 + $0x60] sm:$0xff] %v8165_v44 }
0x1363   : > { %8170 = vst [vmem:[%s14932_s27 + $0x8] sm:$0xff] %v8154_v2  ;;  %8174 = vst [vmem:[%s14932_s27 + $0x28] sm:$0xff] %v8158_v54 }
0x1364   : > { %8178 = vst [vmem:[%s14932_s27 + $0x48] sm:$0xff] %v8162_v37  ;;  %8182 = vst [vmem:[%s14932_s27 + $0x68] sm:$0xff] %v8166_v63 }
0x13e7   : > { %v7918_v52 = vpop.f32.mrb[72].mxu1 }
0x13e8   : > { %v7920_v56 = vpop.f32.mrb[73].mxu1  ;;  %v7919_v51 = vadd.f32 %v7918_v52, %v14883_v58 }
0x13e9   : > { %v7922_v26 = vpop.f32.mrb[74].mxu1  ;;  %v7921_v34 = vadd.f32 %v7920_v56, %v14883_v58 }
0x13ea   : > { %v7923_v60 = vadd.f32 %v7922_v26, %v14881_v23  ;;  %v7924_v13 = vpop.f32.mrb[75].mxu1 }
0x13eb   : > { %v7925_v19 = vadd.f32 %v7924_v13, %v14881_v23 }
0x13ec   : > { %v7963_v0 = vadd.f32 %v7923_v60, %v7919_v51 }
0x13ed   : > { %v7972_v39 = vadd.f32 %v7925_v19, %v7921_v34 }
0x13ef   : > { %v7928_v30 = vpop.f32.mrb[76].mxu1 }
0x13f0   : > { %v7929_v36 = vadd.f32 %v7928_v30, %v14891_v49  ;;  %v7930_v11 = vpop.f32.mrb[77].mxu1 }
0x13f1   : > { %v7931_v7 = vadd.f32 %v7930_v11, %v14891_v49  ;;  %v7932_v12 = vpop.f32.mrb[78].mxu1 }
0x13f2   : > { %v7964_v61 = vadd.f32 %v7963_v0, %v7929_v36  ;;  %v7933_v28 = vadd.f32 %v7932_v12, %v14894_v4  ;;  %v7934_v17 = vpop.f32.mrb[79].mxu1 }
0x13f3   : > { %v7973_v27 = vadd.f32 %v7972_v39, %v7931_v7  ;;  %v7935_v32 = vadd.f32 %v7934_v17, %v14894_v4 }
0x13f4   : > { %v7965_v20 = vadd.f32 %v7964_v61, %v7933_v28 }
0x13f5   : > { %v7974_v58 = vadd.f32 %v7973_v27, %v7935_v32 }
0x13f6   : > { %v7966_v33 = vrot.slane %v7965_v20, 4 }
0x13f7   : > { %v7975_v23 = vrot.slane %v7974_v58, 4 }
0x13f8   : > { %v7967_v10 = vadd.f32 %v7966_v33, %v7965_v20 }
0x13f9   : > { %v7976_v9 = vadd.f32 %v7975_v23, %v7974_v58 }
0x13fa   : > { %v7968_v24 = vrot.slane %v7967_v10, 2 }
0x13fb   : > { %v7977_v16 = vrot.slane %v7976_v9, 2 }
0x13fc   : > { %v7969_v41 = vadd.f32 %v7968_v24, %v7967_v10 }
0x13fd   : > { %v7978_v14 = vadd.f32 %v7977_v16, %v7976_v9 }
0x13fe   : > { %v7970_v43 = vrot.slane %v7969_v41, 1 }
0x13ff   : > { %v7979_v49 = vrot.slane %v7978_v14, 1 }
0x1400   : > { %v7971_v22 = vadd.f32 %v7970_v43, %v7969_v41 }
0x1401   : > { %v7980_v50 = vadd.f32 %v7979_v49, %v7978_v14 }
0x1402   : > { %v7983_v5 = vmul.f32 0.03125, %v7971_v22 }
0x1403   : > { %v7984_v42 = vmul.f32 0.03125, %v7980_v50 }
0x1404   : > { %v7987_v25 = vsub.f32 %v7919_v51, %v7983_v5  ;;  %v7991_v48 = vsub.f32 %v7923_v60, %v7983_v5  ;;  %v7995_v15 = vsub.f32 %v7929_v36, %v7983_v5  ;;  %v7999_v4 = vsub.f32 %v7933_v28, %v7983_v5 }
0x1405   : > { %v7988_v29 = vsub.f32 %v7921_v34, %v7984_v42  ;;  %v7992_v8 = vsub.f32 %v7925_v19, %v7984_v42  ;;  %v7996_v1 = vsub.f32 %v7931_v7, %v7984_v42  ;;  %v8000_v44 = vsub.f32 %v7935_v32, %v7984_v42 }
0x1406   : > { %v8003_v2 = vmul.f32 %v7987_v25, %v7987_v25  ;;  %v8007_v54 = vmul.f32 %v7991_v48, %v7991_v48  ;;  %v8011_v52 = vmul.f32 %v7995_v15, %v7995_v15  ;;  %v8015_v0 = vmul.f32 %v7999_v4, %v7999_v4 }
0x1407   : > { %v8004_v37 = vmul.f32 %v7988_v29, %v7988_v29  ;;  %v8008_v63 = vmul.f32 %v7992_v8, %v7992_v8  ;;  %v8012_v26 = vmul.f32 %v7996_v1, %v7996_v1  ;;  %v8016_v30 = vmul.f32 %v8000_v44, %v8000_v44 }
0x1408   : > { %v8035_v56 = vadd.f32 %v8007_v54, %v8003_v2 }
0x1409   : > { %v8044_v13 = vadd.f32 %v8008_v63, %v8004_v37 }
0x140a   : > { %v8036_v39 = vadd.f32 %v8035_v56, %v8011_v52 }
0x140b   : > { %v8045_v11 = vadd.f32 %v8044_v13, %v8012_v26 }
0x140c   : > { %v8037_v51 = vadd.f32 %v8036_v39, %v8015_v0 }
0x140d   : > { %v8046_v60 = vadd.f32 %v8045_v11, %v8016_v30 }
0x140e   : > { %v8038_v36 = vrot.slane %v8037_v51, 4 }
0x140f   : > { %v8047_v12 = vrot.slane %v8046_v60, 4 }
0x1410   : > { %v8039_v34 = vadd.f32 %v8038_v36, %v8037_v51 }
0x1411   : > { %v8048_v19 = vadd.f32 %v8047_v12, %v8046_v60 }
0x1412   : > { %v8040_v7 = vrot.slane %v8039_v34, 2 }
0x1413   : > { %v8049_v61 = vrot.slane %v8048_v19, 2 }
0x1414   : > { %v8041_v28 = vadd.f32 %v8040_v7, %v8039_v34 }
0x1415   : > { %v8050_v17 = vadd.f32 %v8049_v61, %v8048_v19 }
0x1416   : > { %v8042_v27 = vrot.slane %v8041_v28, 1 }
0x1417   : > { %v8051_v32 = vrot.slane %v8050_v17, 1 }
0x1418   : > { %v8043_v20 = vadd.f32 %v8042_v27, %v8041_v28 }
0x1419   : > { %v8052_v58 = vadd.f32 %v8051_v32, %v8050_v17 }
0x141a   : > { %v8055_v33 = vmul.f32 0.03125, %v8043_v20 }
0x141b   : > { %v8056_v23 = vmul.f32 0.03125, %v8052_v58 }
0x141c   : > { %v8059_v10 = vadd.f32 1e-05, %v8055_v33 }
0x141d   : > { %v8060_v9 = vadd.f32 1e-05, %v8056_v23 }
0x141e   : > { %10578 = vrsqrt.f32 %v8059_v10 }
0x141f   : > { %10580 = vrsqrt.f32 %v8060_v9 }
0x1428   : > { %v10579_v24 = vpop.eup %10578 }
0x1429   : > { %v10581_v16 = vpop.eup %10580  ;;  %v8067_v41 = vmul.f32 %v10579_v24, %v7987_v25  ;;  %v8071_v14 = vmul.f32 %v10579_v24, %v7991_v48  ;;  %v8075_v43 = vmul.f32 %v10579_v24, %v7995_v15  ;;  %v8079_v49 = vmul.f32 %v10579_v24, %v7999_v4 }
0x142a   : > { %v8068_v22 = vmul.f32 %v10581_v16, %v7988_v29  ;;  %v8072_v50 = vmul.f32 %v10581_v16, %v7992_v8  ;;  %v8076_v5 = vmul.f32 %v10581_v16, %v7996_v1  ;;  %v8080_v42 = vmul.f32 %v10581_v16, %v8000_v44 }
0x142b   : > { %v8103_v2 = vmul.f32 %v14901_v6, %v8067_v41  ;;  %v8107_v54 = vmul.f32 %v14899_v55, %v8071_v14  ;;  %v8111_v37 = vmul.f32 %v14905_v18, %v8075_v43  ;;  %v8115_v63 = vmul.f32 %v14903_v21, %v8079_v49 }
0x142c   : > { %v8104_v52 = vmul.f32 %v14901_v6, %v8068_v22  ;;  %v8108_v56 = vmul.f32 %v14899_v55, %v8072_v50  ;;  %v8112_v25 = vmul.f32 %v14905_v18, %v8076_v5  ;;  %v8116_v48 = vmul.f32 %v14903_v21, %v8080_v42 }
0x142d   : > { %v8139_v15 = vadd.f32 %v14909_v62, %v8103_v2  ;;  %v8143_v4 = vadd.f32 %v14907_v57, %v8107_v54  ;;  %v8147_v29 = vadd.f32 %v14917_v35, %v8111_v37  ;;  %v8151_v8 = vadd.f32 %v14915_v59, %v8115_v63 }
0x142e   : > { %v8140_v6 = vadd.f32 %v14909_v62, %v8104_v52  ;;  %v8144_v55 = vadd.f32 %v14907_v57, %v8108_v56  ;;  %v8148_v21 = vadd.f32 %v14917_v35, %v8112_v25  ;;  %v8152_v18 = vadd.f32 %v14915_v59, %v8116_v48 }
0x142f   : > { %v8155_v1 = vadd.f32 %v8139_v15, %v14547_v53  ;;  %v8159_v44 = vadd.f32 %v8143_v4, %v14550_v47  ;;  %v8163_v26 = vadd.f32 %v8147_v29, %v14570_v31  ;;  %v8167_v13 = vadd.f32 %v8151_v8, %v14573_v46 }
0x1430   : > { %v8156_v62 = vadd.f32 %v8140_v6, %v14554_v38  ;;  %v8160_v0 = vadd.f32 %v8144_v55, %v14557_v45  ;;  %v8164_v57 = vadd.f32 %v8148_v21, %v14560_v3  ;;  %v8168_v35 = vadd.f32 %v8152_v18, %v14563_v40 }
0x1431   : > { %8171 = vst [vmem:[%s14932_s27 + $0x10] sm:$0xff] %v8155_v1  ;;  %8175 = vst [vmem:[%s14932_s27 + $0x30] sm:$0xff] %v8159_v44 }
0x1432   : > { %8179 = vst [vmem:[%s14932_s27 + $0x50] sm:$0xff] %v8163_v26  ;;  %8183 = vst [vmem:[%s14932_s27 + $0x70] sm:$0xff] %v8167_v13 }
0x1433   : > { %8172 = vst [vmem:[%s14932_s27 + $0x18] sm:$0xff] %v8156_v62  ;;  %8176 = vst [vmem:[%s14932_s27 + $0x38] sm:$0xff] %v8160_v0 }
0x1434   : > { %8180 = vst [vmem:[%s14932_s27 + $0x58] sm:$0xff] %v8164_v57  ;;  %8184 = vst [vmem:[%s14932_s27 + $0x78] sm:$0xff] %v8168_v35 }
0x1435 PF: > { %s32_s3 = sadd.s32 1, %s10695_s3  }
0x1436   : > { %p29_p4 = scmp.ge.s32.totalorder %s32_s3, 4  }
0x1438   :  { %31 = sbr.rel (!%p29_p4) target bundleno = 8 (0x8), region = 148 }

</bundles_post_ra>
